<compile_context>
chip_gen: v6e
topology: v6e:2x2x1
jax: 0.10.0
libtpu: 0.0.40
codegen_flags: <defaults>
</compile_context>

<pallas_src>
import functools

import jax
import jax.numpy as jnp
from jax.experimental import pallas as pl
from jax.experimental.pallas import tpu as pltpu

EPS = 1e-4  # opts.EPS


def sparse_conv_kernel(feat_ref, mask_ref, w_ref, b_ref,
                       hout_ref, mout_ref, fpad_ref, mpad_ref,
                       *, KH, KW, stride, pad, eps):
    # feat_ref : (1, Cin, H, W)  unpadded feature, NCHW               (VMEM)
    # mask_ref : (1, 1, H, W)    unpadded mask                        (VMEM)
    # w_ref    : (Cout*Cin*KH*KW,) conv1 weights, flat OIHW order     (SMEM)
    # b_ref    : (1,)            scalar bias b                        (SMEM)
    # hout_ref : (1, Cout, Ho, Wo)   NCHW output (no wrapper transpose)
    # mout_ref : (1, Ho, Wo)         lane-dense pooled mask
    # fpad_ref : (Cin, Hp, Wp)   zero-padded masked feature scratch   (VMEM)
    # mpad_ref : (Hp, Wp)        zero-padded mask scratch             (VMEM)
    Cin = feat_ref.shape[1]
    H = feat_ref.shape[2]
    W = feat_ref.shape[3]
    Cout = hout_ref.shape[1]
    Ho = hout_ref.shape[2]
    Wo = hout_ref.shape[3]

    m = mask_ref[0, 0]                                    # (H, W)

    # Synthesize the zero border in VMEM scratch (avoids padded HBM copies).
    if pad > 0:
        fpad_ref[...] = jnp.zeros_like(fpad_ref)
        mpad_ref[...] = jnp.zeros_like(mpad_ref)
    fpad_ref[:, pl.ds(pad, H), pl.ds(pad, W)] = feat_ref[0] * m   # feature * mask
    mpad_ref[pl.ds(pad, H), pl.ds(pad, W)] = m

    accs = [jnp.zeros((Ho, Wo), jnp.float32) for _ in range(Cout)]
    msum = jnp.zeros((Ho, Wo), jnp.float32)
    # Zero init + zero padding is equivalent to PyTorch's -inf padded MaxPool2d
    # because the mask is nonnegative and padding < kernel_size (no window is
    # all padding).
    mmax = jnp.zeros((Ho, Wo), jnp.float32)

    for kh in range(KH):
        for kw in range(KW):
            if stride == 1:
                rs, cs = pl.ds(kh, Ho), pl.ds(kw, Wo)
            else:
                # TODO(synk): for stride > 1 deinterleave once into scratch
                # instead of KH*KW strided sublane/lane loads.
                rs, cs = pl.ds(kh, Ho, stride), pl.ds(kw, Wo, stride)

            xm = mpad_ref[rs, cs]                         # (Ho, Wo)
            msum = msum + xm                              # all-ones conv == window sum
            mmax = jnp.maximum(mmax, xm)                  # max pool

            xf = fpad_ref[:, rs, cs]                      # (Cin, Ho, Wo)
            for ci in range(Cin):
                xfc = xf[ci]                              # (Ho, Wo), W on lanes
                base = ci * KH * KW + kh * KW + kw
                for co in range(Cout):
                    wv = w_ref[co * Cin * KH * KW + base]  # SMEM scalar -> VPU splat
                    accs[co] = accs[co] + wv * xfc

    # Exact divide: pl.reciprocal(approx=True) error (~1e-4) is borderline
    # against EPS=1e-4 and the test tolerance, so keep the exact path.
    inv = 1.0 / jnp.maximum(msum, eps)                    # mask_invc
    bias = b_ref[0]
    for co in range(Cout):
        hout_ref[0, co] = (accs[co] * inv + bias).astype(hout_ref.dtype)
    mout_ref[0] = mmax.astype(mout_ref.dtype)


def sparse_conv(feature, mask, weight, b, *, kernel_size, stride, padding):
    """feature: (N, Cin, H, W); mask: (N, 1, H, W); weight: (Cout, Cin, KH, KW) [OIHW];
    b: (1,) scalar. Returns (hout (N, Cout, Ho, Wo), mask_out (N, 1, Ho, Wo))."""
    N, Cin, H, W = feature.shape
    Cout = weight.shape[0]
    KH = KW = kernel_size
    # Required for the zero-padded max-pool / mask window-sum equivalence.
    assert padding < kernel_size, "padding must be < kernel_size"
    Ho = (H + 2 * padding - KH) // stride + 1
    Wo = (W + 2 * padding - KW) // stride + 1
    Hp, Wp = H + 2 * padding, W + 2 * padding

    feat = feature.astype(jnp.float32)                    # NCHW straight in, no pad/transpose
    msk = mask.astype(jnp.float32)
    w_flat = weight.astype(jnp.float32).reshape(-1)       # (Cout*Cin*KH*KW,), OIHW row-major
    b1 = jnp.reshape(b, (1,)).astype(jnp.float32)

    kernel = functools.partial(sparse_conv_kernel, KH=KH, KW=KW,
                               stride=stride, pad=padding, eps=EPS)

    hout, mout = pl.pallas_call(
        kernel,
        out_shape=(
            jax.ShapeDtypeStruct((N, Cout, Ho, Wo), jnp.float32),
            jax.ShapeDtypeStruct((N, Ho, Wo), jnp.float32),
        ),
        grid=(N,),
        in_specs=[
            pl.BlockSpec((1, Cin, H, W), lambda n: (n, 0, 0, 0)),
            pl.BlockSpec((1, 1, H, W), lambda n: (n, 0, 0, 0)),
            pl.BlockSpec(memory_space=pltpu.MemorySpace.SMEM),
            pl.BlockSpec(memory_space=pltpu.MemorySpace.SMEM),
        ],
        out_specs=(
            pl.BlockSpec((1, Cout, Ho, Wo), lambda n: (n, 0, 0, 0)),
            pl.BlockSpec((1, Ho, Wo), lambda n: (n, 0, 0)),
        ),
        scratch_shapes=[
            pltpu.VMEM((Cin, Hp, Wp), jnp.float32),       # padded masked feature
            pltpu.VMEM((Hp, Wp), jnp.float32),            # padded mask
        ],
        compiler_params=pltpu.CompilerParams(dimension_semantics=("parallel",)),
    )(feat, msk, w_flat, b1)

    # Add back the singleton channel for the pooled mask (cheap, tiny array).
    return hout, mout[:, None, :, :]


def reference_forward(feature, mask, weight, b, *, kernel_size, stride, padding):
    """Plain-JAX reference (for correctness check only)."""
    k, s, p = kernel_size, stride, padding
    masked = feature * mask
    hfeat = jax.lax.conv_general_dilated(
        masked, weight, (s, s), [(p, p), (p, p)],
        dimension_numbers=("NCHW", "OIHW", "NCHW"))
    ones_w = jnp.ones((1, 1, k, k), jnp.float32)
    mask_c = jax.lax.conv_general_dilated(
        mask, ones_w, (s, s), [(p, p), (p, p)],
        dimension_numbers=("NCHW", "OIHW", "NCHW"))
    inv = 1.0 / jnp.maximum(mask_c, EPS)
    hout = hfeat * inv + b
    mask_out = jax.lax.reduce_window(
        mask, -jnp.inf, jax.lax.max,
        (1, 1, k, k), (1, 1, s, s), [(0, 0), (0, 0), (p, p), (p, p)])
    return hout, mask_out


if __name__ == "__main__":
    # Small shapes consistent with the module: N=2, Cin=4, Cout=8, H=W=16, k=3, s=1, p=1
    N, Cin, Cout, H, W = 2, 4, 8, 16, 16
    kernel_size, stride, padding = 3, 1, 1

    key = jax.random.PRNGKey(0)
    k_feat, k_mask, k_w = jax.random.split(key, 3)
    feature = jax.random.normal(k_feat, (N, Cin, H, W), dtype=jnp.float32)
    mask = (jax.random.uniform(k_mask, (N, 1, H, W)) > 0.5).astype(jnp.float32)
    # conv1 weight (Kaiming-like scale, deterministic); mask_conv weight is implicit all-ones.
    weight = jax.random.normal(k_w, (Cout, Cin, kernel_size, kernel_size),
                               dtype=jnp.float32) * 0.1
    b = jnp.zeros((1,), jnp.float32)  # nn.Parameter init 0.0

    hout, mask_out = sparse_conv(feature, mask, weight, b,
                                 kernel_size=kernel_size, stride=stride, padding=padding)
    jax.block_until_ready((hout, mask_out))

    hout_ref, mask_out_ref = reference_forward(
        feature, mask, weight, b,
        kernel_size=kernel_size, stride=stride, padding=padding)
    assert hout.shape == (N, Cout, H, W) and mask_out.shape == (N, 1, H, W)
    assert jnp.allclose(hout, hout_ref, rtol=1e-4, atol=1e-5)
    assert jnp.allclose(mask_out, mask_out_ref, rtol=1e-4, atol=1e-5)

    print("KERNEL_OK")
</pallas_src>

<mosaic_0001>
module attributes {stable_mosaic.version = 11 : i64} {
  func.func @sparse_conv_kernel(%arg0: i32, %arg1: memref<1x4x16x16xf32, #tpu.memory_space<vmem>>, %arg2: memref<1x1x16x16xf32, #tpu.memory_space<vmem>>, %arg3: memref<288xf32, #tpu.memory_space<smem>>, %arg4: memref<1xf32, #tpu.memory_space<smem>>, %arg5: memref<1x8x16x16xf32, #tpu.memory_space<vmem>>, %arg6: memref<1x16x16xf32, #tpu.memory_space<vmem>>, %arg7: memref<4x18x18xf32, #tpu.memory_space<vmem>>, %arg8: memref<18x18xf32, #tpu.memory_space<vmem>>) attributes {dimension_semantics = [#tpu.dimension_semantics<parallel>], iteration_bounds = array<i64: 2>, scalar_prefetch = 0 : i64, scratch_operands = 2 : i64, tpu.core_type = #tpu.core_type<tc>, window_params = [{transform_indices = @transform_0, window_bounds = array<i64: 1, 4, 16, 16>}, {transform_indices = @transform_1, window_bounds = array<i64: 1, 1, 16, 16>}, {transform_indices = @transform_2, window_bounds = array<i64: 288>}, {transform_indices = @transform_3, window_bounds = array<i64: 1>}, {transform_indices = @transform_4, window_bounds = array<i64: 1, 8, 16, 16>}, {transform_indices = @transform_5, window_bounds = array<i64: 1, 16, 16>}]} {
    %c0 = arith.constant 0 : index
    %c0_0 = arith.constant 0 : index
    %c0_1 = arith.constant 0 : index
    %c0_2 = arith.constant 0 : index
    %0 = vector.load %arg2[%c0, %c0_0, %c0_1, %c0_2] : memref<1x1x16x16xf32, #tpu.memory_space<vmem>>, vector<1x1x16x16xf32>
    %1 = vector.shape_cast %0 : vector<1x1x16x16xf32> to vector<16x16xf32>
    %cst = arith.constant 0.000000e+00 : f32
    %2 = vector.broadcast %cst : f32 to vector<4x18x18xf32>
    %c0_3 = arith.constant 0 : index
    %c0_4 = arith.constant 0 : index
    %c0_5 = arith.constant 0 : index
    %3 = vector.load %arg7[%c0_3, %c0_4, %c0_5] : memref<4x18x18xf32, #tpu.memory_space<vmem>>, vector<4x18x18xf32>
    tpu.vector_store %arg7[%c0_3, %c0_4, %c0_5], %2 {strides = array<i32>} : memref<4x18x18xf32, #tpu.memory_space<vmem>>, vector<4x18x18xf32>,
    %cst_6 = arith.constant 0.000000e+00 : f32
    %4 = vector.broadcast %cst_6 : f32 to vector<18x18xf32>
    %c0_7 = arith.constant 0 : index
    %c0_8 = arith.constant 0 : index
    %5 = vector.load %arg8[%c0_7, %c0_8] : memref<18x18xf32, #tpu.memory_space<vmem>>, vector<18x18xf32>
    tpu.vector_store %arg8[%c0_7, %c0_8], %4 {strides = array<i32>} : memref<18x18xf32, #tpu.memory_space<vmem>>, vector<18x18xf32>,
    %c0_9 = arith.constant 0 : index
    %c0_10 = arith.constant 0 : index
    %c0_11 = arith.constant 0 : index
    %c0_12 = arith.constant 0 : index
    %6 = vector.load %arg1[%c0_9, %c0_10, %c0_11, %c0_12] : memref<1x4x16x16xf32, #tpu.memory_space<vmem>>, vector<1x4x16x16xf32>
    %7 = vector.shape_cast %6 : vector<1x4x16x16xf32> to vector<4x16x16xf32>
    %8 = vector.shape_cast %1 : vector<16x16xf32> to vector<1x16x16xf32>
    %9 = vector.broadcast %8 : vector<1x16x16xf32> to vector<4x16x16xf32>
    %10 = arith.mulf %7, %9 : vector<4x16x16xf32>
    %c0_13 = arith.constant 0 : index
    %c1 = arith.constant 1 : index
    %c1_14 = arith.constant 1 : index
    %11 = vector.load %arg7[%c0_13, %c1, %c1_14] : memref<4x18x18xf32, #tpu.memory_space<vmem>>, vector<4x16x16xf32>
    tpu.vector_store %arg7[%c0_13, %c1, %c1_14], %10 {strides = array<i32>} : memref<4x18x18xf32, #tpu.memory_space<vmem>>, vector<4x16x16xf32>,
    %c1_15 = arith.constant 1 : index
    %c1_16 = arith.constant 1 : index
    %12 = vector.load %arg8[%c1_15, %c1_16] : memref<18x18xf32, #tpu.memory_space<vmem>>, vector<16x16xf32>
    tpu.vector_store %arg8[%c1_15, %c1_16], %1 {strides = array<i32>} : memref<18x18xf32, #tpu.memory_space<vmem>>, vector<16x16xf32>,
    %cst_17 = arith.constant 0.000000e+00 : f32
    %13 = vector.broadcast %cst_17 : f32 to vector<16x16xf32>
    %cst_18 = arith.constant 0.000000e+00 : f32
    %14 = vector.broadcast %cst_18 : f32 to vector<16x16xf32>
    %cst_19 = arith.constant 0.000000e+00 : f32
    %15 = vector.broadcast %cst_19 : f32 to vector<16x16xf32>
    %cst_20 = arith.constant 0.000000e+00 : f32
    %16 = vector.broadcast %cst_20 : f32 to vector<16x16xf32>
    %cst_21 = arith.constant 0.000000e+00 : f32
    %17 = vector.broadcast %cst_21 : f32 to vector<16x16xf32>
    %cst_22 = arith.constant 0.000000e+00 : f32
    %18 = vector.broadcast %cst_22 : f32 to vector<16x16xf32>
    %cst_23 = arith.constant 0.000000e+00 : f32
    %19 = vector.broadcast %cst_23 : f32 to vector<16x16xf32>
    %cst_24 = arith.constant 0.000000e+00 : f32
    %20 = vector.broadcast %cst_24 : f32 to vector<16x16xf32>
    %cst_25 = arith.constant 0.000000e+00 : f32
    %21 = vector.broadcast %cst_25 : f32 to vector<16x16xf32>
    %cst_26 = arith.constant 0.000000e+00 : f32
    %22 = vector.broadcast %cst_26 : f32 to vector<16x16xf32>
    %c0_27 = arith.constant 0 : index
    %c0_28 = arith.constant 0 : index
    %23 = vector.load %arg8[%c0_27, %c0_28] : memref<18x18xf32, #tpu.memory_space<vmem>>, vector<16x16xf32>
    %24 = arith.addf %21, %23 : vector<16x16xf32>
    %25 = arith.maximumf %22, %23 : vector<16x16xf32>
    %c0_29 = arith.constant 0 : index
    %c0_30 = arith.constant 0 : index
    %c0_31 = arith.constant 0 : index
    %26 = vector.load %arg7[%c0_29, %c0_30, %c0_31] : memref<4x18x18xf32, #tpu.memory_space<vmem>>, vector<4x16x16xf32>
    %27 = vector.extract_strided_slice %26 {offsets = [0, 0, 0], sizes = [1, 16, 16], strides = [1, 1, 1]} : vector<4x16x16xf32> to vector<1x16x16xf32>
    %28 = vector.shape_cast %27 : vector<1x16x16xf32> to vector<16x16xf32>
    %c0_32 = arith.constant 0 : index
    %29 = memref.load %arg3[%c0_32] : memref<288xf32, #tpu.memory_space<smem>>
    %30 = vector.broadcast %29 : f32 to vector<16x16xf32>
    %31 = arith.mulf %30, %28 : vector<16x16xf32>
    %32 = arith.addf %13, %31 : vector<16x16xf32>
    %c36 = arith.constant 36 : index
    %33 = memref.load %arg3[%c36] : memref<288xf32, #tpu.memory_space<smem>>
    %34 = vector.broadcast %33 : f32 to vector<16x16xf32>
    %35 = arith.mulf %34, %28 : vector<16x16xf32>
    %36 = arith.addf %14, %35 : vector<16x16xf32>
    %c72 = arith.constant 72 : index
    %37 = memref.load %arg3[%c72] : memref<288xf32, #tpu.memory_space<smem>>
    %38 = vector.broadcast %37 : f32 to vector<16x16xf32>
    %39 = arith.mulf %38, %28 : vector<16x16xf32>
    %40 = arith.addf %15, %39 : vector<16x16xf32>
    %c108 = arith.constant 108 : index
    %41 = memref.load %arg3[%c108] : memref<288xf32, #tpu.memory_space<smem>>
    %42 = vector.broadcast %41 : f32 to vector<16x16xf32>
    %43 = arith.mulf %42, %28 : vector<16x16xf32>
    %44 = arith.addf %16, %43 : vector<16x16xf32>
    %c144 = arith.constant 144 : index
    %45 = memref.load %arg3[%c144] : memref<288xf32, #tpu.memory_space<smem>>
    %46 = vector.broadcast %45 : f32 to vector<16x16xf32>
    %47 = arith.mulf %46, %28 : vector<16x16xf32>
    %48 = arith.addf %17, %47 : vector<16x16xf32>
    %c180 = arith.constant 180 : index
    %49 = memref.load %arg3[%c180] : memref<288xf32, #tpu.memory_space<smem>>
    %50 = vector.broadcast %49 : f32 to vector<16x16xf32>
    %51 = arith.mulf %50, %28 : vector<16x16xf32>
    %52 = arith.addf %18, %51 : vector<16x16xf32>
    %c216 = arith.constant 216 : index
    %53 = memref.load %arg3[%c216] : memref<288xf32, #tpu.memory_space<smem>>
    %54 = vector.broadcast %53 : f32 to vector<16x16xf32>
    %55 = arith.mulf %54, %28 : vector<16x16xf32>
    %56 = arith.addf %19, %55 : vector<16x16xf32>
    %c252 = arith.constant 252 : index
    %57 = memref.load %arg3[%c252] : memref<288xf32, #tpu.memory_space<smem>>
    %58 = vector.broadcast %57 : f32 to vector<16x16xf32>
    %59 = arith.mulf %58, %28 : vector<16x16xf32>
    %60 = arith.addf %20, %59 : vector<16x16xf32>
    %61 = vector.extract_strided_slice %26 {offsets = [1, 0, 0], sizes = [1, 16, 16], strides = [1, 1, 1]} : vector<4x16x16xf32> to vector<1x16x16xf32>
    %62 = vector.shape_cast %61 : vector<1x16x16xf32> to vector<16x16xf32>
    %c9 = arith.constant 9 : index
    %63 = memref.load %arg3[%c9] : memref<288xf32, #tpu.memory_space<smem>>
    %64 = vector.broadcast %63 : f32 to vector<16x16xf32>
    %65 = arith.mulf %64, %62 : vector<16x16xf32>
    %66 = arith.addf %32, %65 : vector<16x16xf32>
    %c45 = arith.constant 45 : index
    %67 = memref.load %arg3[%c45] : memref<288xf32, #tpu.memory_space<smem>>
    %68 = vector.broadcast %67 : f32 to vector<16x16xf32>
    %69 = arith.mulf %68, %62 : vector<16x16xf32>
    %70 = arith.addf %36, %69 : vector<16x16xf32>
    %c81 = arith.constant 81 : index
    %71 = memref.load %arg3[%c81] : memref<288xf32, #tpu.memory_space<smem>>
    %72 = vector.broadcast %71 : f32 to vector<16x16xf32>
    %73 = arith.mulf %72, %62 : vector<16x16xf32>
    %74 = arith.addf %40, %73 : vector<16x16xf32>
    %c117 = arith.constant 117 : index
    %75 = memref.load %arg3[%c117] : memref<288xf32, #tpu.memory_space<smem>>
    %76 = vector.broadcast %75 : f32 to vector<16x16xf32>
    %77 = arith.mulf %76, %62 : vector<16x16xf32>
    %78 = arith.addf %44, %77 : vector<16x16xf32>
    %c153 = arith.constant 153 : index
    %79 = memref.load %arg3[%c153] : memref<288xf32, #tpu.memory_space<smem>>
    %80 = vector.broadcast %79 : f32 to vector<16x16xf32>
    %81 = arith.mulf %80, %62 : vector<16x16xf32>
    %82 = arith.addf %48, %81 : vector<16x16xf32>
    %c189 = arith.constant 189 : index
    %83 = memref.load %arg3[%c189] : memref<288xf32, #tpu.memory_space<smem>>
    %84 = vector.broadcast %83 : f32 to vector<16x16xf32>
    %85 = arith.mulf %84, %62 : vector<16x16xf32>
    %86 = arith.addf %52, %85 : vector<16x16xf32>
    %c225 = arith.constant 225 : index
    %87 = memref.load %arg3[%c225] : memref<288xf32, #tpu.memory_space<smem>>
    %88 = vector.broadcast %87 : f32 to vector<16x16xf32>
    %89 = arith.mulf %88, %62 : vector<16x16xf32>
    %90 = arith.addf %56, %89 : vector<16x16xf32>
    %c261 = arith.constant 261 : index
    %91 = memref.load %arg3[%c261] : memref<288xf32, #tpu.memory_space<smem>>
    %92 = vector.broadcast %91 : f32 to vector<16x16xf32>
    %93 = arith.mulf %92, %62 : vector<16x16xf32>
    %94 = arith.addf %60, %93 : vector<16x16xf32>
    %95 = vector.extract_strided_slice %26 {offsets = [2, 0, 0], sizes = [1, 16, 16], strides = [1, 1, 1]} : vector<4x16x16xf32> to vector<1x16x16xf32>
    %96 = vector.shape_cast %95 : vector<1x16x16xf32> to vector<16x16xf32>
    %c18 = arith.constant 18 : index
    %97 = memref.load %arg3[%c18] : memref<288xf32, #tpu.memory_space<smem>>
    %98 = vector.broadcast %97 : f32 to vector<16x16xf32>
    %99 = arith.mulf %98, %96 : vector<16x16xf32>
    %100 = arith.addf %66, %99 : vector<16x16xf32>
    %c54 = arith.constant 54 : index
    %101 = memref.load %arg3[%c54] : memref<288xf32, #tpu.memory_space<smem>>
    %102 = vector.broadcast %101 : f32 to vector<16x16xf32>
    %103 = arith.mulf %102, %96 : vector<16x16xf32>
    %104 = arith.addf %70, %103 : vector<16x16xf32>
    %c90 = arith.constant 90 : index
    %105 = memref.load %arg3[%c90] : memref<288xf32, #tpu.memory_space<smem>>
    %106 = vector.broadcast %105 : f32 to vector<16x16xf32>
    %107 = arith.mulf %106, %96 : vector<16x16xf32>
    %108 = arith.addf %74, %107 : vector<16x16xf32>
    %c126 = arith.constant 126 : index
    %109 = memref.load %arg3[%c126] : memref<288xf32, #tpu.memory_space<smem>>
    %110 = vector.broadcast %109 : f32 to vector<16x16xf32>
    %111 = arith.mulf %110, %96 : vector<16x16xf32>
    %112 = arith.addf %78, %111 : vector<16x16xf32>
    %c162 = arith.constant 162 : index
    %113 = memref.load %arg3[%c162] : memref<288xf32, #tpu.memory_space<smem>>
    %114 = vector.broadcast %113 : f32 to vector<16x16xf32>
    %115 = arith.mulf %114, %96 : vector<16x16xf32>
    %116 = arith.addf %82, %115 : vector<16x16xf32>
    %c198 = arith.constant 198 : index
    %117 = memref.load %arg3[%c198] : memref<288xf32, #tpu.memory_space<smem>>
    %118 = vector.broadcast %117 : f32 to vector<16x16xf32>
    %119 = arith.mulf %118, %96 : vector<16x16xf32>
    %120 = arith.addf %86, %119 : vector<16x16xf32>
    %c234 = arith.constant 234 : index
    %121 = memref.load %arg3[%c234] : memref<288xf32, #tpu.memory_space<smem>>
    %122 = vector.broadcast %121 : f32 to vector<16x16xf32>
    %123 = arith.mulf %122, %96 : vector<16x16xf32>
    %124 = arith.addf %90, %123 : vector<16x16xf32>
    %c270 = arith.constant 270 : index
    %125 = memref.load %arg3[%c270] : memref<288xf32, #tpu.memory_space<smem>>
    %126 = vector.broadcast %125 : f32 to vector<16x16xf32>
    %127 = arith.mulf %126, %96 : vector<16x16xf32>
    %128 = arith.addf %94, %127 : vector<16x16xf32>
    %129 = vector.extract_strided_slice %26 {offsets = [3, 0, 0], sizes = [1, 16, 16], strides = [1, 1, 1]} : vector<4x16x16xf32> to vector<1x16x16xf32>
    %130 = vector.shape_cast %129 : vector<1x16x16xf32> to vector<16x16xf32>
    %c27 = arith.constant 27 : index
    %131 = memref.load %arg3[%c27] : memref<288xf32, #tpu.memory_space<smem>>
    %132 = vector.broadcast %131 : f32 to vector<16x16xf32>
    %133 = arith.mulf %132, %130 : vector<16x16xf32>
    %134 = arith.addf %100, %133 : vector<16x16xf32>
    %c63 = arith.constant 63 : index
    %135 = memref.load %arg3[%c63] : memref<288xf32, #tpu.memory_space<smem>>
    %136 = vector.broadcast %135 : f32 to vector<16x16xf32>
    %137 = arith.mulf %136, %130 : vector<16x16xf32>
    %138 = arith.addf %104, %137 : vector<16x16xf32>
    %c99 = arith.constant 99 : index
    %139 = memref.load %arg3[%c99] : memref<288xf32, #tpu.memory_space<smem>>
    %140 = vector.broadcast %139 : f32 to vector<16x16xf32>
    %141 = arith.mulf %140, %130 : vector<16x16xf32>
    %142 = arith.addf %108, %141 : vector<16x16xf32>
    %c135 = arith.constant 135 : index
    %143 = memref.load %arg3[%c135] : memref<288xf32, #tpu.memory_space<smem>>
    %144 = vector.broadcast %143 : f32 to vector<16x16xf32>
    %145 = arith.mulf %144, %130 : vector<16x16xf32>
    %146 = arith.addf %112, %145 : vector<16x16xf32>
    %c171 = arith.constant 171 : index
    %147 = memref.load %arg3[%c171] : memref<288xf32, #tpu.memory_space<smem>>
    %148 = vector.broadcast %147 : f32 to vector<16x16xf32>
    %149 = arith.mulf %148, %130 : vector<16x16xf32>
    %150 = arith.addf %116, %149 : vector<16x16xf32>
    %c207 = arith.constant 207 : index
    %151 = memref.load %arg3[%c207] : memref<288xf32, #tpu.memory_space<smem>>
    %152 = vector.broadcast %151 : f32 to vector<16x16xf32>
    %153 = arith.mulf %152, %130 : vector<16x16xf32>
    %154 = arith.addf %120, %153 : vector<16x16xf32>
    %c243 = arith.constant 243 : index
    %155 = memref.load %arg3[%c243] : memref<288xf32, #tpu.memory_space<smem>>
    %156 = vector.broadcast %155 : f32 to vector<16x16xf32>
    %157 = arith.mulf %156, %130 : vector<16x16xf32>
    %158 = arith.addf %124, %157 : vector<16x16xf32>
    %c279 = arith.constant 279 : index
    %159 = memref.load %arg3[%c279] : memref<288xf32, #tpu.memory_space<smem>>
    %160 = vector.broadcast %159 : f32 to vector<16x16xf32>
    %161 = arith.mulf %160, %130 : vector<16x16xf32>
    %162 = arith.addf %128, %161 : vector<16x16xf32>
    %c0_33 = arith.constant 0 : index
    %c1_34 = arith.constant 1 : index
    %163 = vector.load %arg8[%c0_33, %c1_34] : memref<18x18xf32, #tpu.memory_space<vmem>>, vector<16x16xf32>
    %164 = arith.addf %24, %163 : vector<16x16xf32>
    %165 = arith.maximumf %25, %163 : vector<16x16xf32>
    %c0_35 = arith.constant 0 : index
    %c0_36 = arith.constant 0 : index
    %c1_37 = arith.constant 1 : index
    %166 = vector.load %arg7[%c0_35, %c0_36, %c1_37] : memref<4x18x18xf32, #tpu.memory_space<vmem>>, vector<4x16x16xf32>
    %167 = vector.extract_strided_slice %166 {offsets = [0, 0, 0], sizes = [1, 16, 16], strides = [1, 1, 1]} : vector<4x16x16xf32> to vector<1x16x16xf32>
    %168 = vector.shape_cast %167 : vector<1x16x16xf32> to vector<16x16xf32>
    %c1_38 = arith.constant 1 : index
    %169 = memref.load %arg3[%c1_38] : memref<288xf32, #tpu.memory_space<smem>>
    %170 = vector.broadcast %169 : f32 to vector<16x16xf32>
    %171 = arith.mulf %170, %168 : vector<16x16xf32>
    %172 = arith.addf %134, %171 : vector<16x16xf32>
    %c37 = arith.constant 37 : index
    %173 = memref.load %arg3[%c37] : memref<288xf32, #tpu.memory_space<smem>>
    %174 = vector.broadcast %173 : f32 to vector<16x16xf32>
    %175 = arith.mulf %174, %168 : vector<16x16xf32>
    %176 = arith.addf %138, %175 : vector<16x16xf32>
    %c73 = arith.constant 73 : index
    %177 = memref.load %arg3[%c73] : memref<288xf32, #tpu.memory_space<smem>>
    %178 = vector.broadcast %177 : f32 to vector<16x16xf32>
    %179 = arith.mulf %178, %168 : vector<16x16xf32>
    %180 = arith.addf %142, %179 : vector<16x16xf32>
    %c109 = arith.constant 109 : index
    %181 = memref.load %arg3[%c109] : memref<288xf32, #tpu.memory_space<smem>>
    %182 = vector.broadcast %181 : f32 to vector<16x16xf32>
    %183 = arith.mulf %182, %168 : vector<16x16xf32>
    %184 = arith.addf %146, %183 : vector<16x16xf32>
    %c145 = arith.constant 145 : index
    %185 = memref.load %arg3[%c145] : memref<288xf32, #tpu.memory_space<smem>>
    %186 = vector.broadcast %185 : f32 to vector<16x16xf32>
    %187 = arith.mulf %186, %168 : vector<16x16xf32>
    %188 = arith.addf %150, %187 : vector<16x16xf32>
    %c181 = arith.constant 181 : index
    %189 = memref.load %arg3[%c181] : memref<288xf32, #tpu.memory_space<smem>>
    %190 = vector.broadcast %189 : f32 to vector<16x16xf32>
    %191 = arith.mulf %190, %168 : vector<16x16xf32>
    %192 = arith.addf %154, %191 : vector<16x16xf32>
    %c217 = arith.constant 217 : index
    %193 = memref.load %arg3[%c217] : memref<288xf32, #tpu.memory_space<smem>>
    %194 = vector.broadcast %193 : f32 to vector<16x16xf32>
    %195 = arith.mulf %194, %168 : vector<16x16xf32>
    %196 = arith.addf %158, %195 : vector<16x16xf32>
    %c253 = arith.constant 253 : index
    %197 = memref.load %arg3[%c253] : memref<288xf32, #tpu.memory_space<smem>>
    %198 = vector.broadcast %197 : f32 to vector<16x16xf32>
    %199 = arith.mulf %198, %168 : vector<16x16xf32>
    %200 = arith.addf %162, %199 : vector<16x16xf32>
    %201 = vector.extract_strided_slice %166 {offsets = [1, 0, 0], sizes = [1, 16, 16], strides = [1, 1, 1]} : vector<4x16x16xf32> to vector<1x16x16xf32>
    %202 = vector.shape_cast %201 : vector<1x16x16xf32> to vector<16x16xf32>
    %c10 = arith.constant 10 : index
    %203 = memref.load %arg3[%c10] : memref<288xf32, #tpu.memory_space<smem>>
    %204 = vector.broadcast %203 : f32 to vector<16x16xf32>
    %205 = arith.mulf %204, %202 : vector<16x16xf32>
    %206 = arith.addf %172, %205 : vector<16x16xf32>
    %c46 = arith.constant 46 : index
    %207 = memref.load %arg3[%c46] : memref<288xf32, #tpu.memory_space<smem>>
    %208 = vector.broadcast %207 : f32 to vector<16x16xf32>
    %209 = arith.mulf %208, %202 : vector<16x16xf32>
    %210 = arith.addf %176, %209 : vector<16x16xf32>
    %c82 = arith.constant 82 : index
    %211 = memref.load %arg3[%c82] : memref<288xf32, #tpu.memory_space<smem>>
    %212 = vector.broadcast %211 : f32 to vector<16x16xf32>
    %213 = arith.mulf %212, %202 : vector<16x16xf32>
    %214 = arith.addf %180, %213 : vector<16x16xf32>
    %c118 = arith.constant 118 : index
    %215 = memref.load %arg3[%c118] : memref<288xf32, #tpu.memory_space<smem>>
    %216 = vector.broadcast %215 : f32 to vector<16x16xf32>
    %217 = arith.mulf %216, %202 : vector<16x16xf32>
    %218 = arith.addf %184, %217 : vector<16x16xf32>
    %c154 = arith.constant 154 : index
    %219 = memref.load %arg3[%c154] : memref<288xf32, #tpu.memory_space<smem>>
    %220 = vector.broadcast %219 : f32 to vector<16x16xf32>
    %221 = arith.mulf %220, %202 : vector<16x16xf32>
    %222 = arith.addf %188, %221 : vector<16x16xf32>
    %c190 = arith.constant 190 : index
    %223 = memref.load %arg3[%c190] : memref<288xf32, #tpu.memory_space<smem>>
    %224 = vector.broadcast %223 : f32 to vector<16x16xf32>
    %225 = arith.mulf %224, %202 : vector<16x16xf32>
    %226 = arith.addf %192, %225 : vector<16x16xf32>
    %c226 = arith.constant 226 : index
    %227 = memref.load %arg3[%c226] : memref<288xf32, #tpu.memory_space<smem>>
    %228 = vector.broadcast %227 : f32 to vector<16x16xf32>
    %229 = arith.mulf %228, %202 : vector<16x16xf32>
    %230 = arith.addf %196, %229 : vector<16x16xf32>
    %c262 = arith.constant 262 : index
    %231 = memref.load %arg3[%c262] : memref<288xf32, #tpu.memory_space<smem>>
    %232 = vector.broadcast %231 : f32 to vector<16x16xf32>
    %233 = arith.mulf %232, %202 : vector<16x16xf32>
    %234 = arith.addf %200, %233 : vector<16x16xf32>
    %235 = vector.extract_strided_slice %166 {offsets = [2, 0, 0], sizes = [1, 16, 16], strides = [1, 1, 1]} : vector<4x16x16xf32> to vector<1x16x16xf32>
    %236 = vector.shape_cast %235 : vector<1x16x16xf32> to vector<16x16xf32>
    %c19 = arith.constant 19 : index
    %237 = memref.load %arg3[%c19] : memref<288xf32, #tpu.memory_space<smem>>
    %238 = vector.broadcast %237 : f32 to vector<16x16xf32>
    %239 = arith.mulf %238, %236 : vector<16x16xf32>
    %240 = arith.addf %206, %239 : vector<16x16xf32>
    %c55 = arith.constant 55 : index
    %241 = memref.load %arg3[%c55] : memref<288xf32, #tpu.memory_space<smem>>
    %242 = vector.broadcast %241 : f32 to vector<16x16xf32>
    %243 = arith.mulf %242, %236 : vector<16x16xf32>
    %244 = arith.addf %210, %243 : vector<16x16xf32>
    %c91 = arith.constant 91 : index
    %245 = memref.load %arg3[%c91] : memref<288xf32, #tpu.memory_space<smem>>
    %246 = vector.broadcast %245 : f32 to vector<16x16xf32>
    %247 = arith.mulf %246, %236 : vector<16x16xf32>
    %248 = arith.addf %214, %247 : vector<16x16xf32>
    %c127 = arith.constant 127 : index
    %249 = memref.load %arg3[%c127] : memref<288xf32, #tpu.memory_space<smem>>
    %250 = vector.broadcast %249 : f32 to vector<16x16xf32>
    %251 = arith.mulf %250, %236 : vector<16x16xf32>
    %252 = arith.addf %218, %251 : vector<16x16xf32>
    %c163 = arith.constant 163 : index
    %253 = memref.load %arg3[%c163] : memref<288xf32, #tpu.memory_space<smem>>
    %254 = vector.broadcast %253 : f32 to vector<16x16xf32>
    %255 = arith.mulf %254, %236 : vector<16x16xf32>
    %256 = arith.addf %222, %255 : vector<16x16xf32>
    %c199 = arith.constant 199 : index
    %257 = memref.load %arg3[%c199] : memref<288xf32, #tpu.memory_space<smem>>
    %258 = vector.broadcast %257 : f32 to vector<16x16xf32>
    %259 = arith.mulf %258, %236 : vector<16x16xf32>
    %260 = arith.addf %226, %259 : vector<16x16xf32>
    %c235 = arith.constant 235 : index
    %261 = memref.load %arg3[%c235] : memref<288xf32, #tpu.memory_space<smem>>
    %262 = vector.broadcast %261 : f32 to vector<16x16xf32>
    %263 = arith.mulf %262, %236 : vector<16x16xf32>
    %264 = arith.addf %230, %263 : vector<16x16xf32>
    %c271 = arith.constant 271 : index
    %265 = memref.load %arg3[%c271] : memref<288xf32, #tpu.memory_space<smem>>
    %266 = vector.broadcast %265 : f32 to vector<16x16xf32>
    %267 = arith.mulf %266, %236 : vector<16x16xf32>
    %268 = arith.addf %234, %267 : vector<16x16xf32>
    %269 = vector.extract_strided_slice %166 {offsets = [3, 0, 0], sizes = [1, 16, 16], strides = [1, 1, 1]} : vector<4x16x16xf32> to vector<1x16x16xf32>
    %270 = vector.shape_cast %269 : vector<1x16x16xf32> to vector<16x16xf32>
    %c28 = arith.constant 28 : index
    %271 = memref.load %arg3[%c28] : memref<288xf32, #tpu.memory_space<smem>>
    %272 = vector.broadcast %271 : f32 to vector<16x16xf32>
    %273 = arith.mulf %272, %270 : vector<16x16xf32>
    %274 = arith.addf %240, %273 : vector<16x16xf32>
    %c64 = arith.constant 64 : index
    %275 = memref.load %arg3[%c64] : memref<288xf32, #tpu.memory_space<smem>>
    %276 = vector.broadcast %275 : f32 to vector<16x16xf32>
    %277 = arith.mulf %276, %270 : vector<16x16xf32>
    %278 = arith.addf %244, %277 : vector<16x16xf32>
    %c100 = arith.constant 100 : index
    %279 = memref.load %arg3[%c100] : memref<288xf32, #tpu.memory_space<smem>>
    %280 = vector.broadcast %279 : f32 to vector<16x16xf32>
    %281 = arith.mulf %280, %270 : vector<16x16xf32>
    %282 = arith.addf %248, %281 : vector<16x16xf32>
    %c136 = arith.constant 136 : index
    %283 = memref.load %arg3[%c136] : memref<288xf32, #tpu.memory_space<smem>>
    %284 = vector.broadcast %283 : f32 to vector<16x16xf32>
    %285 = arith.mulf %284, %270 : vector<16x16xf32>
    %286 = arith.addf %252, %285 : vector<16x16xf32>
    %c172 = arith.constant 172 : index
    %287 = memref.load %arg3[%c172] : memref<288xf32, #tpu.memory_space<smem>>
    %288 = vector.broadcast %287 : f32 to vector<16x16xf32>
    %289 = arith.mulf %288, %270 : vector<16x16xf32>
    %290 = arith.addf %256, %289 : vector<16x16xf32>
    %c208 = arith.constant 208 : index
    %291 = memref.load %arg3[%c208] : memref<288xf32, #tpu.memory_space<smem>>
    %292 = vector.broadcast %291 : f32 to vector<16x16xf32>
    %293 = arith.mulf %292, %270 : vector<16x16xf32>
    %294 = arith.addf %260, %293 : vector<16x16xf32>
    %c244 = arith.constant 244 : index
    %295 = memref.load %arg3[%c244] : memref<288xf32, #tpu.memory_space<smem>>
    %296 = vector.broadcast %295 : f32 to vector<16x16xf32>
    %297 = arith.mulf %296, %270 : vector<16x16xf32>
    %298 = arith.addf %264, %297 : vector<16x16xf32>
    %c280 = arith.constant 280 : index
    %299 = memref.load %arg3[%c280] : memref<288xf32, #tpu.memory_space<smem>>
    %300 = vector.broadcast %299 : f32 to vector<16x16xf32>
    %301 = arith.mulf %300, %270 : vector<16x16xf32>
    %302 = arith.addf %268, %301 : vector<16x16xf32>
    %c0_39 = arith.constant 0 : index
    %c2 = arith.constant 2 : index
    %303 = vector.load %arg8[%c0_39, %c2] : memref<18x18xf32, #tpu.memory_space<vmem>>, vector<16x16xf32>
    %304 = arith.addf %164, %303 : vector<16x16xf32>
    %305 = arith.maximumf %165, %303 : vector<16x16xf32>
    %c0_40 = arith.constant 0 : index
    %c0_41 = arith.constant 0 : index
    %c2_42 = arith.constant 2 : index
    %306 = vector.load %arg7[%c0_40, %c0_41, %c2_42] : memref<4x18x18xf32, #tpu.memory_space<vmem>>, vector<4x16x16xf32>
    %307 = vector.extract_strided_slice %306 {offsets = [0, 0, 0], sizes = [1, 16, 16], strides = [1, 1, 1]} : vector<4x16x16xf32> to vector<1x16x16xf32>
    %308 = vector.shape_cast %307 : vector<1x16x16xf32> to vector<16x16xf32>
    %c2_43 = arith.constant 2 : index
    %309 = memref.load %arg3[%c2_43] : memref<288xf32, #tpu.memory_space<smem>>
    %310 = vector.broadcast %309 : f32 to vector<16x16xf32>
    %311 = arith.mulf %310, %308 : vector<16x16xf32>
    %312 = arith.addf %274, %311 : vector<16x16xf32>
    %c38 = arith.constant 38 : index
    %313 = memref.load %arg3[%c38] : memref<288xf32, #tpu.memory_space<smem>>
    %314 = vector.broadcast %313 : f32 to vector<16x16xf32>
    %315 = arith.mulf %314, %308 : vector<16x16xf32>
    %316 = arith.addf %278, %315 : vector<16x16xf32>
    %c74 = arith.constant 74 : index
    %317 = memref.load %arg3[%c74] : memref<288xf32, #tpu.memory_space<smem>>
    %318 = vector.broadcast %317 : f32 to vector<16x16xf32>
    %319 = arith.mulf %318, %308 : vector<16x16xf32>
    %320 = arith.addf %282, %319 : vector<16x16xf32>
    %c110 = arith.constant 110 : index
    %321 = memref.load %arg3[%c110] : memref<288xf32, #tpu.memory_space<smem>>
    %322 = vector.broadcast %321 : f32 to vector<16x16xf32>
    %323 = arith.mulf %322, %308 : vector<16x16xf32>
    %324 = arith.addf %286, %323 : vector<16x16xf32>
    %c146 = arith.constant 146 : index
    %325 = memref.load %arg3[%c146] : memref<288xf32, #tpu.memory_space<smem>>
    %326 = vector.broadcast %325 : f32 to vector<16x16xf32>
    %327 = arith.mulf %326, %308 : vector<16x16xf32>
    %328 = arith.addf %290, %327 : vector<16x16xf32>
    %c182 = arith.constant 182 : index
    %329 = memref.load %arg3[%c182] : memref<288xf32, #tpu.memory_space<smem>>
    %330 = vector.broadcast %329 : f32 to vector<16x16xf32>
    %331 = arith.mulf %330, %308 : vector<16x16xf32>
    %332 = arith.addf %294, %331 : vector<16x16xf32>
    %c218 = arith.constant 218 : index
    %333 = memref.load %arg3[%c218] : memref<288xf32, #tpu.memory_space<smem>>
    %334 = vector.broadcast %333 : f32 to vector<16x16xf32>
    %335 = arith.mulf %334, %308 : vector<16x16xf32>
    %336 = arith.addf %298, %335 : vector<16x16xf32>
    %c254 = arith.constant 254 : index
    %337 = memref.load %arg3[%c254] : memref<288xf32, #tpu.memory_space<smem>>
    %338 = vector.broadcast %337 : f32 to vector<16x16xf32>
    %339 = arith.mulf %338, %308 : vector<16x16xf32>
    %340 = arith.addf %302, %339 : vector<16x16xf32>
    %341 = vector.extract_strided_slice %306 {offsets = [1, 0, 0], sizes = [1, 16, 16], strides = [1, 1, 1]} : vector<4x16x16xf32> to vector<1x16x16xf32>
    %342 = vector.shape_cast %341 : vector<1x16x16xf32> to vector<16x16xf32>
    %c11 = arith.constant 11 : index
    %343 = memref.load %arg3[%c11] : memref<288xf32, #tpu.memory_space<smem>>
    %344 = vector.broadcast %343 : f32 to vector<16x16xf32>
    %345 = arith.mulf %344, %342 : vector<16x16xf32>
    %346 = arith.addf %312, %345 : vector<16x16xf32>
    %c47 = arith.constant 47 : index
    %347 = memref.load %arg3[%c47] : memref<288xf32, #tpu.memory_space<smem>>
    %348 = vector.broadcast %347 : f32 to vector<16x16xf32>
    %349 = arith.mulf %348, %342 : vector<16x16xf32>
    %350 = arith.addf %316, %349 : vector<16x16xf32>
    %c83 = arith.constant 83 : index
    %351 = memref.load %arg3[%c83] : memref<288xf32, #tpu.memory_space<smem>>
    %352 = vector.broadcast %351 : f32 to vector<16x16xf32>
    %353 = arith.mulf %352, %342 : vector<16x16xf32>
    %354 = arith.addf %320, %353 : vector<16x16xf32>
    %c119 = arith.constant 119 : index
    %355 = memref.load %arg3[%c119] : memref<288xf32, #tpu.memory_space<smem>>
    %356 = vector.broadcast %355 : f32 to vector<16x16xf32>
    %357 = arith.mulf %356, %342 : vector<16x16xf32>
    %358 = arith.addf %324, %357 : vector<16x16xf32>
    %c155 = arith.constant 155 : index
    %359 = memref.load %arg3[%c155] : memref<288xf32, #tpu.memory_space<smem>>
    %360 = vector.broadcast %359 : f32 to vector<16x16xf32>
    %361 = arith.mulf %360, %342 : vector<16x16xf32>
    %362 = arith.addf %328, %361 : vector<16x16xf32>
    %c191 = arith.constant 191 : index
    %363 = memref.load %arg3[%c191] : memref<288xf32, #tpu.memory_space<smem>>
    %364 = vector.broadcast %363 : f32 to vector<16x16xf32>
    %365 = arith.mulf %364, %342 : vector<16x16xf32>
    %366 = arith.addf %332, %365 : vector<16x16xf32>
    %c227 = arith.constant 227 : index
    %367 = memref.load %arg3[%c227] : memref<288xf32, #tpu.memory_space<smem>>
    %368 = vector.broadcast %367 : f32 to vector<16x16xf32>
    %369 = arith.mulf %368, %342 : vector<16x16xf32>
    %370 = arith.addf %336, %369 : vector<16x16xf32>
    %c263 = arith.constant 263 : index
    %371 = memref.load %arg3[%c263] : memref<288xf32, #tpu.memory_space<smem>>
    %372 = vector.broadcast %371 : f32 to vector<16x16xf32>
    %373 = arith.mulf %372, %342 : vector<16x16xf32>
    %374 = arith.addf %340, %373 : vector<16x16xf32>
    %375 = vector.extract_strided_slice %306 {offsets = [2, 0, 0], sizes = [1, 16, 16], strides = [1, 1, 1]} : vector<4x16x16xf32> to vector<1x16x16xf32>
    %376 = vector.shape_cast %375 : vector<1x16x16xf32> to vector<16x16xf32>
    %c20 = arith.constant 20 : index
    %377 = memref.load %arg3[%c20] : memref<288xf32, #tpu.memory_space<smem>>
    %378 = vector.broadcast %377 : f32 to vector<16x16xf32>
    %379 = arith.mulf %378, %376 : vector<16x16xf32>
    %380 = arith.addf %346, %379 : vector<16x16xf32>
    %c56 = arith.constant 56 : index
    %381 = memref.load %arg3[%c56] : memref<288xf32, #tpu.memory_space<smem>>
    %382 = vector.broadcast %381 : f32 to vector<16x16xf32>
    %383 = arith.mulf %382, %376 : vector<16x16xf32>
    %384 = arith.addf %350, %383 : vector<16x16xf32>
    %c92 = arith.constant 92 : index
    %385 = memref.load %arg3[%c92] : memref<288xf32, #tpu.memory_space<smem>>
    %386 = vector.broadcast %385 : f32 to vector<16x16xf32>
    %387 = arith.mulf %386, %376 : vector<16x16xf32>
    %388 = arith.addf %354, %387 : vector<16x16xf32>
    %c128 = arith.constant 128 : index
    %389 = memref.load %arg3[%c128] : memref<288xf32, #tpu.memory_space<smem>>
    %390 = vector.broadcast %389 : f32 to vector<16x16xf32>
    %391 = arith.mulf %390, %376 : vector<16x16xf32>
    %392 = arith.addf %358, %391 : vector<16x16xf32>
    %c164 = arith.constant 164 : index
    %393 = memref.load %arg3[%c164] : memref<288xf32, #tpu.memory_space<smem>>
    %394 = vector.broadcast %393 : f32 to vector<16x16xf32>
    %395 = arith.mulf %394, %376 : vector<16x16xf32>
    %396 = arith.addf %362, %395 : vector<16x16xf32>
    %c200 = arith.constant 200 : index
    %397 = memref.load %arg3[%c200] : memref<288xf32, #tpu.memory_space<smem>>
    %398 = vector.broadcast %397 : f32 to vector<16x16xf32>
    %399 = arith.mulf %398, %376 : vector<16x16xf32>
    %400 = arith.addf %366, %399 : vector<16x16xf32>
    %c236 = arith.constant 236 : index
    %401 = memref.load %arg3[%c236] : memref<288xf32, #tpu.memory_space<smem>>
    %402 = vector.broadcast %401 : f32 to vector<16x16xf32>
    %403 = arith.mulf %402, %376 : vector<16x16xf32>
    %404 = arith.addf %370, %403 : vector<16x16xf32>
    %c272 = arith.constant 272 : index
    %405 = memref.load %arg3[%c272] : memref<288xf32, #tpu.memory_space<smem>>
    %406 = vector.broadcast %405 : f32 to vector<16x16xf32>
    %407 = arith.mulf %406, %376 : vector<16x16xf32>
    %408 = arith.addf %374, %407 : vector<16x16xf32>
    %409 = vector.extract_strided_slice %306 {offsets = [3, 0, 0], sizes = [1, 16, 16], strides = [1, 1, 1]} : vector<4x16x16xf32> to vector<1x16x16xf32>
    %410 = vector.shape_cast %409 : vector<1x16x16xf32> to vector<16x16xf32>
    %c29 = arith.constant 29 : index
    %411 = memref.load %arg3[%c29] : memref<288xf32, #tpu.memory_space<smem>>
    %412 = vector.broadcast %411 : f32 to vector<16x16xf32>
    %413 = arith.mulf %412, %410 : vector<16x16xf32>
    %414 = arith.addf %380, %413 : vector<16x16xf32>
    %c65 = arith.constant 65 : index
    %415 = memref.load %arg3[%c65] : memref<288xf32, #tpu.memory_space<smem>>
    %416 = vector.broadcast %415 : f32 to vector<16x16xf32>
    %417 = arith.mulf %416, %410 : vector<16x16xf32>
    %418 = arith.addf %384, %417 : vector<16x16xf32>
    %c101 = arith.constant 101 : index
    %419 = memref.load %arg3[%c101] : memref<288xf32, #tpu.memory_space<smem>>
    %420 = vector.broadcast %419 : f32 to vector<16x16xf32>
    %421 = arith.mulf %420, %410 : vector<16x16xf32>
    %422 = arith.addf %388, %421 : vector<16x16xf32>
    %c137 = arith.constant 137 : index
    %423 = memref.load %arg3[%c137] : memref<288xf32, #tpu.memory_space<smem>>
    %424 = vector.broadcast %423 : f32 to vector<16x16xf32>
    %425 = arith.mulf %424, %410 : vector<16x16xf32>
    %426 = arith.addf %392, %425 : vector<16x16xf32>
    %c173 = arith.constant 173 : index
    %427 = memref.load %arg3[%c173] : memref<288xf32, #tpu.memory_space<smem>>
    %428 = vector.broadcast %427 : f32 to vector<16x16xf32>
    %429 = arith.mulf %428, %410 : vector<16x16xf32>
    %430 = arith.addf %396, %429 : vector<16x16xf32>
    %c209 = arith.constant 209 : index
    %431 = memref.load %arg3[%c209] : memref<288xf32, #tpu.memory_space<smem>>
    %432 = vector.broadcast %431 : f32 to vector<16x16xf32>
    %433 = arith.mulf %432, %410 : vector<16x16xf32>
    %434 = arith.addf %400, %433 : vector<16x16xf32>
    %c245 = arith.constant 245 : index
    %435 = memref.load %arg3[%c245] : memref<288xf32, #tpu.memory_space<smem>>
    %436 = vector.broadcast %435 : f32 to vector<16x16xf32>
    %437 = arith.mulf %436, %410 : vector<16x16xf32>
    %438 = arith.addf %404, %437 : vector<16x16xf32>
    %c281 = arith.constant 281 : index
    %439 = memref.load %arg3[%c281] : memref<288xf32, #tpu.memory_space<smem>>
    %440 = vector.broadcast %439 : f32 to vector<16x16xf32>
    %441 = arith.mulf %440, %410 : vector<16x16xf32>
    %442 = arith.addf %408, %441 : vector<16x16xf32>
    %c1_44 = arith.constant 1 : index
    %c0_45 = arith.constant 0 : index
    %443 = vector.load %arg8[%c1_44, %c0_45] : memref<18x18xf32, #tpu.memory_space<vmem>>, vector<16x16xf32>
    %444 = arith.addf %304, %443 : vector<16x16xf32>
    %445 = arith.maximumf %305, %443 : vector<16x16xf32>
    %c0_46 = arith.constant 0 : index
    %c1_47 = arith.constant 1 : index
    %c0_48 = arith.constant 0 : index
    %446 = vector.load %arg7[%c0_46, %c1_47, %c0_48] : memref<4x18x18xf32, #tpu.memory_space<vmem>>, vector<4x16x16xf32>
    %447 = vector.extract_strided_slice %446 {offsets = [0, 0, 0], sizes = [1, 16, 16], strides = [1, 1, 1]} : vector<4x16x16xf32> to vector<1x16x16xf32>
    %448 = vector.shape_cast %447 : vector<1x16x16xf32> to vector<16x16xf32>
    %c3 = arith.constant 3 : index
    %449 = memref.load %arg3[%c3] : memref<288xf32, #tpu.memory_space<smem>>
    %450 = vector.broadcast %449 : f32 to vector<16x16xf32>
    %451 = arith.mulf %450, %448 : vector<16x16xf32>
    %452 = arith.addf %414, %451 : vector<16x16xf32>
    %c39 = arith.constant 39 : index
    %453 = memref.load %arg3[%c39] : memref<288xf32, #tpu.memory_space<smem>>
    %454 = vector.broadcast %453 : f32 to vector<16x16xf32>
    %455 = arith.mulf %454, %448 : vector<16x16xf32>
    %456 = arith.addf %418, %455 : vector<16x16xf32>
    %c75 = arith.constant 75 : index
    %457 = memref.load %arg3[%c75] : memref<288xf32, #tpu.memory_space<smem>>
    %458 = vector.broadcast %457 : f32 to vector<16x16xf32>
    %459 = arith.mulf %458, %448 : vector<16x16xf32>
    %460 = arith.addf %422, %459 : vector<16x16xf32>
    %c111 = arith.constant 111 : index
    %461 = memref.load %arg3[%c111] : memref<288xf32, #tpu.memory_space<smem>>
    %462 = vector.broadcast %461 : f32 to vector<16x16xf32>
    %463 = arith.mulf %462, %448 : vector<16x16xf32>
    %464 = arith.addf %426, %463 : vector<16x16xf32>
    %c147 = arith.constant 147 : index
    %465 = memref.load %arg3[%c147] : memref<288xf32, #tpu.memory_space<smem>>
    %466 = vector.broadcast %465 : f32 to vector<16x16xf32>
    %467 = arith.mulf %466, %448 : vector<16x16xf32>
    %468 = arith.addf %430, %467 : vector<16x16xf32>
    %c183 = arith.constant 183 : index
    %469 = memref.load %arg3[%c183] : memref<288xf32, #tpu.memory_space<smem>>
    %470 = vector.broadcast %469 : f32 to vector<16x16xf32>
    %471 = arith.mulf %470, %448 : vector<16x16xf32>
    %472 = arith.addf %434, %471 : vector<16x16xf32>
    %c219 = arith.constant 219 : index
    %473 = memref.load %arg3[%c219] : memref<288xf32, #tpu.memory_space<smem>>
    %474 = vector.broadcast %473 : f32 to vector<16x16xf32>
    %475 = arith.mulf %474, %448 : vector<16x16xf32>
    %476 = arith.addf %438, %475 : vector<16x16xf32>
    %c255 = arith.constant 255 : index
    %477 = memref.load %arg3[%c255] : memref<288xf32, #tpu.memory_space<smem>>
    %478 = vector.broadcast %477 : f32 to vector<16x16xf32>
    %479 = arith.mulf %478, %448 : vector<16x16xf32>
    %480 = arith.addf %442, %479 : vector<16x16xf32>
    %481 = vector.extract_strided_slice %446 {offsets = [1, 0, 0], sizes = [1, 16, 16], strides = [1, 1, 1]} : vector<4x16x16xf32> to vector<1x16x16xf32>
    %482 = vector.shape_cast %481 : vector<1x16x16xf32> to vector<16x16xf32>
    %c12 = arith.constant 12 : index
    %483 = memref.load %arg3[%c12] : memref<288xf32, #tpu.memory_space<smem>>
    %484 = vector.broadcast %483 : f32 to vector<16x16xf32>
    %485 = arith.mulf %484, %482 : vector<16x16xf32>
    %486 = arith.addf %452, %485 : vector<16x16xf32>
    %c48 = arith.constant 48 : index
    %487 = memref.load %arg3[%c48] : memref<288xf32, #tpu.memory_space<smem>>
    %488 = vector.broadcast %487 : f32 to vector<16x16xf32>
    %489 = arith.mulf %488, %482 : vector<16x16xf32>
    %490 = arith.addf %456, %489 : vector<16x16xf32>
    %c84 = arith.constant 84 : index
    %491 = memref.load %arg3[%c84] : memref<288xf32, #tpu.memory_space<smem>>
    %492 = vector.broadcast %491 : f32 to vector<16x16xf32>
    %493 = arith.mulf %492, %482 : vector<16x16xf32>
    %494 = arith.addf %460, %493 : vector<16x16xf32>
    %c120 = arith.constant 120 : index
    %495 = memref.load %arg3[%c120] : memref<288xf32, #tpu.memory_space<smem>>
    %496 = vector.broadcast %495 : f32 to vector<16x16xf32>
    %497 = arith.mulf %496, %482 : vector<16x16xf32>
    %498 = arith.addf %464, %497 : vector<16x16xf32>
    %c156 = arith.constant 156 : index
    %499 = memref.load %arg3[%c156] : memref<288xf32, #tpu.memory_space<smem>>
    %500 = vector.broadcast %499 : f32 to vector<16x16xf32>
    %501 = arith.mulf %500, %482 : vector<16x16xf32>
    %502 = arith.addf %468, %501 : vector<16x16xf32>
    %c192 = arith.constant 192 : index
    %503 = memref.load %arg3[%c192] : memref<288xf32, #tpu.memory_space<smem>>
    %504 = vector.broadcast %503 : f32 to vector<16x16xf32>
    %505 = arith.mulf %504, %482 : vector<16x16xf32>
    %506 = arith.addf %472, %505 : vector<16x16xf32>
    %c228 = arith.constant 228 : index
    %507 = memref.load %arg3[%c228] : memref<288xf32, #tpu.memory_space<smem>>
    %508 = vector.broadcast %507 : f32 to vector<16x16xf32>
    %509 = arith.mulf %508, %482 : vector<16x16xf32>
    %510 = arith.addf %476, %509 : vector<16x16xf32>
    %c264 = arith.constant 264 : index
    %511 = memref.load %arg3[%c264] : memref<288xf32, #tpu.memory_space<smem>>
    %512 = vector.broadcast %511 : f32 to vector<16x16xf32>
    %513 = arith.mulf %512, %482 : vector<16x16xf32>
    %514 = arith.addf %480, %513 : vector<16x16xf32>
    %515 = vector.extract_strided_slice %446 {offsets = [2, 0, 0], sizes = [1, 16, 16], strides = [1, 1, 1]} : vector<4x16x16xf32> to vector<1x16x16xf32>
    %516 = vector.shape_cast %515 : vector<1x16x16xf32> to vector<16x16xf32>
    %c21 = arith.constant 21 : index
    %517 = memref.load %arg3[%c21] : memref<288xf32, #tpu.memory_space<smem>>
    %518 = vector.broadcast %517 : f32 to vector<16x16xf32>
    %519 = arith.mulf %518, %516 : vector<16x16xf32>
    %520 = arith.addf %486, %519 : vector<16x16xf32>
    %c57 = arith.constant 57 : index
    %521 = memref.load %arg3[%c57] : memref<288xf32, #tpu.memory_space<smem>>
    %522 = vector.broadcast %521 : f32 to vector<16x16xf32>
    %523 = arith.mulf %522, %516 : vector<16x16xf32>
    %524 = arith.addf %490, %523 : vector<16x16xf32>
    %c93 = arith.constant 93 : index
    %525 = memref.load %arg3[%c93] : memref<288xf32, #tpu.memory_space<smem>>
    %526 = vector.broadcast %525 : f32 to vector<16x16xf32>
    %527 = arith.mulf %526, %516 : vector<16x16xf32>
    %528 = arith.addf %494, %527 : vector<16x16xf32>
    %c129 = arith.constant 129 : index
    %529 = memref.load %arg3[%c129] : memref<288xf32, #tpu.memory_space<smem>>
    %530 = vector.broadcast %529 : f32 to vector<16x16xf32>
    %531 = arith.mulf %530, %516 : vector<16x16xf32>
    %532 = arith.addf %498, %531 : vector<16x16xf32>
    %c165 = arith.constant 165 : index
    %533 = memref.load %arg3[%c165] : memref<288xf32, #tpu.memory_space<smem>>
    %534 = vector.broadcast %533 : f32 to vector<16x16xf32>
    %535 = arith.mulf %534, %516 : vector<16x16xf32>
    %536 = arith.addf %502, %535 : vector<16x16xf32>
    %c201 = arith.constant 201 : index
    %537 = memref.load %arg3[%c201] : memref<288xf32, #tpu.memory_space<smem>>
    %538 = vector.broadcast %537 : f32 to vector<16x16xf32>
    %539 = arith.mulf %538, %516 : vector<16x16xf32>
    %540 = arith.addf %506, %539 : vector<16x16xf32>
    %c237 = arith.constant 237 : index
    %541 = memref.load %arg3[%c237] : memref<288xf32, #tpu.memory_space<smem>>
    %542 = vector.broadcast %541 : f32 to vector<16x16xf32>
    %543 = arith.mulf %542, %516 : vector<16x16xf32>
    %544 = arith.addf %510, %543 : vector<16x16xf32>
    %c273 = arith.constant 273 : index
    %545 = memref.load %arg3[%c273] : memref<288xf32, #tpu.memory_space<smem>>
    %546 = vector.broadcast %545 : f32 to vector<16x16xf32>
    %547 = arith.mulf %546, %516 : vector<16x16xf32>
    %548 = arith.addf %514, %547 : vector<16x16xf32>
    %549 = vector.extract_strided_slice %446 {offsets = [3, 0, 0], sizes = [1, 16, 16], strides = [1, 1, 1]} : vector<4x16x16xf32> to vector<1x16x16xf32>
    %550 = vector.shape_cast %549 : vector<1x16x16xf32> to vector<16x16xf32>
    %c30 = arith.constant 30 : index
    %551 = memref.load %arg3[%c30] : memref<288xf32, #tpu.memory_space<smem>>
    %552 = vector.broadcast %551 : f32 to vector<16x16xf32>
    %553 = arith.mulf %552, %550 : vector<16x16xf32>
    %554 = arith.addf %520, %553 : vector<16x16xf32>
    %c66 = arith.constant 66 : index
    %555 = memref.load %arg3[%c66] : memref<288xf32, #tpu.memory_space<smem>>
    %556 = vector.broadcast %555 : f32 to vector<16x16xf32>
    %557 = arith.mulf %556, %550 : vector<16x16xf32>
    %558 = arith.addf %524, %557 : vector<16x16xf32>
    %c102 = arith.constant 102 : index
    %559 = memref.load %arg3[%c102] : memref<288xf32, #tpu.memory_space<smem>>
    %560 = vector.broadcast %559 : f32 to vector<16x16xf32>
    %561 = arith.mulf %560, %550 : vector<16x16xf32>
    %562 = arith.addf %528, %561 : vector<16x16xf32>
    %c138 = arith.constant 138 : index
    %563 = memref.load %arg3[%c138] : memref<288xf32, #tpu.memory_space<smem>>
    %564 = vector.broadcast %563 : f32 to vector<16x16xf32>
    %565 = arith.mulf %564, %550 : vector<16x16xf32>
    %566 = arith.addf %532, %565 : vector<16x16xf32>
    %c174 = arith.constant 174 : index
    %567 = memref.load %arg3[%c174] : memref<288xf32, #tpu.memory_space<smem>>
    %568 = vector.broadcast %567 : f32 to vector<16x16xf32>
    %569 = arith.mulf %568, %550 : vector<16x16xf32>
    %570 = arith.addf %536, %569 : vector<16x16xf32>
    %c210 = arith.constant 210 : index
    %571 = memref.load %arg3[%c210] : memref<288xf32, #tpu.memory_space<smem>>
    %572 = vector.broadcast %571 : f32 to vector<16x16xf32>
    %573 = arith.mulf %572, %550 : vector<16x16xf32>
    %574 = arith.addf %540, %573 : vector<16x16xf32>
    %c246 = arith.constant 246 : index
    %575 = memref.load %arg3[%c246] : memref<288xf32, #tpu.memory_space<smem>>
    %576 = vector.broadcast %575 : f32 to vector<16x16xf32>
    %577 = arith.mulf %576, %550 : vector<16x16xf32>
    %578 = arith.addf %544, %577 : vector<16x16xf32>
    %c282 = arith.constant 282 : index
    %579 = memref.load %arg3[%c282] : memref<288xf32, #tpu.memory_space<smem>>
    %580 = vector.broadcast %579 : f32 to vector<16x16xf32>
    %581 = arith.mulf %580, %550 : vector<16x16xf32>
    %582 = arith.addf %548, %581 : vector<16x16xf32>
    %c1_49 = arith.constant 1 : index
    %c1_50 = arith.constant 1 : index
    %583 = vector.load %arg8[%c1_49, %c1_50] : memref<18x18xf32, #tpu.memory_space<vmem>>, vector<16x16xf32>
    %584 = arith.addf %444, %583 : vector<16x16xf32>
    %585 = arith.maximumf %445, %583 : vector<16x16xf32>
    %c0_51 = arith.constant 0 : index
    %c1_52 = arith.constant 1 : index
    %c1_53 = arith.constant 1 : index
    %586 = vector.load %arg7[%c0_51, %c1_52, %c1_53] : memref<4x18x18xf32, #tpu.memory_space<vmem>>, vector<4x16x16xf32>
    %587 = vector.extract_strided_slice %586 {offsets = [0, 0, 0], sizes = [1, 16, 16], strides = [1, 1, 1]} : vector<4x16x16xf32> to vector<1x16x16xf32>
    %588 = vector.shape_cast %587 : vector<1x16x16xf32> to vector<16x16xf32>
    %c4 = arith.constant 4 : index
    %589 = memref.load %arg3[%c4] : memref<288xf32, #tpu.memory_space<smem>>
    %590 = vector.broadcast %589 : f32 to vector<16x16xf32>
    %591 = arith.mulf %590, %588 : vector<16x16xf32>
    %592 = arith.addf %554, %591 : vector<16x16xf32>
    %c40 = arith.constant 40 : index
    %593 = memref.load %arg3[%c40] : memref<288xf32, #tpu.memory_space<smem>>
    %594 = vector.broadcast %593 : f32 to vector<16x16xf32>
    %595 = arith.mulf %594, %588 : vector<16x16xf32>
    %596 = arith.addf %558, %595 : vector<16x16xf32>
    %c76 = arith.constant 76 : index
    %597 = memref.load %arg3[%c76] : memref<288xf32, #tpu.memory_space<smem>>
    %598 = vector.broadcast %597 : f32 to vector<16x16xf32>
    %599 = arith.mulf %598, %588 : vector<16x16xf32>
    %600 = arith.addf %562, %599 : vector<16x16xf32>
    %c112 = arith.constant 112 : index
    %601 = memref.load %arg3[%c112] : memref<288xf32, #tpu.memory_space<smem>>
    %602 = vector.broadcast %601 : f32 to vector<16x16xf32>
    %603 = arith.mulf %602, %588 : vector<16x16xf32>
    %604 = arith.addf %566, %603 : vector<16x16xf32>
    %c148 = arith.constant 148 : index
    %605 = memref.load %arg3[%c148] : memref<288xf32, #tpu.memory_space<smem>>
    %606 = vector.broadcast %605 : f32 to vector<16x16xf32>
    %607 = arith.mulf %606, %588 : vector<16x16xf32>
    %608 = arith.addf %570, %607 : vector<16x16xf32>
    %c184 = arith.constant 184 : index
    %609 = memref.load %arg3[%c184] : memref<288xf32, #tpu.memory_space<smem>>
    %610 = vector.broadcast %609 : f32 to vector<16x16xf32>
    %611 = arith.mulf %610, %588 : vector<16x16xf32>
    %612 = arith.addf %574, %611 : vector<16x16xf32>
    %c220 = arith.constant 220 : index
    %613 = memref.load %arg3[%c220] : memref<288xf32, #tpu.memory_space<smem>>
    %614 = vector.broadcast %613 : f32 to vector<16x16xf32>
    %615 = arith.mulf %614, %588 : vector<16x16xf32>
    %616 = arith.addf %578, %615 : vector<16x16xf32>
    %c256 = arith.constant 256 : index
    %617 = memref.load %arg3[%c256] : memref<288xf32, #tpu.memory_space<smem>>
    %618 = vector.broadcast %617 : f32 to vector<16x16xf32>
    %619 = arith.mulf %618, %588 : vector<16x16xf32>
    %620 = arith.addf %582, %619 : vector<16x16xf32>
    %621 = vector.extract_strided_slice %586 {offsets = [1, 0, 0], sizes = [1, 16, 16], strides = [1, 1, 1]} : vector<4x16x16xf32> to vector<1x16x16xf32>
    %622 = vector.shape_cast %621 : vector<1x16x16xf32> to vector<16x16xf32>
    %c13 = arith.constant 13 : index
    %623 = memref.load %arg3[%c13] : memref<288xf32, #tpu.memory_space<smem>>
    %624 = vector.broadcast %623 : f32 to vector<16x16xf32>
    %625 = arith.mulf %624, %622 : vector<16x16xf32>
    %626 = arith.addf %592, %625 : vector<16x16xf32>
    %c49 = arith.constant 49 : index
    %627 = memref.load %arg3[%c49] : memref<288xf32, #tpu.memory_space<smem>>
    %628 = vector.broadcast %627 : f32 to vector<16x16xf32>
    %629 = arith.mulf %628, %622 : vector<16x16xf32>
    %630 = arith.addf %596, %629 : vector<16x16xf32>
    %c85 = arith.constant 85 : index
    %631 = memref.load %arg3[%c85] : memref<288xf32, #tpu.memory_space<smem>>
    %632 = vector.broadcast %631 : f32 to vector<16x16xf32>
    %633 = arith.mulf %632, %622 : vector<16x16xf32>
    %634 = arith.addf %600, %633 : vector<16x16xf32>
    %c121 = arith.constant 121 : index
    %635 = memref.load %arg3[%c121] : memref<288xf32, #tpu.memory_space<smem>>
    %636 = vector.broadcast %635 : f32 to vector<16x16xf32>
    %637 = arith.mulf %636, %622 : vector<16x16xf32>
    %638 = arith.addf %604, %637 : vector<16x16xf32>
    %c157 = arith.constant 157 : index
    %639 = memref.load %arg3[%c157] : memref<288xf32, #tpu.memory_space<smem>>
    %640 = vector.broadcast %639 : f32 to vector<16x16xf32>
    %641 = arith.mulf %640, %622 : vector<16x16xf32>
    %642 = arith.addf %608, %641 : vector<16x16xf32>
    %c193 = arith.constant 193 : index
    %643 = memref.load %arg3[%c193] : memref<288xf32, #tpu.memory_space<smem>>
    %644 = vector.broadcast %643 : f32 to vector<16x16xf32>
    %645 = arith.mulf %644, %622 : vector<16x16xf32>
    %646 = arith.addf %612, %645 : vector<16x16xf32>
    %c229 = arith.constant 229 : index
    %647 = memref.load %arg3[%c229] : memref<288xf32, #tpu.memory_space<smem>>
    %648 = vector.broadcast %647 : f32 to vector<16x16xf32>
    %649 = arith.mulf %648, %622 : vector<16x16xf32>
    %650 = arith.addf %616, %649 : vector<16x16xf32>
    %c265 = arith.constant 265 : index
    %651 = memref.load %arg3[%c265] : memref<288xf32, #tpu.memory_space<smem>>
    %652 = vector.broadcast %651 : f32 to vector<16x16xf32>
    %653 = arith.mulf %652, %622 : vector<16x16xf32>
    %654 = arith.addf %620, %653 : vector<16x16xf32>
    %655 = vector.extract_strided_slice %586 {offsets = [2, 0, 0], sizes = [1, 16, 16], strides = [1, 1, 1]} : vector<4x16x16xf32> to vector<1x16x16xf32>
    %656 = vector.shape_cast %655 : vector<1x16x16xf32> to vector<16x16xf32>
    %c22 = arith.constant 22 : index
    %657 = memref.load %arg3[%c22] : memref<288xf32, #tpu.memory_space<smem>>
    %658 = vector.broadcast %657 : f32 to vector<16x16xf32>
    %659 = arith.mulf %658, %656 : vector<16x16xf32>
    %660 = arith.addf %626, %659 : vector<16x16xf32>
    %c58 = arith.constant 58 : index
    %661 = memref.load %arg3[%c58] : memref<288xf32, #tpu.memory_space<smem>>
    %662 = vector.broadcast %661 : f32 to vector<16x16xf32>
    %663 = arith.mulf %662, %656 : vector<16x16xf32>
    %664 = arith.addf %630, %663 : vector<16x16xf32>
    %c94 = arith.constant 94 : index
    %665 = memref.load %arg3[%c94] : memref<288xf32, #tpu.memory_space<smem>>
    %666 = vector.broadcast %665 : f32 to vector<16x16xf32>
    %667 = arith.mulf %666, %656 : vector<16x16xf32>
    %668 = arith.addf %634, %667 : vector<16x16xf32>
    %c130 = arith.constant 130 : index
    %669 = memref.load %arg3[%c130] : memref<288xf32, #tpu.memory_space<smem>>
    %670 = vector.broadcast %669 : f32 to vector<16x16xf32>
    %671 = arith.mulf %670, %656 : vector<16x16xf32>
    %672 = arith.addf %638, %671 : vector<16x16xf32>
    %c166 = arith.constant 166 : index
    %673 = memref.load %arg3[%c166] : memref<288xf32, #tpu.memory_space<smem>>
    %674 = vector.broadcast %673 : f32 to vector<16x16xf32>
    %675 = arith.mulf %674, %656 : vector<16x16xf32>
    %676 = arith.addf %642, %675 : vector<16x16xf32>
    %c202 = arith.constant 202 : index
    %677 = memref.load %arg3[%c202] : memref<288xf32, #tpu.memory_space<smem>>
    %678 = vector.broadcast %677 : f32 to vector<16x16xf32>
    %679 = arith.mulf %678, %656 : vector<16x16xf32>
    %680 = arith.addf %646, %679 : vector<16x16xf32>
    %c238 = arith.constant 238 : index
    %681 = memref.load %arg3[%c238] : memref<288xf32, #tpu.memory_space<smem>>
    %682 = vector.broadcast %681 : f32 to vector<16x16xf32>
    %683 = arith.mulf %682, %656 : vector<16x16xf32>
    %684 = arith.addf %650, %683 : vector<16x16xf32>
    %c274 = arith.constant 274 : index
    %685 = memref.load %arg3[%c274] : memref<288xf32, #tpu.memory_space<smem>>
    %686 = vector.broadcast %685 : f32 to vector<16x16xf32>
    %687 = arith.mulf %686, %656 : vector<16x16xf32>
    %688 = arith.addf %654, %687 : vector<16x16xf32>
    %689 = vector.extract_strided_slice %586 {offsets = [3, 0, 0], sizes = [1, 16, 16], strides = [1, 1, 1]} : vector<4x16x16xf32> to vector<1x16x16xf32>
    %690 = vector.shape_cast %689 : vector<1x16x16xf32> to vector<16x16xf32>
    %c31 = arith.constant 31 : index
    %691 = memref.load %arg3[%c31] : memref<288xf32, #tpu.memory_space<smem>>
    %692 = vector.broadcast %691 : f32 to vector<16x16xf32>
    %693 = arith.mulf %692, %690 : vector<16x16xf32>
    %694 = arith.addf %660, %693 : vector<16x16xf32>
    %c67 = arith.constant 67 : index
    %695 = memref.load %arg3[%c67] : memref<288xf32, #tpu.memory_space<smem>>
    %696 = vector.broadcast %695 : f32 to vector<16x16xf32>
    %697 = arith.mulf %696, %690 : vector<16x16xf32>
    %698 = arith.addf %664, %697 : vector<16x16xf32>
    %c103 = arith.constant 103 : index
    %699 = memref.load %arg3[%c103] : memref<288xf32, #tpu.memory_space<smem>>
    %700 = vector.broadcast %699 : f32 to vector<16x16xf32>
    %701 = arith.mulf %700, %690 : vector<16x16xf32>
    %702 = arith.addf %668, %701 : vector<16x16xf32>
    %c139 = arith.constant 139 : index
    %703 = memref.load %arg3[%c139] : memref<288xf32, #tpu.memory_space<smem>>
    %704 = vector.broadcast %703 : f32 to vector<16x16xf32>
    %705 = arith.mulf %704, %690 : vector<16x16xf32>
    %706 = arith.addf %672, %705 : vector<16x16xf32>
    %c175 = arith.constant 175 : index
    %707 = memref.load %arg3[%c175] : memref<288xf32, #tpu.memory_space<smem>>
    %708 = vector.broadcast %707 : f32 to vector<16x16xf32>
    %709 = arith.mulf %708, %690 : vector<16x16xf32>
    %710 = arith.addf %676, %709 : vector<16x16xf32>
    %c211 = arith.constant 211 : index
    %711 = memref.load %arg3[%c211] : memref<288xf32, #tpu.memory_space<smem>>
    %712 = vector.broadcast %711 : f32 to vector<16x16xf32>
    %713 = arith.mulf %712, %690 : vector<16x16xf32>
    %714 = arith.addf %680, %713 : vector<16x16xf32>
    %c247 = arith.constant 247 : index
    %715 = memref.load %arg3[%c247] : memref<288xf32, #tpu.memory_space<smem>>
    %716 = vector.broadcast %715 : f32 to vector<16x16xf32>
    %717 = arith.mulf %716, %690 : vector<16x16xf32>
    %718 = arith.addf %684, %717 : vector<16x16xf32>
    %c283 = arith.constant 283 : index
    %719 = memref.load %arg3[%c283] : memref<288xf32, #tpu.memory_space<smem>>
    %720 = vector.broadcast %719 : f32 to vector<16x16xf32>
    %721 = arith.mulf %720, %690 : vector<16x16xf32>
    %722 = arith.addf %688, %721 : vector<16x16xf32>
    %c1_54 = arith.constant 1 : index
    %c2_55 = arith.constant 2 : index
    %723 = vector.load %arg8[%c1_54, %c2_55] : memref<18x18xf32, #tpu.memory_space<vmem>>, vector<16x16xf32>
    %724 = arith.addf %584, %723 : vector<16x16xf32>
    %725 = arith.maximumf %585, %723 : vector<16x16xf32>
    %c0_56 = arith.constant 0 : index
    %c1_57 = arith.constant 1 : index
    %c2_58 = arith.constant 2 : index
    %726 = vector.load %arg7[%c0_56, %c1_57, %c2_58] : memref<4x18x18xf32, #tpu.memory_space<vmem>>, vector<4x16x16xf32>
    %727 = vector.extract_strided_slice %726 {offsets = [0, 0, 0], sizes = [1, 16, 16], strides = [1, 1, 1]} : vector<4x16x16xf32> to vector<1x16x16xf32>
    %728 = vector.shape_cast %727 : vector<1x16x16xf32> to vector<16x16xf32>
    %c5 = arith.constant 5 : index
    %729 = memref.load %arg3[%c5] : memref<288xf32, #tpu.memory_space<smem>>
    %730 = vector.broadcast %729 : f32 to vector<16x16xf32>
    %731 = arith.mulf %730, %728 : vector<16x16xf32>
    %732 = arith.addf %694, %731 : vector<16x16xf32>
    %c41 = arith.constant 41 : index
    %733 = memref.load %arg3[%c41] : memref<288xf32, #tpu.memory_space<smem>>
    %734 = vector.broadcast %733 : f32 to vector<16x16xf32>
    %735 = arith.mulf %734, %728 : vector<16x16xf32>
    %736 = arith.addf %698, %735 : vector<16x16xf32>
    %c77 = arith.constant 77 : index
    %737 = memref.load %arg3[%c77] : memref<288xf32, #tpu.memory_space<smem>>
    %738 = vector.broadcast %737 : f32 to vector<16x16xf32>
    %739 = arith.mulf %738, %728 : vector<16x16xf32>
    %740 = arith.addf %702, %739 : vector<16x16xf32>
    %c113 = arith.constant 113 : index
    %741 = memref.load %arg3[%c113] : memref<288xf32, #tpu.memory_space<smem>>
    %742 = vector.broadcast %741 : f32 to vector<16x16xf32>
    %743 = arith.mulf %742, %728 : vector<16x16xf32>
    %744 = arith.addf %706, %743 : vector<16x16xf32>
    %c149 = arith.constant 149 : index
    %745 = memref.load %arg3[%c149] : memref<288xf32, #tpu.memory_space<smem>>
    %746 = vector.broadcast %745 : f32 to vector<16x16xf32>
    %747 = arith.mulf %746, %728 : vector<16x16xf32>
    %748 = arith.addf %710, %747 : vector<16x16xf32>
    %c185 = arith.constant 185 : index
    %749 = memref.load %arg3[%c185] : memref<288xf32, #tpu.memory_space<smem>>
    %750 = vector.broadcast %749 : f32 to vector<16x16xf32>
    %751 = arith.mulf %750, %728 : vector<16x16xf32>
    %752 = arith.addf %714, %751 : vector<16x16xf32>
    %c221 = arith.constant 221 : index
    %753 = memref.load %arg3[%c221] : memref<288xf32, #tpu.memory_space<smem>>
    %754 = vector.broadcast %753 : f32 to vector<16x16xf32>
    %755 = arith.mulf %754, %728 : vector<16x16xf32>
    %756 = arith.addf %718, %755 : vector<16x16xf32>
    %c257 = arith.constant 257 : index
    %757 = memref.load %arg3[%c257] : memref<288xf32, #tpu.memory_space<smem>>
    %758 = vector.broadcast %757 : f32 to vector<16x16xf32>
    %759 = arith.mulf %758, %728 : vector<16x16xf32>
    %760 = arith.addf %722, %759 : vector<16x16xf32>
    %761 = vector.extract_strided_slice %726 {offsets = [1, 0, 0], sizes = [1, 16, 16], strides = [1, 1, 1]} : vector<4x16x16xf32> to vector<1x16x16xf32>
    %762 = vector.shape_cast %761 : vector<1x16x16xf32> to vector<16x16xf32>
    %c14 = arith.constant 14 : index
    %763 = memref.load %arg3[%c14] : memref<288xf32, #tpu.memory_space<smem>>
    %764 = vector.broadcast %763 : f32 to vector<16x16xf32>
    %765 = arith.mulf %764, %762 : vector<16x16xf32>
    %766 = arith.addf %732, %765 : vector<16x16xf32>
    %c50 = arith.constant 50 : index
    %767 = memref.load %arg3[%c50] : memref<288xf32, #tpu.memory_space<smem>>
    %768 = vector.broadcast %767 : f32 to vector<16x16xf32>
    %769 = arith.mulf %768, %762 : vector<16x16xf32>
    %770 = arith.addf %736, %769 : vector<16x16xf32>
    %c86 = arith.constant 86 : index
    %771 = memref.load %arg3[%c86] : memref<288xf32, #tpu.memory_space<smem>>
    %772 = vector.broadcast %771 : f32 to vector<16x16xf32>
    %773 = arith.mulf %772, %762 : vector<16x16xf32>
    %774 = arith.addf %740, %773 : vector<16x16xf32>
    %c122 = arith.constant 122 : index
    %775 = memref.load %arg3[%c122] : memref<288xf32, #tpu.memory_space<smem>>
    %776 = vector.broadcast %775 : f32 to vector<16x16xf32>
    %777 = arith.mulf %776, %762 : vector<16x16xf32>
    %778 = arith.addf %744, %777 : vector<16x16xf32>
    %c158 = arith.constant 158 : index
    %779 = memref.load %arg3[%c158] : memref<288xf32, #tpu.memory_space<smem>>
    %780 = vector.broadcast %779 : f32 to vector<16x16xf32>
    %781 = arith.mulf %780, %762 : vector<16x16xf32>
    %782 = arith.addf %748, %781 : vector<16x16xf32>
    %c194 = arith.constant 194 : index
    %783 = memref.load %arg3[%c194] : memref<288xf32, #tpu.memory_space<smem>>
    %784 = vector.broadcast %783 : f32 to vector<16x16xf32>
    %785 = arith.mulf %784, %762 : vector<16x16xf32>
    %786 = arith.addf %752, %785 : vector<16x16xf32>
    %c230 = arith.constant 230 : index
    %787 = memref.load %arg3[%c230] : memref<288xf32, #tpu.memory_space<smem>>
    %788 = vector.broadcast %787 : f32 to vector<16x16xf32>
    %789 = arith.mulf %788, %762 : vector<16x16xf32>
    %790 = arith.addf %756, %789 : vector<16x16xf32>
    %c266 = arith.constant 266 : index
    %791 = memref.load %arg3[%c266] : memref<288xf32, #tpu.memory_space<smem>>
    %792 = vector.broadcast %791 : f32 to vector<16x16xf32>
    %793 = arith.mulf %792, %762 : vector<16x16xf32>
    %794 = arith.addf %760, %793 : vector<16x16xf32>
    %795 = vector.extract_strided_slice %726 {offsets = [2, 0, 0], sizes = [1, 16, 16], strides = [1, 1, 1]} : vector<4x16x16xf32> to vector<1x16x16xf32>
    %796 = vector.shape_cast %795 : vector<1x16x16xf32> to vector<16x16xf32>
    %c23 = arith.constant 23 : index
    %797 = memref.load %arg3[%c23] : memref<288xf32, #tpu.memory_space<smem>>
    %798 = vector.broadcast %797 : f32 to vector<16x16xf32>
    %799 = arith.mulf %798, %796 : vector<16x16xf32>
    %800 = arith.addf %766, %799 : vector<16x16xf32>
    %c59 = arith.constant 59 : index
    %801 = memref.load %arg3[%c59] : memref<288xf32, #tpu.memory_space<smem>>
    %802 = vector.broadcast %801 : f32 to vector<16x16xf32>
    %803 = arith.mulf %802, %796 : vector<16x16xf32>
    %804 = arith.addf %770, %803 : vector<16x16xf32>
    %c95 = arith.constant 95 : index
    %805 = memref.load %arg3[%c95] : memref<288xf32, #tpu.memory_space<smem>>
    %806 = vector.broadcast %805 : f32 to vector<16x16xf32>
    %807 = arith.mulf %806, %796 : vector<16x16xf32>
    %808 = arith.addf %774, %807 : vector<16x16xf32>
    %c131 = arith.constant 131 : index
    %809 = memref.load %arg3[%c131] : memref<288xf32, #tpu.memory_space<smem>>
    %810 = vector.broadcast %809 : f32 to vector<16x16xf32>
    %811 = arith.mulf %810, %796 : vector<16x16xf32>
    %812 = arith.addf %778, %811 : vector<16x16xf32>
    %c167 = arith.constant 167 : index
    %813 = memref.load %arg3[%c167] : memref<288xf32, #tpu.memory_space<smem>>
    %814 = vector.broadcast %813 : f32 to vector<16x16xf32>
    %815 = arith.mulf %814, %796 : vector<16x16xf32>
    %816 = arith.addf %782, %815 : vector<16x16xf32>
    %c203 = arith.constant 203 : index
    %817 = memref.load %arg3[%c203] : memref<288xf32, #tpu.memory_space<smem>>
    %818 = vector.broadcast %817 : f32 to vector<16x16xf32>
    %819 = arith.mulf %818, %796 : vector<16x16xf32>
    %820 = arith.addf %786, %819 : vector<16x16xf32>
    %c239 = arith.constant 239 : index
    %821 = memref.load %arg3[%c239] : memref<288xf32, #tpu.memory_space<smem>>
    %822 = vector.broadcast %821 : f32 to vector<16x16xf32>
    %823 = arith.mulf %822, %796 : vector<16x16xf32>
    %824 = arith.addf %790, %823 : vector<16x16xf32>
    %c275 = arith.constant 275 : index
    %825 = memref.load %arg3[%c275] : memref<288xf32, #tpu.memory_space<smem>>
    %826 = vector.broadcast %825 : f32 to vector<16x16xf32>
    %827 = arith.mulf %826, %796 : vector<16x16xf32>
    %828 = arith.addf %794, %827 : vector<16x16xf32>
    %829 = vector.extract_strided_slice %726 {offsets = [3, 0, 0], sizes = [1, 16, 16], strides = [1, 1, 1]} : vector<4x16x16xf32> to vector<1x16x16xf32>
    %830 = vector.shape_cast %829 : vector<1x16x16xf32> to vector<16x16xf32>
    %c32 = arith.constant 32 : index
    %831 = memref.load %arg3[%c32] : memref<288xf32, #tpu.memory_space<smem>>
    %832 = vector.broadcast %831 : f32 to vector<16x16xf32>
    %833 = arith.mulf %832, %830 : vector<16x16xf32>
    %834 = arith.addf %800, %833 : vector<16x16xf32>
    %c68 = arith.constant 68 : index
    %835 = memref.load %arg3[%c68] : memref<288xf32, #tpu.memory_space<smem>>
    %836 = vector.broadcast %835 : f32 to vector<16x16xf32>
    %837 = arith.mulf %836, %830 : vector<16x16xf32>
    %838 = arith.addf %804, %837 : vector<16x16xf32>
    %c104 = arith.constant 104 : index
    %839 = memref.load %arg3[%c104] : memref<288xf32, #tpu.memory_space<smem>>
    %840 = vector.broadcast %839 : f32 to vector<16x16xf32>
    %841 = arith.mulf %840, %830 : vector<16x16xf32>
    %842 = arith.addf %808, %841 : vector<16x16xf32>
    %c140 = arith.constant 140 : index
    %843 = memref.load %arg3[%c140] : memref<288xf32, #tpu.memory_space<smem>>
    %844 = vector.broadcast %843 : f32 to vector<16x16xf32>
    %845 = arith.mulf %844, %830 : vector<16x16xf32>
    %846 = arith.addf %812, %845 : vector<16x16xf32>
    %c176 = arith.constant 176 : index
    %847 = memref.load %arg3[%c176] : memref<288xf32, #tpu.memory_space<smem>>
    %848 = vector.broadcast %847 : f32 to vector<16x16xf32>
    %849 = arith.mulf %848, %830 : vector<16x16xf32>
    %850 = arith.addf %816, %849 : vector<16x16xf32>
    %c212 = arith.constant 212 : index
    %851 = memref.load %arg3[%c212] : memref<288xf32, #tpu.memory_space<smem>>
    %852 = vector.broadcast %851 : f32 to vector<16x16xf32>
    %853 = arith.mulf %852, %830 : vector<16x16xf32>
    %854 = arith.addf %820, %853 : vector<16x16xf32>
    %c248 = arith.constant 248 : index
    %855 = memref.load %arg3[%c248] : memref<288xf32, #tpu.memory_space<smem>>
    %856 = vector.broadcast %855 : f32 to vector<16x16xf32>
    %857 = arith.mulf %856, %830 : vector<16x16xf32>
    %858 = arith.addf %824, %857 : vector<16x16xf32>
    %c284 = arith.constant 284 : index
    %859 = memref.load %arg3[%c284] : memref<288xf32, #tpu.memory_space<smem>>
    %860 = vector.broadcast %859 : f32 to vector<16x16xf32>
    %861 = arith.mulf %860, %830 : vector<16x16xf32>
    %862 = arith.addf %828, %861 : vector<16x16xf32>
    %c2_59 = arith.constant 2 : index
    %c0_60 = arith.constant 0 : index
    %863 = vector.load %arg8[%c2_59, %c0_60] : memref<18x18xf32, #tpu.memory_space<vmem>>, vector<16x16xf32>
    %864 = arith.addf %724, %863 : vector<16x16xf32>
    %865 = arith.maximumf %725, %863 : vector<16x16xf32>
    %c0_61 = arith.constant 0 : index
    %c2_62 = arith.constant 2 : index
    %c0_63 = arith.constant 0 : index
    %866 = vector.load %arg7[%c0_61, %c2_62, %c0_63] : memref<4x18x18xf32, #tpu.memory_space<vmem>>, vector<4x16x16xf32>
    %867 = vector.extract_strided_slice %866 {offsets = [0, 0, 0], sizes = [1, 16, 16], strides = [1, 1, 1]} : vector<4x16x16xf32> to vector<1x16x16xf32>
    %868 = vector.shape_cast %867 : vector<1x16x16xf32> to vector<16x16xf32>
    %c6 = arith.constant 6 : index
    %869 = memref.load %arg3[%c6] : memref<288xf32, #tpu.memory_space<smem>>
    %870 = vector.broadcast %869 : f32 to vector<16x16xf32>
    %871 = arith.mulf %870, %868 : vector<16x16xf32>
    %872 = arith.addf %834, %871 : vector<16x16xf32>
    %c42 = arith.constant 42 : index
    %873 = memref.load %arg3[%c42] : memref<288xf32, #tpu.memory_space<smem>>
    %874 = vector.broadcast %873 : f32 to vector<16x16xf32>
    %875 = arith.mulf %874, %868 : vector<16x16xf32>
    %876 = arith.addf %838, %875 : vector<16x16xf32>
    %c78 = arith.constant 78 : index
    %877 = memref.load %arg3[%c78] : memref<288xf32, #tpu.memory_space<smem>>
    %878 = vector.broadcast %877 : f32 to vector<16x16xf32>
    %879 = arith.mulf %878, %868 : vector<16x16xf32>
    %880 = arith.addf %842, %879 : vector<16x16xf32>
    %c114 = arith.constant 114 : index
    %881 = memref.load %arg3[%c114] : memref<288xf32, #tpu.memory_space<smem>>
    %882 = vector.broadcast %881 : f32 to vector<16x16xf32>
    %883 = arith.mulf %882, %868 : vector<16x16xf32>
    %884 = arith.addf %846, %883 : vector<16x16xf32>
    %c150 = arith.constant 150 : index
    %885 = memref.load %arg3[%c150] : memref<288xf32, #tpu.memory_space<smem>>
    %886 = vector.broadcast %885 : f32 to vector<16x16xf32>
    %887 = arith.mulf %886, %868 : vector<16x16xf32>
    %888 = arith.addf %850, %887 : vector<16x16xf32>
    %c186 = arith.constant 186 : index
    %889 = memref.load %arg3[%c186] : memref<288xf32, #tpu.memory_space<smem>>
    %890 = vector.broadcast %889 : f32 to vector<16x16xf32>
    %891 = arith.mulf %890, %868 : vector<16x16xf32>
    %892 = arith.addf %854, %891 : vector<16x16xf32>
    %c222 = arith.constant 222 : index
    %893 = memref.load %arg3[%c222] : memref<288xf32, #tpu.memory_space<smem>>
    %894 = vector.broadcast %893 : f32 to vector<16x16xf32>
    %895 = arith.mulf %894, %868 : vector<16x16xf32>
    %896 = arith.addf %858, %895 : vector<16x16xf32>
    %c258 = arith.constant 258 : index
    %897 = memref.load %arg3[%c258] : memref<288xf32, #tpu.memory_space<smem>>
    %898 = vector.broadcast %897 : f32 to vector<16x16xf32>
    %899 = arith.mulf %898, %868 : vector<16x16xf32>
    %900 = arith.addf %862, %899 : vector<16x16xf32>
    %901 = vector.extract_strided_slice %866 {offsets = [1, 0, 0], sizes = [1, 16, 16], strides = [1, 1, 1]} : vector<4x16x16xf32> to vector<1x16x16xf32>
    %902 = vector.shape_cast %901 : vector<1x16x16xf32> to vector<16x16xf32>
    %c15 = arith.constant 15 : index
    %903 = memref.load %arg3[%c15] : memref<288xf32, #tpu.memory_space<smem>>
    %904 = vector.broadcast %903 : f32 to vector<16x16xf32>
    %905 = arith.mulf %904, %902 : vector<16x16xf32>
    %906 = arith.addf %872, %905 : vector<16x16xf32>
    %c51 = arith.constant 51 : index
    %907 = memref.load %arg3[%c51] : memref<288xf32, #tpu.memory_space<smem>>
    %908 = vector.broadcast %907 : f32 to vector<16x16xf32>
    %909 = arith.mulf %908, %902 : vector<16x16xf32>
    %910 = arith.addf %876, %909 : vector<16x16xf32>
    %c87 = arith.constant 87 : index
    %911 = memref.load %arg3[%c87] : memref<288xf32, #tpu.memory_space<smem>>
    %912 = vector.broadcast %911 : f32 to vector<16x16xf32>
    %913 = arith.mulf %912, %902 : vector<16x16xf32>
    %914 = arith.addf %880, %913 : vector<16x16xf32>
    %c123 = arith.constant 123 : index
    %915 = memref.load %arg3[%c123] : memref<288xf32, #tpu.memory_space<smem>>
    %916 = vector.broadcast %915 : f32 to vector<16x16xf32>
    %917 = arith.mulf %916, %902 : vector<16x16xf32>
    %918 = arith.addf %884, %917 : vector<16x16xf32>
    %c159 = arith.constant 159 : index
    %919 = memref.load %arg3[%c159] : memref<288xf32, #tpu.memory_space<smem>>
    %920 = vector.broadcast %919 : f32 to vector<16x16xf32>
    %921 = arith.mulf %920, %902 : vector<16x16xf32>
    %922 = arith.addf %888, %921 : vector<16x16xf32>
    %c195 = arith.constant 195 : index
    %923 = memref.load %arg3[%c195] : memref<288xf32, #tpu.memory_space<smem>>
    %924 = vector.broadcast %923 : f32 to vector<16x16xf32>
    %925 = arith.mulf %924, %902 : vector<16x16xf32>
    %926 = arith.addf %892, %925 : vector<16x16xf32>
    %c231 = arith.constant 231 : index
    %927 = memref.load %arg3[%c231] : memref<288xf32, #tpu.memory_space<smem>>
    %928 = vector.broadcast %927 : f32 to vector<16x16xf32>
    %929 = arith.mulf %928, %902 : vector<16x16xf32>
    %930 = arith.addf %896, %929 : vector<16x16xf32>
    %c267 = arith.constant 267 : index
    %931 = memref.load %arg3[%c267] : memref<288xf32, #tpu.memory_space<smem>>
    %932 = vector.broadcast %931 : f32 to vector<16x16xf32>
    %933 = arith.mulf %932, %902 : vector<16x16xf32>
    %934 = arith.addf %900, %933 : vector<16x16xf32>
    %935 = vector.extract_strided_slice %866 {offsets = [2, 0, 0], sizes = [1, 16, 16], strides = [1, 1, 1]} : vector<4x16x16xf32> to vector<1x16x16xf32>
    %936 = vector.shape_cast %935 : vector<1x16x16xf32> to vector<16x16xf32>
    %c24 = arith.constant 24 : index
    %937 = memref.load %arg3[%c24] : memref<288xf32, #tpu.memory_space<smem>>
    %938 = vector.broadcast %937 : f32 to vector<16x16xf32>
    %939 = arith.mulf %938, %936 : vector<16x16xf32>
    %940 = arith.addf %906, %939 : vector<16x16xf32>
    %c60 = arith.constant 60 : index
    %941 = memref.load %arg3[%c60] : memref<288xf32, #tpu.memory_space<smem>>
    %942 = vector.broadcast %941 : f32 to vector<16x16xf32>
    %943 = arith.mulf %942, %936 : vector<16x16xf32>
    %944 = arith.addf %910, %943 : vector<16x16xf32>
    %c96 = arith.constant 96 : index
    %945 = memref.load %arg3[%c96] : memref<288xf32, #tpu.memory_space<smem>>
    %946 = vector.broadcast %945 : f32 to vector<16x16xf32>
    %947 = arith.mulf %946, %936 : vector<16x16xf32>
    %948 = arith.addf %914, %947 : vector<16x16xf32>
    %c132 = arith.constant 132 : index
    %949 = memref.load %arg3[%c132] : memref<288xf32, #tpu.memory_space<smem>>
    %950 = vector.broadcast %949 : f32 to vector<16x16xf32>
    %951 = arith.mulf %950, %936 : vector<16x16xf32>
    %952 = arith.addf %918, %951 : vector<16x16xf32>
    %c168 = arith.constant 168 : index
    %953 = memref.load %arg3[%c168] : memref<288xf32, #tpu.memory_space<smem>>
    %954 = vector.broadcast %953 : f32 to vector<16x16xf32>
    %955 = arith.mulf %954, %936 : vector<16x16xf32>
    %956 = arith.addf %922, %955 : vector<16x16xf32>
    %c204 = arith.constant 204 : index
    %957 = memref.load %arg3[%c204] : memref<288xf32, #tpu.memory_space<smem>>
    %958 = vector.broadcast %957 : f32 to vector<16x16xf32>
    %959 = arith.mulf %958, %936 : vector<16x16xf32>
    %960 = arith.addf %926, %959 : vector<16x16xf32>
    %c240 = arith.constant 240 : index
    %961 = memref.load %arg3[%c240] : memref<288xf32, #tpu.memory_space<smem>>
    %962 = vector.broadcast %961 : f32 to vector<16x16xf32>
    %963 = arith.mulf %962, %936 : vector<16x16xf32>
    %964 = arith.addf %930, %963 : vector<16x16xf32>
    %c276 = arith.constant 276 : index
    %965 = memref.load %arg3[%c276] : memref<288xf32, #tpu.memory_space<smem>>
    %966 = vector.broadcast %965 : f32 to vector<16x16xf32>
    %967 = arith.mulf %966, %936 : vector<16x16xf32>
    %968 = arith.addf %934, %967 : vector<16x16xf32>
    %969 = vector.extract_strided_slice %866 {offsets = [3, 0, 0], sizes = [1, 16, 16], strides = [1, 1, 1]} : vector<4x16x16xf32> to vector<1x16x16xf32>
    %970 = vector.shape_cast %969 : vector<1x16x16xf32> to vector<16x16xf32>
    %c33 = arith.constant 33 : index
    %971 = memref.load %arg3[%c33] : memref<288xf32, #tpu.memory_space<smem>>
    %972 = vector.broadcast %971 : f32 to vector<16x16xf32>
    %973 = arith.mulf %972, %970 : vector<16x16xf32>
    %974 = arith.addf %940, %973 : vector<16x16xf32>
    %c69 = arith.constant 69 : index
    %975 = memref.load %arg3[%c69] : memref<288xf32, #tpu.memory_space<smem>>
    %976 = vector.broadcast %975 : f32 to vector<16x16xf32>
    %977 = arith.mulf %976, %970 : vector<16x16xf32>
    %978 = arith.addf %944, %977 : vector<16x16xf32>
    %c105 = arith.constant 105 : index
    %979 = memref.load %arg3[%c105] : memref<288xf32, #tpu.memory_space<smem>>
    %980 = vector.broadcast %979 : f32 to vector<16x16xf32>
    %981 = arith.mulf %980, %970 : vector<16x16xf32>
    %982 = arith.addf %948, %981 : vector<16x16xf32>
    %c141 = arith.constant 141 : index
    %983 = memref.load %arg3[%c141] : memref<288xf32, #tpu.memory_space<smem>>
    %984 = vector.broadcast %983 : f32 to vector<16x16xf32>
    %985 = arith.mulf %984, %970 : vector<16x16xf32>
    %986 = arith.addf %952, %985 : vector<16x16xf32>
    %c177 = arith.constant 177 : index
    %987 = memref.load %arg3[%c177] : memref<288xf32, #tpu.memory_space<smem>>
    %988 = vector.broadcast %987 : f32 to vector<16x16xf32>
    %989 = arith.mulf %988, %970 : vector<16x16xf32>
    %990 = arith.addf %956, %989 : vector<16x16xf32>
    %c213 = arith.constant 213 : index
    %991 = memref.load %arg3[%c213] : memref<288xf32, #tpu.memory_space<smem>>
    %992 = vector.broadcast %991 : f32 to vector<16x16xf32>
    %993 = arith.mulf %992, %970 : vector<16x16xf32>
    %994 = arith.addf %960, %993 : vector<16x16xf32>
    %c249 = arith.constant 249 : index
    %995 = memref.load %arg3[%c249] : memref<288xf32, #tpu.memory_space<smem>>
    %996 = vector.broadcast %995 : f32 to vector<16x16xf32>
    %997 = arith.mulf %996, %970 : vector<16x16xf32>
    %998 = arith.addf %964, %997 : vector<16x16xf32>
    %c285 = arith.constant 285 : index
    %999 = memref.load %arg3[%c285] : memref<288xf32, #tpu.memory_space<smem>>
    %1000 = vector.broadcast %999 : f32 to vector<16x16xf32>
    %1001 = arith.mulf %1000, %970 : vector<16x16xf32>
    %1002 = arith.addf %968, %1001 : vector<16x16xf32>
    %c2_64 = arith.constant 2 : index
    %c1_65 = arith.constant 1 : index
    %1003 = vector.load %arg8[%c2_64, %c1_65] : memref<18x18xf32, #tpu.memory_space<vmem>>, vector<16x16xf32>
    %1004 = arith.addf %864, %1003 : vector<16x16xf32>
    %1005 = arith.maximumf %865, %1003 : vector<16x16xf32>
    %c0_66 = arith.constant 0 : index
    %c2_67 = arith.constant 2 : index
    %c1_68 = arith.constant 1 : index
    %1006 = vector.load %arg7[%c0_66, %c2_67, %c1_68] : memref<4x18x18xf32, #tpu.memory_space<vmem>>, vector<4x16x16xf32>
    %1007 = vector.extract_strided_slice %1006 {offsets = [0, 0, 0], sizes = [1, 16, 16], strides = [1, 1, 1]} : vector<4x16x16xf32> to vector<1x16x16xf32>
    %1008 = vector.shape_cast %1007 : vector<1x16x16xf32> to vector<16x16xf32>
    %c7 = arith.constant 7 : index
    %1009 = memref.load %arg3[%c7] : memref<288xf32, #tpu.memory_space<smem>>
    %1010 = vector.broadcast %1009 : f32 to vector<16x16xf32>
    %1011 = arith.mulf %1010, %1008 : vector<16x16xf32>
    %1012 = arith.addf %974, %1011 : vector<16x16xf32>
    %c43 = arith.constant 43 : index
    %1013 = memref.load %arg3[%c43] : memref<288xf32, #tpu.memory_space<smem>>
    %1014 = vector.broadcast %1013 : f32 to vector<16x16xf32>
    %1015 = arith.mulf %1014, %1008 : vector<16x16xf32>
    %1016 = arith.addf %978, %1015 : vector<16x16xf32>
    %c79 = arith.constant 79 : index
    %1017 = memref.load %arg3[%c79] : memref<288xf32, #tpu.memory_space<smem>>
    %1018 = vector.broadcast %1017 : f32 to vector<16x16xf32>
    %1019 = arith.mulf %1018, %1008 : vector<16x16xf32>
    %1020 = arith.addf %982, %1019 : vector<16x16xf32>
    %c115 = arith.constant 115 : index
    %1021 = memref.load %arg3[%c115] : memref<288xf32, #tpu.memory_space<smem>>
    %1022 = vector.broadcast %1021 : f32 to vector<16x16xf32>
    %1023 = arith.mulf %1022, %1008 : vector<16x16xf32>
    %1024 = arith.addf %986, %1023 : vector<16x16xf32>
    %c151 = arith.constant 151 : index
    %1025 = memref.load %arg3[%c151] : memref<288xf32, #tpu.memory_space<smem>>
    %1026 = vector.broadcast %1025 : f32 to vector<16x16xf32>
    %1027 = arith.mulf %1026, %1008 : vector<16x16xf32>
    %1028 = arith.addf %990, %1027 : vector<16x16xf32>
    %c187 = arith.constant 187 : index
    %1029 = memref.load %arg3[%c187] : memref<288xf32, #tpu.memory_space<smem>>
    %1030 = vector.broadcast %1029 : f32 to vector<16x16xf32>
    %1031 = arith.mulf %1030, %1008 : vector<16x16xf32>
    %1032 = arith.addf %994, %1031 : vector<16x16xf32>
    %c223 = arith.constant 223 : index
    %1033 = memref.load %arg3[%c223] : memref<288xf32, #tpu.memory_space<smem>>
    %1034 = vector.broadcast %1033 : f32 to vector<16x16xf32>
    %1035 = arith.mulf %1034, %1008 : vector<16x16xf32>
    %1036 = arith.addf %998, %1035 : vector<16x16xf32>
    %c259 = arith.constant 259 : index
    %1037 = memref.load %arg3[%c259] : memref<288xf32, #tpu.memory_space<smem>>
    %1038 = vector.broadcast %1037 : f32 to vector<16x16xf32>
    %1039 = arith.mulf %1038, %1008 : vector<16x16xf32>
    %1040 = arith.addf %1002, %1039 : vector<16x16xf32>
    %1041 = vector.extract_strided_slice %1006 {offsets = [1, 0, 0], sizes = [1, 16, 16], strides = [1, 1, 1]} : vector<4x16x16xf32> to vector<1x16x16xf32>
    %1042 = vector.shape_cast %1041 : vector<1x16x16xf32> to vector<16x16xf32>
    %c16 = arith.constant 16 : index
    %1043 = memref.load %arg3[%c16] : memref<288xf32, #tpu.memory_space<smem>>
    %1044 = vector.broadcast %1043 : f32 to vector<16x16xf32>
    %1045 = arith.mulf %1044, %1042 : vector<16x16xf32>
    %1046 = arith.addf %1012, %1045 : vector<16x16xf32>
    %c52 = arith.constant 52 : index
    %1047 = memref.load %arg3[%c52] : memref<288xf32, #tpu.memory_space<smem>>
    %1048 = vector.broadcast %1047 : f32 to vector<16x16xf32>
    %1049 = arith.mulf %1048, %1042 : vector<16x16xf32>
    %1050 = arith.addf %1016, %1049 : vector<16x16xf32>
    %c88 = arith.constant 88 : index
    %1051 = memref.load %arg3[%c88] : memref<288xf32, #tpu.memory_space<smem>>
    %1052 = vector.broadcast %1051 : f32 to vector<16x16xf32>
    %1053 = arith.mulf %1052, %1042 : vector<16x16xf32>
    %1054 = arith.addf %1020, %1053 : vector<16x16xf32>
    %c124 = arith.constant 124 : index
    %1055 = memref.load %arg3[%c124] : memref<288xf32, #tpu.memory_space<smem>>
    %1056 = vector.broadcast %1055 : f32 to vector<16x16xf32>
    %1057 = arith.mulf %1056, %1042 : vector<16x16xf32>
    %1058 = arith.addf %1024, %1057 : vector<16x16xf32>
    %c160 = arith.constant 160 : index
    %1059 = memref.load %arg3[%c160] : memref<288xf32, #tpu.memory_space<smem>>
    %1060 = vector.broadcast %1059 : f32 to vector<16x16xf32>
    %1061 = arith.mulf %1060, %1042 : vector<16x16xf32>
    %1062 = arith.addf %1028, %1061 : vector<16x16xf32>
    %c196 = arith.constant 196 : index
    %1063 = memref.load %arg3[%c196] : memref<288xf32, #tpu.memory_space<smem>>
    %1064 = vector.broadcast %1063 : f32 to vector<16x16xf32>
    %1065 = arith.mulf %1064, %1042 : vector<16x16xf32>
    %1066 = arith.addf %1032, %1065 : vector<16x16xf32>
    %c232 = arith.constant 232 : index
    %1067 = memref.load %arg3[%c232] : memref<288xf32, #tpu.memory_space<smem>>
    %1068 = vector.broadcast %1067 : f32 to vector<16x16xf32>
    %1069 = arith.mulf %1068, %1042 : vector<16x16xf32>
    %1070 = arith.addf %1036, %1069 : vector<16x16xf32>
    %c268 = arith.constant 268 : index
    %1071 = memref.load %arg3[%c268] : memref<288xf32, #tpu.memory_space<smem>>
    %1072 = vector.broadcast %1071 : f32 to vector<16x16xf32>
    %1073 = arith.mulf %1072, %1042 : vector<16x16xf32>
    %1074 = arith.addf %1040, %1073 : vector<16x16xf32>
    %1075 = vector.extract_strided_slice %1006 {offsets = [2, 0, 0], sizes = [1, 16, 16], strides = [1, 1, 1]} : vector<4x16x16xf32> to vector<1x16x16xf32>
    %1076 = vector.shape_cast %1075 : vector<1x16x16xf32> to vector<16x16xf32>
    %c25 = arith.constant 25 : index
    %1077 = memref.load %arg3[%c25] : memref<288xf32, #tpu.memory_space<smem>>
    %1078 = vector.broadcast %1077 : f32 to vector<16x16xf32>
    %1079 = arith.mulf %1078, %1076 : vector<16x16xf32>
    %1080 = arith.addf %1046, %1079 : vector<16x16xf32>
    %c61 = arith.constant 61 : index
    %1081 = memref.load %arg3[%c61] : memref<288xf32, #tpu.memory_space<smem>>
    %1082 = vector.broadcast %1081 : f32 to vector<16x16xf32>
    %1083 = arith.mulf %1082, %1076 : vector<16x16xf32>
    %1084 = arith.addf %1050, %1083 : vector<16x16xf32>
    %c97 = arith.constant 97 : index
    %1085 = memref.load %arg3[%c97] : memref<288xf32, #tpu.memory_space<smem>>
    %1086 = vector.broadcast %1085 : f32 to vector<16x16xf32>
    %1087 = arith.mulf %1086, %1076 : vector<16x16xf32>
    %1088 = arith.addf %1054, %1087 : vector<16x16xf32>
    %c133 = arith.constant 133 : index
    %1089 = memref.load %arg3[%c133] : memref<288xf32, #tpu.memory_space<smem>>
    %1090 = vector.broadcast %1089 : f32 to vector<16x16xf32>
    %1091 = arith.mulf %1090, %1076 : vector<16x16xf32>
    %1092 = arith.addf %1058, %1091 : vector<16x16xf32>
    %c169 = arith.constant 169 : index
    %1093 = memref.load %arg3[%c169] : memref<288xf32, #tpu.memory_space<smem>>
    %1094 = vector.broadcast %1093 : f32 to vector<16x16xf32>
    %1095 = arith.mulf %1094, %1076 : vector<16x16xf32>
    %1096 = arith.addf %1062, %1095 : vector<16x16xf32>
    %c205 = arith.constant 205 : index
    %1097 = memref.load %arg3[%c205] : memref<288xf32, #tpu.memory_space<smem>>
    %1098 = vector.broadcast %1097 : f32 to vector<16x16xf32>
    %1099 = arith.mulf %1098, %1076 : vector<16x16xf32>
    %1100 = arith.addf %1066, %1099 : vector<16x16xf32>
    %c241 = arith.constant 241 : index
    %1101 = memref.load %arg3[%c241] : memref<288xf32, #tpu.memory_space<smem>>
    %1102 = vector.broadcast %1101 : f32 to vector<16x16xf32>
    %1103 = arith.mulf %1102, %1076 : vector<16x16xf32>
    %1104 = arith.addf %1070, %1103 : vector<16x16xf32>
    %c277 = arith.constant 277 : index
    %1105 = memref.load %arg3[%c277] : memref<288xf32, #tpu.memory_space<smem>>
    %1106 = vector.broadcast %1105 : f32 to vector<16x16xf32>
    %1107 = arith.mulf %1106, %1076 : vector<16x16xf32>
    %1108 = arith.addf %1074, %1107 : vector<16x16xf32>
    %1109 = vector.extract_strided_slice %1006 {offsets = [3, 0, 0], sizes = [1, 16, 16], strides = [1, 1, 1]} : vector<4x16x16xf32> to vector<1x16x16xf32>
    %1110 = vector.shape_cast %1109 : vector<1x16x16xf32> to vector<16x16xf32>
    %c34 = arith.constant 34 : index
    %1111 = memref.load %arg3[%c34] : memref<288xf32, #tpu.memory_space<smem>>
    %1112 = vector.broadcast %1111 : f32 to vector<16x16xf32>
    %1113 = arith.mulf %1112, %1110 : vector<16x16xf32>
    %1114 = arith.addf %1080, %1113 : vector<16x16xf32>
    %c70 = arith.constant 70 : index
    %1115 = memref.load %arg3[%c70] : memref<288xf32, #tpu.memory_space<smem>>
    %1116 = vector.broadcast %1115 : f32 to vector<16x16xf32>
    %1117 = arith.mulf %1116, %1110 : vector<16x16xf32>
    %1118 = arith.addf %1084, %1117 : vector<16x16xf32>
    %c106 = arith.constant 106 : index
    %1119 = memref.load %arg3[%c106] : memref<288xf32, #tpu.memory_space<smem>>
    %1120 = vector.broadcast %1119 : f32 to vector<16x16xf32>
    %1121 = arith.mulf %1120, %1110 : vector<16x16xf32>
    %1122 = arith.addf %1088, %1121 : vector<16x16xf32>
    %c142 = arith.constant 142 : index
    %1123 = memref.load %arg3[%c142] : memref<288xf32, #tpu.memory_space<smem>>
    %1124 = vector.broadcast %1123 : f32 to vector<16x16xf32>
    %1125 = arith.mulf %1124, %1110 : vector<16x16xf32>
    %1126 = arith.addf %1092, %1125 : vector<16x16xf32>
    %c178 = arith.constant 178 : index
    %1127 = memref.load %arg3[%c178] : memref<288xf32, #tpu.memory_space<smem>>
    %1128 = vector.broadcast %1127 : f32 to vector<16x16xf32>
    %1129 = arith.mulf %1128, %1110 : vector<16x16xf32>
    %1130 = arith.addf %1096, %1129 : vector<16x16xf32>
    %c214 = arith.constant 214 : index
    %1131 = memref.load %arg3[%c214] : memref<288xf32, #tpu.memory_space<smem>>
    %1132 = vector.broadcast %1131 : f32 to vector<16x16xf32>
    %1133 = arith.mulf %1132, %1110 : vector<16x16xf32>
    %1134 = arith.addf %1100, %1133 : vector<16x16xf32>
    %c250 = arith.constant 250 : index
    %1135 = memref.load %arg3[%c250] : memref<288xf32, #tpu.memory_space<smem>>
    %1136 = vector.broadcast %1135 : f32 to vector<16x16xf32>
    %1137 = arith.mulf %1136, %1110 : vector<16x16xf32>
    %1138 = arith.addf %1104, %1137 : vector<16x16xf32>
    %c286 = arith.constant 286 : index
    %1139 = memref.load %arg3[%c286] : memref<288xf32, #tpu.memory_space<smem>>
    %1140 = vector.broadcast %1139 : f32 to vector<16x16xf32>
    %1141 = arith.mulf %1140, %1110 : vector<16x16xf32>
    %1142 = arith.addf %1108, %1141 : vector<16x16xf32>
    %c2_69 = arith.constant 2 : index
    %c2_70 = arith.constant 2 : index
    %1143 = vector.load %arg8[%c2_69, %c2_70] : memref<18x18xf32, #tpu.memory_space<vmem>>, vector<16x16xf32>
    %1144 = arith.addf %1004, %1143 : vector<16x16xf32>
    %1145 = arith.maximumf %1005, %1143 : vector<16x16xf32>
    %c0_71 = arith.constant 0 : index
    %c2_72 = arith.constant 2 : index
    %c2_73 = arith.constant 2 : index
    %1146 = vector.load %arg7[%c0_71, %c2_72, %c2_73] : memref<4x18x18xf32, #tpu.memory_space<vmem>>, vector<4x16x16xf32>
    %1147 = vector.extract_strided_slice %1146 {offsets = [0, 0, 0], sizes = [1, 16, 16], strides = [1, 1, 1]} : vector<4x16x16xf32> to vector<1x16x16xf32>
    %1148 = vector.shape_cast %1147 : vector<1x16x16xf32> to vector<16x16xf32>
    %c8 = arith.constant 8 : index
    %1149 = memref.load %arg3[%c8] : memref<288xf32, #tpu.memory_space<smem>>
    %1150 = vector.broadcast %1149 : f32 to vector<16x16xf32>
    %1151 = arith.mulf %1150, %1148 : vector<16x16xf32>
    %1152 = arith.addf %1114, %1151 : vector<16x16xf32>
    %c44 = arith.constant 44 : index
    %1153 = memref.load %arg3[%c44] : memref<288xf32, #tpu.memory_space<smem>>
    %1154 = vector.broadcast %1153 : f32 to vector<16x16xf32>
    %1155 = arith.mulf %1154, %1148 : vector<16x16xf32>
    %1156 = arith.addf %1118, %1155 : vector<16x16xf32>
    %c80 = arith.constant 80 : index
    %1157 = memref.load %arg3[%c80] : memref<288xf32, #tpu.memory_space<smem>>
    %1158 = vector.broadcast %1157 : f32 to vector<16x16xf32>
    %1159 = arith.mulf %1158, %1148 : vector<16x16xf32>
    %1160 = arith.addf %1122, %1159 : vector<16x16xf32>
    %c116 = arith.constant 116 : index
    %1161 = memref.load %arg3[%c116] : memref<288xf32, #tpu.memory_space<smem>>
    %1162 = vector.broadcast %1161 : f32 to vector<16x16xf32>
    %1163 = arith.mulf %1162, %1148 : vector<16x16xf32>
    %1164 = arith.addf %1126, %1163 : vector<16x16xf32>
    %c152 = arith.constant 152 : index
    %1165 = memref.load %arg3[%c152] : memref<288xf32, #tpu.memory_space<smem>>
    %1166 = vector.broadcast %1165 : f32 to vector<16x16xf32>
    %1167 = arith.mulf %1166, %1148 : vector<16x16xf32>
    %1168 = arith.addf %1130, %1167 : vector<16x16xf32>
    %c188 = arith.constant 188 : index
    %1169 = memref.load %arg3[%c188] : memref<288xf32, #tpu.memory_space<smem>>
    %1170 = vector.broadcast %1169 : f32 to vector<16x16xf32>
    %1171 = arith.mulf %1170, %1148 : vector<16x16xf32>
    %1172 = arith.addf %1134, %1171 : vector<16x16xf32>
    %c224 = arith.constant 224 : index
    %1173 = memref.load %arg3[%c224] : memref<288xf32, #tpu.memory_space<smem>>
    %1174 = vector.broadcast %1173 : f32 to vector<16x16xf32>
    %1175 = arith.mulf %1174, %1148 : vector<16x16xf32>
    %1176 = arith.addf %1138, %1175 : vector<16x16xf32>
    %c260 = arith.constant 260 : index
    %1177 = memref.load %arg3[%c260] : memref<288xf32, #tpu.memory_space<smem>>
    %1178 = vector.broadcast %1177 : f32 to vector<16x16xf32>
    %1179 = arith.mulf %1178, %1148 : vector<16x16xf32>
    %1180 = arith.addf %1142, %1179 : vector<16x16xf32>
    %1181 = vector.extract_strided_slice %1146 {offsets = [1, 0, 0], sizes = [1, 16, 16], strides = [1, 1, 1]} : vector<4x16x16xf32> to vector<1x16x16xf32>
    %1182 = vector.shape_cast %1181 : vector<1x16x16xf32> to vector<16x16xf32>
    %c17 = arith.constant 17 : index
    %1183 = memref.load %arg3[%c17] : memref<288xf32, #tpu.memory_space<smem>>
    %1184 = vector.broadcast %1183 : f32 to vector<16x16xf32>
    %1185 = arith.mulf %1184, %1182 : vector<16x16xf32>
    %1186 = arith.addf %1152, %1185 : vector<16x16xf32>
    %c53 = arith.constant 53 : index
    %1187 = memref.load %arg3[%c53] : memref<288xf32, #tpu.memory_space<smem>>
    %1188 = vector.broadcast %1187 : f32 to vector<16x16xf32>
    %1189 = arith.mulf %1188, %1182 : vector<16x16xf32>
    %1190 = arith.addf %1156, %1189 : vector<16x16xf32>
    %c89 = arith.constant 89 : index
    %1191 = memref.load %arg3[%c89] : memref<288xf32, #tpu.memory_space<smem>>
    %1192 = vector.broadcast %1191 : f32 to vector<16x16xf32>
    %1193 = arith.mulf %1192, %1182 : vector<16x16xf32>
    %1194 = arith.addf %1160, %1193 : vector<16x16xf32>
    %c125 = arith.constant 125 : index
    %1195 = memref.load %arg3[%c125] : memref<288xf32, #tpu.memory_space<smem>>
    %1196 = vector.broadcast %1195 : f32 to vector<16x16xf32>
    %1197 = arith.mulf %1196, %1182 : vector<16x16xf32>
    %1198 = arith.addf %1164, %1197 : vector<16x16xf32>
    %c161 = arith.constant 161 : index
    %1199 = memref.load %arg3[%c161] : memref<288xf32, #tpu.memory_space<smem>>
    %1200 = vector.broadcast %1199 : f32 to vector<16x16xf32>
    %1201 = arith.mulf %1200, %1182 : vector<16x16xf32>
    %1202 = arith.addf %1168, %1201 : vector<16x16xf32>
    %c197 = arith.constant 197 : index
    %1203 = memref.load %arg3[%c197] : memref<288xf32, #tpu.memory_space<smem>>
    %1204 = vector.broadcast %1203 : f32 to vector<16x16xf32>
    %1205 = arith.mulf %1204, %1182 : vector<16x16xf32>
    %1206 = arith.addf %1172, %1205 : vector<16x16xf32>
    %c233 = arith.constant 233 : index
    %1207 = memref.load %arg3[%c233] : memref<288xf32, #tpu.memory_space<smem>>
    %1208 = vector.broadcast %1207 : f32 to vector<16x16xf32>
    %1209 = arith.mulf %1208, %1182 : vector<16x16xf32>
    %1210 = arith.addf %1176, %1209 : vector<16x16xf32>
    %c269 = arith.constant 269 : index
    %1211 = memref.load %arg3[%c269] : memref<288xf32, #tpu.memory_space<smem>>
    %1212 = vector.broadcast %1211 : f32 to vector<16x16xf32>
    %1213 = arith.mulf %1212, %1182 : vector<16x16xf32>
    %1214 = arith.addf %1180, %1213 : vector<16x16xf32>
    %1215 = vector.extract_strided_slice %1146 {offsets = [2, 0, 0], sizes = [1, 16, 16], strides = [1, 1, 1]} : vector<4x16x16xf32> to vector<1x16x16xf32>
    %1216 = vector.shape_cast %1215 : vector<1x16x16xf32> to vector<16x16xf32>
    %c26 = arith.constant 26 : index
    %1217 = memref.load %arg3[%c26] : memref<288xf32, #tpu.memory_space<smem>>
    %1218 = vector.broadcast %1217 : f32 to vector<16x16xf32>
    %1219 = arith.mulf %1218, %1216 : vector<16x16xf32>
    %1220 = arith.addf %1186, %1219 : vector<16x16xf32>
    %c62 = arith.constant 62 : index
    %1221 = memref.load %arg3[%c62] : memref<288xf32, #tpu.memory_space<smem>>
    %1222 = vector.broadcast %1221 : f32 to vector<16x16xf32>
    %1223 = arith.mulf %1222, %1216 : vector<16x16xf32>
    %1224 = arith.addf %1190, %1223 : vector<16x16xf32>
    %c98 = arith.constant 98 : index
    %1225 = memref.load %arg3[%c98] : memref<288xf32, #tpu.memory_space<smem>>
    %1226 = vector.broadcast %1225 : f32 to vector<16x16xf32>
    %1227 = arith.mulf %1226, %1216 : vector<16x16xf32>
    %1228 = arith.addf %1194, %1227 : vector<16x16xf32>
    %c134 = arith.constant 134 : index
    %1229 = memref.load %arg3[%c134] : memref<288xf32, #tpu.memory_space<smem>>
    %1230 = vector.broadcast %1229 : f32 to vector<16x16xf32>
    %1231 = arith.mulf %1230, %1216 : vector<16x16xf32>
    %1232 = arith.addf %1198, %1231 : vector<16x16xf32>
    %c170 = arith.constant 170 : index
    %1233 = memref.load %arg3[%c170] : memref<288xf32, #tpu.memory_space<smem>>
    %1234 = vector.broadcast %1233 : f32 to vector<16x16xf32>
    %1235 = arith.mulf %1234, %1216 : vector<16x16xf32>
    %1236 = arith.addf %1202, %1235 : vector<16x16xf32>
    %c206 = arith.constant 206 : index
    %1237 = memref.load %arg3[%c206] : memref<288xf32, #tpu.memory_space<smem>>
    %1238 = vector.broadcast %1237 : f32 to vector<16x16xf32>
    %1239 = arith.mulf %1238, %1216 : vector<16x16xf32>
    %1240 = arith.addf %1206, %1239 : vector<16x16xf32>
    %c242 = arith.constant 242 : index
    %1241 = memref.load %arg3[%c242] : memref<288xf32, #tpu.memory_space<smem>>
    %1242 = vector.broadcast %1241 : f32 to vector<16x16xf32>
    %1243 = arith.mulf %1242, %1216 : vector<16x16xf32>
    %1244 = arith.addf %1210, %1243 : vector<16x16xf32>
    %c278 = arith.constant 278 : index
    %1245 = memref.load %arg3[%c278] : memref<288xf32, #tpu.memory_space<smem>>
    %1246 = vector.broadcast %1245 : f32 to vector<16x16xf32>
    %1247 = arith.mulf %1246, %1216 : vector<16x16xf32>
    %1248 = arith.addf %1214, %1247 : vector<16x16xf32>
    %1249 = vector.extract_strided_slice %1146 {offsets = [3, 0, 0], sizes = [1, 16, 16], strides = [1, 1, 1]} : vector<4x16x16xf32> to vector<1x16x16xf32>
    %1250 = vector.shape_cast %1249 : vector<1x16x16xf32> to vector<16x16xf32>
    %c35 = arith.constant 35 : index
    %1251 = memref.load %arg3[%c35] : memref<288xf32, #tpu.memory_space<smem>>
    %1252 = vector.broadcast %1251 : f32 to vector<16x16xf32>
    %1253 = arith.mulf %1252, %1250 : vector<16x16xf32>
    %1254 = arith.addf %1220, %1253 : vector<16x16xf32>
    %c71 = arith.constant 71 : index
    %1255 = memref.load %arg3[%c71] : memref<288xf32, #tpu.memory_space<smem>>
    %1256 = vector.broadcast %1255 : f32 to vector<16x16xf32>
    %1257 = arith.mulf %1256, %1250 : vector<16x16xf32>
    %1258 = arith.addf %1224, %1257 : vector<16x16xf32>
    %c107 = arith.constant 107 : index
    %1259 = memref.load %arg3[%c107] : memref<288xf32, #tpu.memory_space<smem>>
    %1260 = vector.broadcast %1259 : f32 to vector<16x16xf32>
    %1261 = arith.mulf %1260, %1250 : vector<16x16xf32>
    %1262 = arith.addf %1228, %1261 : vector<16x16xf32>
    %c143 = arith.constant 143 : index
    %1263 = memref.load %arg3[%c143] : memref<288xf32, #tpu.memory_space<smem>>
    %1264 = vector.broadcast %1263 : f32 to vector<16x16xf32>
    %1265 = arith.mulf %1264, %1250 : vector<16x16xf32>
    %1266 = arith.addf %1232, %1265 : vector<16x16xf32>
    %c179 = arith.constant 179 : index
    %1267 = memref.load %arg3[%c179] : memref<288xf32, #tpu.memory_space<smem>>
    %1268 = vector.broadcast %1267 : f32 to vector<16x16xf32>
    %1269 = arith.mulf %1268, %1250 : vector<16x16xf32>
    %1270 = arith.addf %1236, %1269 : vector<16x16xf32>
    %c215 = arith.constant 215 : index
    %1271 = memref.load %arg3[%c215] : memref<288xf32, #tpu.memory_space<smem>>
    %1272 = vector.broadcast %1271 : f32 to vector<16x16xf32>
    %1273 = arith.mulf %1272, %1250 : vector<16x16xf32>
    %1274 = arith.addf %1240, %1273 : vector<16x16xf32>
    %c251 = arith.constant 251 : index
    %1275 = memref.load %arg3[%c251] : memref<288xf32, #tpu.memory_space<smem>>
    %1276 = vector.broadcast %1275 : f32 to vector<16x16xf32>
    %1277 = arith.mulf %1276, %1250 : vector<16x16xf32>
    %1278 = arith.addf %1244, %1277 : vector<16x16xf32>
    %c287 = arith.constant 287 : index
    %1279 = memref.load %arg3[%c287] : memref<288xf32, #tpu.memory_space<smem>>
    %1280 = vector.broadcast %1279 : f32 to vector<16x16xf32>
    %1281 = arith.mulf %1280, %1250 : vector<16x16xf32>
    %1282 = arith.addf %1248, %1281 : vector<16x16xf32>
    %cst_74 = arith.constant 9.99999974E-5 : f32
    %1283 = vector.broadcast %cst_74 : f32 to vector<16x16xf32>
    %1284 = arith.maximumf %1144, %1283 : vector<16x16xf32>
    %cst_75 = arith.constant 1.000000e+00 : f32
    %1285 = vector.broadcast %cst_75 : f32 to vector<16x16xf32>
    %1286 = arith.divf %1285, %1284 : vector<16x16xf32>
    %c0_76 = arith.constant 0 : index
    %1287 = memref.load %arg4[%c0_76] : memref<1xf32, #tpu.memory_space<smem>>
    %1288 = arith.mulf %1254, %1286 : vector<16x16xf32>
    %1289 = vector.broadcast %1287 : f32 to vector<16x16xf32>
    %1290 = arith.addf %1288, %1289 : vector<16x16xf32>
    %c0_77 = arith.constant 0 : index
    %c0_78 = arith.constant 0 : index
    %c0_79 = arith.constant 0 : index
    %c0_80 = arith.constant 0 : index
    %1291 = vector.load %arg5[%c0_77, %c0_78, %c0_79, %c0_80] : memref<1x8x16x16xf32, #tpu.memory_space<vmem>>, vector<1x1x16x16xf32>
    %1292 = vector.shape_cast %1291 : vector<1x1x16x16xf32> to vector<16x16xf32>
    %1293 = vector.shape_cast %1290 : vector<16x16xf32> to vector<1x1x16x16xf32>
    tpu.vector_store %arg5[%c0_77, %c0_78, %c0_79, %c0_80], %1293 {strides = array<i32>} : memref<1x8x16x16xf32, #tpu.memory_space<vmem>>, vector<1x1x16x16xf32>,
    %1294 = arith.mulf %1258, %1286 : vector<16x16xf32>
    %1295 = vector.broadcast %1287 : f32 to vector<16x16xf32>
    %1296 = arith.addf %1294, %1295 : vector<16x16xf32>
    %c0_81 = arith.constant 0 : index
    %c1_82 = arith.constant 1 : index
    %c0_83 = arith.constant 0 : index
    %c0_84 = arith.constant 0 : index
    %1297 = vector.load %arg5[%c0_81, %c1_82, %c0_83, %c0_84] : memref<1x8x16x16xf32, #tpu.memory_space<vmem>>, vector<1x1x16x16xf32>
    %1298 = vector.shape_cast %1297 : vector<1x1x16x16xf32> to vector<16x16xf32>
    %1299 = vector.shape_cast %1296 : vector<16x16xf32> to vector<1x1x16x16xf32>
    tpu.vector_store %arg5[%c0_81, %c1_82, %c0_83, %c0_84], %1299 {strides = array<i32>} : memref<1x8x16x16xf32, #tpu.memory_space<vmem>>, vector<1x1x16x16xf32>,
    %1300 = arith.mulf %1262, %1286 : vector<16x16xf32>
    %1301 = vector.broadcast %1287 : f32 to vector<16x16xf32>
    %1302 = arith.addf %1300, %1301 : vector<16x16xf32>
    %c0_85 = arith.constant 0 : index
    %c2_86 = arith.constant 2 : index
    %c0_87 = arith.constant 0 : index
    %c0_88 = arith.constant 0 : index
    %1303 = vector.load %arg5[%c0_85, %c2_86, %c0_87, %c0_88] : memref<1x8x16x16xf32, #tpu.memory_space<vmem>>, vector<1x1x16x16xf32>
    %1304 = vector.shape_cast %1303 : vector<1x1x16x16xf32> to vector<16x16xf32>
    %1305 = vector.shape_cast %1302 : vector<16x16xf32> to vector<1x1x16x16xf32>
    tpu.vector_store %arg5[%c0_85, %c2_86, %c0_87, %c0_88], %1305 {strides = array<i32>} : memref<1x8x16x16xf32, #tpu.memory_space<vmem>>, vector<1x1x16x16xf32>,
    %1306 = arith.mulf %1266, %1286 : vector<16x16xf32>
    %1307 = vector.broadcast %1287 : f32 to vector<16x16xf32>
    %1308 = arith.addf %1306, %1307 : vector<16x16xf32>
    %c0_89 = arith.constant 0 : index
    %c3_90 = arith.constant 3 : index
    %c0_91 = arith.constant 0 : index
    %c0_92 = arith.constant 0 : index
    %1309 = vector.load %arg5[%c0_89, %c3_90, %c0_91, %c0_92] : memref<1x8x16x16xf32, #tpu.memory_space<vmem>>, vector<1x1x16x16xf32>
    %1310 = vector.shape_cast %1309 : vector<1x1x16x16xf32> to vector<16x16xf32>
    %1311 = vector.shape_cast %1308 : vector<16x16xf32> to vector<1x1x16x16xf32>
    tpu.vector_store %arg5[%c0_89, %c3_90, %c0_91, %c0_92], %1311 {strides = array<i32>} : memref<1x8x16x16xf32, #tpu.memory_space<vmem>>, vector<1x1x16x16xf32>,
    %1312 = arith.mulf %1270, %1286 : vector<16x16xf32>
    %1313 = vector.broadcast %1287 : f32 to vector<16x16xf32>
    %1314 = arith.addf %1312, %1313 : vector<16x16xf32>
    %c0_93 = arith.constant 0 : index
    %c4_94 = arith.constant 4 : index
    %c0_95 = arith.constant 0 : index
    %c0_96 = arith.constant 0 : index
    %1315 = vector.load %arg5[%c0_93, %c4_94, %c0_95, %c0_96] : memref<1x8x16x16xf32, #tpu.memory_space<vmem>>, vector<1x1x16x16xf32>
    %1316 = vector.shape_cast %1315 : vector<1x1x16x16xf32> to vector<16x16xf32>
    %1317 = vector.shape_cast %1314 : vector<16x16xf32> to vector<1x1x16x16xf32>
    tpu.vector_store %arg5[%c0_93, %c4_94, %c0_95, %c0_96], %1317 {strides = array<i32>} : memref<1x8x16x16xf32, #tpu.memory_space<vmem>>, vector<1x1x16x16xf32>,
    %1318 = arith.mulf %1274, %1286 : vector<16x16xf32>
    %1319 = vector.broadcast %1287 : f32 to vector<16x16xf32>
    %1320 = arith.addf %1318, %1319 : vector<16x16xf32>
    %c0_97 = arith.constant 0 : index
    %c5_98 = arith.constant 5 : index
    %c0_99 = arith.constant 0 : index
    %c0_100 = arith.constant 0 : index
    %1321 = vector.load %arg5[%c0_97, %c5_98, %c0_99, %c0_100] : memref<1x8x16x16xf32, #tpu.memory_space<vmem>>, vector<1x1x16x16xf32>
    %1322 = vector.shape_cast %1321 : vector<1x1x16x16xf32> to vector<16x16xf32>
    %1323 = vector.shape_cast %1320 : vector<16x16xf32> to vector<1x1x16x16xf32>
    tpu.vector_store %arg5[%c0_97, %c5_98, %c0_99, %c0_100], %1323 {strides = array<i32>} : memref<1x8x16x16xf32, #tpu.memory_space<vmem>>, vector<1x1x16x16xf32>,
    %1324 = arith.mulf %1278, %1286 : vector<16x16xf32>
    %1325 = vector.broadcast %1287 : f32 to vector<16x16xf32>
    %1326 = arith.addf %1324, %1325 : vector<16x16xf32>
    %c0_101 = arith.constant 0 : index
    %c6_102 = arith.constant 6 : index
    %c0_103 = arith.constant 0 : index
    %c0_104 = arith.constant 0 : index
    %1327 = vector.load %arg5[%c0_101, %c6_102, %c0_103, %c0_104] : memref<1x8x16x16xf32, #tpu.memory_space<vmem>>, vector<1x1x16x16xf32>
    %1328 = vector.shape_cast %1327 : vector<1x1x16x16xf32> to vector<16x16xf32>
    %1329 = vector.shape_cast %1326 : vector<16x16xf32> to vector<1x1x16x16xf32>
    tpu.vector_store %arg5[%c0_101, %c6_102, %c0_103, %c0_104], %1329 {strides = array<i32>} : memref<1x8x16x16xf32, #tpu.memory_space<vmem>>, vector<1x1x16x16xf32>,
    %1330 = arith.mulf %1282, %1286 : vector<16x16xf32>
    %1331 = vector.broadcast %1287 : f32 to vector<16x16xf32>
    %1332 = arith.addf %1330, %1331 : vector<16x16xf32>
    %c0_105 = arith.constant 0 : index
    %c7_106 = arith.constant 7 : index
    %c0_107 = arith.constant 0 : index
    %c0_108 = arith.constant 0 : index
    %1333 = vector.load %arg5[%c0_105, %c7_106, %c0_107, %c0_108] : memref<1x8x16x16xf32, #tpu.memory_space<vmem>>, vector<1x1x16x16xf32>
    %1334 = vector.shape_cast %1333 : vector<1x1x16x16xf32> to vector<16x16xf32>
    %1335 = vector.shape_cast %1332 : vector<16x16xf32> to vector<1x1x16x16xf32>
    tpu.vector_store %arg5[%c0_105, %c7_106, %c0_107, %c0_108], %1335 {strides = array<i32>} : memref<1x8x16x16xf32, #tpu.memory_space<vmem>>, vector<1x1x16x16xf32>,
    %c0_109 = arith.constant 0 : index
    %c0_110 = arith.constant 0 : index
    %c0_111 = arith.constant 0 : index
    %1336 = vector.load %arg6[%c0_109, %c0_110, %c0_111] : memref<1x16x16xf32, #tpu.memory_space<vmem>>, vector<1x16x16xf32>
    %1337 = vector.shape_cast %1336 : vector<1x16x16xf32> to vector<16x16xf32>
    %1338 = vector.shape_cast %1145 : vector<16x16xf32> to vector<1x16x16xf32>
    tpu.vector_store %arg6[%c0_109, %c0_110, %c0_111], %1338 {strides = array<i32>} : memref<1x16x16xf32, #tpu.memory_space<vmem>>, vector<1x16x16xf32>,
    return
  }
  func.func @transform_0(%arg0: i32) -> (i32, i32, i32, i32) {
    %c0_i32 = arith.constant 0 : i32
    %c0_i32_0 = arith.constant 0 : i32
    %c0_i32_1 = arith.constant 0 : i32
    %c0_i32_2 = arith.constant 0 : i32
    return %arg0, %c0_i32, %c0_i32_0, %c0_i32_1 : i32, i32, i32, i32
  }
  func.func @transform_1(%arg0: i32) -> (i32, i32, i32, i32) {
    %c0_i32 = arith.constant 0 : i32
    %c0_i32_0 = arith.constant 0 : i32
    %c0_i32_1 = arith.constant 0 : i32
    %c0_i32_2 = arith.constant 0 : i32
    return %arg0, %c0_i32, %c0_i32_0, %c0_i32_1 : i32, i32, i32, i32
  }
  func.func @transform_2(%arg0: i32) -> i32 {
    %c0_i32 = arith.constant 0 : i32
    %c0_i32_0 = arith.constant 0 : i32
    return %c0_i32 : i32
  }
  func.func @transform_3(%arg0: i32) -> i32 {
    %c0_i32 = arith.constant 0 : i32
    %c0_i32_0 = arith.constant 0 : i32
    return %c0_i32 : i32
  }
  func.func @transform_4(%arg0: i32) -> (i32, i32, i32, i32) {
    %c0_i32 = arith.constant 0 : i32
    %c0_i32_0 = arith.constant 0 : i32
    %c0_i32_1 = arith.constant 0 : i32
    %c0_i32_2 = arith.constant 0 : i32
    return %arg0, %c0_i32, %c0_i32_0, %c0_i32_1 : i32, i32, i32, i32
  }
  func.func @transform_5(%arg0: i32) -> (i32, i32, i32) {
    %c0_i32 = arith.constant 0 : i32
    %c0_i32_0 = arith.constant 0 : i32
    %c0_i32_1 = arith.constant 0 : i32
    return %arg0, %c0_i32, %c0_i32_0 : i32, i32, i32
  }
}

</mosaic_0001>

<bundles_post_ra>
// kernel: tpu_custom_call.1
= control target key start
LH: loop header
LB: loop body
LE: loop exit
PB: predicated region body
PF: predicated region fallthrough
CT: control target
= control target key end

     0   :  { %s8504_s0 = inlined_call_operand.hbm [shape: f32[2,4,16,16], index: 0, kind: input, shape index: {}]   ;;  %s8505_s1 = inlined_call_operand.hbm [shape: f32[2,1,16,16], index: 1, kind: input, shape index: {}]   ;;  %s8506_s2 = inlined_call_operand.vmem [shape: f32[288], index: 2, kind: input, shape index: {}]   ;;  %s8507_s3 = inlined_call_operand.<no memory space> [shape: f32[1], index: 3, kind: input, shape index: {}]   ;;  %s8508_s4 = inlined_call_operand.hbm [shape: f32[2,8,16,16], index: 4, kind: output, shape index: {0}]   ;;  %s8509_s5 = inlined_call_operand.hbm [shape: f32[2,16,16], index: 5, kind: output, shape index: {1}]  }
   0x1   :  { %8550 = sst [smem:[#allocation191_spill]] %s8504_s0 }
   0x2   :  { %8551 = sst [smem:[#allocation192_spill]] %s8505_s1 }
   0x3   :  { %8552 = sst [smem:[#allocation193_spill]] %s8506_s2 }
   0x4   :  { %8553 = sst [smem:[#allocation194_spill]] %s8508_s4 }
   0x5   :  { %8554 = sst [smem:[#allocation195_spill]] %s8509_s5 }
   0x6   :  { %11 = sst [smem:[#allocation4]] %s8507_s3 }
   0x7   :  { %12 = vsyncpa [#allocation6], 0 }
   0x8   :  { %14 = vsyncpa [#allocation6 + $0x1], 0 }
   0x9   :  { %15 = vsyncpa [#allocation10], 0 }
   0xa   :  { %17 = vsyncpa [#allocation10 + $0x1], 0 }
   0xb   :  { %18 = vsyncpa [#allocation8], 0 }
   0xc   :  { %19 = vsyncpa [#allocation7], 0 }
   0xd   :  { %21 = vsyncpa [#allocation7 + $0x1], 0 }
   0xe   :  { %22 = vsyncpa [#allocation14], 0 }
   0xf   :  { %24 = vsyncpa [#allocation14 + $0x1], 0  ;;  %s4665_s20 = smov 0   ;;  %s4667_s21 = smov 0  }
  0x10   :  { %s4669_s22 = smov 0   ;;  %s4671_s23 = smov 0  }
  0x11 LB: > { %8555 = sst [smem:[#allocation20_spill]] %s4605_s20  ;;  %s4686_s3 = sadd.s32 4294967295, %s4617_s23   ;;  %s4617_s23 = sphi %s4671_s23, %s9258_s23   ;;  %s4613_s22 = sphi %s4669_s22, %s9261_s22   ;;  %s4609_s21 = sphi %s4667_s21, %s9260_s21   ;;  %s4605_s20 = sphi %s4665_s20, %s9259_s20  }
  0x12   : > { %8556 = sst [smem:[#allocation21_spill]] %s4609_s21  ;;  %s4008_s24 = sadd.s32 4294967294, %s4617_s23  }
  0x13   : > { %8557 = sst [smem:[#allocation22_spill]] %s4613_s22  ;;  %s4690_s25 = sadd.s32 1, %s4617_s23  }
  0x14   : > { %8558 = sst [smem:[#allocation23_spill]] %s4617_s23  ;;  %s37_s26 = sadd.s32 1, %s4613_s22 }
  0x15   : > { %8559 = sst [smem:[#allocation24_spill]] %s4686_s3  ;;  %s34_s27 = ssub.s32 %s4617_s23, %s4690_s25 }
  0x16   : > { %8560 = sst [smem:[#allocation25_spill]] %s4690_s25  ;;  %p44_p0 = scmp.ne.s32.totalorder %s4613_s22, %s4609_s21 }
  0x17   : > { %p35_p1 = scmp.eq.s32.totalorder %s34_s27, 0  ;;  %p45_p2 = scmp.eq.s32.totalorder %s4617_s23, 0 }
  0x18   : > { %p50_p3 = scmp.ne.s32.totalorder %s4609_s21, %s4605_s20  ;;  %p8510_p4 = scmp.eq.s32.totalorder %s4686_s3, 0 }
  0x19   : > { %s4702_s28 = scalar_select %p35_p1, %s4613_s22, %s37_s26  }
  0x1a   : > { %p4704_p5 = por %p45_p2, %p44_p0  ;;  %p4710_p6 = por %p8510_p4, %p50_p3 }
  0x1b   : > { %8561 = sst [smem:[#allocation26_spill]] %s4702_s28  ;;  %p142_p7 = scmp.eq.s32.totalorder %s4686_s3, 1 }
  0x1c   : > { %s8563_s30 = scalar_select %p4710_p6, 1, 0 }
  0x1d   : > { %p148_p8 = scmp.eq.s32.totalorder %s4008_s24, 1  ;;  %p4009_p9 = scmp.ge.s32.totalorder %s4617_s23, 1 }
  0x1e   : > { %p181_p10 = scmp.lt.s32.totalorder %s4617_s23, 3  ;;  %p4717_p11 = por %p142_p7, %p44_p0 }
  0x1f   : > { %p4721_p12 = por %p148_p8, %p50_p3  ;;  %s8569_s2 = sld [smem:[#allocation193_spill]] }
  0x20   : > { %s8564_s6 = scalar_select %p4717_p11, 1, 0 }
  0x21   : > { %s8566_s7 = scalar_select %p4721_p12, 1, 0 }
  0x22   : > { %8565 = sst [smem:[#allocation27_spill]] %s8564_s6  ;;  %p4725_p13 = pnand %p4009_p9, %p181_p10 }
  0x23   : > { %8567 = sst [smem:[#allocation28_spill]] %s8566_s7  ;;  %p4368_p2 = scmp.lt.s32.totalorder %s4617_s23, 2 }
  0x24   : > { %p4349_p1 = pneg %p4725_p13  ;;  %s4743_s13 = sand.u32 1, %s4613_s22  }
  0x25   : > { %s194_s11 = sshll.u32 %s8569_s2, 4  ;;  %p4747_p3 = pnand %p4368_p2, %p4704_p5  ;;  %s195_s11 = int_to_ptr.vmem [resolvable:$true] %s194_s11 }
  0x26   : > { %p4738_p7 = pnand %p4349_p1, %p8510_p4  ;;  %s4012_s15 = sshll.u32 %s4743_s13, 6 }
  0x27   : > { %s4444_s16 = scalar_lea.vmem %s195_s11, 48  ;;  %s4451_s17 = scalar_lea.vmem %s195_s11, 64 }
  0x28   : > { %p4445_p8 = scmp.ne.s32.totalorder %s195_s11, %s4444_s16  ;;  %p4446_p9 = pneg %p4738_p7 }
  0x29   : > { %p4452_p1 = scmp.lt.s32.totalorder %s195_s11, %s195_s11  ;;  %p4453_p4 = scmp.lt.s32.totalorder %s4451_s17, %s4444_s16 }
  0x2a   : > { %p4447_p10 = pnand %p4446_p9, %p4445_p8 }
  0x2b   : > { %p4454_p12 = por %p4453_p4, %p4452_p1 }
  0x2c   : > { %p4448_p0 = pneg %p4447_p10 }
  0x2e   : > { %p4455_p11 = pnand %p4454_p12, %p4448_p0 }
  0x30   : > { %4458 = shalt.err (!%p4455_p11)
}
  0x31   : > { %s4619_s18 = smov [#allocation11]   ;;  %s4333_s19 = sshll.u32 %s4617_s23, 10 }
  0x32   : > { %4352 = dma.vmem_to_smem (!%p4738_p7), %s195_s11, 48, %s4619_s18, [#allocation8]  }
  0x33   : > { %s212_s24 = scalar_lea.vmem [#allocation5], %s4012_s15  ;;  %s8572_s0 = sld [smem:[#allocation191_spill]] }
  0x34   : > { %s219_s26 = sshll.u32 %s212_s24, 4  ;;  %s209_s10 = scalar_lea.sflag [#allocation6], %s4743_s13  ;;  %s4762_s26 = int_to_ptr.vmem [resolvable:$true] %s219_s26 }
  0x35   : > { %p4461_p5 = pneg %p4747_p3 }
  0x39   : > { %s4760_s9 = scalar_lea.hbm %s8572_s0, %s4333_s19  ;;  %s4464_s16 = scalar_lea.hbm %s8572_s0, 2048 }
  0x3a   : > { %s4459_s12 = scalar_lea.hbm %s4760_s9, 1024  ;;  %p4465_p0 = scmp.lt.s32.totalorder %s4760_s9, %s8572_s0 }
  0x3b   : > { %p4460_p4 = scmp.ne.s32.totalorder %s4760_s9, %s4459_s12  ;;  %p4466_p2 = scmp.lt.s32.totalorder %s4464_s16, %s4459_s12 }
  0x3d   : > { %p4462_p11 = pnand %p4461_p5, %p4460_p4  ;;  %p4467_p7 = por %p4466_p2, %p4465_p0 }
  0x3f   : > { %p4463_p12 = pneg %p4462_p11 }
  0x41   : > { %p4468_p8 = pnand %p4467_p7, %p4463_p12 }
  0x43   : > { %4471 = shalt.err (!%p4468_p8)
}
  0x44   : > { %s4472_s19 = scalar_lea.vmem %s4762_s26, 1024  ;;  %s4620_s24 = smov [#allocation5]  }
  0x45   : > { %p4473_p9 = scmp.ne.s32.totalorder %s4762_s26, %s4472_s19  ;;  %s4477_s27 = sshll.u32 %s4620_s24, 4  ;;  %s4478_s27 = int_to_ptr.vmem [resolvable:$false] %s4477_s27 }
  0x46   : > { %s4479_s29 = scalar_lea.vmem %s4478_s27, 2048  ;;  %p4480_p4 = scmp.lt.s32.totalorder %s4762_s26, %s4478_s27 }
  0x47   : > { %p4475_p10 = pnand %p4473_p9, %p4461_p5  ;;  %p4481_p11 = scmp.lt.s32.totalorder %s4479_s29, %s4472_s19 }
  0x49   : > { %p4476_p1 = pneg %p4475_p10  ;;  %p4482_p6 = por %p4481_p11, %p4480_p4 }
  0x4b   : > { %p4483_p0 = pnand %p4482_p6, %p4476_p1 }
  0x4d   : > { %4486 = shalt.err (!%p4483_p0)
}
  0x4e   : > { %s4621_s12 = smov 128   ;;  %s4622_s11 = smov 8  }
  0x4f   : > { %4356 = dma.hbm_to_vmem [thread:$0]  (!%p4747_p3), %s4760_s9, 1024, %s4762_s26, %s209_s10, %s4621_s12, %s4621_s12, %s4622_s11  }
  0x50   : > { %s4015_s15 = sshll.u32 %s4743_s13, 4  ;;  %s4334_s16 = sshll.u32 %s4617_s23, 8 }
  0x51   : > { %s8573_s1 = sld [smem:[#allocation192_spill]]  ;;  %s233_s24 = scalar_lea.vmem [#allocation9], %s4015_s15 }
  0x52   : > { %s240_s27 = sshll.u32 %s233_s24, 4  ;;  %s230_s29 = scalar_lea.sflag [#allocation10], %s4743_s13  ;;  %s4801_s27 = int_to_ptr.vmem [resolvable:$true] %s240_s27 }
  0x57   : > { %s4799_s19 = scalar_lea.hbm %s8573_s1, %s4334_s16  ;;  %s4492_s10 = scalar_lea.hbm %s8573_s1, 512 }
  0x58   : > { %s4487_s0 = scalar_lea.hbm %s4799_s19, 256  ;;  %p4493_p7 = scmp.lt.s32.totalorder %s4799_s19, %s8573_s1 }
  0x59   : > { %p4488_p6 = scmp.ne.s32.totalorder %s4799_s19, %s4487_s0  ;;  %p4494_p8 = scmp.lt.s32.totalorder %s4492_s10, %s4487_s0 }
  0x5b   : > { %p4490_p12 = pnand %p4488_p6, %p4461_p5  ;;  %p4495_p9 = por %p4494_p8, %p4493_p7 }
  0x5d   : > { %p4491_p2 = pneg %p4490_p12 }
  0x5f   : > { %p4496_p10 = pnand %p4495_p9, %p4491_p2 }
  0x61   : > { %4499 = shalt.err (!%p4496_p10)
}
  0x62   : > { %s4500_s13 = scalar_lea.vmem %s4801_s27, 256  ;;  %s4623_s15 = smov [#allocation9]  }
  0x63   : > { %p4501_p1 = scmp.ne.s32.totalorder %s4801_s27, %s4500_s13  ;;  %s4505_s18 = sshll.u32 %s4623_s15, 4  ;;  %s4506_s18 = int_to_ptr.vmem [resolvable:$false] %s4505_s18 }
  0x64   : > { %s4507_s24 = scalar_lea.vmem %s4506_s18, 512  ;;  %p4508_p0 = scmp.lt.s32.totalorder %s4801_s27, %s4506_s18 }
  0x65   : > { %p4503_p4 = pnand %p4501_p1, %p4461_p5  ;;  %p4509_p6 = scmp.lt.s32.totalorder %s4507_s24, %s4500_s13 }
  0x67   : > { %p4504_p11 = pneg %p4503_p4  ;;  %p4510_p12 = por %p4509_p6, %p4508_p0 }
  0x69   : > { %p4511_p7 = pnand %p4510_p12, %p4504_p11 }
  0x6b   : > { %4514 = shalt.err (!%p4511_p7)
}
  0x6c   : > { %4359 = dma.hbm_to_vmem [thread:$0]  (!%p4747_p3), %s4799_s19, 256, %s4801_s27, %s230_s29, %s4621_s12, %s4621_s12, %s4622_s11  }
  0x6d   : > { %252 = sbr.rel (%p4725_p13) target bundleno = 1228 (0x4cc), region = 36 }
  0x72   : > { %s4832_s0 = sand.u32 1, %s4609_s21   ;;  %p8575_p5 = scmp.ne.s32.totalorder %s8563_s30, 0 }
  0x73   : > { %8574 = sst [smem:[#allocation29_spill]] %s4832_s0  ;;  %s4019_s26 = sshll.u32 %s4832_s0, 6 }
  0x74   : > { %s255_s9 = scalar_lea.sflag [#allocation6], %s4832_s0  ;;  %s4836_s10 = scalar_lea.vmem [#allocation5], %s4019_s26 }
  0x75   : > { %4584 = dma.done.wait (%p8575_p5), %s255_s9, 1024  }
  0x76   : > { %4586 = vsyncadd (%p8575_p5), %s255_s9, 4294966272  ;;  %s8513_s8 = sshll.u32 %s4832_s0, 4  ;;  %s264_s14 = scalar_lea.sflag [#allocation10], %s4832_s0 }
  0x77   : > { %s267_s12 = scalar_lea.vmem [#allocation9], %s8513_s8 }
  0x78   : > { %4588 = dma.done.wait (%p8575_p5), %s264_s14, 256  }
  0x79   : > { %4590 = vsyncadd (%p8575_p5), %s264_s14, 4294967040  ;;  %p8576_p13 = scmp.eq.s32.totalorder %s4686_s3, 0 }
  0x7b   : > { %4592 = dma.done.wait (%p8576_p13), [#allocation8], 48   ;;  %p8577_p3 = pmov %p8576_p13 }
  0x7d   : > { %4594 = vsyncadd (%p8577_p3), [#allocation8], 4294967248 }
  0x7e   : > { %276 = sfence }
  0x7f   : > { %v309_v0 = vld [vmem:[%s267_s12] sm:$0xff]  ;;  %vm311_vm0 = vcmask 146432   ;;  %v310_v5 = vld [vmem:[%s267_s12 + $0x8] sm:$0xff]  ;;  %v4624_v8 = vmov 0.0   ;;  %vm314_vm1 = vcmask 140288   ;;  %s4625_s30 = smov 1  }
  0x80   : > { %v330_v1 = vld [vmem:[%s4836_s10 + $0x10] sm:$0xff]  ;;  %v328_v2 = vld [vmem:[%s4836_s10] sm:$0xff]  ;;  %v331_v6 = vld [vmem:[%s4836_s10 + $0x18] sm:$0xff]  ;;  %316 = vst.msk [vmem:[#allocation2 + $0x18] sm:$0xff] %vm311_vm0, %v4624_v8  ;;  %s4872_s11 = sld [smem:[#allocation11 + $0x1]]  ;;  %vm376_vm2 = vcmask 138248  }
  0x81   : > { %v338_v3 = vmul.f32 %v330_v1, %v309_v0  ;;  %v336_v4 = vmul.f32 %v328_v2, %v309_v0  ;;  %v329_v7 = vld [vmem:[%s4836_s10 + $0x8] sm:$0xff]  ;;  %317 = vst.msk [vmem:[#allocation2 + $0x20] sm:$0xff] %vm311_vm0, %v4624_v8  ;;  %312 = vst.msk [vmem:[#allocation2] sm:$0xff] %vm311_vm0, %v4624_v8  ;;  %v339_v9 = vmul.f32 %v331_v6, %v310_v5  ;;  %v332_v12 = vld [vmem:[%s4836_s10 + $0x20] sm:$0xff]  ;;  %s4874_s19 = sld [smem:[#allocation11 + $0x25]]  ;;  %vm3779_vm3 = vcmask 130048  }
  0x82   : > { %313 = vst.msk [vmem:[#allocation2 + $0x8] sm:$0xff] %vm311_vm0, %v4624_v8  ;;  %319 = vst.msk [vmem:[#allocation2 + $0x30] sm:$0xff] %vm311_vm0, %v4624_v8  ;;  %v337_v10 = vmul.f32 %v329_v7, %v310_v5  ;;  %v333_v11 = vld [vmem:[%s4836_s10 + $0x28] sm:$0xff]  ;;  %v340_v14 = vmul.f32 %v332_v12, %v309_v0  ;;  %v335_v15 = vld [vmem:[%s4836_s10 + $0x38] sm:$0xff]  ;;  %s4876_s27 = sld [smem:[#allocation11 + $0x49]] }
  0x83   : > { %320 = vst.msk [vmem:[#allocation2 + $0x38] sm:$0xff] %vm311_vm0, %v4624_v8  ;;  %322 = vst.msk [vmem:[#allocation2 + $0x48] sm:$0xff] %vm311_vm0, %v4624_v8  ;;  %356 = vrot.lane.b32.xlu1 %v338_v3, %s4625_s30  ;;  %352 = vrot.lane.b32.xlu0 %v336_v4, %s4625_s30  ;;  %v341_v13 = vmul.f32 %v333_v11, %v310_v5  ;;  %v334_v16 = vld [vmem:[%s4836_s10 + $0x30] sm:$0xff]  ;;  %v343_v17 = vmul.f32 %v335_v15, %v310_v5  ;;  %s4878_s29 = sld [smem:[#allocation11 + $0x6d]] }
  0x84   : > { %323 = vst.msk [vmem:[#allocation2 + $0x50] sm:$0xff] %vm311_vm0, %v4624_v8  ;;  %325 = vst.msk [vmem:[#allocation3] sm:$0xff] %vm311_vm0, %v4624_v8  ;;  %v342_v18 = vmul.f32 %v334_v16, %v309_v0  ;;  %s4880_s16 = sld [smem:[#allocation11 + $0x91]] }
  0x85   : > { %326 = vst.msk [vmem:[#allocation3 + $0x8] sm:$0xff] %vm311_vm0, %v4624_v8  ;;  %s4882_s17 = sld [smem:[#allocation11 + $0xb5]] }
  0x86   : > { %318 = vst.msk [vmem:[#allocation2 + $0x28] sm:$0x3] %vm314_vm1, %v4624_v8  ;;  %315 = vst.msk [vmem:[#allocation2 + $0x10] sm:$0x3] %vm314_vm1, %v4624_v8  ;;  %s4884_s13 = sld [smem:[#allocation11 + $0xd9]]  ;;  %v614_v27 = vstv %s4872_s11 }
  0x87   : > { %321 = vst.msk [vmem:[#allocation2 + $0x40] sm:$0x3] %vm314_vm1, %v4624_v8  ;;  %324 = vst.msk [vmem:[#allocation2 + $0x58] sm:$0x3] %vm314_vm1, %v4624_v8  ;;  %358 = vrot.lane.b32.xlu1 %v339_v9, %s4625_s30  ;;  %354 = vrot.lane.b32.xlu0 %v337_v10, %s4625_s30  ;;  %s4886_s15 = sld [smem:[#allocation11 + $0xfd]]  ;;  %v628_v28 = vstv %s4874_s19 }
  0x88   : > { %327 = vst.msk [vmem:[#allocation3 + $0x10] sm:$0x3] %vm314_vm1, %v4624_v8  ;;  %s4888_s18 = sld [smem:[#allocation11]]  ;;  %v642_v29 = vstv %s4876_s27 }
  0x89   : > { %8578 = sst [smem:[#allocation30_spill]] %s4878_s29  ;;  %v656_v30 = vstv %s4878_s29 }
  0x8a   : > { %s4890_s24 = sld [smem:[#allocation11 + $0x9]]  ;;  %v670_v33 = vstv %s4880_s16 }
  0x8b   : > { %362 = vrot.lane.b32.xlu1 %v341_v13, %s4625_s30  ;;  %360 = vrot.lane.b32.xlu0 %v340_v14, %s4625_s30  ;;  %s4892_s26 = sld [smem:[#allocation11 + $0x12]]  ;;  %v684_v34 = vstv %s4882_s17 }
  0x8c   : > { %s4894_s9 = sld [smem:[#allocation11 + $0x1b]]  ;;  %v698_v35 = vstv %s4884_s13 }
  0x8d   : > { %8579 = sst [smem:[#allocation31_spill]] %s4886_s15  ;;  %v712_v36 = vstv %s4886_s15 }
  0x8e   : > { %s4896_s10 = sld [smem:[#allocation11 + $0x24]]  ;;  %v410_v37 = vstv %s4888_s18 }
  0x8f   : > { %366 = vrot.lane.b32.xlu1 %v343_v17, %s4625_s30  ;;  %364 = vrot.lane.b32.xlu0 %v342_v18, %s4625_s30  ;;  %s4898_s14 = sld [smem:[#allocation11 + $0x2d]] }
  0x90   : > { %s4900_s12 = sld [smem:[#allocation11 + $0x36]]  ;;  %v458_v38 = vstv %s4890_s24 }
  0x91   : > { %s4904_s8 = sld [smem:[#allocation11 + $0x48]]  ;;  %v506_v39 = vstv %s4892_s26  ;;  %s4626_s26 = smov 127  }
  0x92   : > { %s4906_s1 = sld [smem:[#allocation11 + $0x51]]  ;;  %v554_v40 = vstv %s4894_s9 }
  0x93   : > { %389 = vrot.lane.b32.xlu1 %v310_v5, %s4625_s30  ;;  %387 = vrot.lane.b32.xlu0 %v309_v0, %s4625_s30  ;;  %s4902_s30 = sld [smem:[#allocation11 + $0x3f]] }
  0x94   : > { %s4910_s2 = sld [smem:[#allocation11 + $0x5a]]  ;;  %v416_v41 = vstv %s4896_s10 }
  0x95   : > { %s4912_s28 = sld [smem:[#allocation11 + $0x63]]  ;;  %v464_v42 = vstv %s4898_s14 }
  0x96   : > { %s4914_s22 = sld [smem:[#allocation11 + $0x6c]]  ;;  %v512_v43 = vstv %s4900_s12 }
  0x97   : > { %s4916_s21 = sld [smem:[#allocation11 + $0x75]]  ;;  %v422_v45 = vstv %s4904_s8 }
  0x98   : > { %s4920_s25 = sld [smem:[#allocation11 + $0x7e]]  ;;  %v470_v46 = vstv %s4906_s1 }
  0x99   : > { %s4922_s23 = sld [smem:[#allocation11 + $0x87]]  ;;  %v560_v44 = vstv %s4902_s30 }
  0x9a   : > { %s4924_s7 = sld [smem:[#allocation11 + $0x90]]  ;;  %v518_v47 = vstv %s4910_s2 }
  0x9b   : > { %s4926_s20 = sld [smem:[#allocation11 + $0x99]]  ;;  %v566_v48 = vstv %s4912_s28 }
  0x9c   : > { %s4930_s4 = sld [smem:[#allocation11 + $0xa2]]  ;;  %v428_v52 = vstv %s4914_s22 }
  0x9d   : > { %s4932_s5 = sld [smem:[#allocation11 + $0xab]]  ;;  %v476_v53 = vstv %s4916_s21 }
  0x9e   : > { %s4934_s6 = sld [smem:[#allocation11 + $0xb4]]  ;;  %v524_v54 = vstv %s4920_s25 }
  0x9f   : > { %s4936_s3 = sld [smem:[#allocation11 + $0xbd]]  ;;  %v572_v55 = vstv %s4922_s23 }
  0xa0   : > { %s4940_s0 = sld [smem:[#allocation11 + $0xc6]]  ;;  %v434_v58 = vstv %s4924_s7 }
  0xa1   : > { %s4960_s29 = sld [smem:[#allocation11 + $0xe1]]  ;;  %v482_v59 = vstv %s4926_s20 }
  0xa2   : > { %8580 = sst [smem:[#allocation32_spill]] %s4930_s4 }
  0xa3   : > { %s4942_s4 = sld [smem:[#allocation11 + $0xcf]]  ;;  %v578_v61 = vstv %s4932_s5 }
  0xa4   : > { %8581 = sst [smem:[#allocation33_spill]] %s4934_s6 }
  0xa5   : > { %s4948_s6 = sld [smem:[#allocation11 + $0xd8]]  ;;  %v488_v1 = vstv %s4936_s3 }
  0xa6   : > { %s8582_s15 = sld [smem:[#allocation32_spill]]  ;;  %v536_v2 = vstv %s4940_s0 }
  0xa7   : > { %s8583_s18 = sld [smem:[#allocation33_spill]]  ;;  %v494_v18 = vstv %s4960_s29 }
  0xa8   : > { %s4988_s24 = sld [smem:[#allocation11 + $0xea]] }
  0xa9   : > { %v584_v3 = vstv %s4942_s4  ;;  %s5023_s9 = sld [smem:[#allocation11 + $0xf3]] }
  0xaa   : > { %s5046_s11 = sld [smem:[#allocation11 + $0xfc]] }
  0xab   : > { %v446_v8 = vstv %s4948_s6  ;;  %s5082_s19 = sld [smem:[#allocation11 + $0x105]] }
  0xac   : > { %v530_v60 = vstv %s8582_s15  ;;  %s5121_s1 = sld [smem:[#allocation11 + $0x10e]] }
  0xad   : > { %v440_v0 = vstv %s8583_s18  ;;  %s5155_s2 = sld [smem:[#allocation11 + $0x117]] }
  0xae   : > { %s5213_s5 = sld [smem:[#allocation11 + $0xa]] }
  0xaf   : > { %s5246_s20 = sld [smem:[#allocation11 + $0x2e]] }
  0xb0   : > { %s4065_s21 = sld [smem:[#allocation11 + $0x52]] }
  0xb1   : > { %s4066_s22 = sld [smem:[#allocation11 + $0x76]] }
  0xb2   : > { %s4067_s23 = sld [smem:[#allocation11 + $0x9a]] }
  0xb3   : > { %s4068_s3 = sld [smem:[#allocation11 + $0xbe]] }
  0xb4   : > { %s4069_s25 = sld [smem:[#allocation11 + $0xe2]] }
  0xb5   : > { %s4070_s28 = sld [smem:[#allocation11 + $0x106]] }
  0xb6   : > { %s4071_s6 = sld [smem:[#allocation11 + $0x13]] }
  0xb7   : > { %s4072_s7 = sld [smem:[#allocation11 + $0x37]] }
  0xb8   : > { %s4073_s0 = sld [smem:[#allocation11 + $0x5b]] }
  0xb9   : > { %s4074_s8 = sld [smem:[#allocation11 + $0x7f]] }
  0xba   : > { %s4075_s27 = sld [smem:[#allocation11 + $0xa3]] }
  0xbb   : > { %s4076_s29 = sld [smem:[#allocation11 + $0xc7]] }
  0xbc   : > { %s4077_s16 = sld [smem:[#allocation11 + $0xeb]] }
  0xbd   : > { %s4078_s17 = sld [smem:[#allocation11 + $0x10f]] }
  0xbe   : > { %s4079_s13 = sld [smem:[#allocation11 + $0x1c]] }
  0xbf   : > { %s4080_s15 = sld [smem:[#allocation11 + $0x40]] }
  0xc0   : > { %s4081_s14 = sld [smem:[#allocation11 + $0x64]] }
  0xc1   : > { %s4082_s12 = sld [smem:[#allocation11 + $0x88]] }
  0xc2   : > { %s4083_s30 = sld [smem:[#allocation11 + $0xac]] }
  0xc3   : > { %s4084_s18 = sld [smem:[#allocation11 + $0xd0]] }
  0xc4   : > { %s4087_s10 = sld [smem:[#allocation11 + $0x2]] }
  0xc5   : > { %s4092_s4 = sld [smem:[#allocation11 + $0xb6]] }
  0xf5   : > { %v357_v19 = vpop.permute.xlu1 %356  ;;  %v353_v20 = vpop.permute.xlu0 %352 }
  0xf6   : > { %379 = vst.msk [vmem:[#allocation2 + $0x19] sm:$0xff] %vm376_vm2, %v357_v19  ;;  %377 = vst.msk [vmem:[#allocation2 + $0x1] sm:$0xff] %vm376_vm2, %v353_v20 }
  0xf9   : > { %v359_v21 = vpop.permute.xlu1 %358  ;;  %v355_v22 = vpop.permute.xlu0 %354 }
  0xfa   : > { %380 = vst.msk [vmem:[#allocation2 + $0x21] sm:$0xff] %vm376_vm2, %v359_v21  ;;  %378 = vst.msk [vmem:[#allocation2 + $0x9] sm:$0xff] %vm376_vm2, %v355_v22 }
  0xfd   : > { %v363_v23 = vpop.permute.xlu1 %362  ;;  %v361_v24 = vpop.permute.xlu0 %360  ;;  %v4970_v49 = vld [vmem:[#allocation2] sm:$0xff]  ;;  %v4980_v56 = vld [vmem:[#allocation2 + $0x18] sm:$0xff] }
  0xfe   : > { %382 = vst.msk [vmem:[#allocation2 + $0x39] sm:$0xff] %vm376_vm2, %v363_v23  ;;  %381 = vst.msk [vmem:[#allocation2 + $0x31] sm:$0xff] %vm376_vm2, %v361_v24  ;;  %v615_v5 = vmul.f32 %v614_v27, %v4970_v49  ;;  %v629_v11 = vmul.f32 %v628_v28, %v4970_v49  ;;  %v411_v13 = vmul.f32 %v410_v37, %v4970_v49 }
  0xff   : > { %v459_v14 = vmul.f32 %v458_v38, %v4980_v56  ;;  %v643_v20 = vmul.f32 %v642_v29, %v4970_v49 }
 0x101   : > { %v367_v25 = vpop.permute.xlu1 %366  ;;  %v365_v26 = vpop.permute.xlu0 %364  ;;  %v4972_v50 = vld [vmem:[#allocation2 + $0x20] sm:$0xff]  ;;  %v4974_v51 = vld [vmem:[#allocation2 + $0x8] sm:$0xff]  ;;  %v461_v21 = vadd.f32 %v459_v14, %v411_v13 }
 0x102   : > { %384 = vst.msk [vmem:[#allocation2 + $0x51] sm:$0xff] %vm376_vm2, %v367_v25  ;;  %383 = vst.msk [vmem:[#allocation2 + $0x49] sm:$0xff] %vm376_vm2, %v365_v26  ;;  %v412_v6 = vmul.f32 %v410_v37, %v4974_v51  ;;  %v460_v7 = vmul.f32 %v458_v38, %v4972_v50  ;;  %v616_v19 = vmul.f32 %v614_v27, %v4974_v51 }
 0x103   : > { %v418_v24 = vmul.f32 %v416_v41, %v4974_v51  ;;  %v466_v25 = vmul.f32 %v464_v42, %v4972_v50  ;;  %v465_v37 = vmul.f32 %v464_v42, %v4980_v56  ;;  %v424_v13 = vmul.f32 %v422_v45, %v4974_v51 }
 0x104   : > { %v462_v15 = vadd.f32 %v460_v7, %v412_v6  ;;  %v542_v6 = vstv %s4988_s24  ;;  %v472_v14 = vmul.f32 %v470_v46, %v4972_v50  ;;  %s4085_s24 = sld [smem:[#allocation11 + $0xf4]] }
 0x105   : > { %v390_v31 = vpop.permute.xlu1 %389  ;;  %v388_v32 = vpop.permute.xlu0 %387  ;;  %v4982_v57 = vld [vmem:[#allocation2 + $0x38] sm:$0xff]  ;;  %v4990_v62 = vld [vmem:[#allocation2 + $0x30] sm:$0xff] }
 0x106   : > { %394 = vst.msk [vmem:[#allocation3 + $0x9] sm:$0xff] %vm376_vm2, %v390_v31  ;;  %393 = vst.msk [vmem:[#allocation3 + $0x1] sm:$0xff] %vm376_vm2, %v388_v32  ;;  %v508_v12 = vmul.f32 %v506_v39, %v4982_v57  ;;  %v507_v17 = vmul.f32 %v506_v39, %v4990_v62  ;;  %v514_v26 = vmul.f32 %v512_v43, %v4982_v57 }
 0x107   : > { %v417_v32 = vmul.f32 %v416_v41, %v4970_v49  ;;  %v468_v39 = vadd.f32 %v466_v25, %v418_v24  ;;  %v657_v41 = vmul.f32 %v656_v30, %v4970_v49  ;;  %v519_v24 = vmul.f32 %v518_v47, %v4990_v62 }
 0x108   : > { %v510_v23 = vadd.f32 %v508_v12, %v462_v15  ;;  %v509_v31 = vadd.f32 %v507_v17, %v461_v21  ;;  %v630_v12 = vmul.f32 %v628_v28, %v4974_v51  ;;  %v423_v28 = vmul.f32 %v422_v45, %v4970_v49 }
 0x109   : > { %v4992_v63 = vld [vmem:[#allocation2 + $0x50] sm:$0xff]  ;;  %v4998_v4 = vld [vmem:[#allocation2 + $0x48] sm:$0xff]  ;;  %v467_v7 = vadd.f32 %v465_v37, %v417_v32  ;;  %v471_v21 = vmul.f32 %v470_v46, %v4980_v56  ;;  %v644_v45 = vmul.f32 %v642_v29, %v4974_v51  ;;  %v430_v29 = vmul.f32 %v428_v52, %v4974_v51 }
 0x10a   : > { %v556_v16 = vmul.f32 %v554_v40, %v4992_v63  ;;  %v555_v22 = vmul.f32 %v554_v40, %v4998_v4  ;;  %v562_v27 = vmul.f32 %v560_v44, %v4992_v63  ;;  %v513_v40 = vmul.f32 %v512_v43, %v4990_v62 }
 0x10b   : > { %v516_v43 = vadd.f32 %v514_v26, %v468_v39  ;;  %v473_v26 = vadd.f32 %v471_v21, %v423_v28  ;;  %v567_v46 = vmul.f32 %v566_v48, %v4998_v4  ;;  %v477_v37 = vmul.f32 %v476_v53, %v4980_v56 }
 0x10c   : > { %v5042_v38 = vadd.f32 %v556_v16, %v510_v23  ;;  %v5051_v42 = vadd.f32 %v555_v22, %v509_v31  ;;  %v515_v15 = vadd.f32 %v513_v40, %v467_v7  ;;  %v520_v16 = vmul.f32 %v518_v47, %v4982_v57 }
 0x10d   : > { %v5006_v9 = vld [vmem:[#allocation3 + $0x8] sm:$0xff]  ;;  %v5008_v10 = vld [vmem:[#allocation3] sm:$0xff]  ;;  %v5076_v17 = vadd.f32 %v562_v27, %v516_v43  ;;  %v590_v22 = vstv %s5023_s9  ;;  %v658_v23 = vmul.f32 %v656_v30, %v4974_v51  ;;  %v478_v30 = vmul.f32 %v476_v53, %v4972_v50  ;;  %s4086_s9 = sld [smem:[#allocation11 + $0x118]] }
 0x10e   : > { %605 = vrot.lane.b32.xlu1 %v5006_v9, %s4626_s26  ;;  %603 = vrot.lane.b32.xlu0 %v5008_v10, %s4626_s26  ;;  %v526_v31 = vmul.f32 %v524_v54, %v4982_v57  ;;  %v574_v47 = vmul.f32 %v572_v55, %v4992_v63  ;;  %v429_v27 = vmul.f32 %v428_v52, %v4970_v49  ;;  %v452_v39 = vstv %s5046_s11  ;;  %s4088_s11 = sld [smem:[#allocation11 + $0x26]] }
 0x10f   : > { %v521_v32 = vadd.f32 %v519_v24, %v473_v26  ;;  %v480_v40 = vadd.f32 %v478_v30, %v430_v29  ;;  %v525_v52 = vmul.f32 %v524_v54, %v4990_v62  ;;  %v436_v7 = vmul.f32 %v434_v58, %v4974_v51 }
 0x110   : > { %v484_v53 = vmul.f32 %v482_v59, %v4972_v50  ;;  %v532_v43 = vmul.f32 %v530_v60, %v4982_v57  ;;  %v500_v28 = vstv %s5082_s19  ;;  %v672_v21 = vmul.f32 %v670_v33, %v4974_v51  ;;  %s4089_s19 = sld [smem:[#allocation11 + $0x4a]] }
 0x111   : > { %v528_v54 = vadd.f32 %v526_v31, %v480_v40  ;;  %v685_v24 = vmul.f32 %v684_v34, %v4970_v49  ;;  %v489_v29 = vmul.f32 %v488_v1, %v4980_v56  ;;  %v548_v30 = vstv %s5121_s1  ;;  %s4627_s1 = smov 126  }
 0x112   : > { %621 = vrot.lane.b32.xlu1 %v616_v19, %s4626_s26  ;;  %619 = vrot.lane.b32.xlu0 %v615_v5, %s4626_s26  ;;  %v561_v5 = vmul.f32 %v560_v44, %v4998_v4  ;;  %v568_v44 = vmul.f32 %v566_v48, %v4992_v63  ;;  %v474_v19 = vadd.f32 %v472_v14, %v424_v13 }
 0x113   : > { %v580_v13 = vmul.f32 %v578_v61, %v4992_v63  ;;  %v483_v14 = vmul.f32 %v482_v59, %v4980_v56  ;;  %v5160_v59 = vadd.f32 %v574_v47, %v528_v54  ;;  %v448_v40 = vmul.f32 %v446_v8, %v4974_v51 }
 0x114   : > { %v522_v25 = vadd.f32 %v520_v16, %v474_v19  ;;  %v486_v16 = vadd.f32 %v484_v53, %v436_v7  ;;  %v447_v7 = vmul.f32 %v446_v8, %v4970_v49  ;;  %v596_v53 = vstv %s5155_s2  ;;  %s4090_s2 = sld [smem:[#allocation11 + $0x6e]] }
 0x116   : > { %635 = vrot.lane.b32.xlu1 %v630_v12, %s4626_s26  ;;  %633 = vrot.lane.b32.xlu0 %v629_v11, %s4626_s26  ;;  %v5090_v11 = vadd.f32 %v561_v5, %v515_v15  ;;  %v5115_v48 = vadd.f32 %v568_v44, %v522_v25  ;;  %v5132_v5 = vadd.f32 %v567_v46, %v521_v32 }
 0x117   : > { %v479_v12 = vadd.f32 %v477_v37, %v429_v27  ;;  %v531_v44 = vmul.f32 %v530_v60, %v4990_v62  ;;  %v441_v46 = vmul.f32 %v440_v0, %v4970_v49  ;;  %v586_v27 = vmul.f32 %v584_v3, %v4992_v63 }
 0x118   : > { %v537_v32 = vmul.f32 %v536_v2, %v4990_v62  ;;  %v686_v37 = vmul.f32 %v684_v34, %v4974_v51  ;;  %v496_v34 = vmul.f32 %v494_v18, %v4972_v50 }
 0x119   : > { %v527_v15 = vadd.f32 %v525_v52, %v479_v12  ;;  %v699_v52 = vmul.f32 %v698_v35, %v4970_v49  ;;  %v495_v12 = vmul.f32 %v494_v18, %v4980_v56  ;;  %v591_v18 = vmul.f32 %v590_v22, %v4998_v4 }
 0x11a   : > { %649 = vrot.lane.b32.xlu1 %v644_v45, %s4626_s26  ;;  %647 = vrot.lane.b32.xlu0 %v643_v20, %s4626_s26  ;;  %v573_v20 = vmul.f32 %v572_v55, %v4998_v4  ;;  %v435_v55 = vmul.f32 %v434_v58, %v4970_v49  ;;  %v671_v58 = vmul.f32 %v670_v33, %v4970_v49 }
 0x11b   : > { %v534_v45 = vadd.f32 %v532_v43, %v486_v16  ;;  %v538_v33 = vmul.f32 %v536_v2, %v4982_v57  ;;  %v544_v2 = vmul.f32 %v542_v6, %v4982_v57  ;;  %v498_v54 = vadd.f32 %v496_v34, %v448_v40 }
 0x11c   : > { %v485_v19 = vadd.f32 %v483_v14, %v435_v55  ;;  %v5168_v60 = vadd.f32 %v573_v20, %v527_v15  ;;  %v543_v55 = vmul.f32 %v542_v6, %v4990_v62  ;;  %v700_v14 = vmul.f32 %v698_v35, %v4974_v51 }
 0x11d   : > { %v5184_v26 = vadd.f32 %v580_v13, %v534_v45  ;;  %v592_v13 = vmul.f32 %v590_v22, %v4992_v63  ;;  %v497_v8 = vadd.f32 %v495_v12, %v447_v7  ;;  %v546_v16 = vadd.f32 %v544_v2, %v498_v54 }
 0x11e   : > { %663 = vrot.lane.b32.xlu1 %v658_v23, %s4626_s26  ;;  %661 = vrot.lane.b32.xlu0 %v657_v41, %s4626_s26  ;;  %v579_v41 = vmul.f32 %v578_v61, %v4998_v4  ;;  %v442_v23 = vmul.f32 %v440_v0, %v4974_v51  ;;  %v533_v25 = vadd.f32 %v531_v44, %v485_v19 }
 0x11f   : > { %v490_v61 = vmul.f32 %v488_v1, %v4972_v50  ;;  %v491_v0 = vadd.f32 %v489_v29, %v441_v46  ;;  %v585_v1 = vmul.f32 %v584_v3, %v4998_v4  ;;  %v454_v44 = vmul.f32 %v452_v39, %v4974_v51 }
 0x120   : > { %v5193_v31 = vadd.f32 %v579_v41, %v533_v25  ;;  %v502_v6 = vmul.f32 %v500_v28, %v4972_v50  ;;  %v545_v35 = vadd.f32 %v543_v55, %v497_v8  ;;  %v598_v19 = vmul.f32 %v596_v53, %v4992_v63 }
 0x121   : > { %v492_v47 = vadd.f32 %v490_v61, %v442_v23  ;;  %v539_v3 = vadd.f32 %v537_v32, %v491_v0  ;;  %v453_v22 = vmul.f32 %v452_v39, %v4970_v49  ;;  %v5259_v41 = vadd.f32 %v592_v13, %v546_v16 }
 0x122   : > { %677 = vrot.lane.b32.xlu1 %v672_v21, %s4626_s26  ;;  %675 = vrot.lane.b32.xlu0 %v671_v58, %s4626_s26  ;;  %v550_v58 = vmul.f32 %v548_v30, %v4982_v57  ;;  %v504_v21 = vadd.f32 %v502_v6, %v454_v44  ;;  %v501_v45 = vmul.f32 %v500_v28, %v4980_v56  ;;  %v810_v55 = vstv %s4069_s25  ;;  %s4098_s25 = sld [smem:[#allocation11 + $0x77]] }
 0x123   : > { %v540_v20 = vadd.f32 %v538_v33, %v492_v47  ;;  %v5241_v15 = vadd.f32 %v585_v1, %v539_v3  ;;  %v549_v23 = vmul.f32 %v548_v30, %v4990_v62  ;;  %v713_v25 = vmul.f32 %v712_v36, %v4970_v49 }
 0x124   : > { %v5269_v61 = vadd.f32 %v591_v18, %v545_v35  ;;  %v726_v33 = vstv %s5213_s5  ;;  %v552_v46 = vadd.f32 %v550_v58, %v504_v21  ;;  %v503_v39 = vadd.f32 %v501_v45, %v453_v22  ;;  %s4091_s5 = sld [smem:[#allocation11 + $0x92]] }
 0x125   : > { %v5230_v43 = vadd.f32 %v586_v27, %v540_v20  ;;  %v597_v29 = vmul.f32 %v596_v53, %v4998_v4  ;;  %v728_v47 = vmul.f32 %v726_v33, %v4972_v50  ;;  %v727_v27 = vmul.f32 %v726_v33, %v4980_v56 }
 0x126   : > { %691 = vrot.lane.b32.xlu1 %v686_v37, %s4626_s26  ;;  %689 = vrot.lane.b32.xlu0 %v685_v24, %s4626_s26  ;;  %v714_v24 = vmul.f32 %v712_v36, %v4974_v51  ;;  %v5275_v28 = vadd.f32 %v598_v19, %v552_v46  ;;  %v551_v30 = vadd.f32 %v549_v23, %v503_v39  ;;  %v740_v36 = vstv %s5246_s20  ;;  %s4093_s20 = sld [smem:[#allocation11 + $0xda]] }
 0x127   : > { %v742_v37 = vmul.f32 %v740_v36, %v4972_v50  ;;  %v741_v0 = vmul.f32 %v740_v36, %v4980_v56  ;;  %v754_v1 = vstv %s4065_s21  ;;  %v768_v20 = vstv %s4066_s22  ;;  %s4094_s21 = sld [smem:[#allocation11 + $0xfe]] }
 0x128   : > { %v5280_v32 = vadd.f32 %v597_v29, %v551_v30  ;;  %v756_v40 = vmul.f32 %v754_v1, %v4972_v50  ;;  %v770_v34 = vmul.f32 %v768_v20, %v4972_v50  ;;  %v769_v2 = vmul.f32 %v768_v20, %v4980_v56  ;;  %s4095_s22 = sld [smem:[#allocation11 + $0xb]] }
 0x129   : > { %v782_v3 = vstv %s4067_s23  ;;  %v796_v53 = vstv %s4068_s3  ;;  %v811_v8 = vmul.f32 %v810_v55, %v4980_v56  ;;  %v824_v18 = vstv %s4070_s28  ;;  %s4096_s23 = sld [smem:[#allocation11 + $0x2f]] }
 0x12a   : > { %705 = vrot.lane.b32.xlu1 %v700_v14, %s4626_s26  ;;  %703 = vrot.lane.b32.xlu0 %v699_v52, %s4626_s26  ;;  %v755_v52 = vmul.f32 %v754_v1, %v4980_v56  ;;  %v784_v7 = vmul.f32 %v782_v3, %v4972_v50  ;;  %v783_v12 = vmul.f32 %v782_v3, %v4980_v56  ;;  %v838_v6 = vstv %s4071_s6  ;;  %s4097_s3 = sld [smem:[#allocation11 + $0x53]] }
 0x12b   : > { %v798_v54 = vmul.f32 %v796_v53, %v4972_v50  ;;  %v797_v13 = vmul.f32 %v796_v53, %v4980_v56  ;;  %v812_v14 = vmul.f32 %v810_v55, %v4972_v50  ;;  %v826_v16 = vmul.f32 %v824_v18, %v4972_v50  ;;  %s4099_s28 = sld [smem:[#allocation11 + $0x9b]] }
 0x12c   : > { %v825_v44 = vmul.f32 %v824_v18, %v4980_v56  ;;  %v840_v58 = vmul.f32 %v838_v6, %v4982_v57  ;;  %v839_v35 = vmul.f32 %v838_v6, %v4990_v62  ;;  %v852_v19 = vstv %s4072_s7  ;;  %s4100_s6 = sld [smem:[#allocation11 + $0xbf]] }
 0x12d   : > { %v854_v22 = vmul.f32 %v852_v19, %v4982_v57  ;;  %v853_v21 = vmul.f32 %v852_v19, %v4990_v62  ;;  %v866_v45 = vstv %s4073_s0  ;;  %v894_v39 = vstv %s4075_s27  ;;  %s4101_s7 = sld [smem:[#allocation11 + $0xe3]] }
 0x12e   : > { %719 = vrot.lane.b32.xlu1 %v714_v24, %s4626_s26  ;;  %717 = vrot.lane.b32.xlu0 %v713_v25, %s4626_s26  ;;  %v868_v23 = vmul.f32 %v866_v45, %v4982_v57  ;;  %v867_v24 = vmul.f32 %v866_v45, %v4990_v62  ;;  %v880_v25 = vstv %s4074_s8  ;;  %v896_v29 = vmul.f32 %v894_v39, %v4982_v57  ;;  %s4102_s0 = sld [smem:[#allocation11 + $0x107]] }
 0x12f   : > { %v882_v33 = vmul.f32 %v880_v25, %v4982_v57  ;;  %v881_v46 = vmul.f32 %v880_v25, %v4990_v62  ;;  %v895_v30 = vmul.f32 %v894_v39, %v4990_v62  ;;  %v1020_v19 = vstv %s4084_s18  ;;  %s4103_s8 = sld [smem:[#allocation11 + $0x14]] }
 0x130   : > { %v1022_v45 = vmul.f32 %v1020_v19, %v4992_v63  ;;  %s4104_s27 = sld [smem:[#allocation11 + $0x38]] }
 0x131   : > { %s4113_s18 = sld [smem:[#allocation11 + $0x65]] }
 0x132   : > { %733 = vrot.lane.b32.xlu1 %v728_v47, %s4626_s26  ;;  %731 = vrot.lane.b32.xlu0 %v727_v27, %s4626_s26  ;;  %v908_v47 = vstv %s4076_s29  ;;  %s4105_s29 = sld [smem:[#allocation11 + $0x5c]] }
 0x133   : > { %v910_v27 = vmul.f32 %v908_v47, %v4982_v57  ;;  %v909_v36 = vmul.f32 %v908_v47, %v4990_v62 }
 0x136   : > { %747 = vrot.lane.b32.xlu1 %v742_v37, %s4626_s26  ;;  %745 = vrot.lane.b32.xlu0 %v741_v0, %s4626_s26  ;;  %v922_v37 = vstv %s4077_s16  ;;  %s4106_s16 = sld [smem:[#allocation11 + $0x80]] }
 0x137   : > { %v924_v0 = vmul.f32 %v922_v37, %v4982_v57  ;;  %v923_v1 = vmul.f32 %v922_v37, %v4990_v62 }
 0x13a   : > { %761 = vrot.lane.b32.xlu1 %v756_v40, %s4626_s26  ;;  %759 = vrot.lane.b32.xlu0 %v755_v52, %s4626_s26  ;;  %v936_v40 = vstv %s4078_s17  ;;  %s4107_s17 = sld [smem:[#allocation11 + $0xa4]] }
 0x13b   : > { %v938_v52 = vmul.f32 %v936_v40, %v4982_v57  ;;  %v937_v20 = vmul.f32 %v936_v40, %v4990_v62 }
 0x13e   : > { %775 = vrot.lane.b32.xlu1 %v770_v34, %s4626_s26  ;;  %773 = vrot.lane.b32.xlu0 %v769_v2, %s4626_s26  ;;  %v950_v34 = vstv %s4079_s13  ;;  %s4108_s13 = sld [smem:[#allocation11 + $0xc8]] }
 0x13f   : > { %v952_v2 = vmul.f32 %v950_v34, %v4992_v63  ;;  %v951_v3 = vmul.f32 %v950_v34, %v4998_v4 }
 0x142   : > { %789 = vrot.lane.b32.xlu1 %v784_v7, %s4626_s26  ;;  %787 = vrot.lane.b32.xlu0 %v783_v12, %s4626_s26  ;;  %v964_v7 = vstv %s4080_s15  ;;  %s4109_s15 = sld [smem:[#allocation11 + $0xec]] }
 0x143   : > { %v966_v12 = vmul.f32 %v964_v7, %v4992_v63  ;;  %v965_v53 = vmul.f32 %v964_v7, %v4998_v4 }
 0x146   : > { %803 = vrot.lane.b32.xlu1 %v798_v54, %s4626_s26  ;;  %801 = vrot.lane.b32.xlu0 %v797_v13, %s4626_s26  ;;  %v978_v54 = vstv %s4081_s14  ;;  %s4110_s14 = sld [smem:[#allocation11 + $0x110]] }
 0x147   : > { %v980_v13 = vmul.f32 %v978_v54, %v4992_v63  ;;  %v979_v55 = vmul.f32 %v978_v54, %v4998_v4 }
 0x14a   : > { %817 = vrot.lane.b32.xlu1 %v812_v14, %s4626_s26  ;;  %815 = vrot.lane.b32.xlu0 %v811_v8, %s4626_s26  ;;  %v992_v14 = vstv %s4082_s12  ;;  %s4111_s12 = sld [smem:[#allocation11 + $0x1d]] }
 0x14b   : > { %v994_v8 = vmul.f32 %v992_v14, %v4992_v63  ;;  %v993_v18 = vmul.f32 %v992_v14, %v4998_v4 }
 0x14e   : > { %831 = vrot.lane.b32.xlu1 %v826_v16, %s4626_s26  ;;  %829 = vrot.lane.b32.xlu0 %v825_v44, %s4626_s26  ;;  %v1006_v16 = vstv %s4083_s30  ;;  %s4112_s30 = sld [smem:[#allocation11 + $0x41]] }
 0x152   : > { %845 = vrot.lane.b32.xlu1 %v840_v58, %s4626_s26  ;;  %843 = vrot.lane.b32.xlu0 %v839_v35, %s4626_s26  ;;  %v1008_v58 = vmul.f32 %v1006_v16, %v4992_v63  ;;  %v1007_v35 = vmul.f32 %v1006_v16, %v4998_v4  ;;  %v1128_v16 = vstv %s4091_s5  ;;  %s5631_s5 = sld [smem:[#allocation11 + $0x28]] }
 0x156   : > { %859 = vrot.lane.b32.xlu1 %v854_v22, %s4626_s26  ;;  %857 = vrot.lane.b32.xlu0 %v853_v21, %s4626_s26 }
 0x15a   : > { %873 = vrot.lane.b32.xlu1 %v868_v23, %s4626_s26  ;;  %871 = vrot.lane.b32.xlu0 %v867_v24, %s4626_s26  ;;  %v1021_v23 = vmul.f32 %v1020_v19, %v4998_v4  ;;  %v1034_v24 = vstv %s4085_s24  ;;  %v1130_v19 = vmul.f32 %v1128_v16, %v4974_v51  ;;  %s4114_s24 = sld [smem:[#allocation11 + $0x89]] }
 0x15b   : > { %v1035_v39 = vmul.f32 %v1034_v24, %v4998_v4 }
 0x15e   : > { %887 = vrot.lane.b32.xlu1 %v882_v33, %s4626_s26  ;;  %885 = vrot.lane.b32.xlu0 %v881_v46, %s4626_s26  ;;  %v1036_v46 = vmul.f32 %v1034_v24, %v4992_v63 }
 0x162   : > { %901 = vrot.lane.b32.xlu1 %v896_v29, %s4626_s26  ;;  %899 = vrot.lane.b32.xlu0 %v895_v30, %s4626_s26  ;;  %v1048_v29 = vstv %s4086_s9  ;;  %s4115_s9 = sld [smem:[#allocation11 + $0xad]] }
 0x166   : > { %915 = vrot.lane.b32.xlu1 %v910_v27, %s4626_s26  ;;  %913 = vrot.lane.b32.xlu0 %v909_v36, %s4626_s26  ;;  %v1050_v27 = vmul.f32 %v1048_v29, %v4992_v63  ;;  %v1049_v36 = vmul.f32 %v1048_v29, %v4998_v4 }
 0x16a   : > { %929 = vrot.lane.b32.xlu1 %v924_v0, %s4626_s26  ;;  %927 = vrot.lane.b32.xlu0 %v923_v1, %s4626_s26  ;;  %v1072_v1 = vstv %s4087_s10  ;;  %s4116_s10 = sld [smem:[#allocation11 + $0xd1]] }
 0x16b   : > { %v1074_v40 = vmul.f32 %v1072_v1, %v4974_v51 }
 0x16e   : > { %943 = vrot.lane.b32.xlu1 %v938_v52, %s4626_s26  ;;  %941 = vrot.lane.b32.xlu0 %v937_v20, %s4626_s26  ;;  %v1073_v52 = vmul.f32 %v1072_v1, %v4970_v49  ;;  %v1086_v20 = vstv %s4088_s11  ;;  %s4117_s11 = sld [smem:[#allocation11 + $0xf5]] }
 0x172   : > { %957 = vrot.lane.b32.xlu1 %v952_v2, %s4626_s26  ;;  %955 = vrot.lane.b32.xlu0 %v951_v3, %s4626_s26  ;;  %v1087_v2 = vmul.f32 %v1086_v20, %v4970_v49  ;;  %v1100_v3 = vstv %s4089_s19  ;;  %s4118_s19 = sld [smem:[#allocation11 + $0x119]] }
 0x173   : > { %v1101_v54 = vmul.f32 %v1100_v3, %v4970_v49 }
 0x176   : > { %971 = vrot.lane.b32.xlu1 %v966_v12, %s4626_s26  ;;  %969 = vrot.lane.b32.xlu0 %v965_v53, %s4626_s26  ;;  %v1102_v53 = vmul.f32 %v1100_v3, %v4974_v51 }
 0x17a   : > { %985 = vrot.lane.b32.xlu1 %v980_v13, %s4626_s26  ;;  %983 = vrot.lane.b32.xlu0 %v979_v55, %s4626_s26  ;;  %v1114_v13 = vstv %s4090_s2  ;;  %s4151_s2 = sld [smem:[#allocation11 + $0x4]] }
 0x17e   : > { %999 = vrot.lane.b32.xlu1 %v994_v8, %s4626_s26  ;;  %997 = vrot.lane.b32.xlu0 %v993_v18, %s4626_s26  ;;  %v1116_v8 = vmul.f32 %v1114_v13, %v4974_v51  ;;  %v1115_v18 = vmul.f32 %v1114_v13, %v4970_v49 }
 0x180   : > { %v5360_v44 = vpop.permute.xlu1 %605  ;;  %v5362_v6 = vpop.permute.xlu0 %603 }
 0x181   : > { %8586 = vst [vmem:[#allocation34_spill] sm:$0xff] %v5360_v44  ;;  %8587 = vst [vmem:[#allocation35_spill] sm:$0xff] %v5362_v6  ;;  %v1268_v6 = vstv %s4101_s7  ;;  %s5674_s7 = sld [smem:[#allocation11 + $0x79]] }
 0x182   : > { %1013 = vrot.lane.b32.xlu1 %v1008_v58, %s4626_s26  ;;  %1011 = vrot.lane.b32.xlu0 %v1007_v35, %s4626_s26 }
 0x184   : > { %v5368_v22 = vpop.permute.xlu1 %621  ;;  %v5370_v21 = vpop.permute.xlu0 %619 }
 0x186   : > { %1027 = vrot.lane.b32.xlu1 %v1022_v45, %s4626_s26  ;;  %1025 = vrot.lane.b32.xlu0 %v1021_v23, %s4626_s26  ;;  %v1129_v45 = vmul.f32 %v1128_v16, %v4970_v49  ;;  %v1142_v23 = vstv %s4092_s4  ;;  %s5637_s4 = sld [smem:[#allocation11 + $0x4c]] }
 0x187   : > { %v1143_v29 = vmul.f32 %v1142_v23, %v4970_v49 }
 0x188   : > { %v5376_v25 = vpop.permute.xlu1 %635  ;;  %v5378_v33 = vpop.permute.xlu0 %633 }
 0x18a   : > { %1041 = vrot.lane.b32.xlu1 %v1036_v46, %s4626_s26  ;;  %1039 = vrot.lane.b32.xlu0 %v1035_v39, %s4626_s26  ;;  %v1144_v39 = vmul.f32 %v1142_v23, %v4974_v51 }
 0x18c   : > { %v5384_v30 = vpop.permute.xlu1 %649  ;;  %v5386_v47 = vpop.permute.xlu0 %647 }
 0x18e   : > { %1055 = vrot.lane.b32.xlu1 %v1050_v27, %s4626_s26  ;;  %1053 = vrot.lane.b32.xlu0 %v1049_v36, %s4626_s26  ;;  %v1156_v27 = vstv %s4093_s20  ;;  %s5639_s20 = sld [smem:[#allocation11 + $0x70]] }
 0x190   : > { %v5392_v37 = vpop.permute.xlu1 %663  ;;  %v5394_v0 = vpop.permute.xlu0 %661 }
 0x192   : > { %1063 = vrot.lane.b32.xlu1 %v5006_v9, %s4627_s1  ;;  %1061 = vrot.lane.b32.xlu0 %v5008_v10, %s4627_s1  ;;  %v1088_v10 = vmul.f32 %v1086_v20, %v4974_v51  ;;  %v1170_v20 = vstv %s4094_s21  ;;  %s5643_s21 = sld [smem:[#allocation11 + $0x94]] }
 0x193   : > { %v1172_v3 = vmul.f32 %v1170_v20, %v4974_v51 }
 0x194   : > { %v5400_v63 = vpop.permute.xlu1 %677  ;;  %v5402_v4 = vpop.permute.xlu0 %675 }
 0x196   : > { %1079 = vrot.lane.b32.xlu1 %v1074_v40, %s4627_s1  ;;  %1077 = vrot.lane.b32.xlu0 %v1073_v52, %s4627_s1  ;;  %v1158_v40 = vmul.f32 %v1156_v27, %v4974_v51  ;;  %v1157_v52 = vmul.f32 %v1156_v27, %v4970_v49 }
 0x198   : > { %v5408_v34 = vpop.permute.xlu1 %691  ;;  %v5410_v9 = vpop.permute.xlu0 %689 }
 0x19a   : > { %1093 = vrot.lane.b32.xlu1 %v1088_v10, %s4627_s1  ;;  %1091 = vrot.lane.b32.xlu0 %v1087_v2, %s4627_s1 }
 0x19c   : > { %v5416_v7 = vpop.permute.xlu1 %705  ;;  %v5418_v12 = vpop.permute.xlu0 %703 }
 0x19e   : > { %1107 = vrot.lane.b32.xlu1 %v1102_v53, %s4627_s1  ;;  %1105 = vrot.lane.b32.xlu0 %v1101_v54, %s4627_s1  ;;  %v1171_v53 = vmul.f32 %v1170_v20, %v4970_v49  ;;  %v1184_v54 = vstv %s4095_s22  ;;  %v1226_v20 = vstv %s4098_s25  ;;  %s5645_s22 = sld [smem:[#allocation11 + $0xb8]] }
 0x19f   : > { %v1185_v16 = vmul.f32 %v1184_v54, %v4980_v56  ;;  %s5661_s25 = sld [smem:[#allocation11 + $0xd]] }
 0x1a0   : > { %v5424_v55 = vpop.permute.xlu1 %719  ;;  %v5426_v14 = vpop.permute.xlu0 %717 }
 0x1a2   : > { %1121 = vrot.lane.b32.xlu1 %v1116_v8, %s4627_s1  ;;  %1119 = vrot.lane.b32.xlu0 %v1115_v18, %s4627_s1  ;;  %v1186_v18 = vmul.f32 %v1184_v54, %v4972_v50  ;;  %v1228_v54 = vmul.f32 %v1226_v20, %v4972_v50 }
 0x1a4   : > { %v5432_v58 = vpop.permute.xlu1 %733  ;;  %v5434_v35 = vpop.permute.xlu0 %731 }
 0x1a6   : > { %1135 = vrot.lane.b32.xlu1 %v1130_v19, %s4627_s1  ;;  %1133 = vrot.lane.b32.xlu0 %v1129_v45, %s4627_s1  ;;  %v1198_v19 = vstv %s4096_s23  ;;  %s5653_s23 = sld [smem:[#allocation11 + $0xdc]] }
 0x1a7   : > { %v1200_v45 = vmul.f32 %v1198_v19, %v4972_v50  ;;  %v1199_v23 = vmul.f32 %v1198_v19, %v4980_v56 }
 0x1a8   : > { %v5440_v24 = vpop.permute.xlu1 %747  ;;  %v5442_v46 = vpop.permute.xlu0 %745 }
 0x1a9   : > { %8588 = vst [vmem:[#allocation36_spill] sm:$0xff] %v5440_v24  ;;  %8589 = vst [vmem:[#allocation37_spill] sm:$0xff] %v5442_v46 }
 0x1aa   : > { %1149 = vrot.lane.b32.xlu1 %v1144_v39, %s4627_s1  ;;  %1147 = vrot.lane.b32.xlu0 %v1143_v29, %s4627_s1  ;;  %v1212_v39 = vstv %s4097_s3  ;;  %s5657_s3 = sld [smem:[#allocation11 + $0x100]] }
 0x1ac   : > { %v5448_v36 = vpop.permute.xlu1 %761  ;;  %v5450_v1 = vpop.permute.xlu0 %759 }
 0x1ad   : > { %8590 = vst [vmem:[#allocation38_spill] sm:$0xff] %v5448_v36  ;;  %8591 = vst [vmem:[#allocation39_spill] sm:$0xff] %v5450_v1 }
 0x1ae   : > { %1163 = vrot.lane.b32.xlu1 %v1158_v40, %s4627_s1  ;;  %1161 = vrot.lane.b32.xlu0 %v1157_v52, %s4627_s1  ;;  %v1214_v40 = vmul.f32 %v1212_v39, %v4972_v50  ;;  %v1213_v52 = vmul.f32 %v1212_v39, %v4980_v56 }
 0x1b0   : > { %v5456_v10 = vpop.permute.xlu1 %775  ;;  %v5458_v2 = vpop.permute.xlu0 %773 }
 0x1b1   : > { %8592 = vst [vmem:[#allocation40_spill] sm:$0xff] %v5456_v10  ;;  %8593 = vst [vmem:[#allocation41_spill] sm:$0xff] %v5458_v2 }
 0x1b2   : > { %1177 = vrot.lane.b32.xlu1 %v1172_v3, %s4627_s1  ;;  %1175 = vrot.lane.b32.xlu0 %v1171_v53, %s4627_s1 }
 0x1b4   : > { %v5464_v13 = vpop.permute.xlu1 %789  ;;  %v5466_v8 = vpop.permute.xlu0 %787 }
 0x1b5   : > { %8594 = vst [vmem:[#allocation42_spill] sm:$0xff] %v5464_v13  ;;  %8595 = vst [vmem:[#allocation43_spill] sm:$0xff] %v5466_v8  ;;  %v5827_v13 = vld [vmem:[#allocation2 + $0x39] sm:$0xff] }
 0x1b6   : > { %1191 = vrot.lane.b32.xlu1 %v1186_v18, %s4627_s1  ;;  %1189 = vrot.lane.b32.xlu0 %v1185_v16, %s4627_s1  ;;  %v1227_v18 = vmul.f32 %v1226_v20, %v4980_v56  ;;  %v1240_v16 = vstv %s4099_s28  ;;  %s5663_s28 = sld [smem:[#allocation11 + $0x31]]  ;;  %8660 = vst [vmem:[#allocation108_spill] sm:$0xff] %v5827_v13 }
 0x1b7   : > { %v1241_v39 = vmul.f32 %v1240_v16, %v4980_v56 }
 0x1b8   : > { %v5472_v49 = vpop.permute.xlu1 %803  ;;  %v5474_v51 = vpop.permute.xlu0 %801 }
 0x1b9   : > { %8596 = vst [vmem:[#allocation44_spill] sm:$0xff] %v5472_v49  ;;  %8597 = vst [vmem:[#allocation45_spill] sm:$0xff] %v5474_v51 }
 0x1ba   : > { %1205 = vrot.lane.b32.xlu1 %v1200_v45, %s4627_s1  ;;  %1203 = vrot.lane.b32.xlu0 %v1199_v23, %s4627_s1  ;;  %v1242_v23 = vmul.f32 %v1240_v16, %v4972_v50 }
 0x1bc   : > { %v5480_v29 = vpop.permute.xlu1 %817  ;;  %v5482_v27 = vpop.permute.xlu0 %815 }
 0x1bd   : > { %8598 = vst [vmem:[#allocation46_spill] sm:$0xff] %v5480_v29  ;;  %8599 = vst [vmem:[#allocation47_spill] sm:$0xff] %v5482_v27  ;;  %v5797_v27 = vld [vmem:[#allocation2 + $0x21] sm:$0xff]  ;;  %v5829_v29 = vld [vmem:[#allocation2 + $0x31] sm:$0xff] }
 0x1be   : > { %1219 = vrot.lane.b32.xlu1 %v1214_v40, %s4627_s1  ;;  %1217 = vrot.lane.b32.xlu0 %v1213_v52, %s4627_s1  ;;  %v1254_v40 = vstv %s4100_s6  ;;  %s5671_s6 = sld [smem:[#allocation11 + $0x55]] }
 0x1c0   : > { %v5488_v3 = vpop.permute.xlu1 %831  ;;  %v5490_v53 = vpop.permute.xlu0 %829 }
 0x1c1   : > { %8600 = vst [vmem:[#allocation48_spill] sm:$0xff] %v5488_v3  ;;  %8601 = vst [vmem:[#allocation49_spill] sm:$0xff] %v5490_v53  ;;  %v5795_v3 = vld [vmem:[#allocation2 + $0x19] sm:$0xff] }
 0x1c2   : > { %1233 = vrot.lane.b32.xlu1 %v1228_v54, %s4627_s1  ;;  %1231 = vrot.lane.b32.xlu0 %v1227_v18, %s4627_s1  ;;  %v1256_v54 = vmul.f32 %v1254_v40, %v4972_v50  ;;  %v1255_v18 = vmul.f32 %v1254_v40, %v4980_v56 }
 0x1c4   : > { %v5496_v19 = vpop.permute.xlu1 %845  ;;  %v5498_v45 = vpop.permute.xlu0 %843 }
 0x1c5   : > { %8602 = vst [vmem:[#allocation50_spill] sm:$0xff] %v5496_v19  ;;  %8603 = vst [vmem:[#allocation51_spill] sm:$0xff] %v5498_v45 }
 0x1c6   : > { %1247 = vrot.lane.b32.xlu1 %v1242_v23, %s4627_s1  ;;  %1245 = vrot.lane.b32.xlu0 %v1241_v39, %s4627_s1  ;;  %v1270_v23 = vmul.f32 %v1268_v6, %v4972_v50  ;;  %v1269_v39 = vmul.f32 %v1268_v6, %v4980_v56 }
 0x1c8   : > { %v5504_v52 = vpop.permute.xlu1 %859  ;;  %v5506_v20 = vpop.permute.xlu0 %857 }
 0x1c9   : > { %8604 = vst [vmem:[#allocation52_spill] sm:$0xff] %v5504_v52  ;;  %8605 = vst [vmem:[#allocation53_spill] sm:$0xff] %v5506_v20  ;;  %v1282_v52 = vstv %s4102_s0  ;;  %s5678_s0 = sld [smem:[#allocation11 + $0x9d]] }
 0x1ca   : > { %1261 = vrot.lane.b32.xlu1 %v1256_v54, %s4627_s1  ;;  %1259 = vrot.lane.b32.xlu0 %v1255_v18, %s4627_s1  ;;  %v1284_v54 = vmul.f32 %v1282_v52, %v4972_v50  ;;  %v1283_v18 = vmul.f32 %v1282_v52, %v4980_v56 }
 0x1cc   : > { %v5512_v16 = vpop.permute.xlu1 %873  ;;  %v5514_v44 = vpop.permute.xlu0 %871 }
 0x1cd   : > { %8606 = vst [vmem:[#allocation54_spill] sm:$0xff] %v5512_v16  ;;  %8607 = vst [vmem:[#allocation55_spill] sm:$0xff] %v5514_v44  ;;  %v1296_v16 = vstv %s4103_s8  ;;  %s5680_s8 = sld [smem:[#allocation11 + $0xc1]] }
 0x1ce   : > { %1275 = vrot.lane.b32.xlu1 %v1270_v23, %s4627_s1  ;;  %1273 = vrot.lane.b32.xlu0 %v1269_v39, %s4627_s1  ;;  %v1298_v23 = vmul.f32 %v1296_v16, %v4982_v57  ;;  %v1297_v39 = vmul.f32 %v1296_v16, %v4990_v62 }
 0x1d0   : > { %v5520_v40 = vpop.permute.xlu1 %887  ;;  %v5522_v20 = vpop.permute.xlu0 %885 }
 0x1d1   : > { %8608 = vst [vmem:[#allocation56_spill] sm:$0xff] %v5520_v40  ;;  %8609 = vst [vmem:[#allocation57_spill] sm:$0xff] %v5522_v20  ;;  %v1310_v40 = vstv %s4104_s27  ;;  %s5688_s27 = sld [smem:[#allocation11 + $0xe5]] }
 0x1d2   : > { %1289 = vrot.lane.b32.xlu1 %v1284_v54, %s4627_s1  ;;  %1287 = vrot.lane.b32.xlu0 %v1283_v18, %s4627_s1  ;;  %v1312_v52 = vmul.f32 %v1310_v40, %v4982_v57  ;;  %v1311_v54 = vmul.f32 %v1310_v40, %v4990_v62  ;;  %v1324_v18 = vstv %s4105_s29  ;;  %s5691_s29 = sld [smem:[#allocation11 + $0x109]] }
 0x1d4   : > { %v5528_v6 = vpop.permute.xlu1 %901  ;;  %v5530_v44 = vpop.permute.xlu0 %899 }
 0x1d5   : > { %8610 = vst [vmem:[#allocation58_spill] sm:$0xff] %v5528_v6  ;;  %8611 = vst [vmem:[#allocation59_spill] sm:$0xff] %v5530_v44  ;;  %v1394_v6 = vstv %s4110_s14  ;;  %s5712_s14 = sld [smem:[#allocation11 + $0x3]] }
 0x1d6   : > { %1303 = vrot.lane.b32.xlu1 %v1298_v23, %s4627_s1  ;;  %1301 = vrot.lane.b32.xlu0 %v1297_v39, %s4627_s1  ;;  %v1326_v23 = vmul.f32 %v1324_v18, %v4982_v57  ;;  %v1325_v39 = vmul.f32 %v1324_v18, %v4990_v62 }
 0x1d7   : > { %v1934_v45 = vstv %s5688_s27  ;;  %s5909_s27 = sld [smem:[#allocation11 + $0x8b]] }
 0x1d8   : > { %v5536_v50 = vpop.permute.xlu1 %915  ;;  %v5538_v56 = vpop.permute.xlu0 %913  ;;  %v1948_v19 = vstv %s5691_s29  ;;  %s5931_s29 = sld [smem:[#allocation11 + $0xaf]] }
 0x1d9   : > { %8612 = vst [vmem:[#allocation60_spill] sm:$0xff] %v5536_v50  ;;  %8613 = vst [vmem:[#allocation61_spill] sm:$0xff] %v5538_v56  ;;  %v1338_v50 = vstv %s4106_s16  ;;  %s5695_s16 = sld [smem:[#allocation11 + $0x16]] }
 0x1da   : > { %1317 = vrot.lane.b32.xlu1 %v1312_v52, %s4627_s1  ;;  %1315 = vrot.lane.b32.xlu0 %v1311_v54, %s4627_s1  ;;  %v1340_v52 = vmul.f32 %v1338_v50, %v4982_v57  ;;  %v1339_v54 = vmul.f32 %v1338_v50, %v4990_v62 }
 0x1dc   : > { %v5544_v16 = vpop.permute.xlu1 %929  ;;  %v5546_v44 = vpop.permute.xlu0 %927 }
 0x1dd   : > { %8614 = vst [vmem:[#allocation62_spill] sm:$0xff] %v5544_v16  ;;  %8615 = vst [vmem:[#allocation63_spill] sm:$0xff] %v5546_v44  ;;  %v1352_v16 = vstv %s4107_s17  ;;  %s5697_s17 = sld [smem:[#allocation11 + $0x3a]] }
 0x1de   : > { %1331 = vrot.lane.b32.xlu1 %v1326_v23, %s4627_s1  ;;  %1329 = vrot.lane.b32.xlu0 %v1325_v39, %s4627_s1  ;;  %v1354_v23 = vmul.f32 %v1352_v16, %v4982_v57  ;;  %v1353_v39 = vmul.f32 %v1352_v16, %v4990_v62 }
 0x1df   : > { %v1962_v53 = vstv %s5695_s16  ;;  %s5951_s16 = sld [smem:[#allocation11 + $0x15]] }
 0x1e0   : > { %v5552_v40 = vpop.permute.xlu1 %943  ;;  %v5554_v56 = vpop.permute.xlu0 %941  ;;  %v5881_v10 = vmul.f32 %v1962_v53, %v5829_v29 }
 0x1e1   : > { %8616 = vst [vmem:[#allocation64_spill] sm:$0xff] %v5552_v40  ;;  %8617 = vst [vmem:[#allocation65_spill] sm:$0xff] %v5554_v56  ;;  %v1366_v40 = vstv %s4108_s13  ;;  %s5705_s13 = sld [smem:[#allocation11 + $0x5e]] }
 0x1e2   : > { %1345 = vrot.lane.b32.xlu1 %v1340_v52, %s4627_s1  ;;  %1343 = vrot.lane.b32.xlu0 %v1339_v54, %s4627_s1  ;;  %v1368_v52 = vmul.f32 %v1366_v40, %v4982_v57  ;;  %v1367_v54 = vmul.f32 %v1366_v40, %v4990_v62  ;;  %8664 = vst [vmem:[#allocation112_spill] sm:$0xff] %v5881_v10 }
 0x1e3   : > { %v8667_v1 = vstv %s5697_s17  ;;  %s5973_s17 = sld [smem:[#allocation11 + $0x1e]] }
 0x1e4   : > { %v5560_v18 = vpop.permute.xlu1 %957  ;;  %v5562_v44 = vpop.permute.xlu0 %955  ;;  %v8669_v36 = vmov %v8667_v1 }
 0x1e5   : > { %8618 = vst [vmem:[#allocation66_spill] sm:$0xff] %v5560_v18  ;;  %8619 = vst [vmem:[#allocation67_spill] sm:$0xff] %v5562_v44  ;;  %v1380_v18 = vstv %s4109_s15  ;;  %s5708_s15 = sld [smem:[#allocation11 + $0x82]] }
 0x1e6   : > { %1359 = vrot.lane.b32.xlu1 %v1354_v23, %s4627_s1  ;;  %1357 = vrot.lane.b32.xlu0 %v1353_v39, %s4627_s1  ;;  %v4416_v23 = vld [vmem:[#allocation2 + $0x38] sm:$0xff] }
 0x1e7   : > { %v1382_v39 = vmul.f32 %v4416_v23, %v1380_v18 }
 0x1e8   : > { %v5568_v50 = vpop.permute.xlu1 %971  ;;  %v5570_v56 = vpop.permute.xlu0 %969 }
 0x1e9   : > { %8620 = vst [vmem:[#allocation68_spill] sm:$0xff] %v5568_v50  ;;  %8621 = vst [vmem:[#allocation69_spill] sm:$0xff] %v5570_v56  ;;  %v1381_v50 = vmul.f32 %v1380_v18, %v4990_v62 }
 0x1ea   : > { %1373 = vrot.lane.b32.xlu1 %v1368_v52, %s4627_s1  ;;  %1371 = vrot.lane.b32.xlu0 %v1367_v54, %s4627_s1  ;;  %v1396_v52 = vmul.f32 %v4416_v23, %v1394_v6  ;;  %v4417_v54 = vld [vmem:[#allocation2 + $0x30] sm:$0xff] }
 0x1eb   : > { %v1395_v56 = vmul.f32 %v4417_v54, %v1394_v6  ;;  %v1436_v54 = vstv %s4113_s18  ;;  %s5725_s18 = sld [smem:[#allocation11 + $0x27]] }
 0x1ec   : > { %v5576_v16 = vpop.permute.xlu1 %985  ;;  %v5578_v44 = vpop.permute.xlu0 %983 }
 0x1ed   : > { %8622 = vst [vmem:[#allocation70_spill] sm:$0xff] %v5576_v16  ;;  %8623 = vst [vmem:[#allocation71_spill] sm:$0xff] %v5578_v44  ;;  %v1408_v16 = vstv %s4111_s12  ;;  %s5714_s12 = sld [smem:[#allocation11 + $0xc]] }
 0x1ee   : > { %1387 = vrot.lane.b32.xlu1 %v1382_v39, %s4627_s1  ;;  %1385 = vrot.lane.b32.xlu0 %v1381_v50, %s4627_s1  ;;  %v4418_v39 = vld [vmem:[#allocation2 + $0x50] sm:$0xff]  ;;  %v4419_v50 = vld [vmem:[#allocation2 + $0x48] sm:$0xff] }
 0x1ef   : > { %v1410_v44 = vmul.f32 %v4418_v39, %v1408_v16  ;;  %v1409_v20 = vmul.f32 %v4419_v50, %v1408_v16 }
 0x1f0   : > { %v5583_v57 = vpop.permute.xlu1 %999  ;;  %v5585_v40 = vpop.permute.xlu0 %997 }
 0x1f1   : > { %8624 = vst [vmem:[#allocation72_spill] sm:$0xff] %v5583_v57  ;;  %8625 = vst [vmem:[#allocation73_spill] sm:$0xff] %v5585_v40  ;;  %v1422_v57 = vstv %s4112_s30  ;;  %v1450_v40 = vstv %s4114_s24  ;;  %s5722_s30 = sld [smem:[#allocation11 + $0xa6]] }
 0x1f2   : > { %1401 = vrot.lane.b32.xlu1 %v1396_v52, %s4627_s1  ;;  %1399 = vrot.lane.b32.xlu0 %v1395_v56, %s4627_s1  ;;  %v1424_v52 = vmul.f32 %v4418_v39, %v1422_v57  ;;  %v1423_v56 = vmul.f32 %v4419_v50, %v1422_v57  ;;  %s5729_s24 = sld [smem:[#allocation11 + $0x30]] }
 0x1f4   : > { %v5589_v62 = vpop.permute.xlu1 %1013  ;;  %v5591_v18 = vpop.permute.xlu0 %1011 }
 0x1f5   : > { %8626 = vst [vmem:[#allocation74_spill] sm:$0xff] %v5589_v62  ;;  %8627 = vst [vmem:[#allocation75_spill] sm:$0xff] %v5591_v18  ;;  %v1438_v62 = vmul.f32 %v4418_v39, %v1436_v54 }
 0x1f6   : > { %1415 = vrot.lane.b32.xlu1 %v1410_v44, %s4627_s1  ;;  %1413 = vrot.lane.b32.xlu0 %v1409_v20, %s4627_s1  ;;  %v1437_v44 = vmul.f32 %v4419_v50, %v1436_v54 }
 0x1f8   : > { %v5595_v6 = vpop.permute.xlu1 %1027  ;;  %v5597_v23 = vpop.permute.xlu0 %1025 }
 0x1f9   : > { %8628 = vst [vmem:[#allocation76_spill] sm:$0xff] %v5595_v6  ;;  %8629 = vst [vmem:[#allocation77_spill] sm:$0xff] %v5597_v23  ;;  %v1452_v23 = vmul.f32 %v4418_v39, %v1450_v40  ;;  %v1464_v6 = vstv %s4115_s9  ;;  %s5731_s9 = sld [smem:[#allocation11 + $0xca]] }
 0x1fa   : > { %1429 = vrot.lane.b32.xlu1 %v1424_v52, %s4627_s1  ;;  %1427 = vrot.lane.b32.xlu0 %v1423_v56, %s4627_s1  ;;  %v1451_v52 = vmul.f32 %v4419_v50, %v1450_v40 }
 0x1fc   : > { %v5601_v18 = vpop.permute.xlu1 %1041  ;;  %v5603_v16 = vpop.permute.xlu0 %1039 }
 0x1fd   : > { %8630 = vst [vmem:[#allocation78_spill] sm:$0xff] %v5601_v18  ;;  %8631 = vst [vmem:[#allocation79_spill] sm:$0xff] %v5603_v16  ;;  %v1466_v16 = vmul.f32 %v4418_v39, %v1464_v6  ;;  %v1478_v18 = vstv %s4116_s10  ;;  %s5739_s10 = sld [smem:[#allocation11 + $0x4b]] }
 0x1fe   : > { %1443 = vrot.lane.b32.xlu1 %v1438_v62, %s4627_s1  ;;  %1441 = vrot.lane.b32.xlu0 %v1437_v44, %s4627_s1  ;;  %v1465_v62 = vmul.f32 %v4419_v50, %v1464_v6 }
 0x200   : > { %v5607_v20 = vpop.permute.xlu1 %1055  ;;  %v5609_v57 = vpop.permute.xlu0 %1053 }
 0x201   : > { %8632 = vst [vmem:[#allocation80_spill] sm:$0xff] %v5607_v20  ;;  %8633 = vst [vmem:[#allocation81_spill] sm:$0xff] %v5609_v57  ;;  %v1480_v57 = vmul.f32 %v4418_v39, %v1478_v18  ;;  %v1492_v20 = vstv %s4117_s11  ;;  %s5742_s11 = sld [smem:[#allocation11 + $0x54]] }
 0x202   : > { %1457 = vrot.lane.b32.xlu1 %v1452_v23, %s4627_s1  ;;  %1455 = vrot.lane.b32.xlu0 %v1451_v52, %s4627_s1  ;;  %v1479_v23 = vmul.f32 %v4419_v50, %v1478_v18 }
 0x204   : > { %v5613_v56 = vpop.permute.xlu1 %1063  ;;  %v5615_v54 = vpop.permute.xlu0 %1061 }
 0x205   : > { %8634 = vst [vmem:[#allocation82_spill] sm:$0xff] %v5613_v56  ;;  %8635 = vst [vmem:[#allocation83_spill] sm:$0xff] %v5615_v54  ;;  %v1494_v54 = vmul.f32 %v4418_v39, %v1492_v20  ;;  %v1493_v56 = vmul.f32 %v4419_v50, %v1492_v20  ;;  %v5647_v20 = vld [vmem:[#allocation2 + $0x1] sm:$0xff] }
 0x206   : > { %1471 = vrot.lane.b32.xlu1 %v1466_v16, %s4627_s1  ;;  %1469 = vrot.lane.b32.xlu0 %v1465_v62, %s4627_s1  ;;  %v1506_v16 = vstv %s4118_s19  ;;  %s5746_s19 = sld [smem:[#allocation11 + $0xee]] }
 0x208   : > { %v5619_v44 = vpop.permute.xlu1 %1079  ;;  %v5621_v40 = vpop.permute.xlu0 %1077 }
 0x209   : > { %8636 = vst [vmem:[#allocation84_spill] sm:$0xff] %v5619_v44  ;;  %8637 = vst [vmem:[#allocation85_spill] sm:$0xff] %v5621_v40  ;;  %v1920_v44 = vstv %s5680_s8  ;;  %s5883_s8 = sld [smem:[#allocation11 + $0x108]] }
 0x20a   : > { %1485 = vrot.lane.b32.xlu1 %v1480_v57, %s4627_s1  ;;  %1483 = vrot.lane.b32.xlu0 %v1479_v23, %s4627_s1  ;;  %v1508_v57 = vmul.f32 %v4418_v39, %v1506_v16  ;;  %v1507_v23 = vmul.f32 %v4419_v50, %v1506_v16  ;;  %v5655_v39 = vld [vmem:[#allocation2 + $0x9] sm:$0xff]  ;;  %v1519_v16 = vld [vmem:[#allocation3 + $0x1] sm:$0xff] }
 0x20b   : > { %v1520_v50 = vld [vmem:[#allocation3 + $0x9] sm:$0xff] }
 0x20c   : > { %v5625_v52 = vpop.permute.xlu1 %1093  ;;  %v5627_v6 = vpop.permute.xlu0 %1091 }
 0x20d   : > { %8638 = vst [vmem:[#allocation86_spill] sm:$0xff] %v5625_v52  ;;  %8639 = vst [vmem:[#allocation87_spill] sm:$0xff] %v5627_v6  ;;  %v1892_v52 = vstv %s5674_s7  ;;  %s5855_s7 = sld [smem:[#allocation11 + $0x67]] }
 0x20e   : > { %1499 = vrot.lane.b32.xlu1 %v1494_v54, %s4627_s1  ;;  %1497 = vrot.lane.b32.xlu0 %v1493_v56, %s4627_s1  ;;  %v5839_v51 = vmul.f32 %v1892_v52, %v5797_v27  ;;  %v5844_v49 = vmul.f32 %v1892_v52, %v5795_v3  ;;  %v5860_v52 = vmul.f32 %v1920_v44, %v5795_v3 }
 0x210   : > { %v5633_v18 = vpop.permute.xlu1 %1107  ;;  %v5635_v62 = vpop.permute.xlu0 %1105 }
 0x211   : > { %8640 = vst [vmem:[#allocation88_spill] sm:$0xff] %v5633_v18  ;;  %8641 = vst [vmem:[#allocation89_spill] sm:$0xff] %v5635_v62  ;;  %v1752_v18 = vstv %s5631_s5  ;;  %s5756_s5 = sld [smem:[#allocation11 + $0x78]] }
 0x212   : > { %1513 = vrot.lane.b32.xlu1 %v1508_v57, %s4627_s1  ;;  %1511 = vrot.lane.b32.xlu0 %v1507_v23, %s4627_s1  ;;  %v1738_v57 = vstv %s4151_s2  ;;  %s5748_s2 = sld [smem:[#allocation11 + $0x6f]] }
 0x213   : > { %v1739_v62 = vmul.f32 %v1738_v57, %v5647_v20 }
 0x214   : > { %v5649_v56 = vpop.permute.xlu1 %1121  ;;  %v5651_v54 = vpop.permute.xlu0 %1119 }
 0x215   : > { %8642 = vst [vmem:[#allocation90_spill] sm:$0xff] %v5649_v56  ;;  %8643 = vst [vmem:[#allocation91_spill] sm:$0xff] %v5651_v54  ;;  %v1740_v56 = vmul.f32 %v1738_v57, %v5655_v39  ;;  %v1754_v57 = vmul.f32 %v1752_v18, %v5655_v39 }
 0x216   : > { %1729 = vrot.lane.b32.xlu1 %v1520_v50, %s4626_s26  ;;  %1727 = vrot.lane.b32.xlu0 %v1519_v16, %s4626_s26 }
 0x218   : > { %v5665_v23 = vpop.permute.xlu1 %1135  ;;  %v5667_v54 = vpop.permute.xlu0 %1133 }
 0x219   : > { %8644 = vst [vmem:[#allocation92_spill] sm:$0xff] %v5665_v23  ;;  %8645 = vst [vmem:[#allocation93_spill] sm:$0xff] %v5667_v54  ;;  %v1753_v54 = vmul.f32 %v1752_v18, %v5647_v20  ;;  %v1766_v23 = vstv %s5637_s4  ;;  %s5759_s4 = sld [smem:[#allocation11 + $0x112]] }
 0x21a   : > { %1745 = vrot.lane.b32.xlu1 %v1740_v56, %s4626_s26  ;;  %1743 = vrot.lane.b32.xlu0 %v1739_v62, %s4626_s26  ;;  %v1768_v18 = vmul.f32 %v1766_v23, %v5655_v39 }
 0x21c   : > { %v5682_v50 = vpop.permute.xlu1 %1149  ;;  %v5684_v16 = vpop.permute.xlu0 %1147 }
 0x21d   : > { %8646 = vst [vmem:[#allocation94_spill] sm:$0xff] %v5682_v50  ;;  %8647 = vst [vmem:[#allocation95_spill] sm:$0xff] %v5684_v16  ;;  %v1767_v16 = vmul.f32 %v1766_v23, %v5647_v20  ;;  %v1780_v50 = vstv %s5639_s20  ;;  %s5765_s20 = sld [smem:[#allocation11 + $0x93]] }
 0x21e   : > { %1759 = vrot.lane.b32.xlu1 %v1754_v57, %s4626_s26  ;;  %1757 = vrot.lane.b32.xlu0 %v1753_v54, %s4626_s26  ;;  %v1782_v23 = vmul.f32 %v1780_v50, %v5655_v39 }
 0x220   : > { %v5699_v62 = vpop.permute.xlu1 %1163  ;;  %v5701_v56 = vpop.permute.xlu0 %1161 }
 0x221   : > { %8648 = vst [vmem:[#allocation96_spill] sm:$0xff] %v5699_v62  ;;  %8649 = vst [vmem:[#allocation97_spill] sm:$0xff] %v5701_v56  ;;  %v1781_v56 = vmul.f32 %v1780_v50, %v5647_v20  ;;  %v1794_v62 = vstv %s5643_s21  ;;  %s5771_s21 = sld [smem:[#allocation11 + $0x9c]] }
 0x222   : > { %1773 = vrot.lane.b32.xlu1 %v1768_v18, %s4626_s26  ;;  %1771 = vrot.lane.b32.xlu0 %v1767_v16, %s4626_s26  ;;  %v1796_v50 = vmul.f32 %v1794_v62, %v5655_v39 }
 0x224   : > { %v5716_v54 = vpop.permute.xlu1 %1177  ;;  %v5718_v57 = vpop.permute.xlu0 %1175 }
 0x225   : > { %8650 = vst [vmem:[#allocation98_spill] sm:$0xff] %v5716_v54  ;;  %8651 = vst [vmem:[#allocation99_spill] sm:$0xff] %v5718_v57  ;;  %v1795_v57 = vmul.f32 %v1794_v62, %v5647_v20  ;;  %v1808_v54 = vstv %s5645_s22  ;;  %s5789_s22 = sld [smem:[#allocation11 + $0x1f]] }
 0x226   : > { %1787 = vrot.lane.b32.xlu1 %v1782_v23, %s4626_s26  ;;  %1785 = vrot.lane.b32.xlu0 %v1781_v56, %s4626_s26  ;;  %v1810_v23 = vmul.f32 %v1808_v54, %v5655_v39  ;;  %v1809_v6 = vmul.f32 %v1808_v54, %v5647_v20  ;;  %v1864_v54 = vstv %s5663_s28  ;;  %s5825_s28 = sld [smem:[#allocation11 + $0xdb]] }
 0x227   : > { %v1866_v8 = vmul.f32 %v1864_v54, %v5797_v27 }
 0x228   : > { %v5733_v16 = vpop.permute.xlu1 %1191  ;;  %v5735_v18 = vpop.permute.xlu0 %1189 }
 0x229   : > { %8652 = vst [vmem:[#allocation100_spill] sm:$0xff] %v5733_v16  ;;  %8653 = vst [vmem:[#allocation101_spill] sm:$0xff] %v5735_v18  ;;  %v1906_v18 = vstv %s5678_s0  ;;  %s5869_s0 = sld [smem:[#allocation11 + $0xff]] }
 0x22a   : > { %1801 = vrot.lane.b32.xlu1 %v1796_v50, %s4626_s26  ;;  %1799 = vrot.lane.b32.xlu0 %v1795_v57, %s4626_s26  ;;  %v1822_v50 = vstv %s5653_s23  ;;  %v1836_v57 = vstv %s5657_s3  ;;  %s5807_s23 = sld [smem:[#allocation11 + $0xb7]]  ;;  %v5847_v2 = vmul.f32 %v1906_v18, %v5797_v27 }
 0x22b   : > { %v1824_v16 = vmul.f32 %v1822_v50, %v5655_v39  ;;  %v1823_v40 = vmul.f32 %v1822_v50, %v5647_v20  ;;  %s5813_s3 = sld [smem:[#allocation11 + $0xc0]] }
 0x22c   : > { %v5750_v62 = vpop.permute.xlu1 %1205  ;;  %v5752_v56 = vpop.permute.xlu0 %1203 }
 0x22d   : > { %8654 = vst [vmem:[#allocation102_spill] sm:$0xff] %v5750_v62  ;;  %8655 = vst [vmem:[#allocation103_spill] sm:$0xff] %v5752_v56  ;;  %v1850_v56 = vstv %s5661_s25  ;;  %v1878_v62 = vstv %s5671_s6  ;;  %s5819_s25 = sld [smem:[#allocation11 + $0x43]] }
 0x22e   : > { %1815 = vrot.lane.b32.xlu1 %v1810_v23, %s4626_s26  ;;  %1813 = vrot.lane.b32.xlu0 %v1809_v6, %s4626_s26  ;;  %v1851_v50 = vmul.f32 %v1850_v56, %v5795_v3  ;;  %s5841_s6 = sld [smem:[#allocation11 + $0xe4]] }
 0x230   : > { %v5773_v23 = vpop.permute.xlu1 %1219  ;;  %v5775_v6 = vpop.permute.xlu0 %1217 }
 0x231   : > { %8656 = vst [vmem:[#allocation104_spill] sm:$0xff] %v5773_v23  ;;  %8657 = vst [vmem:[#allocation105_spill] sm:$0xff] %v5775_v6  ;;  %v1838_v6 = vmul.f32 %v1836_v57, %v5655_v39  ;;  %v1837_v23 = vmul.f32 %v1836_v57, %v5647_v20  ;;  %v1852_v57 = vmul.f32 %v1850_v56, %v5797_v27 }
 0x232   : > { %1829 = vrot.lane.b32.xlu1 %v1824_v16, %s4626_s26  ;;  %1827 = vrot.lane.b32.xlu0 %v1823_v40, %s4626_s26  ;;  %v1879_v56 = vmul.f32 %v1878_v62, %v5795_v3 }
 0x234   : > { %v5799_v16 = vpop.permute.xlu1 %1233  ;;  %v5801_v40 = vpop.permute.xlu0 %1231 }
 0x235   : > { %8658 = vst [vmem:[#allocation106_spill] sm:$0xff] %v5799_v16  ;;  %8659 = vst [vmem:[#allocation107_spill] sm:$0xff] %v5801_v40  ;;  %v1865_v16 = vmul.f32 %v1864_v54, %v5795_v3  ;;  %v1880_v40 = vmul.f32 %v1878_v62, %v5797_v27  ;;  %v5853_v54 = vmul.f32 %v1920_v44, %v5797_v27 }
 0x236   : > { %1843 = vrot.lane.b32.xlu1 %v1838_v6, %s4626_s26  ;;  %1841 = vrot.lane.b32.xlu0 %v1837_v23, %s4626_s26  ;;  %v5863_v62 = vmul.f32 %v1934_v45, %v5797_v27  ;;  %v5878_v44 = vmul.f32 %v1962_v53, %v5827_v13  ;;  %v8671_v53 = vstv %s5705_s13  ;;  %s5999_s13 = sld [smem:[#allocation11 + $0x39]] }
 0x237   : > { %v5902_v10 = vmul.f32 %v8671_v53, %v5827_v13  ;;  %v8673_v46 = vmov %v8671_v53  ;;  %v8679_v53 = vstv %s5712_s14  ;;  %s6045_s14 = sld [smem:[#allocation11 + $0x5d]] }
 0x238   : > { %v5831_v6 = vpop.permute.xlu1 %1247  ;;  %v5833_v23 = vpop.permute.xlu0 %1245  ;;  %8663 = vst [vmem:[#allocation111_spill] sm:$0xff] %v5878_v44  ;;  %v5897_v44 = vmul.f32 %v8669_v36, %v5829_v29 }
 0x239   : > { %8661 = vst [vmem:[#allocation109_spill] sm:$0xff] %v5831_v6  ;;  %8662 = vst [vmem:[#allocation110_spill] sm:$0xff] %v5833_v23  ;;  %v5850_v23 = vmul.f32 %v1906_v18, %v5795_v3  ;;  %v5866_v18 = vmul.f32 %v1934_v45, %v5795_v3 }
 0x23a   : > { %1857 = vrot.lane.b32.xlu1 %v1852_v57, %s4626_s26  ;;  %1855 = vrot.lane.b32.xlu0 %v1851_v50, %s4626_s26  ;;  %v5872_v57 = vmul.f32 %v1948_v19, %v5797_v27  ;;  %v5875_v50 = vmul.f32 %v1948_v19, %v5795_v3  ;;  %v5892_v19 = vmul.f32 %v8667_v1, %v5827_v13  ;;  %v8675_v1 = vstv %s5708_s15  ;;  %s6021_s15 = sld [smem:[#allocation11 + $0x42]] }
 0x23b   : > { %8670 = vst [vmem:[#allocation116_spill] sm:$0xff] %v5897_v44  ;;  %8672 = vst [vmem:[#allocation117_spill] sm:$0xff] %v5902_v10  ;;  %v8677_v36 = vmov %v8675_v1  ;;  %v5924_v10 = vmul.f32 %v8679_v53, %v5655_v39 }
 0x23c   : > { %v5885_v45 = vpop.permute.xlu1 %1261  ;;  %v5887_v6 = vpop.permute.xlu0 %1259  ;;  %8668 = vst [vmem:[#allocation115_spill] sm:$0xff] %v5892_v19  ;;  %v5919_v44 = vmul.f32 %v8677_v36, %v5829_v29  ;;  %v8681_v19 = vstv %s5714_s12  ;;  %s6067_s12 = sld [smem:[#allocation11 + $0x66]] }
 0x23d   : > { %8665 = vst [vmem:[#allocation113_spill] sm:$0xff] %v5885_v45  ;;  %8666 = vst [vmem:[#allocation114_spill] sm:$0xff] %v5887_v6  ;;  %v5907_v45 = vmul.f32 %v8673_v46, %v5829_v29  ;;  %v5914_v6 = vmul.f32 %v8675_v1, %v5827_v13  ;;  %v5929_v46 = vmul.f32 %v8681_v19, %v5797_v27  ;;  %v8683_v1 = vmov %v8679_v53 }
 0x23e   : > { %8678 = vst [vmem:[#allocation120_spill] sm:$0xff] %v5919_v44  ;;  %8680 = vst [vmem:[#allocation121_spill] sm:$0xff] %v5924_v10  ;;  %1871 = vrot.lane.b32.xlu1 %v1866_v8, %s4626_s26  ;;  %1869 = vrot.lane.b32.xlu0 %v1865_v16, %s4626_s26  ;;  %v5938_v36 = vmul.f32 %v8683_v1, %v5647_v20  ;;  %v8685_v53 = vmov %v8681_v19  ;;  %v8687_v19 = vstv %s5722_s30  ;;  %v1564_v44 = vstv %s5807_s23  ;;  %s6089_s30 = sld [smem:[#allocation11 + $0x81]] }
 0x23f   : > { %8674 = vst [vmem:[#allocation118_spill] sm:$0xff] %v5907_v45  ;;  %8676 = vst [vmem:[#allocation119_spill] sm:$0xff] %v5914_v6  ;;  %v5943_v10 = vmul.f32 %v8685_v53, %v5795_v3  ;;  %v8689_v8 = vmov %v8687_v19  ;;  %v8691_v1 = vstv %s5725_s18  ;;  %v8693_v53 = vstv %s5729_s24  ;;  %s6107_s18 = sld [smem:[#allocation11 + $0x8a]] }
 0x240   : > { %8682 = vst [vmem:[#allocation122_spill] sm:$0xff] %v5929_v46  ;;  %8684 = vst [vmem:[#allocation123_spill] sm:$0xff] %v5938_v36  ;;  %v5948_v46 = vmul.f32 %v8687_v19, %v5827_v13  ;;  %v5956_v16 = vmul.f32 %v8689_v8, %v5829_v29  ;;  %v5961_v36 = vmul.f32 %v8691_v1, %v5655_v39  ;;  %v8695_v19 = vmov %v8691_v1  ;;  %v5975_v6 = vpop.permute.xlu1 %1275  ;;  %v5977_v45 = vpop.permute.xlu0 %1273  ;;  %s6123_s24 = sld [smem:[#allocation11 + $0xa5]] }
 0x241   : > { %8686 = vst [vmem:[#allocation124_spill] sm:$0xff] %v5943_v10  ;;  %v5966_v10 = vmul.f32 %v8693_v53, %v5797_v27  ;;  %8697 = vst [vmem:[#allocation130_spill] sm:$0xff] %v5975_v6  ;;  %v8699_v8 = vmov %v8693_v53  ;;  %v8705_v6 = vstv %s5739_s10  ;;  %s6151_s10 = sld [smem:[#allocation11 + $0xc9]] }
 0x242   : > { %8688 = vst [vmem:[#allocation125_spill] sm:$0xff] %v5948_v46  ;;  %8690 = vst [vmem:[#allocation126_spill] sm:$0xff] %v5956_v16  ;;  %v5971_v46 = vmul.f32 %v8695_v19, %v5647_v20  ;;  %v5982_v1 = vmul.f32 %v8699_v8, %v5795_v3  ;;  %v8707_v8 = vstv %s5742_s11  ;;  %1885 = vrot.lane.b32.xlu1 %v1880_v40, %s4626_s26  ;;  %1883 = vrot.lane.b32.xlu0 %v1879_v56, %s4626_s26  ;;  %s6159_s11 = sld [smem:[#allocation11 + $0xd2]] }
 0x243   : > { %8692 = vst [vmem:[#allocation127_spill] sm:$0xff] %v5961_v36  ;;  %8694 = vst [vmem:[#allocation128_spill] sm:$0xff] %v5966_v10  ;;  %v8701_v36 = vstv %s5731_s9  ;;  %s6135_s9 = sld [smem:[#allocation11 + $0xae]] }
 0x244   : > { %8696 = vst [vmem:[#allocation129_spill] sm:$0xff] %v5971_v46  ;;  %8698 = vst [vmem:[#allocation131_spill] sm:$0xff] %v5977_v45  ;;  %v5987_v53 = vmul.f32 %v8701_v36, %v5827_v13  ;;  %v8703_v19 = vmov %v8701_v36  ;;  %v5997_v46 = vmul.f32 %v8705_v6, %v5655_v39  ;;  %v6004_v45 = vmul.f32 %v8707_v8, %v5797_v27  ;;  %v6069_v16 = vpop.permute.xlu1 %1289  ;;  %v6071_v24 = vpop.permute.xlu0 %1287  ;;  %s4183_s23 = sld [smem:[#allocation11 + $0x5]] }
 0x245   : > { %8700 = vst [vmem:[#allocation132_spill] sm:$0xff] %v5982_v1  ;;  %v5992_v10 = vmul.f32 %v8703_v19, %v5829_v29  ;;  %v8709_v36 = vmov %v8705_v6  ;;  %v8711_v19 = vmov %v8707_v8  ;;  %v8713_v6 = vstv %s5746_s19  ;;  %v6025_v8 = vld [vmem:[#allocation2 + $0x49] sm:$0xff]  ;;  %8729 = vst [vmem:[#allocation147_spill] sm:$0xff] %v6069_v16  ;;  %s6507_s19 = sld [smem:[#allocation11 + $0xed]] }
 0x246   : > { %8702 = vst [vmem:[#allocation133_spill] sm:$0xff] %v5987_v53  ;;  %8706 = vst [vmem:[#allocation135_spill] sm:$0xff] %v5997_v46  ;;  %v6009_v1 = vmul.f32 %v8709_v36, %v5647_v20  ;;  %v6019_v46 = vmul.f32 %v8713_v6, %v5827_v13  ;;  %v6023_v53 = vld [vmem:[#allocation2 + $0x51] sm:$0xff]  ;;  %v8715_v36 = vmov %v8713_v6  ;;  %v8717_v6 = vstv %s5748_s2  ;;  %1899 = vrot.lane.b32.xlu1 %v5839_v51, %s4626_s26  ;;  %s6531_s2 = sld [smem:[#allocation11 + $0xf6]] }
 0x247   : > { %8704 = vst [vmem:[#allocation134_spill] sm:$0xff] %v5992_v10  ;;  %8708 = vst [vmem:[#allocation136_spill] sm:$0xff] %v6004_v45  ;;  %v6014_v10 = vmul.f32 %v8711_v19, %v5795_v3  ;;  %v6032_v19 = vmul.f32 %v8715_v36, %v5829_v29  ;;  %v8719_v45 = vstv %s5756_s5  ;;  %v8721_v40 = vmov %v8717_v6  ;;  %1897 = vrot.lane.b32.xlu0 %v5844_v49, %s4626_s26  ;;  %s6535_s5 = sld [smem:[#allocation11 + $0x111]] }
 0x248   : > { %8710 = vst [vmem:[#allocation137_spill] sm:$0xff] %v6009_v1  ;;  %8714 = vst [vmem:[#allocation139_spill] sm:$0xff] %v6019_v46  ;;  %v6042_v1 = vmul.f32 %v8719_v45, %v5797_v27  ;;  %v1612_v46 = vstv %s5813_s3  ;;  %v6050_v56 = vmul.f32 %v8721_v40, %v5647_v20  ;;  %v8723_v36 = vmov %v8719_v45  ;;  %s4184_s3 = sld [smem:[#allocation11 + $0x29]] }
 0x249   : > { %8712 = vst [vmem:[#allocation138_spill] sm:$0xff] %v6014_v10  ;;  %8716 = vst [vmem:[#allocation140_spill] sm:$0xff] %v6032_v19  ;;  %v6037_v10 = vmul.f32 %v8717_v6, %v5655_v39  ;;  %v6055_v19 = vmul.f32 %v8723_v36, %v5795_v3  ;;  %v8725_v6 = vstv %s5759_s4  ;;  %v8731_v40 = vstv %s5765_s20  ;;  %s6548_s4 = sld [smem:[#allocation11 + $0x11a]] }
 0x24a   : > { %8720 = vst [vmem:[#allocation142_spill] sm:$0xff] %v6042_v1  ;;  %8722 = vst [vmem:[#allocation143_spill] sm:$0xff] %v6050_v56  ;;  %v8727_v45 = vmov %v8725_v6  ;;  %v6076_v56 = vmul.f32 %v8731_v40, %v5655_v39  ;;  %v8733_v36 = vstv %s5771_s21  ;;  %v6126_v51 = vmul.f32 %v1612_v46, %v5795_v3  ;;  %1913 = vrot.lane.b32.xlu1 %v5847_v2, %s4626_s26  ;;  %s6556_s20 = sld [smem:[#allocation11 + $0xd3]] }
 0x24b   : > { %8718 = vst [vmem:[#allocation141_spill] sm:$0xff] %v6037_v10  ;;  %8724 = vst [vmem:[#allocation144_spill] sm:$0xff] %v6055_v19  ;;  %v6060_v10 = vmul.f32 %v8725_v6, %v5827_v13  ;;  %v6065_v1 = vmul.f32 %v8727_v45, %v5829_v29  ;;  %v6081_v19 = vmul.f32 %v8733_v36, %v5797_v27  ;;  %v8735_v6 = vmov %v8731_v40  ;;  %s6586_s21 = sld [smem:[#allocation11 + $0xf7]] }
 0x24c   : > { %8730 = vst [vmem:[#allocation148_spill] sm:$0xff] %v6071_v24  ;;  %8732 = vst [vmem:[#allocation149_spill] sm:$0xff] %v6076_v56  ;;  %v2088_v45 = vstv %s5819_s25  ;;  %v8737_v16 = vmov %v8733_v36  ;;  %1911 = vrot.lane.b32.xlu0 %v5850_v23, %s4626_s26  ;;  %s4185_s25 = sld [smem:[#allocation11 + $0x4d]] }
 0x24d   : > { %8726 = vst [vmem:[#allocation145_spill] sm:$0xff] %v6060_v10  ;;  %8728 = vst [vmem:[#allocation146_spill] sm:$0xff] %v6065_v1  ;;  %v6086_v10 = vmul.f32 %v8735_v6, %v5647_v20  ;;  %v6094_v24 = vmul.f32 %v8737_v16, %v5795_v3  ;;  %v8739_v1 = vstv %s5789_s22  ;;  %v6114_v16 = vmul.f32 %v1564_v44, %v5655_v39  ;;  %s6613_s22 = sld [smem:[#allocation11 + $0x11b]] }
 0x24e   : > { %8734 = vst [vmem:[#allocation150_spill] sm:$0xff] %v6081_v19  ;;  %v6099_v40 = vmul.f32 %v8739_v1, %v6023_v53  ;;  %v8741_v56 = vmov %v8739_v1  ;;  %v1570_v19 = vstv %s5825_s28  ;;  %v6117_v1 = vmul.f32 %v1612_v46, %v5797_v27  ;;  %8746 = vst [vmem:[#allocation158_spill] sm:$0xff] %v6126_v51  ;;  %1927 = vrot.lane.b32.xlu1 %v5853_v54, %s4626_s26  ;;  %s4186_s28 = sld [smem:[#allocation11 + $0x71]] }
 0x24f   : > { %8736 = vst [vmem:[#allocation151_spill] sm:$0xff] %v6086_v10  ;;  %8738 = vst [vmem:[#allocation152_spill] sm:$0xff] %v6094_v24  ;;  %v6104_v36 = vmul.f32 %v8741_v56, %v6025_v8  ;;  %v6120_v6 = vmul.f32 %v1564_v44, %v5647_v20  ;;  %v1618_v56 = vstv %s5841_s6  ;;  %v6129_v49 = vmul.f32 %v2088_v45, %v6023_v53  ;;  %v6137_v44 = vpop.permute.xlu1 %1303  ;;  %s4187_s6 = sld [smem:[#allocation11 + $0x95]] }
 0x250   : > { %8740 = vst [vmem:[#allocation153_spill] sm:$0xff] %v6099_v40  ;;  %8743 = vst [vmem:[#allocation155_spill] sm:$0xff] %v6114_v16  ;;  %v6132_v16 = vmul.f32 %v2088_v45, %v6025_v8  ;;  %v2102_v24 = vstv %s5855_s7  ;;  %v6145_v46 = vmul.f32 %v1618_v56, %v5797_v27  ;;  %v6148_v51 = vmul.f32 %v1570_v19, %v5647_v20  ;;  %s4188_s7 = sld [smem:[#allocation11 + $0xb9]] }
 0x251   : > { %8742 = vst [vmem:[#allocation154_spill] sm:$0xff] %v6104_v36  ;;  %8744 = vst [vmem:[#allocation156_spill] sm:$0xff] %v6117_v1  ;;  %v6139_v1 = vpop.permute.xlu0 %1301  ;;  %v1576_v45 = vstv %s5869_s0  ;;  %v2116_v10 = vstv %s5909_s27  ;;  %1925 = vrot.lane.b32.xlu0 %v5860_v52, %s4626_s26  ;;  %v1696_v52 = vstv %s6107_s18  ;;  %s4189_s0 = sld [smem:[#allocation11 + $0xdd]] }
 0x252   : > { %8745 = vst [vmem:[#allocation157_spill] sm:$0xff] %v6120_v6  ;;  %8747 = vst [vmem:[#allocation159_spill] sm:$0xff] %v6129_v49  ;;  %v6142_v6 = vmul.f32 %v1570_v19, %v5655_v39  ;;  %v1624_v49 = vstv %s5883_s8  ;;  %v6166_v19 = vmul.f32 %v2102_v24, %v6023_v53  ;;  %v6174_v36 = vmul.f32 %v1576_v45, %v5655_v39  ;;  %s4190_s8 = sld [smem:[#allocation11 + $0x101]] }
 0x253   : > { %8748 = vst [vmem:[#allocation160_spill] sm:$0xff] %v6132_v16  ;;  %8750 = vst [vmem:[#allocation162_spill] sm:$0xff] %v6145_v46  ;;  %v6154_v16 = vmul.f32 %v1618_v56, %v5795_v3  ;;  %v6169_v46 = vmul.f32 %v2102_v24, %v6025_v8  ;;  %v1630_v56 = vstv %s5951_s16  ;;  %v6180_v2 = vmul.f32 %v1576_v45, %v5647_v20  ;;  %v6183_v23 = vpop.permute.xlu1 %1317  ;;  %s4191_s27 = sld [smem:[#allocation11 + $0xe]] }
 0x254   : > { %8749 = vst [vmem:[#allocation161_spill] sm:$0xff] %v6142_v6  ;;  %8751 = vst [vmem:[#allocation163_spill] sm:$0xff] %v6148_v51  ;;  %v6177_v51 = vmul.f32 %v1624_v49, %v5797_v27  ;;  %v1636_v6 = vstv %s5999_s13  ;;  %v6188_v24 = vmul.f32 %v1624_v49, %v5795_v3  ;;  %v6194_v27 = vmul.f32 %v2116_v10, %v6025_v8  ;;  %s4193_s16 = sld [smem:[#allocation11 + $0x56]] }
 0x255   : > { %8752 = vst [vmem:[#allocation164_spill] sm:$0xff] %v6154_v16  ;;  %8753 = vst [vmem:[#allocation165_spill] sm:$0xff] %v6166_v19  ;;  %v1678_v16 = vstv %s5973_s17  ;;  %v6185_v19 = vpop.permute.xlu0 %1315  ;;  %v1684_v39 = vstv %s6021_s15  ;;  %v8761_v20 = vstv %s5931_s29  ;;  %v1642_v3 = vstv %s6045_s14  ;;  %s4194_s17 = sld [smem:[#allocation11 + $0x7a]] }
 0x256   : > { %8754 = vst [vmem:[#allocation166_spill] sm:$0xff] %v6169_v46  ;;  %8755 = vst [vmem:[#allocation167_spill] sm:$0xff] %v6174_v36  ;;  %v6191_v46 = vmul.f32 %v2116_v10, %v6023_v53  ;;  %v6200_v45 = vmul.f32 %v8761_v20, %v6023_v53  ;;  %v6214_v10 = vmul.f32 %v1630_v56, %v5829_v29  ;;  %v1648_v36 = vstv %s6089_s30  ;;  %s4195_s13 = sld [smem:[#allocation11 + $0x9e]] }
 0x257   : > { %8756 = vst [vmem:[#allocation168_spill] sm:$0xff] %v6177_v51  ;;  %8757 = vst [vmem:[#allocation169_spill] sm:$0xff] %v6180_v2  ;;  %v6203_v51 = vmul.f32 %v1630_v56, %v5827_v13  ;;  %v6206_v2 = vmul.f32 %v1678_v16, %v6023_v53  ;;  %v6217_v49 = vmul.f32 %v1678_v16, %v6025_v8  ;;  %v1654_v40 = vstv %s6123_s24  ;;  %s4196_s15 = sld [smem:[#allocation11 + $0xc2]] }
 0x258   : > { %8758 = vst [vmem:[#allocation170_spill] sm:$0xff] %v6188_v24  ;;  %8759 = vst [vmem:[#allocation171_spill] sm:$0xff] %v6191_v46  ;;  %v6220_v20 = vmul.f32 %v1636_v6, %v5827_v13  ;;  %v6224_v24 = vmul.f32 %v1684_v39, %v6023_v53  ;;  %v6227_v54 = vmul.f32 %v1636_v6, %v5829_v29  ;;  %1941 = vrot.lane.b32.xlu1 %v5863_v62, %s4626_s26  ;;  %s4197_s14 = sld [smem:[#allocation11 + $0xe6]] }
 0x259   : > { %8760 = vst [vmem:[#allocation172_spill] sm:$0xff] %v6194_v27  ;;  %8762 = vst [vmem:[#allocation173_spill] sm:$0xff] %v6200_v45  ;;  %v1690_v45 = vstv %s6067_s12  ;;  %v6231_v27 = vpop.permute.xlu1 %1331  ;;  %v6233_v56 = vpop.permute.xlu0 %1329  ;;  %v6236_v16 = vmul.f32 %v1684_v39, %v6025_v8  ;;  %v6239_v46 = vmul.f32 %v1642_v3, %v5827_v13  ;;  %v6247_v6 = vmul.f32 %v1642_v3, %v5829_v29  ;;  %s4198_s12 = sld [smem:[#allocation11 + $0x10a]] }
 0x25a   : > { %8763 = vst [vmem:[#allocation174_spill] sm:$0xff] %v6217_v49  ;;  %8764 = vst [vmem:[#allocation175_spill] sm:$0xff] %v6220_v20  ;;  %v1702_v20 = vstv %s6135_s9  ;;  %v6244_v49 = vmul.f32 %v1690_v45, %v6023_v53  ;;  %1939 = vrot.lane.b32.xlu0 %v5866_v18, %s4626_s26  ;;  %v6256_v39 = vmul.f32 %v1690_v45, %v6025_v8  ;;  %s4199_s30 = sld [smem:[#allocation11 + $0x17]] }
 0x25b   : > { %8765 = vst [vmem:[#allocation176_spill] sm:$0xff] %v6224_v24  ;;  %8766 = vst [vmem:[#allocation177_spill] sm:$0xff] %v6227_v54  ;;  %v6265_v3 = vmul.f32 %v1648_v36, %v5829_v29  ;;  %v6268_v54 = vmul.f32 %v1696_v52, %v6025_v8  ;;  %v6271_v62 = vmul.f32 %v1654_v40, %v5827_v13  ;;  %s4200_s18 = sld [smem:[#allocation11 + $0x3b]] }
 0x25c   : > { %8767 = vst [vmem:[#allocation178_spill] sm:$0xff] %v6239_v46  ;;  %8768 = vst [vmem:[#allocation179_spill] sm:$0xff] %v6244_v49  ;;  %v6259_v46 = vmul.f32 %v1648_v36, %v5827_v13  ;;  %v6262_v49 = vmul.f32 %v1696_v52, %v6023_v53  ;;  %v6274_v18 = vmul.f32 %v1702_v20, %v6023_v53  ;;  %v8775_v36 = vstv %s6151_s10  ;;  %s4201_s24 = sld [smem:[#allocation11 + $0x5f]] }
 0x25d   : > { %8771 = vst [vmem:[#allocation182_spill] sm:$0xff] %v6265_v3  ;;  %8772 = vst [vmem:[#allocation183_spill] sm:$0xff] %v6268_v54  ;;  %v6276_v45 = vpop.permute.xlu1 %1345  ;;  %v6278_v24 = vpop.permute.xlu0 %1343  ;;  %v6289_v52 = vmul.f32 %v8775_v36, %v5827_v13  ;;  %v8776_v54 = vstv %s6159_s11  ;;  %v625_v3 = vadd.f32 %v5370_v21, %v5051_v42  ;;  %v654_v36 = vadd.f32 %v5384_v30, %v5115_v48  ;;  %v8777_v21 = vld [vmem:[#allocation36_spill] sm:$0xff]  ;;  %v8779_v30 = vld [vmem:[#allocation38_spill] sm:$0xff]  ;;  %s4202_s9 = sld [smem:[#allocation11 + $0x83]] }
 0x25e   : > { %8769 = vst [vmem:[#allocation180_spill] sm:$0xff] %v6259_v46  ;;  %8770 = vst [vmem:[#allocation181_spill] sm:$0xff] %v6262_v49  ;;  %v6281_v46 = vmul.f32 %v1654_v40, %v5829_v29  ;;  %v6284_v49 = vmul.f32 %v1702_v20, %v6025_v8  ;;  %v640_v40 = vadd.f32 %v5376_v25, %v5076_v17  ;;  %1955 = vrot.lane.b32.xlu1 %v5872_v57, %s4626_s26 }
 0x25f   : > { %8773 = vst [vmem:[#allocation184_spill] sm:$0xff] %v6271_v62  ;;  %8774 = vst [vmem:[#allocation185_spill] sm:$0xff] %v6274_v18  ;;  %v6294_v62 = vmul.f32 %v8776_v54, %v6023_v53  ;;  %v626_v18 = vadd.f32 %v5368_v22, %v5042_v38  ;;  %v639_v20 = vadd.f32 %v5378_v33, %v5090_v11  ;;  %1953 = vrot.lane.b32.xlu0 %v5875_v50, %s4626_s26  ;;  %v8789_v50 = vld [vmem:[#allocation46_spill] sm:$0xff] }
 0x260   : > { %v653_v13 = vadd.f32 %v5386_v47, %v5132_v5  ;;  %v668_v54 = vadd.f32 %v5392_v37, %v5160_v59  ;;  %v667_v38 = vadd.f32 %v5394_v0, %v5168_v60  ;;  %v682_v42 = vadd.f32 %v5400_v63, %v5184_v26  ;;  %v8780_v47 = vld [vmem:[#allocation39_spill] sm:$0xff]  ;;  %v8782_v0 = vld [vmem:[#allocation112_spill] sm:$0xff] }
 0x261   : > { %v681_v17 = vadd.f32 %v5402_v4, %v5193_v31  ;;  %v696_v11 = vadd.f32 %v5408_v34, %v5230_v43  ;;  %v695_v48 = vadd.f32 %v5410_v9, %v5241_v15  ;;  %v710_v5 = vadd.f32 %v5416_v7, %v5259_v41  ;;  %v6330_v22 = vpop.permute.xlu1 %1359  ;;  %v6332_v26 = vpop.permute.xlu0 %1357  ;;  %v8778_v41 = vld [vmem:[#allocation37_spill] sm:$0xff]  ;;  %v8783_v63 = vld [vmem:[#allocation40_spill] sm:$0xff]  ;;  %v8785_v9 = vld [vmem:[#allocation42_spill] sm:$0xff] }
 0x262   : > { %v709_v59 = vadd.f32 %v5418_v12, %v5269_v61  ;;  %v724_v60 = vadd.f32 %v5424_v55, %v5275_v28  ;;  %v723_v31 = vadd.f32 %v5426_v14, %v5280_v32  ;;  %v738_v43 = vadd.f32 %v5432_v58, %v626_v18  ;;  %v8781_v28 = vld [vmem:[#allocation111_spill] sm:$0xff]  ;;  %v8784_v4 = vld [vmem:[#allocation41_spill] sm:$0xff]  ;;  %v8787_v14 = vld [vmem:[#allocation44_spill] sm:$0xff] }
 0x263   : > { %v737_v15 = vadd.f32 %v5434_v35, %v625_v3  ;;  %v752_v25 = vadd.f32 %v8777_v21, %v640_v40  ;;  %v751_v33 = vadd.f32 %v8778_v41, %v639_v20  ;;  %v766_v61 = vadd.f32 %v8779_v30, %v654_v36  ;;  %1969 = vrot.lane.b32.xlu1 %v8781_v28, %s4626_s26  ;;  %v8786_v12 = vld [vmem:[#allocation43_spill] sm:$0xff]  ;;  %v8788_v35 = vld [vmem:[#allocation45_spill] sm:$0xff]  ;;  %v8791_v36 = vld [vmem:[#allocation48_spill] sm:$0xff] }
 0x264   : > { %v765_v37 = vadd.f32 %v8780_v47, %v653_v13  ;;  %1967 = vrot.lane.b32.xlu0 %v8782_v0, %s4626_s26  ;;  %v780_v32 = vadd.f32 %v8783_v63, %v668_v54  ;;  %v779_v34 = vadd.f32 %v8784_v4, %v667_v38  ;;  %v794_v7 = vadd.f32 %v8785_v9, %v682_v42  ;;  %v8790_v3 = vld [vmem:[#allocation47_spill] sm:$0xff]  ;;  %v8792_v21 = vld [vmem:[#allocation49_spill] sm:$0xff]  ;;  %v8793_v41 = vld [vmem:[#allocation50_spill] sm:$0xff] }
 0x265   : > { %v793_v55 = vadd.f32 %v8786_v12, %v681_v17  ;;  %v808_v58 = vadd.f32 %v8787_v14, %v696_v11  ;;  %v807_v57 = vadd.f32 %v8788_v35, %v695_v48  ;;  %v822_v13 = vadd.f32 %v8789_v50, %v710_v5  ;;  %v6354_v40 = vpop.permute.xlu1 %1373  ;;  %v6356_v20 = vpop.permute.xlu0 %1371  ;;  %v8794_v30 = vld [vmem:[#allocation51_spill] sm:$0xff]  ;;  %v8795_v47 = vld [vmem:[#allocation52_spill] sm:$0xff]  ;;  %v8796_v28 = vld [vmem:[#allocation53_spill] sm:$0xff] }
 0x266   : > { %v821_v18 = vadd.f32 %v8790_v3, %v709_v59  ;;  %v836_v54 = vadd.f32 %v8791_v36, %v724_v60  ;;  %v835_v38 = vadd.f32 %v8792_v21, %v723_v31  ;;  %v850_v42 = vadd.f32 %v8793_v41, %v738_v43  ;;  %v8797_v0 = vld [vmem:[#allocation54_spill] sm:$0xff]  ;;  %v8798_v59 = vld [vmem:[#allocation115_spill] sm:$0xff]  ;;  %v8799_v63 = vld [vmem:[#allocation116_spill] sm:$0xff] }
 0x267   : > { %v849_v17 = vadd.f32 %v8794_v30, %v737_v15  ;;  %v864_v11 = vadd.f32 %v8795_v47, %v752_v25  ;;  %v863_v48 = vadd.f32 %v8796_v28, %v751_v33  ;;  %v878_v5 = vadd.f32 %v8797_v0, %v766_v61  ;;  %1983 = vrot.lane.b32.xlu1 %v8798_v59, %s4626_s26  ;;  %v8800_v4 = vld [vmem:[#allocation55_spill] sm:$0xff]  ;;  %v8801_v9 = vld [vmem:[#allocation56_spill] sm:$0xff]  ;;  %v8802_v12 = vld [vmem:[#allocation57_spill] sm:$0xff] }
 0x268   : > { %1981 = vrot.lane.b32.xlu0 %v8799_v63, %s4626_s26  ;;  %v877_v60 = vadd.f32 %v8800_v4, %v765_v37  ;;  %v892_v31 = vadd.f32 %v8801_v9, %v780_v32  ;;  %v891_v43 = vadd.f32 %v8802_v12, %v779_v34  ;;  %v8803_v14 = vld [vmem:[#allocation58_spill] sm:$0xff]  ;;  %v8804_v35 = vld [vmem:[#allocation59_spill] sm:$0xff]  ;;  %v8805_v50 = vld [vmem:[#allocation60_spill] sm:$0xff] }
 0x269   : > { %v906_v15 = vadd.f32 %v8803_v14, %v794_v7  ;;  %v905_v25 = vadd.f32 %v8804_v35, %v793_v55  ;;  %v920_v33 = vadd.f32 %v8805_v50, %v808_v58  ;;  %v8806_v3 = vld [vmem:[#allocation61_spill] sm:$0xff]  ;;  %v8807_v36 = vld [vmem:[#allocation62_spill] sm:$0xff]  ;;  %v6377_v41 = vpop.permute.xlu1 %1387  ;;  %v6379_v30 = vpop.permute.xlu0 %1385  ;;  %v8808_v47 = vld [vmem:[#allocation63_spill] sm:$0xff] }
 0x26a   : > { %v919_v61 = vadd.f32 %v8806_v3, %v807_v57  ;;  %v934_v21 = vadd.f32 %v8807_v36, %v822_v13  ;;  %v933_v37 = vadd.f32 %v8808_v47, %v821_v18  ;;  %v8809_v28 = vld [vmem:[#allocation64_spill] sm:$0xff]  ;;  %v8810_v0 = vld [vmem:[#allocation66_spill] sm:$0xff]  ;;  %v8811_v59 = vld [vmem:[#allocation67_spill] sm:$0xff] }
 0x26b   : > { %v948_v32 = vadd.f32 %v8809_v28, %v836_v54  ;;  %v962_v34 = vadd.f32 %v8810_v0, %v850_v42  ;;  %v961_v7 = vadd.f32 %v8811_v59, %v849_v17  ;;  %v8812_v63 = vld [vmem:[#allocation65_spill] sm:$0xff]  ;;  %v8813_v4 = vld [vmem:[#allocation68_spill] sm:$0xff]  ;;  %v8816_v12 = vld [vmem:[#allocation118_spill] sm:$0xff] }
 0x26c   : > { %v947_v55 = vadd.f32 %v8812_v63, %v835_v38  ;;  %v976_v58 = vadd.f32 %v8813_v4, %v864_v11  ;;  %v8814_v9 = vld [vmem:[#allocation69_spill] sm:$0xff]  ;;  %1995 = vrot.lane.b32.xlu0 %v8816_v12, %s4626_s26  ;;  %v8817_v14 = vld [vmem:[#allocation70_spill] sm:$0xff]  ;;  %v8818_v35 = vld [vmem:[#allocation71_spill] sm:$0xff] }
 0x26d   : > { %v975_v57 = vadd.f32 %v8814_v9, %v863_v48  ;;  %v8815_v13 = vld [vmem:[#allocation117_spill] sm:$0xff]  ;;  %v990_v18 = vadd.f32 %v8817_v14, %v878_v5  ;;  %v989_v54 = vadd.f32 %v8818_v35, %v877_v60  ;;  %v8819_v50 = vld [vmem:[#allocation84_spill] sm:$0xff]  ;;  %v8823_v28 = vld [vmem:[#allocation74_spill] sm:$0xff]  ;;  %v6400_v63 = vpop.permute.xlu1 %1401  ;;  %v6402_v4 = vpop.permute.xlu0 %1399 }
 0x26e   : > { %1997 = vrot.lane.b32.xlu1 %v8815_v13, %s4626_s26  ;;  %v1084_v42 = vadd.f32 %v8819_v50, %v962_v34  ;;  %v8820_v3 = vld [vmem:[#allocation85_spill] sm:$0xff]  ;;  %v8821_v36 = vld [vmem:[#allocation72_spill] sm:$0xff]  ;;  %v1018_v48 = vadd.f32 %v8823_v28, %v906_v15  ;;  %v8824_v0 = vld [vmem:[#allocation75_spill] sm:$0xff] }
 0x26f   : > { %v1083_v17 = vadd.f32 %v8820_v3, %v961_v7  ;;  %v1004_v38 = vadd.f32 %v8821_v36, %v892_v31  ;;  %v8822_v47 = vld [vmem:[#allocation73_spill] sm:$0xff]  ;;  %v1017_v59 = vadd.f32 %v8824_v0, %v905_v25  ;;  %v8825_v9 = vld [vmem:[#allocation76_spill] sm:$0xff]  ;;  %v8829_v35 = vld [vmem:[#allocation78_spill] sm:$0xff] }
 0x270   : > { %v1003_v11 = vadd.f32 %v8822_v47, %v891_v43  ;;  %v1032_v5 = vadd.f32 %v8825_v9, %v920_v33  ;;  %v8826_v13 = vld [vmem:[#allocation77_spill] sm:$0xff]  ;;  %v8827_v12 = vld [vmem:[#allocation100_spill] sm:$0xff]  ;;  %v1046_v31 = vadd.f32 %v8829_v35, %v934_v21  ;;  %v8830_v50 = vld [vmem:[#allocation79_spill] sm:$0xff] }
 0x271   : > { %v1031_v60 = vadd.f32 %v8826_v13, %v919_v61  ;;  %v1196_v34 = vadd.f32 %v8827_v12, %v1084_v42  ;;  %v8828_v14 = vld [vmem:[#allocation101_spill] sm:$0xff]  ;;  %v6410_v43 = vadd.f32 %v8830_v50, %v933_v37  ;;  %v8831_v15 = vld [vmem:[#allocation80_spill] sm:$0xff]  ;;  %v8832_v25 = vld [vmem:[#allocation119_spill] sm:$0xff]  ;;  %v1416_v35 = vpop.permute.xlu1 %1415  ;;  %v1414_v50 = vpop.permute.xlu0 %1413 }
 0x272   : > { %v1195_v7 = vadd.f32 %v8828_v14, %v1083_v17  ;;  %v6413_v3 = vadd.f32 %v8831_v15, %v948_v32  ;;  %2011 = vrot.lane.b32.xlu1 %v8832_v25, %s4626_s26  ;;  %v8833_v36 = vld [vmem:[#allocation120_spill] sm:$0xff]  ;;  %v8834_v33 = vld [vmem:[#allocation86_spill] sm:$0xff]  ;;  %v8835_v47 = vld [vmem:[#allocation87_spill] sm:$0xff] }
 0x273   : > { %2009 = vrot.lane.b32.xlu0 %v8833_v36, %s4626_s26  ;;  %v1098_v61 = vadd.f32 %v8834_v33, %v976_v58  ;;  %v1097_v42 = vadd.f32 %v8835_v47, %v975_v57  ;;  %v1308_v17 = vadd.f32 %v6137_v44, %v1196_v34  ;;  %v8836_v28 = vld [vmem:[#allocation81_spill] sm:$0xff]  ;;  %v8837_v0 = vld [vmem:[#allocation88_spill] sm:$0xff]  ;;  %v8839_v12 = vld [vmem:[#allocation90_spill] sm:$0xff] }
 0x274   : > { %v1307_v21 = vadd.f32 %v6139_v1, %v1195_v7  ;;  %v6424_v37 = vadd.f32 %v8836_v28, %v947_v55  ;;  %v1112_v32 = vadd.f32 %v8837_v0, %v990_v18  ;;  %v8838_v9 = vld [vmem:[#allocation89_spill] sm:$0xff]  ;;  %v1126_v14 = vadd.f32 %v8839_v12, %v1004_v38  ;;  %v8840_v15 = vld [vmem:[#allocation102_spill] sm:$0xff]  ;;  %v8841_v58 = vld [vmem:[#allocation103_spill] sm:$0xff] }
 0x275   : > { %v1111_v13 = vadd.f32 %v8838_v9, %v989_v54  ;;  %v1210_v25 = vadd.f32 %v8840_v15, %v1098_v61  ;;  %v1209_v36 = vadd.f32 %v8841_v58, %v1097_v42  ;;  %v1420_v57 = vadd.f32 %v1416_v35, %v1308_v17  ;;  %v8842_v44 = vld [vmem:[#allocation91_spill] sm:$0xff]  ;;  %v8843_v1 = vld [vmem:[#allocation92_spill] sm:$0xff]  ;;  %v8844_v55 = vld [vmem:[#allocation93_spill] sm:$0xff]  ;;  %v1430_v15 = vpop.permute.xlu1 %1429  ;;  %v1428_v58 = vpop.permute.xlu0 %1427 }
 0x276   : > { %v1419_v33 = vadd.f32 %v1414_v50, %v1307_v21  ;;  %v1125_v34 = vadd.f32 %v8842_v44, %v1003_v11  ;;  %v1140_v7 = vadd.f32 %v8843_v1, %v1018_v48  ;;  %v1139_v47 = vadd.f32 %v8844_v55, %v1017_v59  ;;  %v8845_v18 = vld [vmem:[#allocation125_spill] sm:$0xff]  ;;  %v8846_v54 = vld [vmem:[#allocation126_spill] sm:$0xff]  ;;  %v8848_v17 = vld [vmem:[#allocation123_spill] sm:$0xff] }
 0x277   : > { %2025 = vrot.lane.b32.xlu1 %v8845_v18, %s4626_s26  ;;  %2023 = vrot.lane.b32.xlu0 %v8846_v54, %s4626_s26  ;;  %v1322_v38 = vadd.f32 %v6183_v23, %v1210_v25  ;;  %v1321_v61 = vadd.f32 %v6185_v19, %v1209_v36  ;;  %v8847_v28 = vld [vmem:[#allocation121_spill] sm:$0xff]  ;;  %v8849_v0 = vld [vmem:[#allocation94_spill] sm:$0xff]  ;;  %v8850_v9 = vld [vmem:[#allocation95_spill] sm:$0xff] }
 0x278   : > { %v1538_v42 = vadd.f32 %v8847_v28, %v1420_v57  ;;  %v1537_v21 = vadd.f32 %v8848_v17, %v1419_v33  ;;  %v1154_v11 = vadd.f32 %v8849_v0, %v1032_v5  ;;  %v1153_v48 = vadd.f32 %v8850_v9, %v1031_v60  ;;  %v8851_v12 = vld [vmem:[#allocation104_spill] sm:$0xff]  ;;  %v8852_v35 = vld [vmem:[#allocation105_spill] sm:$0xff]  ;;  %v8853_v44 = vld [vmem:[#allocation122_spill] sm:$0xff] }
 0x279   : > { %v1224_v59 = vadd.f32 %v8851_v12, %v1112_v32  ;;  %v1223_v50 = vadd.f32 %v8852_v35, %v1111_v13  ;;  %v8854_v55 = vld [vmem:[#allocation124_spill] sm:$0xff]  ;;  %v1434_v25 = vadd.f32 %v1430_v15, %v1322_v38  ;;  %v1433_v19 = vadd.f32 %v1428_v58, %v1321_v61  ;;  %v8855_v36 = vld [vmem:[#allocation106_spill] sm:$0xff]  ;;  %v8856_v60 = vld [vmem:[#allocation133_spill] sm:$0xff]  ;;  %v1444_v9 = vpop.permute.xlu1 %1443  ;;  %v1442_v12 = vpop.permute.xlu0 %1441 }
 0x27a   : > { %v1586_v1 = vadd.f32 %v8853_v44, %v1538_v42  ;;  %v1585_v23 = vadd.f32 %v8854_v55, %v1537_v21  ;;  %v1238_v57 = vadd.f32 %v8855_v36, %v1126_v14  ;;  %v8857_v32 = vld [vmem:[#allocation134_spill] sm:$0xff]  ;;  %v8858_v13 = vld [vmem:[#allocation127_spill] sm:$0xff]  ;;  %v8859_v54 = vld [vmem:[#allocation129_spill] sm:$0xff] }
 0x27b   : > { %v1336_v33 = vadd.f32 %v6231_v27, %v1224_v59  ;;  %v1335_v5 = vadd.f32 %v6233_v56, %v1223_v50  ;;  %2039 = vrot.lane.b32.xlu1 %v8856_v60, %s4626_s26  ;;  %2037 = vrot.lane.b32.xlu0 %v8857_v32, %s4626_s26  ;;  %v1544_v18 = vadd.f32 %v8858_v13, %v1434_v25  ;;  %v8860_v61 = vld [vmem:[#allocation96_spill] sm:$0xff]  ;;  %v8861_v17 = vld [vmem:[#allocation107_spill] sm:$0xff]  ;;  %v8862_v21 = vld [vmem:[#allocation109_spill] sm:$0xff] }
 0x27c   : > { %v1543_v28 = vadd.f32 %v8859_v54, %v1433_v19  ;;  %v1634_v42 = vadd.f32 %v6203_v51, %v1586_v1  ;;  %v1633_v38 = vadd.f32 %v6214_v10, %v1585_v23  ;;  %v1168_v14 = vadd.f32 %v8860_v61, %v1046_v31  ;;  %v8863_v59 = vld [vmem:[#allocation128_spill] sm:$0xff]  ;;  %v8865_v10 = vld [vmem:[#allocation139_spill] sm:$0xff]  ;;  %v8869_v23 = vld [vmem:[#allocation137_spill] sm:$0xff] }
 0x27d   : > { %v1237_v27 = vadd.f32 %v8861_v17, %v1125_v34  ;;  %v1252_v56 = vadd.f32 %v8862_v21, %v1140_v7  ;;  %v1350_v0 = vadd.f32 %v6276_v45, %v1238_v57  ;;  %v1592_v35 = vadd.f32 %v8863_v59, %v1544_v18  ;;  %v8864_v50 = vld [vmem:[#allocation132_spill] sm:$0xff]  ;;  %v8867_v45 = vld [vmem:[#allocation174_spill] sm:$0xff]  ;;  %v8868_v1 = vld [vmem:[#allocation135_spill] sm:$0xff]  ;;  %v1458_v54 = vpop.permute.xlu1 %1457 }
 0x27e   : > { %v1591_v15 = vadd.f32 %v8864_v50, %v1543_v28  ;;  %v1448_v58 = vadd.f32 %v1444_v9, %v1336_v33  ;;  %v1447_v44 = vadd.f32 %v1442_v12, %v1335_v5  ;;  %v8866_v31 = vld [vmem:[#allocation140_spill] sm:$0xff]  ;;  %v6471_v34 = vadd.f32 %v6206_v2, %v1634_v42  ;;  %v8870_v19 = vld [vmem:[#allocation175_spill] sm:$0xff]  ;;  %v8871_v57 = vld [vmem:[#allocation177_spill] sm:$0xff]  ;;  %v1456_v28 = vpop.permute.xlu0 %1455 }
 0x27f   : > { %v1349_v51 = vadd.f32 %v6278_v24, %v1237_v27  ;;  %2053 = vrot.lane.b32.xlu1 %v8865_v10, %s4626_s26  ;;  %2051 = vrot.lane.b32.xlu0 %v8866_v31, %s4626_s26  ;;  %v6474_v7 = vadd.f32 %v8867_v45, %v1633_v38  ;;  %v1640_v36 = vadd.f32 %v8870_v19, %v1592_v35  ;;  %v8872_v33 = vld [vmem:[#allocation97_spill] sm:$0xff]  ;;  %v8873_v60 = vld [vmem:[#allocation110_spill] sm:$0xff]  ;;  %v8875_v42 = vld [vmem:[#allocation136_spill] sm:$0xff] }
 0x280   : > { %v1550_v55 = vadd.f32 %v8868_v1, %v1448_v58  ;;  %v1549_v25 = vadd.f32 %v8869_v23, %v1447_v44  ;;  %v1639_v24 = vadd.f32 %v8871_v57, %v1591_v15  ;;  %v1167_v5 = vadd.f32 %v8872_v33, %v6410_v43  ;;  %v8874_v13 = vld [vmem:[#allocation113_spill] sm:$0xff]  ;;  %v8876_v61 = vld [vmem:[#allocation138_spill] sm:$0xff]  ;;  %v8881_v35 = vld [vmem:[#allocation143_spill] sm:$0xff] }
 0x281   : > { %v1251_v32 = vadd.f32 %v8873_v60, %v1139_v47  ;;  %v1266_v18 = vadd.f32 %v8874_v13, %v1154_v11  ;;  %v1364_v2 = vadd.f32 %v6330_v22, %v1252_v56  ;;  %v1462_v27 = vadd.f32 %v1458_v54, %v1350_v0  ;;  %v8877_v12 = vld [vmem:[#allocation145_spill] sm:$0xff]  ;;  %v8878_v43 = vld [vmem:[#allocation146_spill] sm:$0xff]  ;;  %v8879_v47 = vld [vmem:[#allocation176_spill] sm:$0xff] }
 0x282   : > { %v1598_v38 = vadd.f32 %v8875_v42, %v1550_v55  ;;  %v1597_v17 = vadd.f32 %v8876_v61, %v1549_v25  ;;  %v1461_v21 = vadd.f32 %v1456_v28, %v1349_v51  ;;  %v6493_v11 = vadd.f32 %v8879_v47, %v1640_v36  ;;  %v8880_v56 = vld [vmem:[#allocation141_spill] sm:$0xff]  ;;  %v8882_v0 = vld [vmem:[#allocation178_spill] sm:$0xff]  ;;  %v1472_v55 = vpop.permute.xlu1 %1471  ;;  %v8887_v19 = vld [vmem:[#allocation144_spill] sm:$0xff] }
 0x283   : > { %v1363_v9 = vadd.f32 %v6332_v26, %v1251_v32  ;;  %2067 = vrot.lane.b32.xlu1 %v8877_v12, %s4626_s26  ;;  %2065 = vrot.lane.b32.xlu0 %v8878_v43, %s4626_s26  ;;  %v6496_v22 = vadd.f32 %v6236_v16, %v1639_v24  ;;  %v1556_v59 = vadd.f32 %v8880_v56, %v1462_v27  ;;  %v8883_v58 = vld [vmem:[#allocation98_spill] sm:$0xff]  ;;  %v1470_v16 = vpop.permute.xlu0 %1469  ;;  %v8891_v60 = vld [vmem:[#allocation149_spill] sm:$0xff]  ;;  %v8892_v13 = vld [vmem:[#allocation151_spill] sm:$0xff] }
 0x284   : > { %v1555_v50 = vadd.f32 %v8881_v35, %v1461_v21  ;;  %v1646_v15 = vadd.f32 %v8882_v0, %v1598_v38  ;;  %v1645_v26 = vadd.f32 %v6247_v6, %v1597_v17  ;;  %v1182_v44 = vadd.f32 %v8883_v58, %v6413_v3  ;;  %v8884_v51 = vld [vmem:[#allocation114_spill] sm:$0xff]  ;;  %v8888_v3 = vld [vmem:[#allocation153_spill] sm:$0xff]  ;;  %v8895_v42 = vld [vmem:[#allocation99_spill] sm:$0xff] }
 0x285   : > { %v1265_v10 = vadd.f32 %v8884_v51, %v1153_v48  ;;  %v8885_v31 = vld [vmem:[#allocation130_spill] sm:$0xff]  ;;  %v1378_v1 = vadd.f32 %v6354_v40, %v1266_v18  ;;  %v1476_v57 = vadd.f32 %v1472_v55, %v1364_v2  ;;  %v1475_v24 = vadd.f32 %v1470_v16, %v1363_v9  ;;  %v8893_v2 = vld [vmem:[#allocation180_spill] sm:$0xff]  ;;  %v8896_v61 = vld [vmem:[#allocation131_spill] sm:$0xff] }
 0x286   : > { %v1280_v45 = vadd.f32 %v8885_v31, %v1168_v14  ;;  %v8886_v23 = vld [vmem:[#allocation142_spill] sm:$0xff]  ;;  %v1603_v36 = vadd.f32 %v8887_v19, %v1555_v50  ;;  %v8890_v14 = vld [vmem:[#allocation179_spill] sm:$0xff]  ;;  %v6520_v33 = vadd.f32 %v6256_v39, %v1645_v26  ;;  %v1181_v38 = vadd.f32 %v8895_v42, %v6424_v37  ;;  %v1486_v12 = vpop.permute.xlu1 %1485  ;;  %v8899_v56 = vld [vmem:[#allocation152_spill] sm:$0xff] }
 0x287   : > { %v1604_v25 = vadd.f32 %v8886_v23, %v1556_v59  ;;  %v1377_v6 = vadd.f32 %v6356_v20, %v1265_v10  ;;  %2081 = vrot.lane.b32.xlu1 %v8888_v3, %s4626_s26  ;;  %v8889_v48 = vld [vmem:[#allocation154_spill] sm:$0xff]  ;;  %v6517_v40 = vadd.f32 %v8890_v14, %v1646_v15  ;;  %v1562_v32 = vadd.f32 %v8891_v60, %v1476_v57  ;;  %v8897_v27 = vld [vmem:[#allocation147_spill] sm:$0xff]  ;;  %v1484_v39 = vpop.permute.xlu0 %1483  ;;  %v8902_v0 = vld [vmem:[#allocation181_spill] sm:$0xff] }
 0x288   : > { %2079 = vrot.lane.b32.xlu0 %v8889_v48, %s4626_s26  ;;  %v1561_v18 = vadd.f32 %v8892_v13, %v1475_v24  ;;  %v8894_v28 = vld [vmem:[#allocation182_spill] sm:$0xff]  ;;  %v1279_v17 = vadd.f32 %v8896_v61, %v1167_v5  ;;  %v1294_v21 = vadd.f32 %v8897_v27, %v1182_v44  ;;  %v1392_v9 = vadd.f32 %v6377_v41, %v1280_v45  ;;  %v8900_v5 = vld [vmem:[#allocation159_spill] sm:$0xff]  ;;  %v8901_v41 = vld [vmem:[#allocation160_spill] sm:$0xff] }
 0x289   : > { %v1652_v54 = vadd.f32 %v8893_v2, %v1604_v25  ;;  %v1651_v20 = vadd.f32 %v8894_v28, %v1603_v36  ;;  %v8898_v43 = vld [vmem:[#allocation150_spill] sm:$0xff]  ;;  %v1490_v35 = vadd.f32 %v1486_v12, %v1378_v1  ;;  %v1489_v50 = vadd.f32 %v1484_v39, %v1377_v6  ;;  %v8903_v26 = vld [vmem:[#allocation183_spill] sm:$0xff]  ;;  %v8905_v10 = vld [vmem:[#allocation157_spill] sm:$0xff] }
 0x28a   : > { %v1610_v47 = vadd.f32 %v8898_v43, %v1562_v32  ;;  %v1609_v59 = vadd.f32 %v8899_v56, %v1561_v18  ;;  %v1391_v37 = vadd.f32 %v6379_v30, %v1279_v17  ;;  %v8904_v44 = vld [vmem:[#allocation155_spill] sm:$0xff]  ;;  %v8906_v30 = vld [vmem:[#allocation184_spill] sm:$0xff]  ;;  %v1406_v23 = vadd.f32 %v6400_v63, %v1294_v21  ;;  %v1500_v25 = vpop.permute.xlu1 %1499  ;;  %v8910_v48 = vld [vmem:[#allocation158_spill] sm:$0xff] }
 0x28b   : > { %2095 = vrot.lane.b32.xlu1 %v8900_v5, %s4626_s26  ;;  %v6543_v15 = vadd.f32 %v8902_v0, %v1652_v54  ;;  %v6546_v58 = vadd.f32 %v8903_v26, %v1651_v20  ;;  %v1568_v51 = vadd.f32 %v8904_v44, %v1490_v35  ;;  %v1567_v31 = vadd.f32 %v8905_v10, %v1489_v50  ;;  %v8907_v55 = vld [vmem:[#allocation148_spill] sm:$0xff]  ;;  %v1498_v19 = vpop.permute.xlu0 %1497  ;;  %v8911_v63 = vld [vmem:[#allocation165_spill] sm:$0xff]  ;;  %v8912_v13 = vld [vmem:[#allocation166_spill] sm:$0xff] }
 0x28c   : > { %2093 = vrot.lane.b32.xlu0 %v8901_v41, %s4626_s26  ;;  %v1658_v45 = vadd.f32 %v8906_v30, %v1610_v47  ;;  %v1657_v1 = vadd.f32 %v6281_v46, %v1609_v59  ;;  %v1293_v16 = vadd.f32 %v8907_v55, %v1181_v38  ;;  %v8908_v36 = vstv %s6151_s10  ;;  %v8909_v6 = vld [vmem:[#allocation156_spill] sm:$0xff]  ;;  %v8913_v18 = vld [vmem:[#allocation185_spill] sm:$0xff]  ;;  %v8915_v42 = vld [vmem:[#allocation163_spill] sm:$0xff]  ;;  %s4203_s10 = sld [smem:[#allocation11 + $0xa7]] }
 0x28d   : > { %v1661_v57 = vmul.f32 %v8908_v36, %v5829_v29  ;;  %v1666_v24 = vstv %s6507_s19  ;;  %v1616_v3 = vadd.f32 %v8909_v6, %v1568_v51  ;;  %v1615_v14 = vadd.f32 %v8910_v48, %v1567_v31  ;;  %v8914_v28 = vld [vmem:[#allocation161_spill] sm:$0xff]  ;;  %v8917_v12 = vld [vmem:[#allocation108_spill] sm:$0xff]  ;;  %v8918_v47 = vld [vmem:[#allocation162_spill] sm:$0xff]  ;;  %s4205_s19 = sld [smem:[#allocation11 + $0xef]] }
 0x28e   : > { %v1504_v60 = vadd.f32 %v1500_v25, %v1392_v9  ;;  %v1503_v46 = vadd.f32 %v1498_v19, %v1391_v37  ;;  %v1405_v32 = vadd.f32 %v6402_v4, %v1293_v16  ;;  %v6570_v2 = vadd.f32 %v8913_v18, %v1658_v45  ;;  %v1514_v4 = vpop.permute.xlu1 %1513  ;;  %v8919_v59 = vld [vmem:[#allocation164_spill] sm:$0xff]  ;;  %v8920_v37 = vld [vmem:[#allocation171_spill] sm:$0xff]  ;;  %v8923_v31 = vld [vmem:[#allocation169_spill] sm:$0xff] }
 0x28f   : > { %2109 = vrot.lane.b32.xlu1 %v8911_v63, %s4626_s26  ;;  %v6573_v54 = vadd.f32 %v6284_v49, %v1657_v1  ;;  %v1664_v61 = vadd.f32 %v6289_v52, %v1616_v3  ;;  %v1663_v17 = vadd.f32 %v1661_v57, %v1615_v14  ;;  %v1512_v27 = vpop.permute.xlu0 %1511  ;;  %v8916_v21 = vstv %s6159_s11  ;;  %v8921_v5 = vld [vmem:[#allocation172_spill] sm:$0xff]  ;;  %v8922_v51 = vld [vmem:[#allocation167_spill] sm:$0xff]  ;;  %v8928_v6 = vld [vmem:[#allocation170_spill] sm:$0xff]  ;;  %s4204_s11 = sld [smem:[#allocation11 + $0xcb]] }
 0x290   : > { %2107 = vrot.lane.b32.xlu0 %v8912_v13, %s4626_s26  ;;  %v1574_v20 = vadd.f32 %v8914_v28, %v1504_v60  ;;  %v1573_v38 = vadd.f32 %v8915_v42, %v1503_v46  ;;  %v1709_v9 = vmul.f32 %v8916_v21, %v6025_v8  ;;  %v1668_v39 = vmul.f32 %v1666_v24, %v8917_v12  ;;  %v8927_v57 = vld [vmem:[#allocation168_spill] sm:$0xff]  ;;  %v8929_v60 = vld [vmem:[#allocation173_spill] sm:$0xff] }
 0x291   : > { %v1714_v43 = vstv %s6531_s2  ;;  %v1667_v49 = vmul.f32 %v1666_v24, %v5829_v29  ;;  %v1518_v50 = vadd.f32 %v1514_v4, %v1406_v23  ;;  %v1517_v52 = vadd.f32 %v1512_v27, %v1405_v32  ;;  %s4206_s2 = sld [smem:[#allocation11 + $0x113]] }
 0x292   : > { %v1622_v56 = vadd.f32 %v8918_v47, %v1574_v20  ;;  %v1621_v35 = vadd.f32 %v8919_v59, %v1573_v38  ;;  %v6593_v41 = vadd.f32 %v6294_v62, %v1664_v61  ;;  %v6595_v0 = vadd.f32 %v1709_v9, %v1663_v17  ;;  %v6601_v55 = vpop.permute.xlu1 %1729 }
 0x293   : > { %2123 = vrot.lane.b32.xlu1 %v8920_v37, %s4626_s26  ;;  %v1672_v26 = vstv %s6535_s5  ;;  %v1720_v44 = vstv %s6548_s4  ;;  %v1580_v10 = vadd.f32 %v8922_v51, %v1518_v50  ;;  %v1579_v30 = vadd.f32 %v8923_v31, %v1517_v52  ;;  %8924 = vst [vmem:[#allocation36_spill] sm:$0xff] %v6601_v55  ;;  %v6603_v16 = vpop.permute.xlu0 %1727  ;;  %v4420_v52 = vld [vmem:[#allocation3 + $0x9] sm:$0xff]  ;;  %v4421_v37 = vld [vmem:[#allocation3 + $0x1] sm:$0xff]  ;;  %s4207_s5 = sld [smem:[#allocation11 + $0x20]] }
 0x294   : > { %2121 = vrot.lane.b32.xlu0 %v8921_v5, %s4626_s26  ;;  %v1670_v45 = vadd.f32 %v1668_v39, %v1622_v56  ;;  %v1669_v1 = vadd.f32 %v1667_v49, %v1621_v35  ;;  %8925 = vst [vmem:[#allocation37_spill] sm:$0xff] %v6603_v16  ;;  %v8926_v23 = vstv %s5931_s29  ;;  %v2144_v19 = vstv %s6556_s20  ;;  %v4422_v5 = vld [vmem:[#allocation2 + $0x9] sm:$0xff]  ;;  %s4192_s29 = sld [smem:[#allocation11 + $0x32]] }
 0x295   : > { %v2131_v25 = vmul.f32 %v8926_v23, %v6025_v8  ;;  %v1716_v62 = vmul.f32 %v1714_v43, %v6023_v53  ;;  %v1715_v36 = vmul.f32 %v1714_v43, %v6025_v8  ;;  %v1628_v24 = vadd.f32 %v8927_v57, %v1580_v10  ;;  %s4208_s4 = sld [smem:[#allocation11 + $0x44]] }
 0x296   : > { %v1627_v3 = vadd.f32 %v8928_v6, %v1579_v30  ;;  %v1674_v48 = vmul.f32 %v1672_v26, %v8917_v12  ;;  %v1673_v14 = vmul.f32 %v1672_v26, %v5829_v29  ;;  %v1722_v32 = vmul.f32 %v1720_v44, %v6023_v53  ;;  %v6626_v20 = vpop.permute.xlu1 %1745  ;;  %s4209_s20 = sld [smem:[#allocation11 + $0x68]] }
 0x297   : > { %2137 = vrot.lane.b32.xlu1 %v8929_v60, %s4626_s26  ;;  %v6620_v46 = vadd.f32 %v1716_v62, %v1670_v45  ;;  %v6623_v63 = vadd.f32 %v1715_v36, %v1669_v1  ;;  %v1721_v28 = vmul.f32 %v1720_v44, %v6025_v8  ;;  %v6628_v42 = vpop.permute.xlu0 %1743  ;;  %v2146_v29 = vmul.f32 %v2144_v19, %v6023_v53  ;;  %v4423_v44 = vld [vmem:[#allocation2 + $0x1] sm:$0xff] }
 0x298   : > { %2135 = vrot.lane.b32.xlu0 %v2131_v25, %s4626_s26  ;;  %v1676_v13 = vadd.f32 %v1674_v48, %v1628_v24  ;;  %v1675_v18 = vadd.f32 %v1673_v14, %v1627_v3  ;;  %v2145_v38 = vmul.f32 %v2144_v19, %v6025_v8  ;;  %v2158_v61 = vstv %s6586_s21  ;;  %s4210_s21 = sld [smem:[#allocation11 + $0x8c]] }
 0x299   : > { %v2160_v9 = vmul.f32 %v2158_v61, %v6023_v53  ;;  %v2159_v12 = vmul.f32 %v2158_v61, %v6025_v8  ;;  %v2172_v39 = vstv %s6613_s22  ;;  %v2196_v50 = vstv %s4183_s23  ;;  %s4211_s22 = sld [smem:[#allocation11 + $0xb0]] }
 0x29a   : > { %v6633_v17 = vadd.f32 %v1722_v32, %v1676_v13  ;;  %v6635_v4 = vadd.f32 %v1721_v28, %v1675_v18  ;;  %v6639_v27 = vpop.permute.xlu1 %1759  ;;  %v2174_v47 = vmul.f32 %v2172_v39, %v6023_v53  ;;  %v2173_v56 = vmul.f32 %v2172_v39, %v6025_v8  ;;  %s4212_s23 = sld [smem:[#allocation11 + $0xd4]] }
 0x29b   : > { %2151 = vrot.lane.b32.xlu1 %v2146_v29, %s4626_s26  ;;  %v6641_v21 = vpop.permute.xlu0 %1757  ;;  %v2198_v26 = vmul.f32 %v4422_v5, %v2196_v50  ;;  %v2197_v51 = vmul.f32 %v4423_v44, %v2196_v50  ;;  %v2210_v10 = vstv %s4184_s3  ;;  %v2224_v23 = vstv %s4185_s25  ;;  %s4213_s3 = sld [smem:[#allocation11 + $0xf8]] }
 0x29c   : > { %8930 = vst [vmem:[#allocation38_spill] sm:$0xff] %v6635_v4  ;;  %2149 = vrot.lane.b32.xlu0 %v2145_v38, %s4626_s26  ;;  %v2212_v45 = vmul.f32 %v4422_v5, %v2210_v10  ;;  %v2211_v1 = vmul.f32 %v4423_v44, %v2210_v10  ;;  %v2226_v62 = vmul.f32 %v4422_v5, %v2224_v23  ;;  %v2238_v57 = vstv %s4186_s28  ;;  %s4214_s25 = sld [smem:[#allocation11 + $0x11c]] }
 0x29d   : > { %v2225_v36 = vmul.f32 %v4423_v44, %v2224_v23  ;;  %v2240_v3 = vmul.f32 %v4422_v5, %v2238_v57  ;;  %v2239_v48 = vmul.f32 %v4423_v44, %v2238_v57  ;;  %v2252_v14 = vstv %s4187_s6  ;;  %v4425_v57 = vld [vmem:[#allocation2 + $0x19] sm:$0xff]  ;;  %s4247_s28 = sld [smem:[#allocation11 + $0x7]] }
 0x29e   : > { %v6648_v43 = vpop.permute.xlu1 %1773  ;;  %v2254_v13 = vmul.f32 %v4422_v5, %v2252_v14  ;;  %v2253_v18 = vmul.f32 %v4423_v44, %v2252_v14  ;;  %v2266_v28 = vstv %s4188_s7  ;;  %v2406_v55 = vstv %s4198_s12  ;;  %s6852_s6 = sld [smem:[#allocation11 + $0x2b]] }
 0x29f   : > { %2165 = vrot.lane.b32.xlu1 %v2160_v9, %s4626_s26  ;;  %v6650_v49 = vpop.permute.xlu0 %1771  ;;  %v2268_v61 = vmul.f32 %v4422_v5, %v2266_v28  ;;  %v2267_v9 = vmul.f32 %v4423_v44, %v2266_v28  ;;  %s6856_s7 = sld [smem:[#allocation11 + $0x4f]] }
 0x2a0   : > { %2163 = vrot.lane.b32.xlu0 %v2159_v12, %s4626_s26  ;;  %v2280_v12 = vstv %s4189_s0  ;;  %s6864_s0 = sld [smem:[#allocation11 + $0x73]] }
 0x2a1   : > { %v2281_v50 = vmul.f32 %v4423_v44, %v2280_v12  ;;  %s6902_s12 = sld [smem:[#allocation11 + $0xa0]] }
 0x2a2   : > { %v6656_v59 = vpop.permute.xlu1 %1787 }
 0x2a3   : > { %2179 = vrot.lane.b32.xlu1 %v2174_v47, %s4626_s26  ;;  %v6658_v35 = vpop.permute.xlu0 %1785 }
 0x2a4   : > { %2177 = vrot.lane.b32.xlu0 %v2173_v56, %s4626_s26  ;;  %v2282_v56 = vmul.f32 %v4422_v5, %v2280_v12 }
 0x2a6   : > { %v6662_v53 = vpop.permute.xlu1 %1801 }
 0x2a7   : > { %2187 = vrot.lane.b32.xlu1 %v4420_v52, %s4627_s1  ;;  %v6664_v8 = vpop.permute.xlu0 %1799  ;;  %v2294_v52 = vstv %s4190_s8  ;;  %s6868_s8 = sld [smem:[#allocation11 + $0x97]] }
 0x2a8   : > { %2185 = vrot.lane.b32.xlu0 %v4421_v37, %s4627_s1  ;;  %v2295_v10 = vmul.f32 %v4423_v44, %v2294_v52 }
 0x2aa   : > { %v6668_v31 = vpop.permute.xlu1 %1815 }
 0x2ab   : > { %2203 = vrot.lane.b32.xlu1 %v2198_v26, %s4627_s1  ;;  %v6670_v30 = vpop.permute.xlu0 %1813 }
 0x2ac   : > { %2201 = vrot.lane.b32.xlu0 %v2197_v51, %s4627_s1  ;;  %v2296_v51 = vmul.f32 %v4422_v5, %v2294_v52 }
 0x2ae   : > { %v6674_v25 = vpop.permute.xlu1 %1829 }
 0x2af   : > { %2217 = vrot.lane.b32.xlu1 %v2212_v45, %s4627_s1  ;;  %v6676_v19 = vpop.permute.xlu0 %1827  ;;  %v2308_v45 = vstv %s4191_s27  ;;  %s6872_s27 = sld [smem:[#allocation11 + $0xbb]] }
 0x2b0   : > { %2215 = vrot.lane.b32.xlu0 %v2211_v1, %s4627_s1 }
 0x2b2   : > { %v6680_v24 = vpop.permute.xlu1 %1843 }
 0x2b3   : > { %2231 = vrot.lane.b32.xlu1 %v2226_v62, %s4627_s1  ;;  %8931 = vst [vmem:[#allocation39_spill] sm:$0xff] %v6680_v24  ;;  %v6682_v6 = vpop.permute.xlu0 %1841  ;;  %v4424_v62 = vld [vmem:[#allocation2 + $0x21] sm:$0xff] }
 0x2b4   : > { %2229 = vrot.lane.b32.xlu0 %v2225_v36, %s4627_s1  ;;  %8932 = vst [vmem:[#allocation111_spill] sm:$0xff] %v6682_v6  ;;  %v2310_v36 = vmul.f32 %v4424_v62, %v2308_v45 }
 0x2b6   : > { %v6686_v60 = vpop.permute.xlu1 %1857 }
 0x2b7   : > { %2245 = vrot.lane.b32.xlu1 %v2240_v3, %s4627_s1  ;;  %8933 = vst [vmem:[#allocation112_spill] sm:$0xff] %v6686_v60  ;;  %v6688_v32 = vpop.permute.xlu0 %1855  ;;  %v2309_v3 = vmul.f32 %v4425_v57, %v2308_v45  ;;  %v2364_v45 = vstv %s4195_s13  ;;  %s6889_s13 = sld [smem:[#allocation11 + $0x34]] }
 0x2b8   : > { %2243 = vrot.lane.b32.xlu0 %v2239_v48, %s4627_s1  ;;  %8934 = vst [vmem:[#allocation40_spill] sm:$0xff] %v6688_v32  ;;  %v2322_v48 = vstv %s4192_s29  ;;  %s6874_s29 = sld [smem:[#allocation11 + $0xdf]] }
 0x2b9   : > { %v2324_v14 = vmul.f32 %v4424_v62, %v2322_v48 }
 0x2ba   : > { %v6692_v29 = vpop.permute.xlu1 %1871 }
 0x2bb   : > { %2259 = vrot.lane.b32.xlu1 %v2254_v13, %s4627_s1  ;;  %8935 = vst [vmem:[#allocation41_spill] sm:$0xff] %v6692_v29  ;;  %v6694_v38 = vpop.permute.xlu0 %1869  ;;  %v2323_v13 = vmul.f32 %v4425_v57, %v2322_v48  ;;  %v2366_v48 = vmul.f32 %v4424_v62, %v2364_v45 }
 0x2bc   : > { %2257 = vrot.lane.b32.xlu0 %v2253_v18, %s4627_s1  ;;  %8936 = vst [vmem:[#allocation42_spill] sm:$0xff] %v6694_v38  ;;  %v2336_v18 = vstv %s4193_s16  ;;  %s6882_s16 = sld [smem:[#allocation11 + $0x103]] }
 0x2bd   : > { %v2337_v12 = vmul.f32 %v4425_v57, %v2336_v18 }
 0x2be   : > { %v6698_v39 = vpop.permute.xlu1 %1885 }
 0x2bf   : > { %2273 = vrot.lane.b32.xlu1 %v2268_v61, %s4627_s1  ;;  %8937 = vst [vmem:[#allocation43_spill] sm:$0xff] %v6698_v39  ;;  %v6700_v47 = vpop.permute.xlu0 %1883 }
 0x2c0   : > { %2271 = vrot.lane.b32.xlu0 %v2267_v9, %s4627_s1  ;;  %8938 = vst [vmem:[#allocation44_spill] sm:$0xff] %v6700_v47  ;;  %v2338_v9 = vmul.f32 %v4424_v62, %v2336_v18 }
 0x2c2   : > { %v6704_v37 = vpop.permute.xlu1 %1899 }
 0x2c3   : > { %2287 = vrot.lane.b32.xlu1 %v2282_v56, %s4627_s1  ;;  %8939 = vst [vmem:[#allocation45_spill] sm:$0xff] %v6704_v37  ;;  %v6706_v26 = vpop.permute.xlu0 %1897  ;;  %v2350_v56 = vstv %s4194_s17  ;;  %s6885_s17 = sld [smem:[#allocation11 + $0x10]] }
 0x2c4   : > { %2285 = vrot.lane.b32.xlu0 %v2281_v50, %s4627_s1  ;;  %8940 = vst [vmem:[#allocation46_spill] sm:$0xff] %v6706_v26  ;;  %v7041_v26 = vld [vmem:[#allocation2 + $0x32] sm:$0xff] }
 0x2c6   : > { %v6710_v1 = vpop.permute.xlu1 %1913 }
 0x2c7   : > { %2301 = vrot.lane.b32.xlu1 %v2296_v51, %s4627_s1  ;;  %8941 = vst [vmem:[#allocation47_spill] sm:$0xff] %v6710_v1  ;;  %v6712_v23 = vpop.permute.xlu0 %1911  ;;  %v2352_v51 = vmul.f32 %v4424_v62, %v2350_v56 }
 0x2c8   : > { %2299 = vrot.lane.b32.xlu0 %v2295_v10, %s4627_s1  ;;  %8942 = vst [vmem:[#allocation48_spill] sm:$0xff] %v6712_v23  ;;  %v2351_v10 = vmul.f32 %v4425_v57, %v2350_v56 }
 0x2ca   : > { %v6716_v5 = vpop.permute.xlu1 %1927 }
 0x2cb   : > { %2315 = vrot.lane.b32.xlu1 %v2310_v36, %s4627_s1  ;;  %8943 = vst [vmem:[#allocation49_spill] sm:$0xff] %v6716_v5  ;;  %v6718_v44 = vpop.permute.xlu0 %1925 }
 0x2cc   : > { %2313 = vrot.lane.b32.xlu0 %v2309_v3, %s4627_s1  ;;  %8944 = vst [vmem:[#allocation50_spill] sm:$0xff] %v6718_v44 }
 0x2ce   : > { %v6722_v28 = vpop.permute.xlu1 %1941 }
 0x2cf   : > { %2329 = vrot.lane.b32.xlu1 %v2324_v14, %s4627_s1  ;;  %8945 = vst [vmem:[#allocation51_spill] sm:$0xff] %v6722_v28  ;;  %v6724_v61 = vpop.permute.xlu0 %1939  ;;  %v2365_v14 = vmul.f32 %v4425_v57, %v2364_v45 }
 0x2d0   : > { %2327 = vrot.lane.b32.xlu0 %v2323_v13, %s4627_s1  ;;  %8946 = vst [vmem:[#allocation52_spill] sm:$0xff] %v6724_v61  ;;  %v2378_v13 = vstv %s4196_s15  ;;  %s6891_s15 = sld [smem:[#allocation11 + $0x58]] }
 0x2d1   : > { %v2379_v56 = vmul.f32 %v4425_v57, %v2378_v13 }
 0x2d2   : > { %v6728_v50 = vpop.permute.xlu1 %1955 }
 0x2d3   : > { %2343 = vrot.lane.b32.xlu1 %v2338_v9, %s4627_s1  ;;  %8947 = vst [vmem:[#allocation53_spill] sm:$0xff] %v6728_v50  ;;  %v6730_v52 = vpop.permute.xlu0 %1953 }
 0x2d4   : > { %2341 = vrot.lane.b32.xlu0 %v2337_v12, %s4627_s1  ;;  %8948 = vst [vmem:[#allocation54_spill] sm:$0xff] %v6730_v52  ;;  %v2380_v12 = vmul.f32 %v4424_v62, %v2378_v13 }
 0x2d6   : > { %v6734_v36 = vpop.permute.xlu1 %1969 }
 0x2d7   : > { %2357 = vrot.lane.b32.xlu1 %v2352_v51, %s4627_s1  ;;  %8949 = vst [vmem:[#allocation115_spill] sm:$0xff] %v6734_v36  ;;  %v6736_v3 = vpop.permute.xlu0 %1967  ;;  %v2392_v51 = vstv %s4197_s14  ;;  %s6899_s14 = sld [smem:[#allocation11 + $0x7c]] }
 0x2d8   : > { %2355 = vrot.lane.b32.xlu0 %v2351_v10, %s4627_s1  ;;  %8950 = vst [vmem:[#allocation116_spill] sm:$0xff] %v6736_v3  ;;  %v2394_v16 = vmul.f32 %v4424_v62, %v2392_v51  ;;  %v2434_v3 = vstv %s4200_s18  ;;  %s6908_s18 = sld [smem:[#allocation11 + $0xe8]] }
 0x2da   : > { %v6740_v18 = vpop.permute.xlu1 %1983 }
 0x2db   : > { %2371 = vrot.lane.b32.xlu1 %v2366_v48, %s4627_s1  ;;  %8951 = vst [vmem:[#allocation55_spill] sm:$0xff] %v6740_v18  ;;  %v6742_v9 = vpop.permute.xlu0 %1981  ;;  %v2393_v48 = vmul.f32 %v4425_v57, %v2392_v51  ;;  %v2420_v18 = vstv %s4199_s30  ;;  %s6906_s30 = sld [smem:[#allocation11 + $0xc4]] }
 0x2dc   : > { %2369 = vrot.lane.b32.xlu0 %v2365_v14, %s4627_s1  ;;  %8952 = vst [vmem:[#allocation56_spill] sm:$0xff] %v6742_v9  ;;  %v2408_v9 = vmul.f32 %v4424_v62, %v2406_v55 }
 0x2dd   : > { %v3016_v52 = vstv %s6899_s14  ;;  %s7103_s14 = sld [smem:[#allocation11 + $0x6a]] }
 0x2df   : > { %2385 = vrot.lane.b32.xlu1 %v2380_v12, %s4627_s1  ;;  %v6748_v45 = vpop.permute.xlu0 %1995  ;;  %v2407_v12 = vmul.f32 %v4425_v57, %v2406_v55 }
 0x2e0   : > { %2383 = vrot.lane.b32.xlu0 %v2379_v56, %s4627_s1  ;;  %v6746_v10 = vpop.permute.xlu1 %1997  ;;  %8954 = vst [vmem:[#allocation58_spill] sm:$0xff] %v6748_v45  ;;  %v4426_v45 = vld [vmem:[#allocation2 + $0x39] sm:$0xff] }
 0x2e1   : > { %8953 = vst [vmem:[#allocation57_spill] sm:$0xff] %v6746_v10  ;;  %v4427_v10 = vld [vmem:[#allocation2 + $0x31] sm:$0xff]  ;;  %v2436_v57 = vmul.f32 %v4426_v45, %v2434_v3 }
 0x2e3   : > { %2399 = vrot.lane.b32.xlu1 %v2394_v16, %s4627_s1  ;;  %v2422_v16 = vmul.f32 %v4426_v45, %v2420_v18 }
 0x2e4   : > { %2397 = vrot.lane.b32.xlu0 %v2393_v48, %s4627_s1  ;;  %v6752_v14 = vpop.permute.xlu1 %2011  ;;  %v2421_v48 = vmul.f32 %v4427_v10, %v2420_v18 }
 0x2e5   : > { %8955 = vst [vmem:[#allocation59_spill] sm:$0xff] %v6752_v14  ;;  %v6754_v13 = vpop.permute.xlu0 %2009  ;;  %v2546_v14 = vstv %s4208_s4  ;;  %s6942_s4 = sld [smem:[#allocation11 + $0xa9]] }
 0x2e6   : > { %8956 = vst [vmem:[#allocation60_spill] sm:$0xff] %v6754_v13  ;;  %v2462_v13 = vstv %s4202_s9  ;;  %s6919_s9 = sld [smem:[#allocation11 + $0x19]] }
 0x2e7   : > { %2413 = vrot.lane.b32.xlu1 %v2408_v9, %s4627_s1  ;;  %v2435_v9 = vmul.f32 %v4427_v10, %v2434_v3 }
 0x2e8   : > { %2411 = vrot.lane.b32.xlu0 %v2407_v12, %s4627_s1  ;;  %v2448_v12 = vstv %s4201_s24  ;;  %s6916_s24 = sld [smem:[#allocation11 + $0x10c]] }
 0x2e9   : > { %v6758_v56 = vpop.permute.xlu1 %2025  ;;  %v6760_v51 = vpop.permute.xlu0 %2023 }
 0x2ea   : > { %8957 = vst [vmem:[#allocation61_spill] sm:$0xff] %v6758_v56  ;;  %8958 = vst [vmem:[#allocation62_spill] sm:$0xff] %v6760_v51  ;;  %v2450_v56 = vmul.f32 %v4426_v45, %v2448_v12 }
 0x2eb   : > { %2427 = vrot.lane.b32.xlu1 %v2422_v16, %s4627_s1  ;;  %v2449_v16 = vmul.f32 %v4427_v10, %v2448_v12 }
 0x2ec   : > { %2425 = vrot.lane.b32.xlu0 %v2421_v48, %s4627_s1  ;;  %v3086_v1 = vstv %s6919_s9  ;;  %s7169_s9 = sld [smem:[#allocation11 + $0x18]] }
 0x2ed   : > { %v6764_v55 = vpop.permute.xlu1 %2039  ;;  %v6766_v62 = vpop.permute.xlu0 %2037  ;;  %v7084_v60 = vmul.f32 %v3086_v1, %v7041_v26 }
 0x2ee   : > { %8959 = vst [vmem:[#allocation63_spill] sm:$0xff] %v6764_v55  ;;  %8960 = vst [vmem:[#allocation64_spill] sm:$0xff] %v6766_v62  ;;  %v2464_v62 = vmul.f32 %v4426_v45, %v2462_v13  ;;  %v2476_v55 = vstv %s4203_s10  ;;  %s6923_s10 = sld [smem:[#allocation11 + $0x3d]] }
 0x2ef   : > { %2441 = vrot.lane.b32.xlu1 %v2436_v57, %s4627_s1  ;;  %v2463_v57 = vmul.f32 %v4427_v10, %v2462_v13 }
 0x2f0   : > { %2439 = vrot.lane.b32.xlu0 %v2435_v9, %s4627_s1 }
 0x2f1   : > { %v6770_v51 = vpop.permute.xlu1 %2053  ;;  %v6772_v18 = vpop.permute.xlu0 %2051 }
 0x2f2   : > { %8961 = vst [vmem:[#allocation66_spill] sm:$0xff] %v6770_v51  ;;  %8962 = vst [vmem:[#allocation67_spill] sm:$0xff] %v6772_v18  ;;  %v2478_v18 = vmul.f32 %v4426_v45, %v2476_v55  ;;  %v2490_v51 = vstv %s4204_s11  ;;  %s6925_s11 = sld [smem:[#allocation11 + $0x61]] }
 0x2f3   : > { %2455 = vrot.lane.b32.xlu1 %v2450_v56, %s4627_s1  ;;  %v2477_v56 = vmul.f32 %v4427_v10, %v2476_v55 }
 0x2f4   : > { %2453 = vrot.lane.b32.xlu0 %v2449_v16, %s4627_s1 }
 0x2f5   : > { %v6776_v48 = vpop.permute.xlu1 %2067  ;;  %v6778_v3 = vpop.permute.xlu0 %2065 }
 0x2f6   : > { %8963 = vst [vmem:[#allocation65_spill] sm:$0xff] %v6776_v48  ;;  %8964 = vst [vmem:[#allocation68_spill] sm:$0xff] %v6778_v3  ;;  %v2492_v3 = vmul.f32 %v4426_v45, %v2490_v51  ;;  %v2504_v48 = vstv %s4205_s19  ;;  %s6933_s19 = sld [smem:[#allocation11 + $0x85]] }
 0x2f7   : > { %2469 = vrot.lane.b32.xlu1 %v2464_v62, %s4627_s1  ;;  %v2491_v62 = vmul.f32 %v4427_v10, %v2490_v51 }
 0x2f8   : > { %2467 = vrot.lane.b32.xlu0 %v2463_v57, %s4627_s1  ;;  %v3114_v38 = vstv %s6925_s11  ;;  %s7197_s11 = sld [smem:[#allocation11 + $0x3c]] }
 0x2f9   : > { %v6782_v9 = vpop.permute.xlu1 %2081 }
 0x2fa   : > { %8965 = vst [vmem:[#allocation69_spill] sm:$0xff] %v6782_v9  ;;  %v6784_v12 = vpop.permute.xlu0 %2079  ;;  %v2518_v9 = vstv %s4206_s2  ;;  %s6936_s2 = sld [smem:[#allocation11 + $0x6]] }
 0x2fb   : > { %8966 = vst [vmem:[#allocation117_spill] sm:$0xff] %v6784_v12  ;;  %2483 = vrot.lane.b32.xlu1 %v2478_v18, %s4627_s1  ;;  %v2506_v12 = vmul.f32 %v4426_v45, %v2504_v48  ;;  %v2505_v18 = vmul.f32 %v4427_v10, %v2504_v48 }
 0x2fc   : > { %2481 = vrot.lane.b32.xlu0 %v2477_v56, %s4627_s1 }
 0x2fd   : > { %v6788_v16 = vpop.permute.xlu1 %2095 }
 0x2fe   : > { %8967 = vst [vmem:[#allocation118_spill] sm:$0xff] %v6788_v16  ;;  %v6790_v13 = vpop.permute.xlu0 %2093  ;;  %v2532_v16 = vstv %s4207_s5  ;;  %s6940_s5 = sld [smem:[#allocation11 + $0xf]] }
 0x2ff   : > { %8968 = vst [vmem:[#allocation70_spill] sm:$0xff] %v6790_v13  ;;  %2497 = vrot.lane.b32.xlu1 %v2492_v3, %s4627_s1  ;;  %v2520_v13 = vmul.f32 %v4426_v45, %v2518_v9  ;;  %v2519_v3 = vmul.f32 %v4427_v10, %v2518_v9 }
 0x300   : > { %2495 = vrot.lane.b32.xlu0 %v2491_v62, %s4627_s1  ;;  %v2658_v29 = vstv %s6936_s2  ;;  %s7229_s2 = sld [smem:[#allocation11 + $0x60]] }
 0x301   : > { %v6794_v57 = vpop.permute.xlu1 %2109 }
 0x302   : > { %8969 = vst [vmem:[#allocation71_spill] sm:$0xff] %v6794_v57  ;;  %v6796_v55 = vpop.permute.xlu0 %2107  ;;  %v4429_v57 = vld [vmem:[#allocation2 + $0x49] sm:$0xff] }
 0x303   : > { %8970 = vst [vmem:[#allocation84_spill] sm:$0xff] %v6796_v55  ;;  %2511 = vrot.lane.b32.xlu1 %v2506_v12, %s4627_s1  ;;  %v4428_v55 = vld [vmem:[#allocation2 + $0x51] sm:$0xff] }
 0x304   : > { %2509 = vrot.lane.b32.xlu0 %v2505_v18, %s4627_s1  ;;  %v2534_v12 = vmul.f32 %v4428_v55, %v2532_v16  ;;  %v2533_v18 = vmul.f32 %v4429_v57, %v2532_v16  ;;  %v2548_v9 = vmul.f32 %v4428_v55, %v2546_v14  ;;  %v2706_v4 = vstv %s6940_s5  ;;  %s7239_s5 = sld [smem:[#allocation11 + $0x69]] }
 0x305   : > { %v6800_v56 = vpop.permute.xlu1 %2123 }
 0x306   : > { %8971 = vst [vmem:[#allocation85_spill] sm:$0xff] %v6800_v56  ;;  %v6802_v51 = vpop.permute.xlu0 %2121 }
 0x307   : > { %8972 = vst [vmem:[#allocation72_spill] sm:$0xff] %v6802_v51  ;;  %2525 = vrot.lane.b32.xlu1 %v2520_v13, %s4627_s1  ;;  %v2547_v13 = vmul.f32 %v4429_v57, %v2546_v14  ;;  %v2574_v51 = vstv %s4210_s21  ;;  %s6953_s21 = sld [smem:[#allocation11 + $0x33]] }
 0x308   : > { %2523 = vrot.lane.b32.xlu0 %v2519_v3, %s4627_s1  ;;  %v2560_v3 = vstv %s4209_s20  ;;  %s6950_s20 = sld [smem:[#allocation11 + $0x2a]] }
 0x309   : > { %v6806_v62 = vpop.permute.xlu1 %2137 }
 0x30a   : > { %8973 = vst [vmem:[#allocation73_spill] sm:$0xff] %v6806_v62  ;;  %v6808_v48 = vpop.permute.xlu0 %2135  ;;  %v2562_v62 = vmul.f32 %v4428_v55, %v2560_v3 }
 0x30b   : > { %8974 = vst [vmem:[#allocation74_spill] sm:$0xff] %v6808_v48  ;;  %2539 = vrot.lane.b32.xlu1 %v2534_v12, %s4627_s1  ;;  %v2561_v12 = vmul.f32 %v4429_v57, %v2560_v3 }
 0x30c   : > { %2537 = vrot.lane.b32.xlu0 %v2533_v18, %s4627_s1 }
 0x30d   : > { %v6812_v10 = vpop.permute.xlu1 %2151 }
 0x30e   : > { %8975 = vst [vmem:[#allocation75_spill] sm:$0xff] %v6812_v10  ;;  %v6814_v45 = vpop.permute.xlu0 %2149  ;;  %v2588_v10 = vstv %s4211_s22  ;;  %s6957_s22 = sld [smem:[#allocation11 + $0xcd]]  ;;  %v2664_v24 = vstv %s6950_s20 }
 0x30f   : > { %8976 = vst [vmem:[#allocation76_spill] sm:$0xff] %v6814_v45  ;;  %2553 = vrot.lane.b32.xlu1 %v2548_v9, %s4627_s1  ;;  %v2576_v45 = vmul.f32 %v4428_v55, %v2574_v51  ;;  %v2575_v9 = vmul.f32 %v4429_v57, %v2574_v51  ;;  %s7265_s20 = sld [smem:[#allocation11 + $0x8d]] }
 0x310   : > { %2551 = vrot.lane.b32.xlu0 %v2547_v13, %s4627_s1 }
 0x311   : > { %v6818_v48 = vpop.permute.xlu1 %2165 }
 0x312   : > { %8977 = vst [vmem:[#allocation77_spill] sm:$0xff] %v6818_v48  ;;  %v6820_v16 = vpop.permute.xlu0 %2163  ;;  %v2602_v48 = vstv %s4212_s23  ;;  %s6959_s23 = sld [smem:[#allocation11 + $0x4e]] }
 0x313   : > { %8978 = vst [vmem:[#allocation100_spill] sm:$0xff] %v6820_v16  ;;  %2567 = vrot.lane.b32.xlu1 %v2562_v62, %s4627_s1  ;;  %v2590_v16 = vmul.f32 %v4428_v55, %v2588_v10  ;;  %v2589_v62 = vmul.f32 %v4429_v57, %v2588_v10 }
 0x314   : > { %2565 = vrot.lane.b32.xlu0 %v2561_v12, %s4627_s1 }
 0x315   : > { %v6824_v18 = vpop.permute.xlu1 %2179 }
 0x316   : > { %8979 = vst [vmem:[#allocation101_spill] sm:$0xff] %v6824_v18  ;;  %v6826_v14 = vpop.permute.xlu0 %2177  ;;  %v2616_v18 = vstv %s4213_s3  ;;  %s6967_s3 = sld [smem:[#allocation11 + $0x57]] }
 0x317   : > { %8980 = vst [vmem:[#allocation78_spill] sm:$0xff] %v6826_v14  ;;  %2581 = vrot.lane.b32.xlu1 %v2576_v45, %s4627_s1  ;;  %v2604_v14 = vmul.f32 %v4428_v55, %v2602_v48  ;;  %v2603_v45 = vmul.f32 %v4429_v57, %v2602_v48 }
 0x318   : > { %2579 = vrot.lane.b32.xlu0 %v2575_v9, %s4627_s1 }
 0x319   : > { %v6830_v13 = vpop.permute.xlu1 %2187 }
 0x31a   : > { %8981 = vst [vmem:[#allocation79_spill] sm:$0xff] %v6830_v13  ;;  %v6832_v3 = vpop.permute.xlu0 %2185  ;;  %v2617_v13 = vmul.f32 %v4429_v57, %v2616_v18 }
 0x31b   : > { %8982 = vst [vmem:[#allocation80_spill] sm:$0xff] %v6832_v3  ;;  %2595 = vrot.lane.b32.xlu1 %v2590_v16, %s4627_s1  ;;  %v2618_v3 = vmul.f32 %v4428_v55, %v2616_v18  ;;  %v2630_v16 = vstv %s4214_s25  ;;  %v6858_v18 = vld [vmem:[#allocation2 + $0x2] sm:$0xff]  ;;  %s6971_s25 = sld [smem:[#allocation11 + $0xf1]] }
 0x31c   : > { %2593 = vrot.lane.b32.xlu0 %v2589_v62, %s4627_s1  ;;  %v2632_v56 = vmul.f32 %v4428_v55, %v2630_v16  ;;  %v2643_v55 = vld [vmem:[#allocation3 + $0x2] sm:$0xff] }
 0x31d   : > { %v6836_v12 = vpop.permute.xlu1 %2203 }
 0x31e   : > { %8983 = vst [vmem:[#allocation119_spill] sm:$0xff] %v6836_v12  ;;  %v6838_v51 = vpop.permute.xlu0 %2201 }
 0x31f   : > { %8984 = vst [vmem:[#allocation120_spill] sm:$0xff] %v6838_v51  ;;  %2609 = vrot.lane.b32.xlu1 %v2604_v14, %s4627_s1  ;;  %v2631_v14 = vmul.f32 %v4429_v57, %v2630_v16  ;;  %v2644_v57 = vld [vmem:[#allocation3 + $0xa] sm:$0xff]  ;;  %v2862_v16 = vstv %s4247_s28  ;;  %s6978_s28 = sld [smem:[#allocation11 + $0x72]]  ;;  %v3002_v51 = vstv %s6891_s15 }
 0x320   : > { %2607 = vrot.lane.b32.xlu0 %v2603_v45, %s4627_s1  ;;  %s7093_s15 = sld [smem:[#allocation11 + $0xe7]] }
 0x321   : > { %v6842_v9 = vpop.permute.xlu1 %2217 }
 0x322   : > { %8985 = vst [vmem:[#allocation86_spill] sm:$0xff] %v6842_v9  ;;  %v6844_v10 = vpop.permute.xlu0 %2215 }
 0x323   : > { %8986 = vst [vmem:[#allocation87_spill] sm:$0xff] %v6844_v10  ;;  %2623 = vrot.lane.b32.xlu1 %v2618_v3, %s4627_s1  ;;  %v2946_v10 = vstv %s6874_s29  ;;  %s7039_s29 = sld [smem:[#allocation11 + $0xba]] }
 0x324   : > { %2621 = vrot.lane.b32.xlu0 %v2617_v13, %s4627_s1  ;;  %v6866_v13 = vld [vmem:[#allocation2 + $0xa] sm:$0xff] }
 0x325   : > { %v6848_v62 = vpop.permute.xlu1 %2231 }
 0x326   : > { %8987 = vst [vmem:[#allocation81_spill] sm:$0xff] %v6848_v62  ;;  %v6850_v48 = vpop.permute.xlu0 %2229 }
 0x327   : > { %8988 = vst [vmem:[#allocation88_spill] sm:$0xff] %v6850_v48  ;;  %2637 = vrot.lane.b32.xlu1 %v2632_v56, %s4627_s1  ;;  %v2876_v48 = vstv %s6852_s6  ;;  %s6983_s6 = sld [smem:[#allocation11 + $0x7b]] }
 0x328   : > { %2635 = vrot.lane.b32.xlu0 %v2631_v14, %s4627_s1 }
 0x329   : > { %v6860_v45 = vpop.permute.xlu1 %2245 }
 0x32a   : > { %8989 = vst [vmem:[#allocation89_spill] sm:$0xff] %v6860_v45  ;;  %v6862_v3 = vpop.permute.xlu0 %2243  ;;  %v2863_v45 = vmul.f32 %v2862_v16, %v6858_v18 }
 0x32b   : > { %8990 = vst [vmem:[#allocation90_spill] sm:$0xff] %v6862_v3  ;;  %2853 = vrot.lane.b32.xlu1 %v2644_v57, %s4626_s26  ;;  %v2864_v3 = vmul.f32 %v2862_v16, %v6866_v13  ;;  %v2878_v16 = vmul.f32 %v2876_v48, %v6866_v13 }
 0x32c   : > { %2851 = vrot.lane.b32.xlu0 %v2643_v55, %s4626_s26 }
 0x32d   : > { %v6876_v56 = vpop.permute.xlu1 %2259 }
 0x32e   : > { %8991 = vst [vmem:[#allocation102_spill] sm:$0xff] %v6876_v56  ;;  %v6878_v14 = vpop.permute.xlu0 %2257  ;;  %v2890_v56 = vstv %s6856_s7  ;;  %s6993_s7 = sld [smem:[#allocation11 + $0x115]] }
 0x32f   : > { %8992 = vst [vmem:[#allocation103_spill] sm:$0xff] %v6878_v14  ;;  %2869 = vrot.lane.b32.xlu1 %v2864_v3, %s4626_s26  ;;  %v2877_v14 = vmul.f32 %v2876_v48, %v6858_v18  ;;  %v2892_v48 = vmul.f32 %v2890_v56, %v6866_v13 }
 0x330   : > { %2867 = vrot.lane.b32.xlu0 %v2863_v45, %s4626_s26 }
 0x331   : > { %v6893_v57 = vpop.permute.xlu1 %2273 }
 0x332   : > { %8993 = vst [vmem:[#allocation91_spill] sm:$0xff] %v6893_v57  ;;  %v6895_v55 = vpop.permute.xlu0 %2271  ;;  %v2904_v57 = vstv %s6864_s0  ;;  %s6999_s0 = sld [smem:[#allocation11 + $0x96]] }
 0x333   : > { %8994 = vst [vmem:[#allocation92_spill] sm:$0xff] %v6895_v55  ;;  %2883 = vrot.lane.b32.xlu1 %v2878_v16, %s4626_s26  ;;  %v2891_v55 = vmul.f32 %v2890_v56, %v6858_v18  ;;  %v2906_v56 = vmul.f32 %v2904_v57, %v6866_v13 }
 0x334   : > { %2881 = vrot.lane.b32.xlu0 %v2877_v14, %s4626_s26 }
 0x335   : > { %v6910_v45 = vpop.permute.xlu1 %2287 }
 0x336   : > { %8995 = vst [vmem:[#allocation93_spill] sm:$0xff] %v6910_v45  ;;  %v6912_v3 = vpop.permute.xlu0 %2285  ;;  %v2918_v45 = vstv %s6868_s8  ;;  %s7011_s8 = sld [smem:[#allocation11 + $0x9f]] }
 0x337   : > { %8996 = vst [vmem:[#allocation125_spill] sm:$0xff] %v6912_v3  ;;  %2897 = vrot.lane.b32.xlu1 %v2892_v48, %s4626_s26  ;;  %v2905_v3 = vmul.f32 %v2904_v57, %v6858_v18  ;;  %v2920_v57 = vmul.f32 %v2918_v45, %v6866_v13 }
 0x338   : > { %2895 = vrot.lane.b32.xlu0 %v2891_v55, %s4626_s26 }
 0x339   : > { %v6927_v14 = vpop.permute.xlu1 %2301 }
 0x33a   : > { %8997 = vst [vmem:[#allocation126_spill] sm:$0xff] %v6927_v14  ;;  %v6929_v16 = vpop.permute.xlu0 %2299  ;;  %v2932_v14 = vstv %s6872_s27  ;;  %s7021_s27 = sld [smem:[#allocation11 + $0x22]] }
 0x33b   : > { %8998 = vst [vmem:[#allocation121_spill] sm:$0xff] %v6929_v16  ;;  %2911 = vrot.lane.b32.xlu1 %v2906_v56, %s4626_s26  ;;  %v2919_v16 = vmul.f32 %v2918_v45, %v6858_v18  ;;  %v2934_v45 = vmul.f32 %v2932_v14, %v6866_v13  ;;  %v2933_v62 = vmul.f32 %v2932_v14, %v6858_v18  ;;  %v2988_v14 = vstv %s6889_s13  ;;  %s7077_s13 = sld [smem:[#allocation11 + $0xde]] }
 0x33c   : > { %2909 = vrot.lane.b32.xlu0 %v2905_v3, %s4626_s26 }
 0x33d   : > { %v6944_v55 = vpop.permute.xlu1 %2315 }
 0x33e   : > { %8999 = vst [vmem:[#allocation123_spill] sm:$0xff] %v6944_v55  ;;  %v6946_v48 = vpop.permute.xlu0 %2313  ;;  %v2948_v55 = vmul.f32 %v2946_v10, %v6866_v13 }
 0x33f   : > { %9000 = vst [vmem:[#allocation94_spill] sm:$0xff] %v6946_v48  ;;  %2925 = vrot.lane.b32.xlu1 %v2920_v57, %s4626_s26  ;;  %v2960_v57 = vstv %s6882_s16  ;;  %s7053_s16 = sld [smem:[#allocation11 + $0xc3]] }
 0x340   : > { %2923 = vrot.lane.b32.xlu0 %v2919_v16, %s4626_s26  ;;  %v6973_v16 = vld [vmem:[#allocation2 + $0x22] sm:$0xff]  ;;  %v2961_v12 = vmul.f32 %v2960_v57, %v6858_v18 }
 0x341   : > { %v6961_v3 = vpop.permute.xlu1 %2329  ;;  %v7014_v61 = vmul.f32 %v3002_v51, %v6973_v16  ;;  %v7030_v5 = vmul.f32 %v3016_v52, %v6973_v16 }
 0x342   : > { %9001 = vst [vmem:[#allocation95_spill] sm:$0xff] %v6961_v3  ;;  %v6963_v56 = vpop.permute.xlu0 %2327  ;;  %v6980_v3 = vld [vmem:[#allocation2 + $0x1a] sm:$0xff] }
 0x343   : > { %9002 = vst [vmem:[#allocation104_spill] sm:$0xff] %v6963_v56  ;;  %2939 = vrot.lane.b32.xlu1 %v2934_v45, %s4626_s26  ;;  %v2974_v56 = vstv %s6885_s17  ;;  %v2947_v45 = vmul.f32 %v2946_v10, %v6858_v18  ;;  %v7008_v50 = vmul.f32 %v2988_v14, %v6980_v3  ;;  %v7017_v28 = vmul.f32 %v3002_v51, %v6980_v3  ;;  %s7067_s17 = sld [smem:[#allocation11 + $0x46]] }
 0x344   : > { %2937 = vrot.lane.b32.xlu0 %v2933_v62, %s4626_s26  ;;  %v2962_v62 = vmul.f32 %v2960_v57, %v6866_v13  ;;  %v2976_v36 = vmul.f32 %v2974_v56, %v6973_v16  ;;  %v2975_v10 = vmul.f32 %v2974_v56, %v6980_v3  ;;  %v3044_v57 = vstv %s6906_s30  ;;  %v7023_v56 = vld [vmem:[#allocation2 + $0x3a] sm:$0xff]  ;;  %s7129_s30 = sld [smem:[#allocation11 + $0x10b]] }
 0x345   : > { %v6985_v9 = vpop.permute.xlu1 %2343  ;;  %9005 = vst [vmem:[#allocation124_spill] sm:$0xff] %v7023_v56  ;;  %v7033_v23 = vmul.f32 %v3016_v52, %v6980_v3  ;;  %v7050_v37 = vmul.f32 %v3044_v57, %v6980_v3  ;;  %v3100_v52 = vstv %s6923_s10  ;;  %s7181_s10 = sld [smem:[#allocation11 + $0x21]] }
 0x346   : > { %9003 = vst [vmem:[#allocation105_spill] sm:$0xff] %v6985_v9  ;;  %v6987_v48 = vpop.permute.xlu0 %2341  ;;  %v3030_v9 = vstv %s6902_s12  ;;  %v7087_v6 = vmul.f32 %v3100_v52, %v7023_v56  ;;  %s7117_s12 = sld [smem:[#allocation11 + $0x102]] }
 0x347   : > { %9004 = vst [vmem:[#allocation122_spill] sm:$0xff] %v6987_v48  ;;  %2953 = vrot.lane.b32.xlu1 %v2948_v55, %s4626_s26  ;;  %v7005_v48 = vmul.f32 %v2988_v14, %v6973_v16  ;;  %v3058_v55 = vstv %s6908_s18  ;;  %v7036_v51 = vmul.f32 %v3030_v9, %v6973_v16  ;;  %s7145_s18 = sld [smem:[#allocation11 + $0x8e]] }
 0x348   : > { %2951 = vrot.lane.b32.xlu0 %v2947_v45, %s4626_s26  ;;  %v3072_v45 = vstv %s6916_s24  ;;  %v7058_v47 = vmul.f32 %v3058_v55, %v6973_v16  ;;  %s7155_s24 = sld [smem:[#allocation11 + $0xb2]] }
 0x349   : > { %v7025_v44 = vpop.permute.xlu1 %2357  ;;  %v7064_v39 = vmul.f32 %v3072_v45, %v6973_v16 }
 0x34a   : > { %9006 = vst [vmem:[#allocation106_spill] sm:$0xff] %v7025_v44  ;;  %v7027_v14 = vpop.permute.xlu0 %2355  ;;  %v7044_v44 = vmul.f32 %v3030_v9, %v6980_v3  ;;  %v7061_v9 = vmul.f32 %v3058_v55, %v6980_v3 }
 0x34b   : > { %9007 = vst [vmem:[#allocation133_spill] sm:$0xff] %v7027_v14  ;;  %v7047_v14 = vmul.f32 %v3044_v57, %v6973_v16  ;;  %2967 = vrot.lane.b32.xlu1 %v2962_v62, %s4626_s26  ;;  %v7070_v57 = vmul.f32 %v3072_v45, %v6980_v3  ;;  %v3128_v62 = vstv %s6933_s19  ;;  %v7090_v45 = vmul.f32 %v3100_v52, %v7041_v26  ;;  %s7209_s19 = sld [smem:[#allocation11 + $0x45]] }
 0x34c   : > { %2965 = vrot.lane.b32.xlu0 %v2961_v12, %s4626_s26  ;;  %v7073_v12 = vmul.f32 %v3086_v1, %v7023_v56  ;;  %v7108_v1 = vmul.f32 %v3128_v62, %v7023_v56  ;;  %v7111_v52 = vmul.f32 %v3128_v62, %v7041_v26 }
 0x34d   : > { %v7079_v55 = vpop.permute.xlu1 %2371 }
 0x34e   : > { %9008 = vst [vmem:[#allocation134_spill] sm:$0xff] %v7073_v12  ;;  %9009 = vst [vmem:[#allocation127_spill] sm:$0xff] %v7079_v55  ;;  %v7081_v32 = vpop.permute.xlu0 %2369  ;;  %v7096_v12 = vmul.f32 %v3114_v38, %v7023_v56  ;;  %v7099_v55 = vmul.f32 %v3114_v38, %v7041_v26  ;;  %v2712_v38 = vstv %s6953_s21  ;;  %s7280_s21 = sld [smem:[#allocation11 + $0xa8]] }
 0x34f   : > { %9010 = vst [vmem:[#allocation129_spill] sm:$0xff] %v7081_v32  ;;  %v3142_v32 = vstv %s6942_s4  ;;  %2981 = vrot.lane.b32.xlu1 %v2976_v36, %s4626_s26  ;;  %9013 = vst [vmem:[#allocation109_spill] sm:$0xff] %v7108_v1  ;;  %v7123_v36 = vmul.f32 %v2658_v29, %v6858_v18  ;;  %v3156_v1 = vstv %s6957_s22  ;;  %s7255_s4 = sld [smem:[#allocation11 + $0x84]] }
 0x350   : > { %9011 = vst [vmem:[#allocation96_spill] sm:$0xff] %v7096_v12  ;;  %9012 = vst [vmem:[#allocation107_spill] sm:$0xff] %v7099_v55  ;;  %2979 = vrot.lane.b32.xlu0 %v2975_v10, %s4626_s26  ;;  %v7114_v12 = vmul.f32 %v2658_v29, %v6866_v13  ;;  %v7120_v55 = vmul.f32 %v2706_v4, %v6973_v16  ;;  %v7126_v10 = vmul.f32 %v2706_v4, %v6980_v3  ;;  %s7292_s22 = sld [smem:[#allocation11 + $0xb1]] }
 0x351   : > { %9014 = vst [vmem:[#allocation128_spill] sm:$0xff] %v7111_v52  ;;  %9017 = vst [vmem:[#allocation140_spill] sm:$0xff] %v7123_v36  ;;  %v7131_v62 = vpop.permute.xlu1 %2385  ;;  %v7136_v52 = vmul.f32 %v3142_v32, %v7023_v56  ;;  %v7142_v29 = vmul.f32 %v2664_v24, %v6866_v13  ;;  %v2670_v4 = vstv %s6959_s23  ;;  %v3170_v36 = vstv %s6971_s25  ;;  %s7306_s23 = sld [smem:[#allocation11 + $0xcc]] }
 0x352   : > { %9015 = vst [vmem:[#allocation132_spill] sm:$0xff] %v7114_v12  ;;  %9016 = vst [vmem:[#allocation139_spill] sm:$0xff] %v7120_v55  ;;  %v7133_v12 = vpop.permute.xlu0 %2383  ;;  %v7139_v55 = vmul.f32 %v3142_v32, %v7041_v26  ;;  %v7162_v32 = vmul.f32 %v2712_v38, %v6980_v3  ;;  %s7664_s25 = sld [smem:[#allocation11 + $0xf0]] }
 0x353   : > { %9018 = vst [vmem:[#allocation174_spill] sm:$0xff] %v7126_v10  ;;  %9019 = vst [vmem:[#allocation135_spill] sm:$0xff] %v7131_v62  ;;  %v7148_v10 = vmul.f32 %v2712_v38, %v6973_v16  ;;  %v7151_v62 = vmul.f32 %v2664_v24, %v6858_v18  ;;  %2995 = vrot.lane.b32.xlu1 %v7005_v48, %s4626_s26  ;;  %v2724_v24 = vstv %s6983_s6  ;;  %s7692_s6 = sld [smem:[#allocation11 + $0x114]] }
 0x354   : > { %9020 = vst [vmem:[#allocation137_spill] sm:$0xff] %v7133_v12  ;;  %9021 = vst [vmem:[#allocation175_spill] sm:$0xff] %v7136_v52  ;;  %v2718_v12 = vstv %s6967_s3  ;;  %2993 = vrot.lane.b32.xlu0 %v7008_v50, %s4626_s26  ;;  %v7175_v48 = vmul.f32 %v2670_v4, %v6866_v13  ;;  %v7178_v50 = vmul.f32 %v2670_v4, %v6858_v18  ;;  %s7316_s3 = sld [smem:[#allocation11 + $0xd5]] }
 0x355   : > { %9022 = vst [vmem:[#allocation177_spill] sm:$0xff] %v7139_v55  ;;  %9023 = vst [vmem:[#allocation97_spill] sm:$0xff] %v7142_v29  ;;  %v7165_v29 = vmul.f32 %v3156_v1, %v7023_v56  ;;  %v3184_v55 = vstv %s6993_s7  ;;  %v7183_v38 = vpop.permute.xlu1 %2399  ;;  %v7191_v52 = vmul.f32 %v2718_v12, %v6980_v3  ;;  %v7200_v4 = vmul.f32 %v3170_v36, %v7041_v26  ;;  %s7705_s7 = sld [smem:[#allocation11 + $0x11d]] }
 0x356   : > { %9024 = vst [vmem:[#allocation110_spill] sm:$0xff] %v7148_v10  ;;  %9025 = vst [vmem:[#allocation113_spill] sm:$0xff] %v7151_v62  ;;  %v2676_v10 = vstv %s6978_s28  ;;  %v7172_v62 = vmul.f32 %v3156_v1, %v7041_v26  ;;  %v7194_v1 = vmul.f32 %v3170_v36, %v7023_v56  ;;  %s7688_s28 = sld [smem:[#allocation11 + $0xf9]] }
 0x357   : > { %9026 = vst [vmem:[#allocation136_spill] sm:$0xff] %v7162_v32  ;;  %9027 = vst [vmem:[#allocation138_spill] sm:$0xff] %v7165_v29  ;;  %v7185_v32 = vpop.permute.xlu0 %2397  ;;  %v7188_v29 = vmul.f32 %v2718_v12, %v6973_v16  ;;  %v2730_v12 = vstv %s7011_s8  ;;  %3009 = vrot.lane.b32.xlu1 %v7014_v61, %s4626_s26  ;;  %v7220_v36 = vmul.f32 %v2676_v10, %v6858_v18  ;;  %s7743_s8 = sld [smem:[#allocation11 + $0xfa]] }
 0x358   : > { %9028 = vst [vmem:[#allocation145_spill] sm:$0xff] %v7175_v48  ;;  %9029 = vst [vmem:[#allocation146_spill] sm:$0xff] %v7178_v50  ;;  %v2682_v48 = vstv %s6999_s0  ;;  %3007 = vrot.lane.b32.xlu0 %v7017_v28, %s4626_s26  ;;  %v3198_v50 = vstv %s7021_s27  ;;  %v7232_v61 = vmul.f32 %v3184_v55, %v7041_v26  ;;  %s7713_s0 = sld [smem:[#allocation11 + $0xd6]] }
 0x359   : > { %9030 = vst [vmem:[#allocation176_spill] sm:$0xff] %v7183_v38  ;;  %9031 = vst [vmem:[#allocation141_spill] sm:$0xff] %v7185_v32  ;;  %v7203_v38 = vmul.f32 %v2676_v10, %v6866_v13  ;;  %v7206_v32 = vmul.f32 %v2724_v24, %v6973_v16  ;;  %v7235_v28 = vmul.f32 %v2682_v48, %v6866_v13  ;;  %v2736_v10 = vstv %s7053_s16  ;;  %s7770_s27 = sld [smem:[#allocation11 + $0x11e]] }
 0x35a   : > { %9032 = vst [vmem:[#allocation143_spill] sm:$0xff] %v7188_v29  ;;  %9033 = vst [vmem:[#allocation178_spill] sm:$0xff] %v7191_v52  ;;  %v7211_v52 = vld [vmem:[#allocation2 + $0x52] sm:$0xff]  ;;  %v7213_v29 = vld [vmem:[#allocation2 + $0x4a] sm:$0xff]  ;;  %s4280_s16 = sld [smem:[#allocation11 + $0x2c]] }
 0x35b   : > { %9034 = vst [vmem:[#allocation98_spill] sm:$0xff] %v7194_v1  ;;  %9035 = vst [vmem:[#allocation114_spill] sm:$0xff] %v7200_v4  ;;  %v2688_v4 = vstv %s7039_s29  ;;  %v2742_v1 = vstv %s7093_s15  ;;  %3023 = vrot.lane.b32.xlu1 %v7030_v5, %s4626_s26  ;;  %s4279_s29 = sld [smem:[#allocation11 + $0x8]] }
 0x35c   : > { %9036 = vst [vmem:[#allocation130_spill] sm:$0xff] %v7203_v38  ;;  %9037 = vst [vmem:[#allocation142_spill] sm:$0xff] %v7206_v32  ;;  %v7223_v38 = vmul.f32 %v2724_v24, %v6980_v3  ;;  %v7226_v32 = vmul.f32 %v3184_v55, %v7023_v56  ;;  %v7241_v24 = vpop.permute.xlu1 %2413  ;;  %v7252_v55 = vmul.f32 %v2730_v12, %v6980_v3  ;;  %3021 = vrot.lane.b32.xlu0 %v7033_v23, %s4626_s26  ;;  %s4284_s15 = sld [smem:[#allocation11 + $0xbc]] }
 0x35d   : > { %9038 = vst [vmem:[#allocation144_spill] sm:$0xff] %v7211_v52  ;;  %9039 = vst [vmem:[#allocation153_spill] sm:$0xff] %v7220_v36  ;;  %v7246_v36 = vmul.f32 %v2730_v12, %v6973_v16  ;;  %v7275_v12 = vmul.f32 %v2736_v10, %v6973_v16 }
 0x35e   : > { %9040 = vst [vmem:[#allocation154_spill] sm:$0xff] %v7223_v38  ;;  %9041 = vst [vmem:[#allocation179_spill] sm:$0xff] %v7226_v32  ;;  %v7243_v38 = vpop.permute.xlu0 %2411  ;;  %v7249_v32 = vmul.f32 %v2682_v48, %v6858_v18  ;;  %v7272_v48 = vmul.f32 %v2688_v4, %v6866_v13 }
 0x35f   : > { %9042 = vst [vmem:[#allocation149_spill] sm:$0xff] %v7232_v61  ;;  %9043 = vst [vmem:[#allocation151_spill] sm:$0xff] %v7235_v28  ;;  %v3212_v61 = vstv %s7067_s17  ;;  %v7258_v28 = vmul.f32 %v3198_v50, %v7211_v52  ;;  %3037 = vrot.lane.b32.xlu1 %v7036_v51, %s4626_s26  ;;  %s4281_s17 = sld [smem:[#allocation11 + $0x50]] }
 0x360   : > { %9044 = vst [vmem:[#allocation180_spill] sm:$0xff] %v7241_v24  ;;  %9045 = vst [vmem:[#allocation182_spill] sm:$0xff] %v7243_v38  ;;  %v7261_v24 = vmul.f32 %v3198_v50, %v7213_v29  ;;  %v2694_v38 = vstv %s7077_s13  ;;  %v7278_v50 = vmul.f32 %v2688_v4, %v6858_v18  ;;  %v7286_v5 = vmul.f32 %v3212_v61, %v7211_v52  ;;  %s4283_s13 = sld [smem:[#allocation11 + $0x98]] }
 0x361   : > { %9046 = vst [vmem:[#allocation99_spill] sm:$0xff] %v7246_v36  ;;  %9047 = vst [vmem:[#allocation131_spill] sm:$0xff] %v7249_v32  ;;  %v7289_v23 = vmul.f32 %v3212_v61, %v7213_v29  ;;  %v7309_v61 = vmul.f32 %v2694_v38, %v6858_v18  ;;  %v3240_v36 = vstv %s7145_s18  ;;  %3035 = vrot.lane.b32.xlu0 %v7044_v44, %s4626_s26  ;;  %s4288_s18 = sld [smem:[#allocation11 + $0x35]] }
 0x362   : > { %9048 = vst [vmem:[#allocation147_spill] sm:$0xff] %v7252_v55  ;;  %9049 = vst [vmem:[#allocation150_spill] sm:$0xff] %v7258_v28  ;;  %v7283_v55 = vmul.f32 %v2736_v10, %v6980_v3  ;;  %v7296_v4 = vpop.permute.xlu0 %2425  ;;  %v7302_v10 = vmul.f32 %v2742_v1, %v6973_v16  ;;  %v2826_v28 = vstv %s7292_s22  ;;  %s8019_s22 = sld [smem:[#allocation11 + $0xaa]] }
 0x363   : > { %9050 = vst [vmem:[#allocation152_spill] sm:$0xff] %v7261_v24  ;;  %9051 = vst [vmem:[#allocation159_spill] sm:$0xff] %v7272_v48  ;;  %v3226_v48 = vstv %s7103_s14  ;;  %3051 = vrot.lane.b32.xlu1 %v7047_v14, %s4626_s26  ;;  %v2778_v24 = vstv %s7280_s21  ;;  %s4285_s14 = sld [smem:[#allocation11 + $0xe0]] }
 0x364   : > { %9052 = vst [vmem:[#allocation160_spill] sm:$0xff] %v7275_v12  ;;  %9053 = vst [vmem:[#allocation181_spill] sm:$0xff] %v7278_v50  ;;  %v7294_v12 = vpop.permute.xlu1 %2427  ;;  %v7299_v50 = vmul.f32 %v2694_v38, %v6866_v13  ;;  %v7326_v38 = vmul.f32 %v3226_v48, %v7213_v29  ;;  %s7994_s21 = sld [smem:[#allocation11 + $0x86]] }
 0x365   : > { %9054 = vst [vmem:[#allocation183_spill] sm:$0xff] %v7283_v55  ;;  %9055 = vst [vmem:[#allocation155_spill] sm:$0xff] %v7286_v5  ;;  %v2700_v55 = vstv %s7117_s12  ;;  %v2748_v5 = vstv %s7129_s30  ;;  %3049 = vrot.lane.b32.xlu0 %v7050_v37, %s4626_s26  ;;  %v2820_v37 = vstv %s7265_s20  ;;  %s4286_s12 = sld [smem:[#allocation11 + $0x104]] }
 0x366   : > { %9056 = vst [vmem:[#allocation157_spill] sm:$0xff] %v7289_v23  ;;  %9057 = vst [vmem:[#allocation184_spill] sm:$0xff] %v7299_v50  ;;  %v7312_v23 = vmul.f32 %v2742_v1, %v6980_v3  ;;  %v2754_v1 = vstv %s7169_s9  ;;  %v7331_v32 = vmul.f32 %v2700_v55, %v6866_v13  ;;  %v7337_v51 = vmul.f32 %v2700_v55, %v6858_v18  ;;  %s4287_s30 = sld [smem:[#allocation11 + $0x11]] }
 0x367   : > { %9058 = vst [vmem:[#allocation148_spill] sm:$0xff] %v7302_v10  ;;  %9059 = vst [vmem:[#allocation156_spill] sm:$0xff] %v7309_v61  ;;  %v7323_v10 = vmul.f32 %v3226_v48, %v7211_v52  ;;  %v7334_v61 = vmul.f32 %v2748_v5, %v6973_v16  ;;  %v2760_v50 = vstv %s7197_s11  ;;  %v7345_v48 = vmul.f32 %v2748_v5, %v6980_v3  ;;  %s4290_s9 = sld [smem:[#allocation11 + $0x7d]] }
 0x368   : > { %9060 = vst [vmem:[#allocation158_spill] sm:$0xff] %v7312_v23  ;;  %9062 = vst [vmem:[#allocation166_spill] sm:$0xff] %v7326_v38  ;;  %v2802_v23 = vstv %s7181_s10  ;;  %v7340_v44 = vpop.permute.xlu1 %2441  ;;  %v7348_v38 = vmul.f32 %v3240_v36, %v7211_v52  ;;  %v7351_v13 = vmul.f32 %v3240_v36, %v7213_v29  ;;  %v2808_v16 = vstv %s7209_s19  ;;  %3065 = vrot.lane.b32.xlu1 %v7058_v47, %s4626_s26  ;;  %s4291_s10 = sld [smem:[#allocation11 + $0xa1]] }
 0x369   : > { %9061 = vst [vmem:[#allocation165_spill] sm:$0xff] %v7323_v10  ;;  %9063 = vst [vmem:[#allocation185_spill] sm:$0xff] %v7331_v32  ;;  %v7342_v10 = vpop.permute.xlu0 %2439  ;;  %v9069_v18 = vstv %s7155_s24  ;;  %v2766_v3 = vstv %s7229_s2  ;;  %v7371_v36 = vmul.f32 %v2754_v1, %v7041_v26  ;;  %v7374_v5 = vmul.f32 %v2802_v23, %v7213_v29  ;;  %3063 = vrot.lane.b32.xlu0 %v7061_v9, %s4626_s26  ;;  %s7899_s11 = sld [smem:[#allocation11 + $0xc5]] }
 0x36a   : > { %9064 = vst [vmem:[#allocation161_spill] sm:$0xff] %v7334_v61  ;;  %9065 = vst [vmem:[#allocation163_spill] sm:$0xff] %v7337_v51  ;;  %v7357_v55 = vmul.f32 %v9069_v18, %v7211_v52  ;;  %v7360_v61 = vmul.f32 %v2754_v1, %v7023_v56  ;;  %v7363_v51 = vmul.f32 %v2802_v23, %v7211_v52  ;;  %v2772_v32 = vstv %s7255_s4  ;;  %s7909_s19 = sld [smem:[#allocation11 + $0xe9]] }
 0x36b   : > { %9066 = vst [vmem:[#allocation108_spill] sm:$0xff] %v7345_v48  ;;  %9067 = vst [vmem:[#allocation162_spill] sm:$0xff] %v7348_v38  ;;  %v7377_v18 = vmul.f32 %v2760_v50, %v7023_v56  ;;  %v7381_v48 = vmul.f32 %v2808_v16, %v7211_v52  ;;  %v7384_v14 = vmul.f32 %v2760_v50, %v7041_v26  ;;  %s7922_s2 = sld [smem:[#allocation11 + $0x10d]] }
 0x36c   : > { %9068 = vst [vmem:[#allocation164_spill] sm:$0xff] %v7351_v13  ;;  %9070 = vst [vmem:[#allocation171_spill] sm:$0xff] %v7357_v55  ;;  %v2814_v55 = vstv %s7239_s5  ;;  %v7388_v13 = vpop.permute.xlu1 %2455  ;;  %v7393_v23 = vmul.f32 %v2808_v16, %v7213_v29  ;;  %v7396_v38 = vmul.f32 %v2766_v3, %v7023_v56  ;;  %v7404_v50 = vmul.f32 %v2766_v3, %v7041_v26  ;;  %s7939_s5 = sld [smem:[#allocation11 + $0x1a]] }
 0x36d   : > { %9071 = vst [vmem:[#allocation172_spill] sm:$0xff] %v7377_v18  ;;  %9072 = vst [vmem:[#allocation167_spill] sm:$0xff] %v7381_v48  ;;  %v7390_v1 = vpop.permute.xlu0 %2453  ;;  %v7401_v18 = vmul.f32 %v2814_v55, %v7211_v52  ;;  %v7413_v16 = vmul.f32 %v2814_v55, %v7213_v29  ;;  %v7422_v3 = vmul.f32 %v2772_v32, %v7041_v26  ;;  %3079 = vrot.lane.b32.xlu1 %v7064_v39, %s4626_s26  ;;  %v9095_v39 = vld [vmem:[#allocation46_spill] sm:$0xff]  ;;  %s7956_s4 = sld [smem:[#allocation11 + $0x3e]] }
 0x36e   : > { %9073 = vst [vmem:[#allocation169_spill] sm:$0xff] %v7384_v14  ;;  %9074 = vst [vmem:[#allocation168_spill] sm:$0xff] %v7396_v38  ;;  %v7416_v38 = vmul.f32 %v2772_v32, %v7023_v56  ;;  %v7425_v14 = vmul.f32 %v2820_v37, %v7213_v29  ;;  %v7428_v47 = vmul.f32 %v2778_v24, %v7023_v56  ;;  %v9082_v32 = vstv %s7306_s23  ;;  %s7973_s20 = sld [smem:[#allocation11 + $0x62]] }
 0x36f   : > { %9075 = vst [vmem:[#allocation170_spill] sm:$0xff] %v7401_v18  ;;  %v7419_v18 = vmul.f32 %v2820_v37, %v7211_v52  ;;  %9078 = vst [vmem:[#allocation187_spill] sm:$0xff] %v7422_v3  ;;  %v7431_v9 = vmul.f32 %v2826_v28, %v7211_v52  ;;  %v7446_v37 = vmul.f32 %v9082_v32, %v7023_v56  ;;  %3077 = vrot.lane.b32.xlu0 %v7070_v57, %s4626_s26 }
 0x370   : > { %9076 = vst [vmem:[#allocation173_spill] sm:$0xff] %v7416_v38  ;;  %9079 = vst [vmem:[#allocation188_spill] sm:$0xff] %v7425_v14  ;;  %v7433_v55 = vpop.permute.xlu1 %2469  ;;  %v7438_v38 = vmul.f32 %v2778_v24, %v7041_v26  ;;  %v9083_v14 = vstv %s7316_s3  ;;  %v1749_v3 = vadd.f32 %v6628_v42, %v6474_v7  ;;  %v1764_v24 = vadd.f32 %v6639_v27, %v6493_v11  ;;  %v9086_v27 = vld [vmem:[#allocation111_spill] sm:$0xff] }
 0x371   : > { %9077 = vst [vmem:[#allocation186_spill] sm:$0xff] %v7419_v18  ;;  %9080 = vst [vmem:[#allocation189_spill] sm:$0xff] %v7428_v47  ;;  %v7435_v48 = vpop.permute.xlu0 %2467  ;;  %v7441_v18 = vmul.f32 %v2826_v28, %v7213_v29  ;;  %v7451_v47 = vmul.f32 %v9083_v14, %v7211_v52  ;;  %v1763_v28 = vadd.f32 %v6641_v21, %v6496_v22 }
 0x372   : > { %9081 = vst [vmem:[#allocation190_spill] sm:$0xff] %v7431_v9  ;;  %v1750_v9 = vadd.f32 %v6626_v20, %v6471_v34  ;;  %v1778_v32 = vadd.f32 %v6648_v43, %v6517_v40  ;;  %v1777_v56 = vadd.f32 %v6650_v49, %v6520_v33  ;;  %v1792_v14 = vadd.f32 %v6656_v59, %v6543_v15  ;;  %v9088_v49 = vld [vmem:[#allocation40_spill] sm:$0xff]  ;;  %v9089_v59 = vld [vmem:[#allocation41_spill] sm:$0xff] }
 0x373   : > { %v1791_v34 = vadd.f32 %v6658_v35, %v6546_v58  ;;  %v1806_v7 = vadd.f32 %v6662_v53, %v6570_v2  ;;  %v1805_v11 = vadd.f32 %v6664_v8, %v6573_v54  ;;  %v1820_v22 = vadd.f32 %v6668_v31, %v6593_v41  ;;  %v9084_v58 = vld [vmem:[#allocation39_spill] sm:$0xff]  ;;  %v9085_v54 = vld [vmem:[#allocation38_spill] sm:$0xff]  ;;  %v9087_v41 = vld [vmem:[#allocation112_spill] sm:$0xff]  ;;  %3091 = vrot.lane.b32.xlu0 %v7084_v60, %s4626_s26 }
 0x374   : > { %v1819_v40 = vadd.f32 %v6670_v30, %v6595_v0  ;;  %v1834_v33 = vadd.f32 %v6674_v25, %v6620_v46  ;;  %v1833_v15 = vadd.f32 %v6676_v19, %v6623_v63  ;;  %v1848_v20 = vadd.f32 %v9084_v58, %v6633_v17  ;;  %v7487_v42 = vpop.permute.xlu1 %2483  ;;  %v9090_v46 = vld [vmem:[#allocation42_spill] sm:$0xff]  ;;  %v9091_v8 = vld [vmem:[#allocation43_spill] sm:$0xff]  ;;  %v9092_v31 = vld [vmem:[#allocation44_spill] sm:$0xff] }
 0x375   : > { %v7489_v2 = vpop.permute.xlu0 %2481  ;;  %v1847_v21 = vadd.f32 %v9086_v27, %v9085_v54  ;;  %v1862_v43 = vadd.f32 %v9087_v41, %v1750_v9  ;;  %v1861_v0 = vadd.f32 %v9088_v49, %v1749_v3  ;;  %v1876_v35 = vadd.f32 %v9089_v59, %v1764_v24  ;;  %v9093_v17 = vld [vmem:[#allocation134_spill] sm:$0xff]  ;;  %v9094_v25 = vld [vmem:[#allocation45_spill] sm:$0xff]  ;;  %v9096_v9 = vld [vmem:[#allocation47_spill] sm:$0xff] }
 0x376   : > { %v1875_v53 = vadd.f32 %v9090_v46, %v1763_v28  ;;  %v1890_v63 = vadd.f32 %v9091_v8, %v1778_v32  ;;  %v1889_v30 = vadd.f32 %v9092_v31, %v1777_v56  ;;  %3093 = vrot.lane.b32.xlu1 %v9093_v17, %s4626_s26  ;;  %v1904_v19 = vadd.f32 %v9094_v25, %v1792_v14  ;;  %v9097_v58 = vld [vmem:[#allocation48_spill] sm:$0xff]  ;;  %v9098_v54 = vld [vmem:[#allocation49_spill] sm:$0xff]  ;;  %v9099_v27 = vld [vmem:[#allocation50_spill] sm:$0xff] }
 0x377   : > { %v1903_v57 = vadd.f32 %v9095_v39, %v1791_v34  ;;  %v1918_v3 = vadd.f32 %v9096_v9, %v1806_v7  ;;  %v1917_v24 = vadd.f32 %v9097_v58, %v1805_v11  ;;  %v1932_v28 = vadd.f32 %v9098_v54, %v1820_v22  ;;  %v9100_v41 = vld [vmem:[#allocation51_spill] sm:$0xff]  ;;  %v9101_v49 = vld [vmem:[#allocation52_spill] sm:$0xff]  ;;  %v9102_v60 = vld [vmem:[#allocation53_spill] sm:$0xff]  ;;  %3105 = vrot.lane.b32.xlu0 %v7090_v45, %s4626_s26 }
 0x378   : > { %v1931_v32 = vadd.f32 %v9099_v27, %v1819_v40  ;;  %v1946_v56 = vadd.f32 %v9100_v41, %v1834_v33  ;;  %v1945_v59 = vadd.f32 %v9101_v49, %v1833_v15  ;;  %v7511_v46 = vpop.permute.xlu1 %2497  ;;  %v1960_v14 = vadd.f32 %v9102_v60, %v1848_v20  ;;  %v9103_v31 = vld [vmem:[#allocation54_spill] sm:$0xff]  ;;  %v9104_v17 = vld [vmem:[#allocation115_spill] sm:$0xff]  ;;  %v9105_v25 = vld [vmem:[#allocation116_spill] sm:$0xff] }
 0x379   : > { %v7513_v8 = vpop.permute.xlu0 %2495  ;;  %v1959_v34 = vadd.f32 %v9103_v31, %v1847_v21  ;;  %v1974_v7 = vadd.f32 %v9104_v17, %v1862_v43  ;;  %v1973_v11 = vadd.f32 %v9105_v25, %v1861_v0  ;;  %v9106_v39 = vld [vmem:[#allocation55_spill] sm:$0xff]  ;;  %v9107_v9 = vld [vmem:[#allocation56_spill] sm:$0xff]  ;;  %v9108_v58 = vld [vmem:[#allocation57_spill] sm:$0xff] }
 0x37a   : > { %v1988_v22 = vadd.f32 %v9106_v39, %v1876_v35  ;;  %v1987_v40 = vadd.f32 %v9107_v9, %v1875_v53  ;;  %v2002_v33 = vadd.f32 %v9108_v58, %v1890_v63  ;;  %3107 = vrot.lane.b32.xlu1 %v7087_v6, %s4626_s26  ;;  %v9109_v15 = vld [vmem:[#allocation58_spill] sm:$0xff]  ;;  %v9110_v54 = vld [vmem:[#allocation59_spill] sm:$0xff]  ;;  %v9111_v27 = vld [vmem:[#allocation60_spill] sm:$0xff] }
 0x37b   : > { %v2001_v20 = vadd.f32 %v9109_v15, %v1889_v30  ;;  %v2016_v21 = vadd.f32 %v9110_v54, %v1904_v19  ;;  %v2015_v43 = vadd.f32 %v9111_v27, %v1903_v57  ;;  %v9112_v41 = vld [vmem:[#allocation61_spill] sm:$0xff]  ;;  %v9113_v49 = vld [vmem:[#allocation62_spill] sm:$0xff]  ;;  %v9114_v60 = vld [vmem:[#allocation63_spill] sm:$0xff] }
 0x37c   : > { %v2030_v0 = vadd.f32 %v9112_v41, %v1918_v3  ;;  %v2029_v35 = vadd.f32 %v9113_v49, %v1917_v24  ;;  %v2044_v53 = vadd.f32 %v9114_v60, %v1932_v28  ;;  %v9115_v31 = vld [vmem:[#allocation64_spill] sm:$0xff]  ;;  %v9116_v17 = vld [vmem:[#allocation66_spill] sm:$0xff]  ;;  %v7534_v6 = vpop.permute.xlu1 %2511  ;;  %v9117_v45 = vld [vmem:[#allocation67_spill] sm:$0xff] }
 0x37d   : > { %v2043_v63 = vadd.f32 %v9115_v31, %v1931_v32  ;;  %v2058_v25 = vadd.f32 %v9116_v17, %v1946_v56  ;;  %v7536_v39 = vpop.permute.xlu0 %2509  ;;  %v2057_v30 = vadd.f32 %v9117_v45, %v1945_v59  ;;  %v9118_v9 = vld [vmem:[#allocation65_spill] sm:$0xff]  ;;  %v9121_v54 = vld [vmem:[#allocation68_spill] sm:$0xff]  ;;  %v9122_v27 = vld [vmem:[#allocation118_spill] sm:$0xff] }
 0x37e   : > { %v2072_v19 = vadd.f32 %v9118_v9, %v1960_v14  ;;  %v9119_v58 = vld [vmem:[#allocation69_spill] sm:$0xff]  ;;  %v2071_v24 = vadd.f32 %v9121_v54, %v1959_v34  ;;  %v2100_v28 = vadd.f32 %v9122_v27, %v1988_v22  ;;  %v9123_v41 = vld [vmem:[#allocation70_spill] sm:$0xff]  ;;  %v9124_v56 = vld [vmem:[#allocation96_spill] sm:$0xff] }
 0x37f   : > { %v2086_v57 = vadd.f32 %v9119_v58, %v1974_v7  ;;  %v9120_v15 = vld [vmem:[#allocation117_spill] sm:$0xff]  ;;  %v2099_v32 = vadd.f32 %v9123_v41, %v1987_v40  ;;  %3121 = vrot.lane.b32.xlu1 %v9124_v56, %s4626_s26  ;;  %v9125_v49 = vld [vmem:[#allocation107_spill] sm:$0xff]  ;;  %v9127_v31 = vld [vmem:[#allocation84_spill] sm:$0xff] }
 0x380   : > { %v2085_v3 = vadd.f32 %v9120_v15, %v1973_v11  ;;  %3119 = vrot.lane.b32.xlu0 %v9125_v49, %s4626_s26  ;;  %v9126_v60 = vld [vmem:[#allocation71_spill] sm:$0xff]  ;;  %v2113_v14 = vadd.f32 %v9127_v31, %v2001_v20  ;;  %v9129_v45 = vld [vmem:[#allocation120_spill] sm:$0xff]  ;;  %v9130_v9 = vld [vmem:[#allocation85_spill] sm:$0xff]  ;;  %v7557_v41 = vpop.permute.xlu1 %2525 }
 0x381   : > { %v2114_v59 = vadd.f32 %v9126_v60, %v2002_v33  ;;  %v9128_v17 = vld [vmem:[#allocation119_spill] sm:$0xff]  ;;  %v2128_v34 = vadd.f32 %v9130_v9, %v2016_v21  ;;  %v9131_v58 = vld [vmem:[#allocation72_spill] sm:$0xff]  ;;  %v9132_v15 = vld [vmem:[#allocation73_spill] sm:$0xff]  ;;  %v7559_v56 = vpop.permute.xlu0 %2523 }
 0x382   : > { %v2208_v7 = vadd.f32 %v9128_v17, %v2086_v57  ;;  %v2207_v11 = vadd.f32 %v9129_v45, %v2085_v3  ;;  %v2127_v22 = vadd.f32 %v9131_v58, %v2015_v43  ;;  %v2142_v40 = vadd.f32 %v9132_v15, %v2030_v0  ;;  %v9133_v54 = vld [vmem:[#allocation74_spill] sm:$0xff]  ;;  %v9134_v49 = vld [vmem:[#allocation75_spill] sm:$0xff]  ;;  %v9135_v60 = vld [vmem:[#allocation76_spill] sm:$0xff] }
 0x383   : > { %v2141_v27 = vadd.f32 %v9133_v54, %v2029_v35  ;;  %v2156_v33 = vadd.f32 %v9134_v49, %v2044_v53  ;;  %v2155_v20 = vadd.f32 %v9135_v60, %v2043_v63  ;;  %v9136_v31 = vld [vmem:[#allocation123_spill] sm:$0xff]  ;;  %v9137_v17 = vld [vmem:[#allocation94_spill] sm:$0xff]  ;;  %v9138_v45 = vld [vmem:[#allocation77_spill] sm:$0xff] }
 0x384   : > { %v2320_v57 = vadd.f32 %v9136_v31, %v2208_v7  ;;  %v2319_v3 = vadd.f32 %v9137_v17, %v2207_v11  ;;  %v2170_v21 = vadd.f32 %v9138_v45, %v2058_v25  ;;  %v9139_v9 = vld [vmem:[#allocation100_spill] sm:$0xff]  ;;  %v9140_v0 = vld [vmem:[#allocation101_spill] sm:$0xff]  ;;  %v9143_v53 = vld [vmem:[#allocation86_spill] sm:$0xff] }
 0x385   : > { %v7567_v43 = vadd.f32 %v9139_v9, %v2057_v30  ;;  %v7570_v58 = vadd.f32 %v9140_v0, %v2072_v19  ;;  %v9141_v35 = vld [vmem:[#allocation109_spill] sm:$0xff]  ;;  %v9142_v15 = vld [vmem:[#allocation128_spill] sm:$0xff]  ;;  %v2222_v63 = vadd.f32 %v9143_v53, %v2100_v28  ;;  %v9144_v54 = vld [vmem:[#allocation87_spill] sm:$0xff]  ;;  %v2540_v0 = vpop.permute.xlu1 %2539 }
 0x386   : > { %3135 = vrot.lane.b32.xlu1 %v9141_v35, %s4626_s26  ;;  %3133 = vrot.lane.b32.xlu0 %v9142_v15, %s4626_s26  ;;  %v2221_v7 = vadd.f32 %v9144_v54, %v2099_v32  ;;  %v2432_v11 = vadd.f32 %v7294_v12, %v2320_v57  ;;  %v2431_v25 = vadd.f32 %v7296_v4, %v2319_v3  ;;  %v9145_v49 = vld [vmem:[#allocation78_spill] sm:$0xff]  ;;  %v9146_v60 = vld [vmem:[#allocation81_spill] sm:$0xff]  ;;  %v9147_v31 = vld [vmem:[#allocation88_spill] sm:$0xff]  ;;  %v2538_v35 = vpop.permute.xlu0 %2537 }
 0x387   : > { %v7581_v30 = vadd.f32 %v9145_v49, %v2071_v24  ;;  %v2236_v19 = vadd.f32 %v9146_v60, %v2114_v59  ;;  %v2235_v17 = vadd.f32 %v9147_v31, %v2113_v14  ;;  %v9148_v45 = vld [vmem:[#allocation89_spill] sm:$0xff]  ;;  %v9149_v15 = vld [vmem:[#allocation95_spill] sm:$0xff]  ;;  %v9150_v28 = vld [vmem:[#allocation104_spill] sm:$0xff] }
 0x388   : > { %v2250_v9 = vadd.f32 %v9148_v45, %v2128_v34  ;;  %v2334_v52 = vadd.f32 %v9149_v15, %v2222_v63  ;;  %v2333_v53 = vadd.f32 %v9150_v28, %v2221_v7  ;;  %v2544_v32 = vadd.f32 %v2540_v0, %v2432_v11  ;;  %v9151_v12 = vld [vmem:[#allocation90_spill] sm:$0xff]  ;;  %v9153_v24 = vld [vmem:[#allocation103_spill] sm:$0xff]  ;;  %v9155_v14 = vld [vmem:[#allocation177_spill] sm:$0xff] }
 0x389   : > { %v2543_v54 = vadd.f32 %v2538_v35, %v2431_v25  ;;  %v2249_v57 = vadd.f32 %v9151_v12, %v2127_v22  ;;  %v9152_v4 = vld [vmem:[#allocation102_spill] sm:$0xff]  ;;  %v2263_v49 = vadd.f32 %v9153_v24, %v2141_v27  ;;  %v9154_v59 = vld [vmem:[#allocation175_spill] sm:$0xff]  ;;  %v9156_v60 = vld [vmem:[#allocation132_spill] sm:$0xff]  ;;  %v2554_v28 = vpop.permute.xlu1 %2553 }
 0x38a   : > { %v2264_v3 = vadd.f32 %v9152_v4, %v2142_v40  ;;  %3149 = vrot.lane.b32.xlu1 %v9154_v59, %s4626_s26  ;;  %3147 = vrot.lane.b32.xlu0 %v9155_v14, %s4626_s26  ;;  %v2446_v34 = vadd.f32 %v7340_v44, %v2334_v52  ;;  %v2445_v63 = vadd.f32 %v7342_v10, %v2333_v53  ;;  %v9157_v11 = vld [vmem:[#allocation140_spill] sm:$0xff]  ;;  %v9158_v31 = vld [vmem:[#allocation91_spill] sm:$0xff]  ;;  %v9160_v0 = vld [vmem:[#allocation105_spill] sm:$0xff]  ;;  %v2552_v12 = vpop.permute.xlu0 %2551 }
 0x38b   : > { %v2662_v7 = vadd.f32 %v9156_v60, %v2544_v32  ;;  %v2661_v25 = vadd.f32 %v9157_v11, %v2543_v54  ;;  %v2278_v22 = vadd.f32 %v9158_v31, %v2156_v33  ;;  %v9159_v45 = vld [vmem:[#allocation92_spill] sm:$0xff]  ;;  %v2348_v27 = vadd.f32 %v9160_v0, %v2236_v19  ;;  %v9161_v35 = vld [vmem:[#allocation122_spill] sm:$0xff]  ;;  %v9162_v4 = vld [vmem:[#allocation139_spill] sm:$0xff] }
 0x38c   : > { %v2277_v40 = vadd.f32 %v9159_v45, %v2155_v20  ;;  %v2347_v15 = vadd.f32 %v9161_v35, %v2235_v17  ;;  %v9163_v59 = vld [vmem:[#allocation174_spill] sm:$0xff]  ;;  %v2558_v44 = vadd.f32 %v2554_v28, %v2446_v34  ;;  %v2557_v10 = vadd.f32 %v2552_v12, %v2445_v63  ;;  %v9166_v19 = vld [vmem:[#allocation97_spill] sm:$0xff]  ;;  %v9172_v35 = vld [vmem:[#allocation136_spill] sm:$0xff] }
 0x38d   : > { %v2710_v24 = vadd.f32 %v9162_v4, %v2662_v7  ;;  %v2709_v52 = vadd.f32 %v9163_v59, %v2661_v25  ;;  %v9164_v53 = vld [vmem:[#allocation106_spill] sm:$0xff]  ;;  %v2460_v54 = vadd.f32 %v7388_v13, %v2348_v27  ;;  %v9167_v14 = vld [vmem:[#allocation113_spill] sm:$0xff]  ;;  %v9170_v25 = vld [vmem:[#allocation127_spill] sm:$0xff]  ;;  %v2568_v45 = vpop.permute.xlu1 %2567 }
 0x38e   : > { %v2362_v32 = vadd.f32 %v9164_v53, %v2250_v9  ;;  %v2459_v33 = vadd.f32 %v7390_v1, %v2347_v15  ;;  %v9165_v20 = vld [vmem:[#allocation138_spill] sm:$0xff]  ;;  %3161 = vrot.lane.b32.xlu0 %v7172_v62, %s4626_s26  ;;  %v2668_v17 = vadd.f32 %v9166_v19, %v2558_v44  ;;  %v2667_v60 = vadd.f32 %v9167_v14, %v2557_v10  ;;  %v9168_v63 = vld [vmem:[#allocation93_spill] sm:$0xff]  ;;  %v2566_v0 = vpop.permute.xlu0 %2565  ;;  %v9182_v14 = vld [vmem:[#allocation143_spill] sm:$0xff] }
 0x38f   : > { %3163 = vrot.lane.b32.xlu1 %v9165_v20, %s4626_s26  ;;  %v2758_v7 = vadd.f32 %v7360_v61, %v2710_v24  ;;  %v2757_v34 = vadd.f32 %v7371_v36, %v2709_v52  ;;  %v2292_v9 = vadd.f32 %v9168_v63, %v2170_v21  ;;  %v9169_v11 = vld [vmem:[#allocation133_spill] sm:$0xff]  ;;  %v2376_v1 = vadd.f32 %v9170_v25, %v2264_v3  ;;  %v9171_v27 = vld [vmem:[#allocation110_spill] sm:$0xff]  ;;  %v9177_v52 = vld [vmem:[#allocation172_spill] sm:$0xff] }
 0x390   : > { %v2361_v13 = vadd.f32 %v9169_v11, %v2249_v57  ;;  %v2474_v31 = vadd.f32 %v7433_v55, %v2362_v32  ;;  %v2716_v62 = vadd.f32 %v9171_v27, %v2668_v17  ;;  %v2715_v15 = vadd.f32 %v9172_v35, %v2667_v60  ;;  %v9173_v36 = vld [vmem:[#allocation98_spill] sm:$0xff]  ;;  %v9175_v3 = vld [vmem:[#allocation145_spill] sm:$0xff]  ;;  %v9181_v20 = vld [vmem:[#allocation135_spill] sm:$0xff] }
 0x391   : > { %v2572_v28 = vadd.f32 %v2568_v45, %v2460_v54  ;;  %v2571_v12 = vadd.f32 %v2566_v0, %v2459_v33  ;;  %v9174_v21 = vld [vmem:[#allocation114_spill] sm:$0xff]  ;;  %v7628_v57 = vadd.f32 %v7363_v51, %v2758_v7  ;;  %v7631_v55 = vadd.f32 %v7374_v5, %v2757_v34  ;;  %v9178_v10 = vld [vmem:[#allocation169_spill] sm:$0xff]  ;;  %v2582_v17 = vpop.permute.xlu1 %2581  ;;  %v9184_v25 = vld [vmem:[#allocation179_spill] sm:$0xff] }
 0x392   : > { %v2473_v61 = vadd.f32 %v7435_v48, %v2361_v13  ;;  %3175 = vrot.lane.b32.xlu0 %v9174_v21, %s4626_s26  ;;  %v9176_v24 = vld [vmem:[#allocation146_spill] sm:$0xff]  ;;  %v2764_v44 = vadd.f32 %v9177_v52, %v2716_v62  ;;  %v2763_v48 = vadd.f32 %v9178_v10, %v2715_v15  ;;  %v9179_v53 = vld [vmem:[#allocation125_spill] sm:$0xff]  ;;  %v2390_v19 = vadd.f32 %v9181_v20, %v2278_v22  ;;  %v2580_v5 = vpop.permute.xlu0 %2579 }
 0x393   : > { %3177 = vrot.lane.b32.xlu1 %v9173_v36, %s4626_s26  ;;  %v2674_v4 = vadd.f32 %v9175_v3, %v2572_v28  ;;  %v2673_v59 = vadd.f32 %v9176_v24, %v2571_v12  ;;  %v2291_v32 = vadd.f32 %v9179_v53, %v7567_v43  ;;  %v9180_v54 = vld [vmem:[#allocation129_spill] sm:$0xff]  ;;  %v2488_v51 = vadd.f32 %v7487_v42, %v2376_v1  ;;  %v9183_v7 = vld [vmem:[#allocation178_spill] sm:$0xff]  ;;  %v9198_v53 = vld [vmem:[#allocation151_spill] sm:$0xff] }
 0x394   : > { %v2375_v33 = vadd.f32 %v9180_v54, %v2263_v49  ;;  %v2586_v63 = vadd.f32 %v2582_v17, %v2474_v31  ;;  %v2585_v11 = vadd.f32 %v2580_v5, %v2473_v61  ;;  %v9185_v43 = vld [vmem:[#allocation149_spill] sm:$0xff]  ;;  %v9186_v49 = vld [vmem:[#allocation167_spill] sm:$0xff]  ;;  %v7653_v42 = vadd.f32 %v7393_v23, %v2763_v48  ;;  %v9187_v1 = vld [vmem:[#allocation130_spill] sm:$0xff] }
 0x395   : > { %v2722_v60 = vadd.f32 %v9182_v14, %v2674_v4  ;;  %v2721_v34 = vadd.f32 %v9183_v7, %v2673_v59  ;;  %v7650_v22 = vadd.f32 %v9186_v49, %v2764_v44  ;;  %v9188_v0 = vld [vmem:[#allocation153_spill] sm:$0xff]  ;;  %v9189_v31 = vld [vmem:[#allocation168_spill] sm:$0xff]  ;;  %v9190_v35 = vld [vmem:[#allocation126_spill] sm:$0xff]  ;;  %v2502_v21 = vadd.f32 %v7511_v46, %v2390_v19  ;;  %v2596_v3 = vpop.permute.xlu1 %2595 }
 0x396   : > { %v2487_v13 = vadd.f32 %v7489_v2, %v2375_v33  ;;  %3189 = vrot.lane.b32.xlu0 %v9185_v43, %s4626_s26  ;;  %v2680_v45 = vadd.f32 %v9187_v1, %v2586_v63  ;;  %v2679_v27 = vadd.f32 %v9188_v0, %v2585_v11  ;;  %v2306_v15 = vadd.f32 %v9190_v35, %v7570_v58  ;;  %v9191_v28 = vld [vmem:[#allocation137_spill] sm:$0xff]  ;;  %v9192_v61 = vld [vmem:[#allocation176_spill] sm:$0xff]  ;;  %v2594_v23 = vpop.permute.xlu0 %2593  ;;  %v9193_v4 = vld [vmem:[#allocation142_spill] sm:$0xff] }
 0x397   : > { %3191 = vrot.lane.b32.xlu1 %v9184_v25, %s4626_s26  ;;  %v2770_v62 = vadd.f32 %v9189_v31, %v2722_v60  ;;  %v2769_v2 = vadd.f32 %v7404_v50, %v2721_v34  ;;  %v2389_v12 = vadd.f32 %v9191_v28, %v2277_v40  ;;  %v2404_v36 = vadd.f32 %v9192_v61, %v2292_v9  ;;  %v9194_v59 = vld [vmem:[#allocation154_spill] sm:$0xff]  ;;  %v9196_v40 = vld [vmem:[#allocation152_spill] sm:$0xff]  ;;  %v9199_v33 = vld [vmem:[#allocation131_spill] sm:$0xff] }
 0x398   : > { %v2728_v24 = vadd.f32 %v9193_v4, %v2680_v45  ;;  %v2727_v52 = vadd.f32 %v9194_v59, %v2679_v27  ;;  %v2600_v44 = vadd.f32 %v2596_v3, %v2488_v51  ;;  %v2599_v10 = vadd.f32 %v2594_v23, %v2487_v13  ;;  %v9195_v58 = vld [vmem:[#allocation150_spill] sm:$0xff]  ;;  %v9200_v19 = vld [vmem:[#allocation173_spill] sm:$0xff]  ;;  %v9201_v17 = vld [vmem:[#allocation187_spill] sm:$0xff] }
 0x399   : > { %v2501_v50 = vadd.f32 %v7513_v8, %v2389_v12  ;;  %v9197_v9 = vld [vmem:[#allocation170_spill] sm:$0xff]  ;;  %v7677_v48 = vadd.f32 %v7413_v16, %v2769_v2  ;;  %v9202_v5 = vld [vmem:[#allocation121_spill] sm:$0xff]  ;;  %v9204_v34 = vld [vmem:[#allocation180_spill] sm:$0xff]  ;;  %v2516_v11 = vadd.f32 %v7534_v6, %v2404_v36  ;;  %v2610_v13 = vpop.permute.xlu1 %2609  ;;  %v9215_v59 = vstv %s7306_s23  ;;  %s4300_s23 = sld [smem:[#allocation11 + $0xce]] }
 0x39a   : > { %3203 = vrot.lane.b32.xlu0 %v9196_v40, %s4626_s26  ;;  %v7674_v46 = vadd.f32 %v9197_v9, %v2770_v62  ;;  %v2686_v54 = vadd.f32 %v9198_v53, %v2600_v44  ;;  %v2685_v20 = vadd.f32 %v9199_v33, %v2599_v10  ;;  %v2776_v51 = vadd.f32 %v9200_v19, %v2728_v24  ;;  %v9203_v60 = vld [vmem:[#allocation141_spill] sm:$0xff]  ;;  %v2608_v16 = vpop.permute.xlu0 %2607  ;;  %v9205_v25 = vld [vmem:[#allocation99_spill] sm:$0xff]  ;;  %v9209_v27 = vld [vmem:[#allocation186_spill] sm:$0xff] }
 0x39b   : > { %3205 = vrot.lane.b32.xlu1 %v9195_v58, %s4626_s26  ;;  %v2775_v8 = vadd.f32 %v9201_v17, %v2727_v52  ;;  %v2305_v14 = vadd.f32 %v9202_v5, %v7581_v30  ;;  %v2403_v7 = vadd.f32 %v9203_v60, %v2291_v32  ;;  %v2418_v63 = vadd.f32 %v9204_v34, %v2306_v15  ;;  %v9206_v49 = vld [vmem:[#allocation147_spill] sm:$0xff]  ;;  %v9208_v6 = vld [vmem:[#allocation157_spill] sm:$0xff]  ;;  %v9210_v62 = vld [vmem:[#allocation188_spill] sm:$0xff] }
 0x39c   : > { %v2734_v43 = vadd.f32 %v9205_v25, %v2686_v54  ;;  %v2733_v1 = vadd.f32 %v9206_v49, %v2685_v20  ;;  %v2614_v45 = vadd.f32 %v2610_v13, %v2502_v21  ;;  %v2613_v0 = vadd.f32 %v2608_v16, %v2501_v50  ;;  %v9207_v32 = vld [vmem:[#allocation155_spill] sm:$0xff]  ;;  %v9212_v28 = vld [vmem:[#allocation181_spill] sm:$0xff]  ;;  %v9214_v21 = vld [vmem:[#allocation182_spill] sm:$0xff] }
 0x39d   : > { %v2515_v30 = vadd.f32 %v7536_v39, %v2403_v7  ;;  %v7700_v31 = vadd.f32 %v9209_v27, %v2776_v51  ;;  %v7703_v2 = vadd.f32 %v9210_v62, %v2775_v8  ;;  %v9211_v35 = vld [vmem:[#allocation159_spill] sm:$0xff]  ;;  %v9213_v39 = vld [vmem:[#allocation189_spill] sm:$0xff]  ;;  %v2417_v3 = vadd.f32 %v9214_v21, %v2305_v14  ;;  %v2624_v4 = vpop.permute.xlu1 %2623  ;;  %v9216_v10 = vld [vmem:[#allocation160_spill] sm:$0xff] }
 0x39e   : > { %3217 = vrot.lane.b32.xlu0 %v9208_v6, %s4626_s26  ;;  %v2692_v15 = vadd.f32 %v9211_v35, %v2614_v45  ;;  %v2691_v12 = vadd.f32 %v9212_v28, %v2613_v0  ;;  %v2782_v61 = vadd.f32 %v9213_v39, %v2734_v43  ;;  %v2781_v36 = vadd.f32 %v7438_v38, %v2733_v1  ;;  %v2622_v24 = vpop.permute.xlu0 %2621  ;;  %v9217_v58 = vld [vmem:[#allocation183_spill] sm:$0xff]  ;;  %v9219_v54 = vld [vmem:[#allocation166_spill] sm:$0xff]  ;;  %v9221_v51 = vld [vmem:[#allocation184_spill] sm:$0xff] }
 0x39f   : > { %3219 = vrot.lane.b32.xlu1 %v9207_v32, %s4626_s26  ;;  %v2530_v23 = vadd.f32 %v7557_v41, %v2418_v63  ;;  %v2785_v52 = vmul.f32 %v9215_v59, %v7041_v26  ;;  %v2790_v44 = vstv %s7664_s25  ;;  %v2628_v9 = vadd.f32 %v2624_v4, %v2516_v11  ;;  %v9218_v41 = vld [vmem:[#allocation165_spill] sm:$0xff]  ;;  %v9220_v33 = vld [vmem:[#allocation190_spill] sm:$0xff]  ;;  %v9222_v8 = vld [vmem:[#allocation156_spill] sm:$0xff]  ;;  %s4302_s25 = sld [smem:[#allocation11 + $0x116]] }
 0x3a0   : > { %v2740_v50 = vadd.f32 %v9216_v10, %v2692_v15  ;;  %v2739_v40 = vadd.f32 %v9217_v58, %v2691_v12  ;;  %v2627_v38 = vadd.f32 %v2622_v24, %v2515_v30  ;;  %v2529_v53 = vadd.f32 %v7559_v56, %v2417_v3  ;;  %v9224_v11 = vld [vmem:[#allocation124_spill] sm:$0xff]  ;;  %v9226_v49 = vld [vmem:[#allocation158_spill] sm:$0xff]  ;;  %v9229_v35 = vld [vmem:[#allocation185_spill] sm:$0xff] }
 0x3a1   : > { %v7727_v20 = vadd.f32 %v9220_v33, %v2782_v61  ;;  %v7730_v19 = vadd.f32 %v7441_v18, %v2781_v36  ;;  %v2698_v17 = vadd.f32 %v9221_v51, %v2628_v9  ;;  %v2638_v56 = vpop.permute.xlu1 %2637  ;;  %v9223_v34 = vstv %s7316_s3  ;;  %v9225_v25 = vld [vmem:[#allocation148_spill] sm:$0xff]  ;;  %v9227_v0 = vld [vmem:[#allocation162_spill] sm:$0xff]  ;;  %v9230_v28 = vld [vmem:[#allocation163_spill] sm:$0xff]  ;;  %s4301_s3 = sld [smem:[#allocation11 + $0xf2]] }
 0x3a2   : > { %3231 = vrot.lane.b32.xlu0 %v9219_v54, %s4626_s26  ;;  %v2697_v5 = vadd.f32 %v9222_v8, %v2627_v38  ;;  %v2788_v14 = vadd.f32 %v7446_v37, %v2740_v50  ;;  %v2787_v60 = vadd.f32 %v2785_v52, %v2739_v40  ;;  %v2636_v7 = vpop.permute.xlu0 %2635  ;;  %v2833_v63 = vmul.f32 %v9223_v34, %v7213_v29  ;;  %v9228_v30 = vld [vmem:[#allocation164_spill] sm:$0xff]  ;;  %v9234_v52 = vld [vmem:[#allocation161_spill] sm:$0xff]  ;;  %v9236_v9 = vld [vmem:[#allocation171_spill] sm:$0xff] }
 0x3a3   : > { %3233 = vrot.lane.b32.xlu1 %v9218_v41, %s4626_s26  ;;  %v2792_v13 = vmul.f32 %v2790_v44, %v9224_v11  ;;  %v2838_v16 = vstv %s7688_s28  ;;  %v2791_v18 = vmul.f32 %v2790_v44, %v7041_v26  ;;  %v2746_v43 = vadd.f32 %v9225_v25, %v2698_v17  ;;  %v9235_v10 = vld [vmem:[#allocation108_spill] sm:$0xff]  ;;  %s8067_s28 = sld [smem:[#allocation11 + $0x23]] }
 0x3a4   : > { %v2745_v1 = vadd.f32 %v9226_v49, %v2697_v5  ;;  %v2642_v45 = vadd.f32 %v2638_v56, %v2530_v23  ;;  %v2641_v37 = vadd.f32 %v2636_v7, %v2529_v53  ;;  %v7750_v32 = vadd.f32 %v7451_v47, %v2788_v14  ;;  %v9233_v47 = vld [vmem:[#allocation144_spill] sm:$0xff] }
 0x3a5   : > { %v7752_v6 = vadd.f32 %v2833_v63, %v2787_v60  ;;  %v2796_v27 = vstv %s7692_s6  ;;  %v2844_v62 = vstv %s7705_s7  ;;  %v2794_v39 = vadd.f32 %v2792_v13, %v2746_v43  ;;  %v7758_v36 = vpop.permute.xlu1 %2853  ;;  %s8073_s6 = sld [smem:[#allocation11 + $0x47]] }
 0x3a6   : > { %3245 = vrot.lane.b32.xlu0 %v9228_v30, %s4626_s26  ;;  %v2704_v15 = vadd.f32 %v9229_v35, %v2642_v45  ;;  %v2703_v12 = vadd.f32 %v9230_v28, %v2641_v37  ;;  %v2793_v61 = vadd.f32 %v2791_v18, %v2745_v1  ;;  %v7760_v21 = vpop.permute.xlu0 %2851  ;;  %v9232_v3 = vstv %s7155_s24  ;;  %v7817_v37 = vld [vmem:[#allocation3 + $0xa] sm:$0xff]  ;;  %v4433_v35 = vld [vmem:[#allocation2 + $0x2] sm:$0xff]  ;;  %s4289_s24 = sld [smem:[#allocation11 + $0x59]] }
 0x3a7   : > { %3247 = vrot.lane.b32.xlu1 %v9227_v0, %s4626_s26  ;;  %9231 = vst [vmem:[#allocation39_spill] sm:$0xff] %v7760_v21  ;;  %v3255_v23 = vmul.f32 %v9232_v3, %v7213_v29  ;;  %v3268_v4 = vstv %s7713_s0  ;;  %v2840_v24 = vmul.f32 %v2838_v16, %v9233_v47  ;;  %v2839_v59 = vmul.f32 %v2838_v16, %v7213_v29  ;;  %v7821_v0 = vld [vmem:[#allocation3 + $0x2] sm:$0xff]  ;;  %s8088_s7 = sld [smem:[#allocation11 + $0x6b]] }
 0x3a8   : > { %v2752_v44 = vadd.f32 %v9234_v52, %v2704_v15  ;;  %v2751_v50 = vadd.f32 %v9235_v10, %v2703_v12  ;;  %v2798_v58 = vmul.f32 %v2796_v27, %v9224_v11  ;;  %v2797_v40 = vmul.f32 %v2796_v27, %v7041_v26  ;;  %v4432_v27 = vld [vmem:[#allocation2 + $0xa] sm:$0xff]  ;;  %s8111_s0 = sld [smem:[#allocation11 + $0x8f]] }
 0x3a9   : > { %v7777_v38 = vadd.f32 %v2840_v24, %v2794_v39  ;;  %v2846_v53 = vmul.f32 %v2844_v62, %v9233_v47  ;;  %v7780_v41 = vadd.f32 %v2839_v59, %v2793_v61  ;;  %v2845_v51 = vmul.f32 %v2844_v62, %v7213_v29  ;;  %v7783_v17 = vpop.permute.xlu1 %2869 }
 0x3aa   : > { %3259 = vrot.lane.b32.xlu0 %v3255_v23, %s4626_s26  ;;  %v2800_v54 = vadd.f32 %v2798_v58, %v2752_v44  ;;  %v2799_v33 = vadd.f32 %v2797_v40, %v2751_v50  ;;  %v7785_v8 = vpop.permute.xlu0 %2867  ;;  %v3270_v26 = vmul.f32 %v3268_v4, %v9233_v47  ;;  %v3269_v5 = vmul.f32 %v3268_v4, %v7213_v29 }
 0x3ab   : > { %3261 = vrot.lane.b32.xlu1 %v9236_v9, %s4626_s26  ;;  %v3282_v14 = vstv %s7743_s8  ;;  %v3296_v13 = vstv %s7770_s27  ;;  %v3320_v45 = vstv %s4279_s29  ;;  %s8126_s8 = sld [smem:[#allocation11 + $0xb3]] }
 0x3ac   : > { %v7790_v60 = vadd.f32 %v2846_v53, %v2800_v54  ;;  %v7792_v56 = vadd.f32 %v2845_v51, %v2799_v33  ;;  %v3284_v63 = vmul.f32 %v3282_v14, %v9233_v47  ;;  %v3283_v11 = vmul.f32 %v3282_v14, %v7213_v29  ;;  %s8155_s27 = sld [smem:[#allocation11 + $0xd7]] }
 0x3ad   : > { %v7796_v7 = vpop.permute.xlu1 %2883  ;;  %v3298_v25 = vmul.f32 %v3296_v13, %v9233_v47  ;;  %v3297_v43 = vmul.f32 %v3296_v13, %v7213_v29  ;;  %v3322_v62 = vmul.f32 %v4432_v27, %v3320_v45  ;;  %v3321_v15 = vmul.f32 %v4433_v35, %v3320_v45  ;;  %s8170_s29 = sld [smem:[#allocation11 + $0xfb]] }
 0x3ae   : > { %3273 = vrot.lane.b32.xlu0 %v3269_v5, %s4626_s26  ;;  %v7798_v34 = vpop.permute.xlu0 %2881  ;;  %v3334_v28 = vstv %s4280_s16  ;;  %v3348_v23 = vstv %s4281_s17  ;;  %v3376_v40 = vstv %s4283_s13  ;;  %s9245_s16 = sld [smem:[#allocation29_spill]] }
 0x3af   : > { %3275 = vrot.lane.b32.xlu1 %v3270_v26, %s4626_s26  ;;  %v3336_v61 = vmul.f32 %v4432_v27, %v3334_v28  ;;  %v3335_v3 = vmul.f32 %v4433_v35, %v3334_v28  ;;  %v3350_v24 = vmul.f32 %v4432_v27, %v3348_v23  ;;  %v3349_v59 = vmul.f32 %v4433_v35, %v3348_v23  ;;  %s4310_s17 = sld [smem:[#allocation11 + $0x11f]] }
 0x3b0   : > { %v3378_v54 = vmul.f32 %v4432_v27, %v3376_v40  ;;  %v3377_v33 = vmul.f32 %v4433_v35, %v3376_v40  ;;  %v3390_v51 = vstv %s4284_s15  ;;  %v3432_v23 = vstv %s4287_s30  ;;  %s9248_s15 = sld [smem:[#allocation24_spill]] }
 0x3b1   : > { %v7805_v16 = vpop.permute.xlu1 %2897  ;;  %v3392_v14 = vmul.f32 %v4432_v27, %v3390_v51 }
 0x3b2   : > { %3287 = vrot.lane.b32.xlu0 %v3283_v11, %s4626_s26  ;;  %v7807_v18 = vpop.permute.xlu0 %2895  ;;  %v3404_v11 = vstv %s4285_s14 }
 0x3b3   : > { %3289 = vrot.lane.b32.xlu1 %v3284_v63, %s4626_s26  ;;  %v3391_v63 = vmul.f32 %v4433_v35, %v3390_v51  ;;  %v3405_v45 = vmul.f32 %v4433_v35, %v3404_v11 }
 0x3b5   : > { %v7813_v49 = vpop.permute.xlu1 %2911 }
 0x3b6   : > { %3301 = vrot.lane.b32.xlu0 %v3297_v43, %s4626_s26  ;;  %v7815_v1 = vpop.permute.xlu0 %2909  ;;  %v3406_v43 = vmul.f32 %v4432_v27, %v3404_v11  ;;  %s4336_s30 = sshll.u32 %s9248_s15, 8 }
 0x3b7   : > { %3303 = vrot.lane.b32.xlu1 %v3298_v25, %s4626_s26  ;;  %s4282_s26 = sld [smem:[#allocation11 + $0x74]] }
 0x3b9   : > { %v7825_v29 = vpop.permute.xlu1 %2925 }
 0x3ba   : > { %3309 = vrot.lane.b32.xlu0 %v7821_v0, %s4627_s1  ;;  %v7827_v30 = vpop.permute.xlu0 %2923 }
 0x3bb   : > { %3311 = vrot.lane.b32.xlu1 %v7817_v37, %s4627_s1 }
 0x3bd   : > { %v7831_v12 = vpop.permute.xlu1 %2939  ;;  %v3362_v52 = vstv %s4282_s26  ;;  %s9247_s26 = sshll.u32 %s9245_s16, 4 }
 0x3be   : > { %3325 = vrot.lane.b32.xlu0 %v3321_v15, %s4627_s1  ;;  %v7833_v39 = vpop.permute.xlu0 %2937  ;;  %v3364_v50 = vmul.f32 %v4432_v27, %v3362_v52  ;;  %v3363_v58 = vmul.f32 %v4433_v35, %v3362_v52  ;;  %v7877_v52 = vld [vmem:[#allocation2 + $0x22] sm:$0xff]  ;;  %s308_s13 = scalar_lea.vmem [#allocation13], %s9247_s26 }
 0x3bf   : > { %3327 = vrot.lane.b32.xlu1 %v3322_v62, %s4627_s1  ;;  %v3418_v62 = vstv %s4286_s12  ;;  %s3868_s14 = sshll.u32 %s308_s13, 4  ;;  %s9249_s12 = sld [smem:[#allocation27_spill]]  ;;  %s8204_s14 = int_to_ptr.vmem [resolvable:$true] %s3868_s14 }
 0x3c1   : > { %v7837_v4 = vpop.permute.xlu1 %2953 }
 0x3c2   : > { %3339 = vrot.lane.b32.xlu0 %v3335_v3, %s4627_s1  ;;  %v7839_v47 = vpop.permute.xlu0 %2951  ;;  %v3419_v3 = vmul.f32 %v4433_v35, %v3418_v62 }
 0x3c3   : > { %3341 = vrot.lane.b32.xlu1 %v3336_v61, %s4627_s1  ;;  %v3420_v61 = vmul.f32 %v4432_v27, %v3418_v62  ;;  %v3446_v27 = vstv %s4288_s18  ;;  %v3474_v62 = vstv %s4290_s9  ;;  %s9250_s9 = sld [smem:[#allocation195_spill]] }
 0x3c5   : > { %v7843_v44 = vpop.permute.xlu1 %2967  ;;  %p9251_p8 = scmp.ne.s32.totalorder %s9249_s12, 0 }
 0x3c6   : > { %3353 = vrot.lane.b32.xlu0 %v3349_v59, %s4627_s1  ;;  %v7845_v10 = vpop.permute.xlu0 %2965 }
 0x3c7   : > { %3355 = vrot.lane.b32.xlu1 %v3350_v24, %s4627_s1 }
 0x3c9   : > { %v7849_v9 = vpop.permute.xlu1 %2981 }
 0x3ca   : > { %3367 = vrot.lane.b32.xlu0 %v3363_v58, %s4627_s1  ;;  %v7851_v53 = vpop.permute.xlu0 %2979  ;;  %v7880_v58 = vld [vmem:[#allocation2 + $0x1a] sm:$0xff] }
 0x3cb   : > { %3369 = vrot.lane.b32.xlu1 %v3364_v50, %s4627_s1  ;;  %v3434_v50 = vmul.f32 %v7877_v52, %v3432_v23  ;;  %v3433_v40 = vmul.f32 %v7880_v58, %v3432_v23  ;;  %v3447_v51 = vmul.f32 %v7880_v58, %v3446_v27  ;;  %v3476_v23 = vmul.f32 %v7877_v52, %v3474_v62 }
 0x3cd   : > { %v7855_v26 = vpop.permute.xlu1 %2995 }
 0x3ce   : > { %3381 = vrot.lane.b32.xlu0 %v3377_v33, %s4627_s1  ;;  %v7857_v5 = vpop.permute.xlu0 %2993  ;;  %v3448_v33 = vmul.f32 %v7877_v52, %v3446_v27  ;;  %v2873_v27 = vadd.f32 %v7785_v8, %v7631_v55  ;;  %v2888_v55 = vadd.f32 %v7796_v7, %v7650_v22  ;;  %v2902_v7 = vadd.f32 %v7805_v16, %v7674_v46 }
 0x3cf   : > { %3383 = vrot.lane.b32.xlu1 %v3378_v54, %s4627_s1  ;;  %v2916_v16 = vadd.f32 %v7813_v49, %v7700_v31  ;;  %v3544_v49 = vstv %s7939_s5 }
 0x3d1   : > { %v7861_v13 = vpop.permute.xlu1 %3009 }
 0x3d2   : > { %3395 = vrot.lane.b32.xlu0 %v3391_v63, %s4627_s1  ;;  %v7863_v25 = vpop.permute.xlu0 %3007 }
 0x3d3   : > { %3397 = vrot.lane.b32.xlu1 %v3392_v14, %s4627_s1  ;;  %v3460_v14 = vstv %s4289_s24 }
 0x3d5   : > { %v7867_v15 = vpop.permute.xlu1 %3023 }
 0x3d6   : > { %3409 = vrot.lane.b32.xlu0 %v3405_v45, %s4627_s1  ;;  %v7869_v28 = vpop.permute.xlu0 %3021  ;;  %v3461_v45 = vmul.f32 %v7880_v58, %v3460_v14 }
 0x3d7   : > { %3411 = vrot.lane.b32.xlu1 %v3406_v43, %s4627_s1  ;;  %v3462_v43 = vmul.f32 %v7877_v52, %v3460_v14  ;;  %v2985_v14 = vadd.f32 %v7851_v53, %v2873_v27  ;;  %v3000_v53 = vadd.f32 %v7855_v26, %v2888_v55 }
 0x3d9   : > { %v7873_v24 = vpop.permute.xlu1 %3037 }
 0x3da   : > { %3423 = vrot.lane.b32.xlu0 %v3419_v3, %s4627_s1  ;;  %v7875_v59 = vpop.permute.xlu0 %3035 }
 0x3db   : > { %3425 = vrot.lane.b32.xlu1 %v3420_v61, %s4627_s1 }
 0x3dd   : > { %v7885_v35 = vpop.permute.xlu1 %3051 }
 0x3de   : > { %3437 = vrot.lane.b32.xlu0 %v3433_v40, %s4627_s1  ;;  %v7887_v54 = vpop.permute.xlu0 %3049  ;;  %v2874_v40 = vadd.f32 %v7783_v17, %v7628_v57  ;;  %v3502_v57 = vstv %s7899_s11  ;;  %v2887_v17 = vadd.f32 %v7798_v34, %v7653_v42  ;;  %v3516_v42 = vstv %s7909_s19  ;;  %s3839_s11 = scalar_lea.sflag [#allocation14], %s9245_s16  ;;  %s4515_s19 = scalar_lea.vmem %s8204_s14, 256 }
 0x3df   : > { %3439 = vrot.lane.b32.xlu1 %v3434_v50, %s4627_s1  ;;  %v3475_v50 = vmul.f32 %v7880_v58, %v3474_v62  ;;  %v3504_v27 = vmul.f32 %v7877_v52, %v3502_v57  ;;  %v3503_v22 = vmul.f32 %v7880_v58, %v3502_v57  ;;  %v3517_v46 = vmul.f32 %v7880_v58, %v3516_v42  ;;  %p4516_p2 = scmp.ne.s32.totalorder %s8204_s14, %s4515_s19 }
 0x3e1   : > { %v7893_v63 = vpop.permute.xlu1 %3065  ;;  %p4517_p9 = pnand %p4516_p2, %p9251_p8 }
 0x3e2   : > { %3451 = vrot.lane.b32.xlu0 %v3447_v51, %s4627_s1  ;;  %v7895_v11 = vpop.permute.xlu0 %3063  ;;  %v2986_v51 = vadd.f32 %v7849_v9, %v2874_v40 }
 0x3e3   : > { %3453 = vrot.lane.b32.xlu1 %v3448_v33, %s4627_s1  ;;  %v3488_v33 = vstv %s4291_s10  ;;  %s8220_s10 = scalar_lea.hbm %s9250_s9, %s4336_s30  ;;  %p4518_p10 = pneg %p4517_p9 }
 0x3e4   : > { %v3490_v62 = vmul.f32 %v7877_v52, %v3488_v33  ;;  %v3489_v21 = vmul.f32 %v7880_v58, %v3488_v33 }
 0x3e5   : > { %v7903_v61 = vpop.permute.xlu1 %3079 }
 0x3e6   : > { %3465 = vrot.lane.b32.xlu0 %v3461_v45, %s4627_s1  ;;  %v7905_v3 = vpop.permute.xlu0 %3077 }
 0x3e7   : > { %3467 = vrot.lane.b32.xlu1 %v3462_v43, %s4627_s1 }
 0x3e9   : > { %v3094_v43 = vpop.permute.xlu1 %3093 }
 0x3ea   : > { %3479 = vrot.lane.b32.xlu0 %v3475_v50, %s4627_s1  ;;  %v3092_v45 = vpop.permute.xlu0 %3091  ;;  %v7928_v8 = vadd.f32 %v3094_v43, %v2986_v51  ;;  %v3518_v43 = vmul.f32 %v7877_v52, %v3516_v42 }
 0x3eb   : > { %3481 = vrot.lane.b32.xlu1 %v3476_v23, %s4627_s1  ;;  %v7930_v9 = vadd.f32 %v3092_v45, %v2985_v14  ;;  %v2999_v23 = vadd.f32 %v7857_v5, %v2887_v17  ;;  %v3014_v5 = vadd.f32 %v7861_v13, %v2902_v7 }
 0x3ed   : > { %v3108_v50 = vpop.permute.xlu1 %3107 }
 0x3ee   : > { %3493 = vrot.lane.b32.xlu0 %v3489_v21, %s4627_s1  ;;  %v3106_v40 = vpop.permute.xlu0 %3105  ;;  %v2901_v21 = vadd.f32 %v7807_v18, %v7677_v48  ;;  %v7945_v34 = vadd.f32 %v3108_v50, %v3000_v53  ;;  %v3530_v48 = vstv %s7922_s2  ;;  %v2915_v18 = vadd.f32 %v7815_v1, %v7703_v2  ;;  %v7987_v50 = vld [vmem:[#allocation2 + $0x3a] sm:$0xff]  ;;  %s4628_s2 = smov [#allocation13]  }
 0x3ef   : > { %3495 = vrot.lane.b32.xlu1 %v3490_v62, %s4627_s1  ;;  %v7947_v26 = vadd.f32 %v3106_v40, %v2999_v23  ;;  %v3532_v17 = vmul.f32 %v7877_v52, %v3530_v48  ;;  %v3531_v31 = vmul.f32 %v7880_v58, %v3530_v48  ;;  %v2930_v2 = vadd.f32 %v7825_v29, %v7727_v20  ;;  %v7990_v29 = vld [vmem:[#allocation2 + $0x32] sm:$0xff]  ;;  %s4519_s5 = sshll.u32 %s4628_s2, 4  ;;  %s4520_s5 = int_to_ptr.vmem [resolvable:$false] %s4519_s5 }
 0x3f0   : > { %v3013_v33 = vadd.f32 %v7863_v25, %v2901_v21  ;;  %v3028_v25 = vadd.f32 %v7867_v15, %v2916_v16  ;;  %v3027_v62 = vadd.f32 %v7869_v28, %v2915_v18  ;;  %v2929_v1 = vadd.f32 %v7827_v30, %v7730_v19  ;;  %p4522_p1 = scmp.lt.s32.totalorder %s8204_s14, %s4520_s5 }
 0x3f1   : > { %v3122_v51 = vpop.permute.xlu1 %3121  ;;  %v3042_v28 = vadd.f32 %v7873_v24, %v2930_v2  ;;  %v3546_v20 = vmul.f32 %v7987_v50, %v3544_v49  ;;  %v3545_v19 = vmul.f32 %v7990_v29, %v3544_v49  ;;  %v3558_v30 = vstv %s7956_s4  ;;  %s4521_s4 = scalar_lea.vmem %s4520_s5, 512 }
 0x3f2   : > { %3507 = vrot.lane.b32.xlu0 %v3503_v22, %s4627_s1  ;;  %v3120_v14 = vpop.permute.xlu0 %3119  ;;  %v7962_v45 = vadd.f32 %v3122_v51, %v3014_v5  ;;  %v3041_v52 = vadd.f32 %v7875_v59, %v2929_v1  ;;  %v2944_v40 = vadd.f32 %v7831_v12, %v7750_v32  ;;  %v2943_v24 = vadd.f32 %v7833_v39, %v7752_v6  ;;  %p4523_p4 = scmp.lt.s32.totalorder %s4521_s4, %s4515_s19 }
 0x3f3   : > { %3509 = vrot.lane.b32.xlu1 %v3504_v27, %s4627_s1  ;;  %v7964_v13 = vadd.f32 %v3120_v14, %v3013_v33  ;;  %v3560_v5 = vmul.f32 %v7987_v50, %v3558_v30  ;;  %v3559_v32 = vmul.f32 %v7990_v29, %v3558_v30  ;;  %v3572_v6 = vstv %s7973_s20 }
 0x3f4   : > { %v3056_v22 = vadd.f32 %v7885_v35, %v2944_v40  ;;  %v3055_v42 = vadd.f32 %v7887_v54, %v2943_v24  ;;  %v2958_v12 = vadd.f32 %v7837_v4, %v7777_v38  ;;  %v2957_v39 = vadd.f32 %v7839_v47, %v7780_v41  ;;  %v8083_v24 = vld [vmem:[#allocation3 + $0x8] sm:$0xff]  ;;  %p4524_p11 = por %p4523_p4, %p4522_p1 }
 0x3f5   : > { %v3574_v38 = vmul.f32 %v7987_v50, %v3572_v6  ;;  %v3573_v41 = vmul.f32 %v7990_v29, %v3572_v6  ;;  %v3586_v4 = vstv %s7994_s21  ;;  %v2972_v47 = vadd.f32 %v7843_v44, %v7790_v60 }
 0x3f6   : > { %3521 = vrot.lane.b32.xlu0 %v3517_v46, %s4627_s1  ;;  %v3070_v35 = vadd.f32 %v7893_v63, %v2958_v12  ;;  %v3069_v54 = vadd.f32 %v7895_v11, %v2957_v39  ;;  %v2971_v46 = vadd.f32 %v7845_v10, %v7792_v56  ;;  %v3588_v60 = vmul.f32 %v7987_v50, %v3586_v4  ;;  %v9238_v39 = vld [vmem:[#allocation35_spill] sm:$0xff]  ;;  %p4525_p0 = pnand %p4524_p11, %p4518_p10 }
 0x3f7   : > { %3523 = vrot.lane.b32.xlu1 %v3518_v43, %s4627_s1  ;;  %v3084_v63 = vadd.f32 %v7903_v61, %v2972_v47  ;;  %v3587_v44 = vmul.f32 %v7990_v29, %v3586_v4  ;;  %v3614_v49 = vstv %s4300_s23  ;;  %v3642_v40 = vstv %s4302_s25  ;;  %v9239_v4 = vld [vmem:[#allocation82_spill] sm:$0xff] }
 0x3f8   : > { %v3136_v57 = vpop.permute.xlu1 %3135  ;;  %v3134_v55 = vpop.permute.xlu0 %3133  ;;  %v3083_v11 = vadd.f32 %v7905_v3, %v2971_v46  ;;  %v3656_v12 = vstv %s8067_s28  ;;  %v9240_v46 = vld [vmem:[#allocation83_spill] sm:$0xff] }
 0x3f9   : > { %v7979_v53 = vadd.f32 %v3136_v57, %v3028_v25  ;;  %v7981_v15 = vadd.f32 %v3134_v55, %v3027_v62  ;;  %v3600_v62 = vstv %s8019_s22 }
 0x3fa   : > { %3535 = vrot.lane.b32.xlu0 %v3531_v31, %s4627_s1  ;;  %v3602_v3 = vmul.f32 %v7987_v50, %v3600_v62  ;;  %v3601_v55 = vmul.f32 %v7990_v29, %v3600_v62 }
 0x3fb   : > { %3537 = vrot.lane.b32.xlu1 %v3532_v17, %s4627_s1 }
 0x3fc   : > { %v3150_v58 = vpop.permute.xlu1 %3149  ;;  %v3148_v23 = vpop.permute.xlu0 %3147 }
 0x3fd   : > { %v8000_v59 = vadd.f32 %v3150_v58, %v3042_v28  ;;  %v8002_v27 = vadd.f32 %v3148_v23, %v3041_v52  ;;  %v3616_v28 = vmul.f32 %v7987_v50, %v3614_v49  ;;  %v3615_v52 = vmul.f32 %v7990_v29, %v3614_v49 }
 0x3fe   : > { %3549 = vrot.lane.b32.xlu0 %v3545_v19, %s4627_s1 }
 0x3ff   : > { %3551 = vrot.lane.b32.xlu1 %v3546_v20, %s4627_s1 }
 0x400   : > { %v3162_v21 = vpop.permute.xlu0 %3161 }
 0x401   : > { %v3164_v7 = vpop.permute.xlu1 %3163  ;;  %v8017_v51 = vadd.f32 %v3162_v21, %v3055_v42  ;;  %v3644_v21 = vmul.f32 %v7987_v50, %v3642_v40 }
 0x402   : > { %v8015_v33 = vadd.f32 %v3164_v7, %v3056_v22  ;;  %3563 = vrot.lane.b32.xlu0 %v3559_v32, %s4627_s1  ;;  %v400_v22 = vmax.f32 %v8083_v24, 0.0 }
 0x403   : > { %3565 = vrot.lane.b32.xlu1 %v3560_v5, %s4627_s1 }
 0x404   : > { %v3176_v43 = vpop.permute.xlu0 %3175 }
 0x405   : > { %v3178_v14 = vpop.permute.xlu1 %3177  ;;  %v8034_v16 = vadd.f32 %v3176_v43, %v3069_v54  ;;  %v8104_v43 = vld [vmem:[#allocation2 + $0x52] sm:$0xff] }
 0x406   : > { %v8032_v48 = vadd.f32 %v3178_v14, %v3070_v35  ;;  %3577 = vrot.lane.b32.xlu0 %v3573_v41, %s4627_s1  ;;  %v3670_v41 = vstv %s8073_s6 }
 0x407   : > { %3579 = vrot.lane.b32.xlu1 %v3574_v38, %s4627_s1  ;;  %v8107_v38 = vld [vmem:[#allocation2 + $0x4a] sm:$0xff] }
 0x408   : > { %v3190_v25 = vpop.permute.xlu0 %3189  ;;  %v3671_v62 = vmul.f32 %v8107_v38, %v3670_v41 }
 0x409   : > { %v3192_v18 = vpop.permute.xlu1 %3191  ;;  %v8044_v10 = vadd.f32 %v3190_v25, %v3083_v11 }
 0x40a   : > { %v8042_v56 = vadd.f32 %v3192_v18, %v3084_v63  ;;  %3591 = vrot.lane.b32.xlu0 %v3587_v44, %s4627_s1  ;;  %v3672_v44 = vmul.f32 %v8104_v43, %v3670_v41 }
 0x40b   : > { %3593 = vrot.lane.b32.xlu1 %v3588_v60, %s4627_s1 }
 0x40c   : > { %v3204_v61 = vpop.permute.xlu0 %3203 }
 0x40d   : > { %v3206_v57 = vpop.permute.xlu1 %3205  ;;  %v8055_v31 = vadd.f32 %v3204_v61, %v7930_v9  ;;  %v3628_v9 = vstv %s4301_s3  ;;  %v8128_v61 = vld [vmem:[#allocation3 + $0x9] sm:$0xff] }
 0x40e   : > { %v8052_v17 = vadd.f32 %v3206_v57, %v7928_v8  ;;  %3605 = vrot.lane.b32.xlu0 %v3601_v55, %s4627_s1  ;;  %v3630_v19 = vmul.f32 %v7987_v50, %v3628_v9  ;;  %v3629_v30 = vmul.f32 %v7990_v29, %v3628_v9  ;;  %v9237_v50 = vld [vmem:[#allocation34_spill] sm:$0xff]  ;;  %v3684_v57 = vstv %s8088_s7 }
 0x40f   : > { %3607 = vrot.lane.b32.xlu1 %v3602_v3, %s4627_s1 }
 0x410   : > { %v3218_v1 = vpop.permute.xlu0 %3217 }
 0x411   : > { %v3220_v2 = vpop.permute.xlu1 %3219  ;;  %v8065_v8 = vadd.f32 %v3218_v1, %v7947_v26 }
 0x412   : > { %v8062_v58 = vadd.f32 %v3220_v2, %v7945_v34  ;;  %3619 = vrot.lane.b32.xlu0 %v3615_v52, %s4627_s1  ;;  %v9241_v2 = vld [vmem:[#allocation36_spill] sm:$0xff] }
 0x413   : > { %3621 = vrot.lane.b32.xlu1 %v3616_v28, %s4627_s1  ;;  %v9242_v28 = vld [vmem:[#allocation37_spill] sm:$0xff] }
 0x414   : > { %v3232_v20 = vpop.permute.xlu0 %3231 }
 0x415   : > { %v3234_v23 = vpop.permute.xlu1 %3233  ;;  %v8079_v26 = vadd.f32 %v3232_v20, %v7964_v13  ;;  %v8090_v13 = vld [vmem:[#allocation3] sm:$0xff]  ;;  %v3686_v20 = vmul.f32 %v8104_v43, %v3684_v57 }
 0x416   : > { %v8076_v34 = vadd.f32 %v3234_v23, %v7962_v45  ;;  %3633 = vrot.lane.b32.xlu0 %v3629_v30, %s4627_s1  ;;  %v3643_v45 = vmul.f32 %v7990_v29, %v3642_v40  ;;  %v399_v5 = vmax.f32 %v8090_v13, 0.0  ;;  %v612_v29 = vmax.f32 %v400_v22, %v9237_v50  ;;  %v9243_v30 = vld [vmem:[#allocation79_spill] sm:$0xff] }
 0x417   : > { %3635 = vrot.lane.b32.xlu1 %v3630_v19, %s4627_s1  ;;  %v3685_v19 = vmul.f32 %v8107_v38, %v3684_v57 }
 0x418   : > { %v3246_v7 = vpop.permute.xlu0 %3245  ;;  %v611_v35 = vmax.f32 %v399_v5, %v9238_v39  ;;  %v1070_v47 = vmax.f32 %v612_v29, %v9239_v4  ;;  %v3712_v29 = vstv %s8126_s8 }
 0x419   : > { %v3248_v42 = vpop.permute.xlu1 %3247  ;;  %v8097_v6 = vadd.f32 %v3246_v7, %v7981_v15  ;;  %v3657_v15 = vmul.f32 %v8107_v38, %v3656_v12 }
 0x41a   : > { %v8094_v32 = vadd.f32 %v3248_v42, %v7979_v53  ;;  %3647 = vrot.lane.b32.xlu0 %v3643_v45, %s4627_s1  ;;  %v3658_v53 = vmul.f32 %v8104_v43, %v3656_v12  ;;  %v1069_v63 = vmax.f32 %v611_v35, %v9240_v46 }
 0x41b   : > { %3649 = vrot.lane.b32.xlu1 %v3644_v21, %s4627_s1 }
 0x41c   : > { %v3260_v14 = vpop.permute.xlu0 %3259 }
 0x41d   : > { %v3262_v54 = vpop.permute.xlu1 %3261  ;;  %v8119_v18 = vadd.f32 %v3260_v14, %v8002_v27  ;;  %v8131_v27 = vld [vmem:[#allocation3 + $0x1] sm:$0xff] }
 0x41e   : > { %v8116_v11 = vadd.f32 %v3262_v54, %v8000_v59  ;;  %3661 = vrot.lane.b32.xlu0 %v3657_v15, %s4627_s1  ;;  %v1524_v59 = vmax.f32 %v1070_v47, %v8128_v61  ;;  %v1523_v3 = vmax.f32 %v1069_v63, %v8131_v27 }
 0x41f   : > { %3663 = vrot.lane.b32.xlu1 %v3658_v53, %s4627_s1  ;;  %v9246_v53 = vld [vmem:[#allocation39_spill] sm:$0xff] }
 0x420   : > { %v3274_v60 = vpop.permute.xlu0 %3273  ;;  %v1736_v1 = vmax.f32 %v1524_v59, %v9241_v2  ;;  %v1735_v52 = vmax.f32 %v1523_v3, %v9242_v28 }
 0x421   : > { %v3276_v25 = vpop.permute.xlu1 %3275  ;;  %v8138_v49 = vadd.f32 %v3274_v60, %v8017_v51  ;;  %v9244_v51 = vld [vmem:[#allocation80_spill] sm:$0xff]  ;;  %v3726_v60 = vstv %s8155_s27 }
 0x422   : > { %v8135_v55 = vadd.f32 %v3276_v25, %v8015_v33  ;;  %3675 = vrot.lane.b32.xlu0 %v3671_v62, %s4627_s1  ;;  %v3698_v33 = vstv %s8111_s0  ;;  %v2194_v40 = vmax.f32 %v1736_v1, %v9243_v30  ;;  %v2193_v22 = vmax.f32 %v1735_v52, %v9244_v51 }
 0x423   : > { %3677 = vrot.lane.b32.xlu1 %v3672_v44, %s4627_s1  ;;  %v3700_v5 = vmul.f32 %v8104_v43, %v3698_v33  ;;  %v3699_v12 = vmul.f32 %v8107_v38, %v3698_v33  ;;  %v3728_v57 = vmul.f32 %v8104_v43, %v3726_v60  ;;  %v3727_v59 = vmul.f32 %v8107_v38, %v3726_v60 }
 0x424   : > { %v3288_v23 = vpop.permute.xlu0 %3287  ;;  %v2648_v35 = vmax.f32 %v2194_v40, %v7817_v37  ;;  %v3740_v52 = vstv %s8170_s29  ;;  %v3754_v33 = vstv %s4310_s17 }
 0x425   : > { %v3290_v9 = vpop.permute.xlu1 %3289  ;;  %v8153_v7 = vadd.f32 %v3288_v23, %v8034_v16 }
 0x426   : > { %v8150_v42 = vadd.f32 %v3290_v9, %v8032_v48  ;;  %3689 = vrot.lane.b32.xlu0 %v3685_v19, %s4627_s1  ;;  %v2647_v48 = vmax.f32 %v2193_v22, %v7821_v0  ;;  %v2860_v14 = vmax.f32 %v2648_v35, %v7758_v36  ;;  %v3741_v19 = vmul.f32 %v8107_v38, %v3740_v52 }
 0x427   : > { %3691 = vrot.lane.b32.xlu1 %v3686_v20, %s4627_s1  ;;  %v3742_v20 = vmul.f32 %v8104_v43, %v3740_v52 }
 0x428   : > { %v3302_v45 = vpop.permute.xlu0 %3301  ;;  %v2859_v15 = vmax.f32 %v2647_v48, %v9246_v53 }
 0x429   : > { %v3304_v21 = vpop.permute.xlu1 %3303  ;;  %v8168_v54 = vadd.f32 %v3302_v45, %v8044_v10  ;;  %v3713_v10 = vmul.f32 %v8107_v38, %v3712_v29  ;;  %v3755_v45 = vmul.f32 %v8107_v38, %v3754_v33 }
 0x42a   : > { %v8165_v16 = vadd.f32 %v3304_v21, %v8042_v56  ;;  %3703 = vrot.lane.b32.xlu0 %v3699_v12, %s4627_s1  ;;  %v3714_v56 = vmul.f32 %v8104_v43, %v3712_v29  ;;  %v3756_v21 = vmul.f32 %v8104_v43, %v3754_v33 }
 0x42b   : > { %3705 = vrot.lane.b32.xlu1 %v3700_v5, %s4627_s1 }
 0x42c   : > { %v8178_v47 = vpop.permute.xlu0 %3309 }
 0x42d   : > { %v8176_v41 = vpop.permute.xlu1 %3311  ;;  %v3317_v25 = vmax.f32 %v2859_v15, %v8178_v47 }
 0x42e   : > { %v3318_v63 = vmax.f32 %v2860_v14, %v8176_v41  ;;  %3717 = vrot.lane.b32.xlu0 %v3713_v10, %s4627_s1 }
 0x42f   : > { %3719 = vrot.lane.b32.xlu1 %v3714_v56, %s4627_s1  ;;  %3831 = vst.msk [vmem:[%s308_s13] sm:$0xff] %vm3779_vm3, %v3317_v25 }
 0x430   : > { %3832 = vst.msk [vmem:[%s308_s13 + $0x8] sm:$0xff] %vm3779_vm3, %v3318_v63  ;;  %v3326_v62 = vpop.permute.xlu0 %3325 }
 0x431   : > { %v3328_v44 = vpop.permute.xlu1 %3327  ;;  %v8197_v1 = vadd.f32 %v3326_v62, %v8055_v31 }
 0x432   : > { %v8194_v3 = vadd.f32 %v3328_v44, %v8052_v17  ;;  %3731 = vrot.lane.b32.xlu0 %v3727_v59, %s4627_s1 }
 0x433   : > { %3733 = vrot.lane.b32.xlu1 %v3728_v57, %s4627_s1 }
 0x434   : > { %v3340_v23 = vpop.permute.xlu0 %3339 }
 0x435   : > { %v3342_v9 = vpop.permute.xlu1 %3341  ;;  %v8210_v31 = vadd.f32 %v3340_v23, %v8065_v8 }
 0x436   : > { %v8207_v17 = vadd.f32 %v3342_v9, %v8062_v58  ;;  %3745 = vrot.lane.b32.xlu0 %v3741_v19, %s4627_s1 }
 0x437   : > { %3747 = vrot.lane.b32.xlu1 %v3742_v20, %s4627_s1 }
 0x438   : > { %v3354_v22 = vpop.permute.xlu0 %3353 }
 0x439   : > { %v3356_v40 = vpop.permute.xlu1 %3355  ;;  %v8226_v8 = vadd.f32 %v3354_v22, %v8079_v26 }
 0x43a   : > { %v8223_v58 = vadd.f32 %v3356_v40, %v8076_v34 }
 0x43b   : > { %4528 = shalt.err (!%p4525_p0)
}
 0x43c   : > { %s4529_s20 = scalar_lea.hbm %s8220_s10, 256  ;;  %s4533_s23 = scalar_lea.hbm %s9250_s9, 512 }
 0x43d   : > { %p4530_p6 = scmp.ne.s32.totalorder %s8220_s10, %s4529_s20  ;;  %p4534_p5 = scmp.lt.s32.totalorder %s8220_s10, %s9250_s9 }
 0x43e   : > { %p4535_p13 = scmp.lt.s32.totalorder %s4533_s23, %s4529_s20 }
 0x43f   : > { %p4531_p12 = pnand %p4530_p6, %p9251_p8 }
 0x440   : > { %p4536_p3 = por %p4535_p13, %p4534_p5 }
 0x441   : > { %p4532_p7 = pneg %p4531_p12 }
 0x443   : > { %p4537_p2 = pnand %p4536_p3, %p4532_p7 }
 0x445   : > { %4540 = shalt.err (!%p4537_p2)
}
 0x446   : > { %s4629_s28 = smov 128   ;;  %s4630_s6 = smov 8   ;;  %3761 = vrot.lane.b32.xlu1 %v3756_v21, %s4627_s1  ;;  %3759 = vrot.lane.b32.xlu0 %v3755_v45, %s4627_s1  ;;  %v3370_v34 = vpop.permute.xlu1 %3369  ;;  %v3368_v26 = vpop.permute.xlu0 %3367  ;;  %v610_v19 = vadd.f32 %v8083_v24, %v9237_v50  ;;  %v609_v33 = vadd.f32 %v8090_v13, %v9238_v39 }
 0x447   : > { %4346 = dma.vmem_to_hbm [thread:$0]  (%p9251_p8), %s8204_s14, 256, %s8220_s10, %s3839_s11, %s4629_s28, %s4629_s28, %s4630_s6   ;;  %v8257_v43 = vadd.f32 %v3370_v34, %v8094_v32  ;;  %v8260_v38 = vadd.f32 %v3368_v26, %v8097_v6 }
 0x448   : > { %v1068_v40 = vadd.f32 %v9239_v4, %v610_v19  ;;  %v1067_v45 = vadd.f32 %v9240_v46, %v609_v33  ;;  %s3773_s1 = sld [smem:[#allocation4]]  ;;  %s4022_s7 = sshll.u32 %s9245_s16, 7 }
 0x449   : > { %s8363_s0 = scalar_lea.vmem [#allocation12], %s4022_s7  ;;  %s4335_s8 = sshll.u32 %s9248_s15, 11 }
 0x44a   : > { %v3384_v5 = vpop.permute.xlu1 %3383  ;;  %v3382_v12 = vpop.permute.xlu0 %3381  ;;  %v1522_v34 = vadd.f32 %v8128_v61, %v1068_v40  ;;  %s3852_s27 = sshll.u32 %s8363_s0, 4  ;;  %s9252_s26 = sld [smem:[#allocation194_spill]]  ;;  %s8456_s27 = int_to_ptr.vmem [resolvable:$true] %s3852_s27 }
 0x44b   : > { %v8263_v29 = vadd.f32 %v3384_v5, %v8116_v11  ;;  %v8266_v35 = vadd.f32 %v3382_v12, %v8119_v18  ;;  %v1521_v12 = vadd.f32 %v8131_v27, %v1067_v45  ;;  %s3834_s15 = scalar_lea.sflag [#allocation7], %s9245_s16  ;;  %s4541_s14 = scalar_lea.vmem %s8456_s27, 2048 }
 0x44c   : > { %p4542_p9 = scmp.ne.s32.totalorder %s8456_s27, %s4541_s14  ;;  %s4631_s30 = smov [#allocation12]  }
 0x44d   : > { %v1733_v24 = vadd.f32 %v9242_v28, %v1521_v12  ;;  %s4545_s18 = sshll.u32 %s4631_s30, 4  ;;  %s4546_s18 = int_to_ptr.vmem [resolvable:$false] %s4545_s18 }
 0x44e   : > { %v3398_v48 = vpop.permute.xlu1 %3397  ;;  %v3396_v14 = vpop.permute.xlu0 %3395  ;;  %p4543_p10 = pnand %p4542_p9, %p9251_p8  ;;  %s4547_s24 = scalar_lea.vmem %s4546_s18, 4096 }
 0x44f   : > { %v8269_v15 = vadd.f32 %v3398_v48, %v8135_v55  ;;  %v8272_v56 = vadd.f32 %v3396_v14, %v8138_v49  ;;  %v1734_v48 = vadd.f32 %v9241_v2, %v1522_v34  ;;  %v2191_v4 = vadd.f32 %v9244_v51, %v1733_v24  ;;  %p4548_p4 = scmp.lt.s32.totalorder %s8456_s27, %s4546_s18  ;;  %p4549_p11 = scmp.lt.s32.totalorder %s4547_s24, %s4541_s14 }
 0x450   : > { %s8454_s13 = scalar_lea.hbm %s9252_s26, %s4335_s8  ;;  %p4544_p1 = pneg %p4543_p10 }
 0x451   : > { %v2192_v13 = vadd.f32 %v9243_v30, %v1734_v48  ;;  %v2645_v61 = vadd.f32 %v7821_v0, %v2191_v4  ;;  %p4550_p0 = por %p4549_p11, %p4548_p4 }
 0x452   : > { %v3412_v32 = vpop.permute.xlu1 %3411  ;;  %v3410_v10 = vpop.permute.xlu0 %3409 }
 0x453   : > { %v8275_v6 = vadd.f32 %v3412_v32, %v8150_v42  ;;  %v8278_v63 = vadd.f32 %v3410_v10, %v8153_v7  ;;  %v2646_v14 = vadd.f32 %v7817_v37, %v2192_v13  ;;  %v2857_v27 = vadd.f32 %v9246_v53, %v2645_v61  ;;  %p4551_p6 = pnand %p4550_p0, %p4544_p1 }
 0x455   : > { %v2858_v10 = vadd.f32 %v7758_v36, %v2646_v14  ;;  %v3315_v30 = vadd.f32 %v8178_v47, %v2857_v27 }
 0x456   : > { %v3426_v11 = vpop.permute.xlu1 %3425  ;;  %v3424_v25 = vpop.permute.xlu0 %3423 }
 0x457   : > { %v8281_v18 = vadd.f32 %v3426_v11, %v8165_v16  ;;  %v8284_v60 = vadd.f32 %v3424_v25, %v8168_v54  ;;  %v3316_v2 = vadd.f32 %v8176_v41, %v2858_v10  ;;  %v3767_v37 = vmax.f32 %v3315_v30, 0.0001 }
 0x459   : > { %v3768_v25 = vmax.f32 %v3316_v2, 0.0001  ;;  %v8353_v2 = vstv %s3773_s1 }
 0x45a   : > { %v3440_v55 = vpop.permute.xlu1 %3439  ;;  %v3438_v44 = vpop.permute.xlu0 %3437 }
 0x45b   : > { %4412 = vrcp.f32 %v3768_v25  ;;  %v3444_v40 = vadd.f32 %v3440_v55, %v8194_v3  ;;  %v3443_v45 = vadd.f32 %v3438_v44, %v8197_v1 }
 0x45c   : > { %4414 = vrcp.f32 %v3767_v37 }
 0x45e   : > { %v3454_v49 = vpop.permute.xlu1 %3453  ;;  %v3452_v62 = vpop.permute.xlu0 %3451 }
 0x45f   : > { %v3458_v4 = vadd.f32 %v3454_v49, %v8207_v17  ;;  %v3457_v14 = vadd.f32 %v3452_v62, %v8210_v31 }
 0x462   : > { %v8286_v57 = vpop.permute.xlu1 %3467  ;;  %v8288_v59 = vpop.permute.xlu0 %3465 }
 0x463   : > { %v3471_v17 = vadd.f32 %v8288_v59, %v8226_v8 }
 0x466   : > { %v8290_v42 = vpop.permute.xlu1 %3481  ;;  %v8292_v7 = vpop.permute.xlu0 %3479 }
 0x467   : > { %v3485_v59 = vadd.f32 %v8292_v7, %v8260_v38 }
 0x468   : > { %v8346_v13 = vpop.eup %4412 }
 0x469   : > { %v8351_v27 = vpop.eup %4414 }
 0x46a   : > { %v8294_v52 = vpop.permute.xlu1 %3495  ;;  %v8296_v9 = vpop.permute.xlu0 %3493 }
 0x46b   : > { %v3499_v7 = vadd.f32 %v8296_v9, %v8266_v35 }
 0x46e   : > { %v8298_v16 = vpop.permute.xlu1 %3509  ;;  %v8300_v54 = vpop.permute.xlu0 %3507 }
 0x46f   : > { %v3513_v9 = vadd.f32 %v8300_v54, %v8272_v56 }
 0x472   : > { %v8302_v23 = vpop.permute.xlu1 %3523  ;;  %v8304_v20 = vpop.permute.xlu0 %3521 }
 0x473   : > { %v3527_v54 = vadd.f32 %v8304_v20, %v8278_v63 }
 0x476   : > { %v8311_v22 = vpop.permute.xlu1 %3537  ;;  %v8313_v21 = vpop.permute.xlu0 %3535 }
 0x477   : > { %v3541_v20 = vadd.f32 %v8313_v21, %v8284_v60 }
 0x47a   : > { %v3552_v26 = vpop.permute.xlu1 %3551  ;;  %v3550_v5 = vpop.permute.xlu0 %3549 }
 0x47b   : > { %v3556_v34 = vadd.f32 %v3552_v26, %v3444_v40  ;;  %v3555_v12 = vadd.f32 %v3550_v5, %v3443_v45  ;;  %v3472_v26 = vadd.f32 %v8286_v57, %v8223_v58  ;;  %v3486_v57 = vadd.f32 %v8290_v42, %v8257_v43 }
 0x47c   : > { %v3500_v42 = vadd.f32 %v8294_v52, %v8263_v29  ;;  %v3514_v52 = vadd.f32 %v8298_v16, %v8269_v15  ;;  %v3528_v16 = vadd.f32 %v8302_v23, %v8275_v6  ;;  %v3542_v23 = vadd.f32 %v8311_v22, %v8281_v18 }
 0x47e   : > { %v3566_v50 = vpop.permute.xlu1 %3565  ;;  %v3564_v39 = vpop.permute.xlu0 %3563 }
 0x47f   : > { %v3570_v3 = vadd.f32 %v3566_v50, %v3458_v4  ;;  %v3569_v55 = vadd.f32 %v3564_v39, %v3457_v14 }
 0x482   : > { %v3580_v32 = vpop.permute.xlu1 %3579  ;;  %v3578_v46 = vpop.permute.xlu0 %3577 }
 0x483   : > { %v3584_v50 = vadd.f32 %v3580_v32, %v3472_v26  ;;  %v3583_v39 = vadd.f32 %v3578_v46, %v3471_v17 }
 0x486   : > { %v3594_v11 = vpop.permute.xlu1 %3593  ;;  %v3592_v28 = vpop.permute.xlu0 %3591 }
 0x48a   : > { %v8328_v19 = vpop.permute.xlu1 %3607  ;;  %v8330_v51 = vpop.permute.xlu0 %3605 }
 0x48e   : > { %v8332_v33 = vpop.permute.xlu1 %3621  ;;  %v8334_v0 = vpop.permute.xlu0 %3619 }
 0x48f   : > { %v3626_v17 = vadd.f32 %v8332_v33, %v3514_v52 }
 0x492   : > { %v8336_v36 = vpop.permute.xlu1 %3635  ;;  %v8338_v53 = vpop.permute.xlu0 %3633 }
 0x496   : > { %v8340_v41 = vpop.permute.xlu1 %3649  ;;  %v8342_v47 = vpop.permute.xlu0 %3647 }
 0x49a   : > { %v3664_v48 = vpop.permute.xlu1 %3663  ;;  %v3662_v24 = vpop.permute.xlu0 %3661 }
 0x49b   : > { %v3668_v61 = vadd.f32 %v3664_v48, %v3556_v34  ;;  %v3667_v10 = vadd.f32 %v3662_v24, %v3555_v12  ;;  %v3598_v12 = vadd.f32 %v3594_v11, %v3486_v57  ;;  %v3597_v48 = vadd.f32 %v3592_v28, %v3485_v59 }
 0x49c   : > { %v3654_v59 = vadd.f32 %v8340_v41, %v3542_v23 }
 0x49d   : > { %v3775_v1 = vmul.f32 %v8346_v13, %v3668_v61  ;;  %v3774_v44 = vmul.f32 %v8351_v27, %v3667_v10  ;;  %v3612_v10 = vadd.f32 %v8328_v19, %v3500_v42 }
 0x49e   : > { %v3678_v31 = vpop.permute.xlu1 %3677  ;;  %v3676_v49 = vpop.permute.xlu0 %3675 }
 0x49f   : > { %v3778_v62 = vadd.f32 %v8353_v2, %v3775_v1  ;;  %v3777_v5 = vadd.f32 %v8353_v2, %v3774_v44  ;;  %v3682_v30 = vadd.f32 %v3678_v31, %v3570_v3  ;;  %v3681_v25 = vadd.f32 %v3676_v49, %v3569_v55 }
 0x4a0   : > { %v3611_v3 = vadd.f32 %v8330_v51, %v3499_v7  ;;  %v3625_v31 = vadd.f32 %v8334_v0, %v3513_v9 }
 0x4a1   : > { %3781 = vst.msk [vmem:[%s8363_s0 + $0x8] sm:$0xff] %vm3779_vm3, %v3778_v62  ;;  %3780 = vst.msk [vmem:[%s8363_s0] sm:$0xff] %vm3779_vm3, %v3777_v5  ;;  %v3783_v58 = vmul.f32 %v8346_v13, %v3682_v30  ;;  %v3782_v8 = vmul.f32 %v8351_v27, %v3681_v25  ;;  %v3640_v25 = vadd.f32 %v8336_v36, %v3528_v16 }
 0x4a2   : > { %v3692_v32 = vpop.permute.xlu1 %3691  ;;  %v3690_v46 = vpop.permute.xlu0 %3689 }
 0x4a3   : > { %v3785_v37 = vadd.f32 %v3783_v58, %v8353_v2  ;;  %v3784_v40 = vadd.f32 %v3782_v8, %v8353_v2  ;;  %v3696_v45 = vadd.f32 %v3692_v32, %v3584_v50  ;;  %v3695_v34 = vadd.f32 %v3690_v46, %v3583_v39 }
 0x4a4   : > { %v3639_v50 = vadd.f32 %v8338_v53, %v3527_v54  ;;  %v3653_v32 = vadd.f32 %v8342_v47, %v3541_v20 }
 0x4a5   : > { %4312 = vst.msk [vmem:[%s8363_s0 + $0x18] sm:$0xff] %vm3779_vm3, %v3785_v37  ;;  %4311 = vst.msk [vmem:[%s8363_s0 + $0x10] sm:$0xff] %vm3779_vm3, %v3784_v40  ;;  %v3790_v43 = vmul.f32 %v8346_v13, %v3696_v45  ;;  %v3789_v38 = vmul.f32 %v8351_v27, %v3695_v34 }
 0x4a6   : > { %v3706_v24 = vpop.permute.xlu1 %3705  ;;  %v3704_v4 = vpop.permute.xlu0 %3703 }
 0x4a7   : > { %v3792_v11 = vadd.f32 %v3790_v43, %v8353_v2  ;;  %v3791_v28 = vadd.f32 %v3789_v38, %v8353_v2  ;;  %v3710_v14 = vadd.f32 %v3706_v24, %v3598_v12  ;;  %v3709_v61 = vadd.f32 %v3704_v4, %v3597_v48 }
 0x4a9   : > { %4314 = vst.msk [vmem:[%s8363_s0 + $0x28] sm:$0xff] %vm3779_vm3, %v3792_v11  ;;  %4313 = vst.msk [vmem:[%s8363_s0 + $0x20] sm:$0xff] %vm3779_vm3, %v3791_v28  ;;  %v3797_v29 = vmul.f32 %v8346_v13, %v3710_v14  ;;  %v3796_v35 = vmul.f32 %v8351_v27, %v3709_v61 }
 0x4aa   : > { %v3720_v55 = vpop.permute.xlu1 %3719  ;;  %v3718_v19 = vpop.permute.xlu0 %3717 }
 0x4ab   : > { %v3799_v1 = vadd.f32 %v3797_v29, %v8353_v2  ;;  %v3798_v51 = vadd.f32 %v3796_v35, %v8353_v2  ;;  %v3724_v44 = vadd.f32 %v3720_v55, %v3612_v10  ;;  %v3723_v26 = vadd.f32 %v3718_v19, %v3611_v3 }
 0x4ad   : > { %4316 = vst.msk [vmem:[%s8363_s0 + $0x38] sm:$0xff] %vm3779_vm3, %v3799_v1  ;;  %4315 = vst.msk [vmem:[%s8363_s0 + $0x30] sm:$0xff] %vm3779_vm3, %v3798_v51  ;;  %v3804_v15 = vmul.f32 %v8346_v13, %v3724_v44  ;;  %v3803_v56 = vmul.f32 %v8351_v27, %v3723_v26 }
 0x4ae   : > { %v3734_v49 = vpop.permute.xlu1 %3733  ;;  %v3732_v33 = vpop.permute.xlu0 %3731 }
 0x4af   : > { %v3806_v62 = vadd.f32 %v3804_v15, %v8353_v2  ;;  %v3805_v0 = vadd.f32 %v3803_v56, %v8353_v2  ;;  %v3738_v5 = vadd.f32 %v3734_v49, %v3626_v17  ;;  %v3737_v30 = vadd.f32 %v3732_v33, %v3625_v31 }
 0x4b1   : > { %4318 = vst.msk [vmem:[%s8363_s0 + $0x48] sm:$0xff] %vm3779_vm3, %v3806_v62  ;;  %4317 = vst.msk [vmem:[%s8363_s0 + $0x40] sm:$0xff] %vm3779_vm3, %v3805_v0  ;;  %v3811_v6 = vmul.f32 %v8346_v13, %v3738_v5  ;;  %v3810_v63 = vmul.f32 %v8351_v27, %v3737_v30 }
 0x4b2   : > { %v3748_v39 = vpop.permute.xlu1 %3747  ;;  %v3746_v36 = vpop.permute.xlu0 %3745 }
 0x4b3   : > { %v3813_v58 = vadd.f32 %v3811_v6, %v8353_v2  ;;  %v3812_v53 = vadd.f32 %v3810_v63, %v8353_v2  ;;  %v3752_v8 = vadd.f32 %v3748_v39, %v3640_v25  ;;  %v3751_v57 = vadd.f32 %v3746_v36, %v3639_v50 }
 0x4b5   : > { %4320 = vst.msk [vmem:[%s8363_s0 + $0x58] sm:$0xff] %vm3779_vm3, %v3813_v58  ;;  %4319 = vst.msk [vmem:[%s8363_s0 + $0x50] sm:$0xff] %vm3779_vm3, %v3812_v53  ;;  %v3818_v18 = vmul.f32 %v8346_v13, %v3752_v8  ;;  %v3817_v60 = vmul.f32 %v8351_v27, %v3751_v57 }
 0x4b7   : > { %v3820_v46 = vadd.f32 %v3818_v18, %v8353_v2  ;;  %v3819_v37 = vadd.f32 %v3817_v60, %v8353_v2 }
 0x4b8   : > { %v3762_v22 = vpop.permute.xlu1 %3761  ;;  %v3760_v21 = vpop.permute.xlu0 %3759 }
 0x4b9   : > { %v3766_v41 = vadd.f32 %v3762_v22, %v3654_v59  ;;  %v3765_v40 = vadd.f32 %v3760_v21, %v3653_v32  ;;  %4322 = vst.msk [vmem:[%s8363_s0 + $0x68] sm:$0xff] %vm3779_vm3, %v3820_v46  ;;  %4321 = vst.msk [vmem:[%s8363_s0 + $0x60] sm:$0xff] %vm3779_vm3, %v3819_v37 }
 0x4bb   : > { %v3825_v47 = vmul.f32 %v8346_v13, %v3766_v41  ;;  %v3824_v45 = vmul.f32 %v8351_v27, %v3765_v40 }
 0x4bd   : > { %v3827_v34 = vadd.f32 %v3825_v47, %v8353_v2  ;;  %v3826_v12 = vadd.f32 %v3824_v45, %v8353_v2 }
 0x4bf   : > { %4324 = vst.msk [vmem:[%s8363_s0 + $0x78] sm:$0xff] %vm3779_vm3, %v3827_v34  ;;  %4323 = vst.msk [vmem:[%s8363_s0 + $0x70] sm:$0xff] %vm3779_vm3, %v3826_v12 }
 0x4c0   : > { %4554 = shalt.err (!%p4551_p6)
}
 0x4c1   : > { %s4555_s10 = scalar_lea.hbm %s8454_s13, 2048  ;;  %s4559_s19 = scalar_lea.hbm %s9252_s26, 4096 }
 0x4c2   : > { %p4556_p12 = scmp.ne.s32.totalorder %s8454_s13, %s4555_s10  ;;  %p4560_p13 = scmp.lt.s32.totalorder %s8454_s13, %s9252_s26 }
 0x4c3   : > { %p4561_p3 = scmp.lt.s32.totalorder %s4559_s19, %s4555_s10 }
 0x4c4   : > { %p4557_p7 = pnand %p4556_p12, %p9251_p8 }
 0x4c5   : > { %p4562_p2 = por %p4561_p3, %p4560_p13 }
 0x4c6   : > { %p4558_p5 = pneg %p4557_p7 }
 0x4c8   : > { %p4563_p9 = pnand %p4562_p2, %p4558_p5 }
 0x4ca   : > { %4566 = shalt.err (!%p4563_p9)
}
 0x4cb   : > { %4345 = dma.vmem_to_hbm [thread:$0]  (%p9251_p8), %s8456_s27, 2048, %s8454_s13, %s3834_s15, %s4629_s28, %s4629_s28, %s4630_s6  }
 0x4cc PF: > { %s9253_s4 = sld [smem:[#allocation20_spill]] }
 0x4cd   : > { %s9254_s20 = sld [smem:[#allocation28_spill]] }
 0x4ce   : > { %s9255_s21 = sld [smem:[#allocation23_spill]] }
 0x4d2   : > { %s3883_s22 = sand.u32 1, %s9253_s4  }
 0x4d3   : > { %p9256_p10 = scmp.ne.s32.totalorder %s9254_s20, 0  ;;  %s3884_s23 = scalar_lea.sflag [#allocation7], %s3883_s22 }
 0x4d4   : > { %p9257_p1 = scmp.ge.s32.totalorder %s9255_s21, 2 }
 0x4d6   : > { %p4361_p4 = pnand %p9257_p1, %p9256_p10 }
 0x4d8   : > { %p4362_p11 = pneg %p4361_p4 }
 0x4da   : > { %4596 = dma.done.wait (%p4362_p11), %s3884_s23, 2048  }
 0x4db   : > { %4598 = vsyncadd (%p4362_p11), %s3884_s23, 4294965248  ;;  %s3893_s3 = scalar_lea.sflag [#allocation14], %s3883_s22 }
 0x4dc   : > { %4600 = dma.done.wait (%p4362_p11), %s3893_s3, 256  }
 0x4dd   : > { %4602 = vsyncadd (%p4362_p11), %s3893_s3, 4294967040  ;;  %s9258_s23 = sld [smem:[#allocation25_spill]] }
 0x4de   : > { %s9259_s20 = sld [smem:[#allocation21_spill]] }
 0x4df   : > { %s9260_s21 = sld [smem:[#allocation22_spill]] }
 0x4e0   : > { %s9261_s22 = sld [smem:[#allocation26_spill]] }
 0x4e3   : > { %p27_p8 = scmp.ge.s32.totalorder %s9258_s23, 4  }
 0x4e5   :  { %29 = sbr.rel (!%p27_p8) target bundleno = 17 (0x11), region = 123 }
 0x4ea   :  { %3898 = vsyncpa [#allocation6], 1 }
 0x4eb   :  { %3900 = vsyncpa [#allocation6 + $0x1], 1 }
 0x4ec   :  { %3901 = vsyncpa [#allocation10], 1 }
 0x4ed   :  { %3903 = vsyncpa [#allocation10 + $0x1], 1 }
 0x4ee   :  { %3904 = vsyncpa [#allocation7], 1 }
 0x4ef   :  { %3906 = vsyncpa [#allocation7 + $0x1], 1 }
 0x4f0   :  { %3907 = vsyncpa [#allocation14], 1 }
 0x4f1   :  { %3909 = vsyncpa [#allocation14 + $0x1], 1 }
 0x4f2   :  { %3910 = vsyncpa [#allocation8], 1 }
 0x4f3   :  { %3912 = vsyncpa [#allocation8 + $0x1], 1 }

</bundles_post_ra>
